<compile_context>
chip_gen: v5e
topology: v5e:2x2
jax: 0.10.0
libtpu: 0.0.40
codegen_flags: <defaults>
</compile_context>

<pallas_src>
import math

import jax
import jax.numpy as jnp
from jax.experimental import pallas as pl
from jax.experimental.pallas import tpu as pltpu

# ---- hyper-params implied by the PyTorch module ----------------------------
D = 768                      # wav2vec2-base hidden size == attention embed_dim
NUM_HEADS = 4
HEAD_DIM = D // NUM_HEADS    # 192
HIDDEN = 256                 # classifier hidden width
NUM_CLASSES = 4
PAD_CLASSES = 128            # lane-dense logits tile; sliced back to NUM_CLASSES in wrapper


# ---- fused kernel: MHA + mean-pool + classifier (block of Bt batch elems) --
def _fused_kernel(x_ref, wqkv_ref, bqkv_ref, wout_ref, bout_ref,
                  w1_ref, b1_ref, w2_ref, b2_ref, o_ref):
    bt, s, d = x_ref.shape

    # --- QKV projection: one big (Bt*S, D) x (D, 3D) bf16 MXU matmul ---------
    # (softmax scale is already folded into Wq / bq by prepare_params)
    x2 = x_ref[...].reshape(bt * s, d).astype(jnp.bfloat16)
    qkv = jnp.dot(x2, wqkv_ref[...], preferred_element_type=jnp.float32)
    qkv = (qkv + bqkv_ref[...]).astype(jnp.bfloat16)            # bias once, bf16 once
    qkv = qkv.reshape(bt, s, 3 * D)

    # --- attention, pooled before the PV / out_proj matmuls ------------------
    # mean_q(softmax(QK^T) @ V) @ Wout == (mean_q softmax(QK^T)) @ V @ Wout  (exact)
    acc = None                                                  # (Bt, D) f32
    for h in range(NUM_HEADS):                                  # static loop, 4 heads
        lo = h * HEAD_DIM
        q = qkv[:, :, lo:lo + HEAD_DIM]                          # bf16, pre-scaled
        k = qkv[:, :, D + lo:D + lo + HEAD_DIM]
        v = qkv[:, :, 2 * D + lo:2 * D + lo + HEAD_DIM]
        # batched scores; contract last dims directly (no materialized k.T)
        sc = jnp.einsum("bqd,bkd->bqk", q, k, preferred_element_type=jnp.float32)
        sc = sc - jnp.max(sc, axis=-1, keepdims=True)
        p = jnp.exp(sc)
        p = p * pl.reciprocal(jnp.sum(p, axis=-1, keepdims=True), approx=True)
        # pool the probabilities over the query axis (sublane reduce) BEFORE P@V
        p_pool = jnp.mean(p, axis=1, keepdims=True)              # (Bt, 1, S) f32
        o_h = jnp.einsum("bqk,bkd->bqd", p_pool.astype(jnp.bfloat16), v,
                         preferred_element_type=jnp.float32)     # (Bt, 1, HEAD_DIM)
        # fold this head straight into its (sublane-aligned) slice of out_proj
        contrib = jnp.dot(o_h.reshape(bt, HEAD_DIM).astype(jnp.bfloat16),
                          wout_ref[lo:lo + HEAD_DIM, :],
                          preferred_element_type=jnp.float32)    # (Bt, D)
        acc = contrib if acc is None else acc + contrib

    pooled = acc + bout_ref[...]                                 # (Bt, D) f32

    # --- classifier: Linear(768,256) -> ReLU -> Linear(256, 4 padded to 128)
    # Dropout(0.3) is identity at inference.
    h1 = jnp.dot(pooled.astype(jnp.bfloat16), w1_ref[...],
                 preferred_element_type=jnp.float32) + b1_ref[...]
    h1 = jnp.maximum(h1, 0.0)
    logits = jnp.dot(h1.astype(jnp.bfloat16), w2_ref[...],
                     preferred_element_type=jnp.float32) + b2_ref[...]   # (Bt, PAD_CLASSES)
    o_ref[...] = logits


# ---- batch-block chooser -----------------------------------------------------
def _pick_block_batch(batch, seq, target_rows=256):
    """Pick bt: a multiple of 8 that divides `batch` (so the (bt,128) output block
    satisfies the (8,128) rule) and feeds >= target_rows MXU rows; prefers grid >= 2
    (v7x megacore).  Falls back to the full batch when no such divisor exists."""
    cands = [bt for bt in range(8, batch, 8) if batch % bt == 0]
    for bt in cands:
        if bt * seq >= target_rows:
            return bt
    if cands:                      # keep grid >= 2 for megacore even if rows fall short
        return cands[-1]
    return batch


# ---- one-time parameter prep (fold scale, pad logits proj) -------------------
def prepare_params(params):
    """Fold 1/sqrt(head_dim) into Wq/bq, keep matmul weights bf16, pad w2/b2 to a
    lane-dense 128-wide tile.  Run ONCE, outside the per-call path."""
    wqkv, bqkv, wout, bout, w1, b1, w2, b2 = params
    scale = 1.0 / math.sqrt(HEAD_DIM)
    wqkv_f = wqkv.astype(jnp.float32).at[:, :D].multiply(scale)
    wqkv_p = wqkv_f.astype(jnp.bfloat16)
    bqkv_p = bqkv.astype(jnp.float32).at[:, :D].multiply(scale)
    w2p = jnp.pad(w2, ((0, 0), (0, PAD_CLASSES - NUM_CLASSES))).astype(jnp.bfloat16)
    b2p = jnp.pad(b2, ((0, 0), (0, PAD_CLASSES - NUM_CLASSES)))
    return (wqkv_p, bqkv_p,
            wout.astype(jnp.bfloat16), bout,
            w1.astype(jnp.bfloat16), b1,
            w2p, b2p)


# ---- wrapper ----------------------------------------------------------------
def wav2vec_emotion_head(hidden_states, prepared_params):
    """Attention + pooling + classifier part of Wav2VecEmotion.forward (fused kernel).
    `prepared_params` must come from prepare_params(...)."""
    batch, seq, feat = hidden_states.shape
    assert feat == D
    wqkv, bqkv, wout, bout, w1, b1, w2p, b2p = prepared_params

    bt = _pick_block_batch(batch, seq)
    assert batch % bt == 0 and (bt % 8 == 0 or bt == batch)
    grid = (batch // bt,)

    logits_padded = pl.pallas_call(
        _fused_kernel,
        out_shape=jax.ShapeDtypeStruct((batch, PAD_CLASSES), jnp.float32),
        grid=grid,
        in_specs=[
            pl.BlockSpec((bt, seq, D), lambda b: (b, 0, 0)),
            pl.BlockSpec((D, 3 * D), lambda b: (0, 0)),
            pl.BlockSpec((1, 3 * D), lambda b: (0, 0)),
            pl.BlockSpec((D, D), lambda b: (0, 0)),
            pl.BlockSpec((1, D), lambda b: (0, 0)),
            pl.BlockSpec((D, HIDDEN), lambda b: (0, 0)),
            pl.BlockSpec((1, HIDDEN), lambda b: (0, 0)),
            pl.BlockSpec((HIDDEN, PAD_CLASSES), lambda b: (0, 0)),
            pl.BlockSpec((1, PAD_CLASSES), lambda b: (0, 0)),
        ],
        out_specs=pl.BlockSpec((bt, PAD_CLASSES), lambda b: (b, 0)),
        compiler_params=pltpu.CompilerParams(
            dimension_semantics=("parallel",),       # megacore-shardable batch loop
            vmem_limit_bytes=32 * 1024 * 1024,
        ),
    )(hidden_states, wqkv, bqkv, wout, bout, w1, b1, w2p, b2p)
    return logits_padded[:, :NUM_CLASSES]


# ---- pure-JAX reference (f32 math over the bf16-rounded raw params) ----------
def _reference(hidden_states, params):
    wqkv, bqkv, wout, bout, w1, b1, w2, b2 = [p.astype(jnp.float32) for p in params]
    x = hidden_states.astype(jnp.float32)
    B, S, _ = x.shape
    qkv = x @ wqkv + bqkv[0]
    q, k, v = jnp.split(qkv, 3, axis=-1)
    heads = lambda t: t.reshape(B, S, NUM_HEADS, HEAD_DIM).transpose(0, 2, 1, 3)
    qh, kh, vh = heads(q), heads(k), heads(v)
    s = jnp.einsum("bhqd,bhkd->bhqk", qh, kh) / math.sqrt(HEAD_DIM)
    p = jax.nn.softmax(s, axis=-1)
    o = jnp.einsum("bhqk,bhkd->bhqd", p, vh).transpose(0, 2, 1, 3).reshape(B, S, D)
    attn = o @ wout + bout[0]
    pooled = attn.mean(axis=1)
    h = jax.nn.relu(pooled @ w1 + b1[0])
    return h @ w2 + b2[0]


# ---- deterministic parameter init (weights bf16, biases f32, PyTorch layout) --
def _init_params(key):
    ks = jax.random.split(key, 8)
    scale = 0.02
    wqkv = (scale * jax.random.normal(ks[0], (D, 3 * D), jnp.float32)).astype(jnp.bfloat16)
    bqkv = scale * jax.random.normal(ks[1], (1, 3 * D), jnp.float32)
    wout = (scale * jax.random.normal(ks[2], (D, D), jnp.float32)).astype(jnp.bfloat16)
    bout = scale * jax.random.normal(ks[3], (1, D), jnp.float32)
    w1 = (scale * jax.random.normal(ks[4], (D, HIDDEN), jnp.float32)).astype(jnp.bfloat16)
    b1 = scale * jax.random.normal(ks[5], (1, HIDDEN), jnp.float32)
    w2 = (scale * jax.random.normal(ks[6], (HIDDEN, NUM_CLASSES), jnp.float32)).astype(jnp.bfloat16)
    b2 = scale * jax.random.normal(ks[7], (1, NUM_CLASSES), jnp.float32)
    return (wqkv, bqkv, wout, bout, w1, b1, w2, b2)


if __name__ == "__main__":
    B, S = 2, 8
    root = jax.random.PRNGKey(0)
    k_x, k_p = jax.random.split(root)
    # hidden_states stands in for wav2vec(x.squeeze(1)).last_hidden_state
    hidden_states = jax.random.normal(k_x, (B, S, D), jnp.float32).astype(jnp.bfloat16)
    params = _init_params(k_p)
    prepared = prepare_params(params)          # one-time: fold scale, pad logits proj

    logits = wav2vec_emotion_head(hidden_states, prepared)
    logits = jax.block_until_ready(logits)

    ref = _reference(hidden_states, params)
    assert logits.shape == (B, NUM_CLASSES)
    assert jnp.allclose(logits, ref, atol=5e-3, rtol=5e-2), (logits, ref)
    print("KERNEL_OK")
</pallas_src>

<mosaic_0001>
module attributes {stable_mosaic.version = 11 : i64} {
  func.func @_fused_kernel(%arg0: i32, %arg1: memref<2x8x768xbf16, #tpu.memory_space<vmem>>, %arg2: memref<768x2304xbf16, #tpu.memory_space<vmem>>, %arg3: memref<1x2304xf32, #tpu.memory_space<vmem>>, %arg4: memref<768x768xbf16, #tpu.memory_space<vmem>>, %arg5: memref<1x768xf32, #tpu.memory_space<vmem>>, %arg6: memref<768x256xbf16, #tpu.memory_space<vmem>>, %arg7: memref<1x256xf32, #tpu.memory_space<vmem>>, %arg8: memref<256x128xbf16, #tpu.memory_space<vmem>>, %arg9: memref<1x128xf32, #tpu.memory_space<vmem>>, %arg10: memref<2x128xf32, #tpu.memory_space<vmem>>) attributes {dimension_semantics = [#tpu.dimension_semantics<parallel>], iteration_bounds = array<i64: 1>, scalar_prefetch = 0 : i64, scratch_operands = 0 : i64, tpu.core_type = #tpu.core_type<tc>, window_params = [{transform_indices = @transform_0, window_bounds = array<i64: 2, 8, 768>}, {pipeline_mode = #tpu.pipeline_mode<synchronous>, transform_indices = @transform_1, window_bounds = array<i64: 768, 2304>}, {pipeline_mode = #tpu.pipeline_mode<synchronous>, transform_indices = @transform_2, window_bounds = array<i64: 1, 2304>}, {pipeline_mode = #tpu.pipeline_mode<synchronous>, transform_indices = @transform_3, window_bounds = array<i64: 768, 768>}, {pipeline_mode = #tpu.pipeline_mode<synchronous>, transform_indices = @transform_4, window_bounds = array<i64: 1, 768>}, {pipeline_mode = #tpu.pipeline_mode<synchronous>, transform_indices = @transform_5, window_bounds = array<i64: 768, 256>}, {pipeline_mode = #tpu.pipeline_mode<synchronous>, transform_indices = @transform_6, window_bounds = array<i64: 1, 256>}, {pipeline_mode = #tpu.pipeline_mode<synchronous>, transform_indices = @transform_7, window_bounds = array<i64: 256, 128>}, {pipeline_mode = #tpu.pipeline_mode<synchronous>, transform_indices = @transform_8, window_bounds = array<i64: 1, 128>}, {transform_indices = @transform_9, window_bounds = array<i64: 2, 128>}]} {
    %c0 = arith.constant 0 : index
    %c0_0 = arith.constant 0 : index
    %c0_1 = arith.constant 0 : index
    %0 = vector.load %arg1[%c0, %c0_0, %c0_1] : memref<2x8x768xbf16, #tpu.memory_space<vmem>>, vector<2x8x768xbf16>
    %1 = vector.shape_cast %0 : vector<2x8x768xbf16> to vector<16x768xbf16>
    %c0_2 = arith.constant 0 : index
    %c0_3 = arith.constant 0 : index
    %2 = vector.load %arg2[%c0_2, %c0_3] : memref<768x2304xbf16, #tpu.memory_space<vmem>>, vector<768x2304xbf16>
    %cst = arith.constant dense<0.000000e+00> : vector<16x2304xf32>
    %3 = tpu.matmul %1, %2, %cst {dimension_numbers = #tpu.dot_dimension_numbers<[1], [0], [0], [1], [0, 0, 1, 1], [], []>} : vector<16x768xbf16>, vector<768x2304xbf16>, vector<16x2304xf32> -> vector<16x2304xf32>
    %c0_4 = arith.constant 0 : index
    %c0_5 = arith.constant 0 : index
    %4 = vector.load %arg3[%c0_4, %c0_5] : memref<1x2304xf32, #tpu.memory_space<vmem>>, vector<1x2304xf32>
    %5 = vector.broadcast %4 : vector<1x2304xf32> to vector<16x2304xf32>
    %6 = arith.addf %3, %5 : vector<16x2304xf32>
    %7 = arith.truncf %6 : vector<16x2304xf32> to vector<16x2304xbf16>
    %8 = vector.shape_cast %7 : vector<16x2304xbf16> to vector<2x8x2304xbf16>
    %9 = vector.extract_strided_slice %8 {offsets = [0, 0, 0], sizes = [2, 8, 192], strides = [1, 1, 1]} : vector<2x8x2304xbf16> to vector<2x8x192xbf16>
    %10 = vector.extract_strided_slice %8 {offsets = [0, 0, 768], sizes = [2, 8, 192], strides = [1, 1, 1]} : vector<2x8x2304xbf16> to vector<2x8x192xbf16>
    %11 = vector.extract_strided_slice %8 {offsets = [0, 0, 1536], sizes = [2, 8, 192], strides = [1, 1, 1]} : vector<2x8x2304xbf16> to vector<2x8x192xbf16>
    "tpu.trace_start"() <{level = 10 : i32, message = "bqd,bkd->bqk"}> : () -> ()
    %cst_6 = arith.constant dense<0.000000e+00> : vector<2x8x8xf32>
    %12 = tpu.matmul %9, %10, %cst_6 {dimension_numbers = #tpu.dot_dimension_numbers<[2], [2], [1], [1], [0, 0, 0, 1, 1, 1], [0], [0]>} : vector<2x8x192xbf16>, vector<2x8x192xbf16>, vector<2x8x8xf32> -> vector<2x8x8xf32>
    "tpu.trace_stop"() : () -> ()
    %cst_7 = arith.constant dense<0xFF800000> : vector<2x8xf32>
    %13 = vector.multi_reduction <maximumf>, %12, %cst_7 [2] : vector<2x8x8xf32> to vector<2x8xf32>
    %14 = vector.shape_cast %13 : vector<2x8xf32> to vector<2x8x1xf32>
    %15 = vector.broadcast %14 : vector<2x8x1xf32> to vector<2x8x8xf32>
    %16 = arith.subf %12, %15 : vector<2x8x8xf32>
    %17 = math.exp %16 : vector<2x8x8xf32>
    %cst_8 = arith.constant dense<0.000000e+00> : vector<2x8xf32>
    %18 = vector.multi_reduction <add>, %17, %cst_8 [2] : vector<2x8x8xf32> to vector<2x8xf32>
    %19 = vector.shape_cast %18 : vector<2x8xf32> to vector<2x8x1xf32>
    %20 = tpu.reciprocal %19 {approx = true} : vector<2x8x1xf32> -> vector<2x8x1xf32>
    %21 = vector.broadcast %20 : vector<2x8x1xf32> to vector<2x8x8xf32>
    %22 = arith.mulf %17, %21 : vector<2x8x8xf32>
    %cst_9 = arith.constant dense<0.000000e+00> : vector<2x8xf32>
    %23 = vector.multi_reduction <add>, %22, %cst_9 [1] : vector<2x8x8xf32> to vector<2x8xf32>
    %24 = vector.shape_cast %23 : vector<2x8xf32> to vector<2x1x8xf32>
    %cst_10 = arith.constant 8.000000e+00 : f32
    %25 = vector.broadcast %cst_10 : f32 to vector<2x1x8xf32>
    %26 = arith.divf %24, %25 : vector<2x1x8xf32>
    %27 = arith.truncf %26 : vector<2x1x8xf32> to vector<2x1x8xbf16>
    "tpu.trace_start"() <{level = 10 : i32, message = "bqk,bkd->bqd"}> : () -> ()
    %cst_11 = arith.constant dense<0.000000e+00> : vector<2x1x192xf32>
    %28 = tpu.matmul %27, %11, %cst_11 {dimension_numbers = #tpu.dot_dimension_numbers<[2], [1], [1], [2], [0, 0, 0, 1, 1, 2], [0], [0]>} : vector<2x1x8xbf16>, vector<2x8x192xbf16>, vector<2x1x192xf32> -> vector<2x1x192xf32>
    "tpu.trace_stop"() : () -> ()
    %29 = vector.shape_cast %28 : vector<2x1x192xf32> to vector<2x192xf32>
    %30 = arith.truncf %29 : vector<2x192xf32> to vector<2x192xbf16>
    %c0_12 = arith.constant 0 : index
    %c0_13 = arith.constant 0 : index
    %31 = vector.load %arg4[%c0_12, %c0_13] : memref<768x768xbf16, #tpu.memory_space<vmem>>, vector<192x768xbf16>
    %cst_14 = arith.constant dense<0.000000e+00> : vector<2x768xf32>
    %32 = tpu.matmul %30, %31, %cst_14 {dimension_numbers = #tpu.dot_dimension_numbers<[1], [0], [0], [1], [0, 0, 1, 1], [], []>} : vector<2x192xbf16>, vector<192x768xbf16>, vector<2x768xf32> -> vector<2x768xf32>
    %33 = vector.extract_strided_slice %8 {offsets = [0, 0, 192], sizes = [2, 8, 192], strides = [1, 1, 1]} : vector<2x8x2304xbf16> to vector<2x8x192xbf16>
    %34 = vector.extract_strided_slice %8 {offsets = [0, 0, 960], sizes = [2, 8, 192], strides = [1, 1, 1]} : vector<2x8x2304xbf16> to vector<2x8x192xbf16>
    %35 = vector.extract_strided_slice %8 {offsets = [0, 0, 1728], sizes = [2, 8, 192], strides = [1, 1, 1]} : vector<2x8x2304xbf16> to vector<2x8x192xbf16>
    "tpu.trace_start"() <{level = 10 : i32, message = "bqd,bkd->bqk"}> : () -> ()
    %cst_15 = arith.constant dense<0.000000e+00> : vector<2x8x8xf32>
    %36 = tpu.matmul %33, %34, %cst_15 {dimension_numbers = #tpu.dot_dimension_numbers<[2], [2], [1], [1], [0, 0, 0, 1, 1, 1], [0], [0]>} : vector<2x8x192xbf16>, vector<2x8x192xbf16>, vector<2x8x8xf32> -> vector<2x8x8xf32>
    "tpu.trace_stop"() : () -> ()
    %cst_16 = arith.constant dense<0xFF800000> : vector<2x8xf32>
    %37 = vector.multi_reduction <maximumf>, %36, %cst_16 [2] : vector<2x8x8xf32> to vector<2x8xf32>
    %38 = vector.shape_cast %37 : vector<2x8xf32> to vector<2x8x1xf32>
    %39 = vector.broadcast %38 : vector<2x8x1xf32> to vector<2x8x8xf32>
    %40 = arith.subf %36, %39 : vector<2x8x8xf32>
    %41 = math.exp %40 : vector<2x8x8xf32>
    %cst_17 = arith.constant dense<0.000000e+00> : vector<2x8xf32>
    %42 = vector.multi_reduction <add>, %41, %cst_17 [2] : vector<2x8x8xf32> to vector<2x8xf32>
    %43 = vector.shape_cast %42 : vector<2x8xf32> to vector<2x8x1xf32>
    %44 = tpu.reciprocal %43 {approx = true} : vector<2x8x1xf32> -> vector<2x8x1xf32>
    %45 = vector.broadcast %44 : vector<2x8x1xf32> to vector<2x8x8xf32>
    %46 = arith.mulf %41, %45 : vector<2x8x8xf32>
    %cst_18 = arith.constant dense<0.000000e+00> : vector<2x8xf32>
    %47 = vector.multi_reduction <add>, %46, %cst_18 [1] : vector<2x8x8xf32> to vector<2x8xf32>
    %48 = vector.shape_cast %47 : vector<2x8xf32> to vector<2x1x8xf32>
    %cst_19 = arith.constant 8.000000e+00 : f32
    %49 = vector.broadcast %cst_19 : f32 to vector<2x1x8xf32>
    %50 = arith.divf %48, %49 : vector<2x1x8xf32>
    %51 = arith.truncf %50 : vector<2x1x8xf32> to vector<2x1x8xbf16>
    "tpu.trace_start"() <{level = 10 : i32, message = "bqk,bkd->bqd"}> : () -> ()
    %cst_20 = arith.constant dense<0.000000e+00> : vector<2x1x192xf32>
    %52 = tpu.matmul %51, %35, %cst_20 {dimension_numbers = #tpu.dot_dimension_numbers<[2], [1], [1], [2], [0, 0, 0, 1, 1, 2], [0], [0]>} : vector<2x1x8xbf16>, vector<2x8x192xbf16>, vector<2x1x192xf32> -> vector<2x1x192xf32>
    "tpu.trace_stop"() : () -> ()
    %53 = vector.shape_cast %52 : vector<2x1x192xf32> to vector<2x192xf32>
    %54 = arith.truncf %53 : vector<2x192xf32> to vector<2x192xbf16>
    %c192 = arith.constant 192 : index
    %c0_21 = arith.constant 0 : index
    %55 = vector.load %arg4[%c192, %c0_21] : memref<768x768xbf16, #tpu.memory_space<vmem>>, vector<192x768xbf16>
    %cst_22 = arith.constant dense<0.000000e+00> : vector<2x768xf32>
    %56 = tpu.matmul %54, %55, %cst_22 {dimension_numbers = #tpu.dot_dimension_numbers<[1], [0], [0], [1], [0, 0, 1, 1], [], []>} : vector<2x192xbf16>, vector<192x768xbf16>, vector<2x768xf32> -> vector<2x768xf32>
    %57 = arith.addf %32, %56 : vector<2x768xf32>
    %58 = vector.extract_strided_slice %8 {offsets = [0, 0, 384], sizes = [2, 8, 192], strides = [1, 1, 1]} : vector<2x8x2304xbf16> to vector<2x8x192xbf16>
    %59 = vector.extract_strided_slice %8 {offsets = [0, 0, 1152], sizes = [2, 8, 192], strides = [1, 1, 1]} : vector<2x8x2304xbf16> to vector<2x8x192xbf16>
    %60 = vector.extract_strided_slice %8 {offsets = [0, 0, 1920], sizes = [2, 8, 192], strides = [1, 1, 1]} : vector<2x8x2304xbf16> to vector<2x8x192xbf16>
    "tpu.trace_start"() <{level = 10 : i32, message = "bqd,bkd->bqk"}> : () -> ()
    %cst_23 = arith.constant dense<0.000000e+00> : vector<2x8x8xf32>
    %61 = tpu.matmul %58, %59, %cst_23 {dimension_numbers = #tpu.dot_dimension_numbers<[2], [2], [1], [1], [0, 0, 0, 1, 1, 1], [0], [0]>} : vector<2x8x192xbf16>, vector<2x8x192xbf16>, vector<2x8x8xf32> -> vector<2x8x8xf32>
    "tpu.trace_stop"() : () -> ()
    %cst_24 = arith.constant dense<0xFF800000> : vector<2x8xf32>
    %62 = vector.multi_reduction <maximumf>, %61, %cst_24 [2] : vector<2x8x8xf32> to vector<2x8xf32>
    %63 = vector.shape_cast %62 : vector<2x8xf32> to vector<2x8x1xf32>
    %64 = vector.broadcast %63 : vector<2x8x1xf32> to vector<2x8x8xf32>
    %65 = arith.subf %61, %64 : vector<2x8x8xf32>
    %66 = math.exp %65 : vector<2x8x8xf32>
    %cst_25 = arith.constant dense<0.000000e+00> : vector<2x8xf32>
    %67 = vector.multi_reduction <add>, %66, %cst_25 [2] : vector<2x8x8xf32> to vector<2x8xf32>
    %68 = vector.shape_cast %67 : vector<2x8xf32> to vector<2x8x1xf32>
    %69 = tpu.reciprocal %68 {approx = true} : vector<2x8x1xf32> -> vector<2x8x1xf32>
    %70 = vector.broadcast %69 : vector<2x8x1xf32> to vector<2x8x8xf32>
    %71 = arith.mulf %66, %70 : vector<2x8x8xf32>
    %cst_26 = arith.constant dense<0.000000e+00> : vector<2x8xf32>
    %72 = vector.multi_reduction <add>, %71, %cst_26 [1] : vector<2x8x8xf32> to vector<2x8xf32>
    %73 = vector.shape_cast %72 : vector<2x8xf32> to vector<2x1x8xf32>
    %cst_27 = arith.constant 8.000000e+00 : f32
    %74 = vector.broadcast %cst_27 : f32 to vector<2x1x8xf32>
    %75 = arith.divf %73, %74 : vector<2x1x8xf32>
    %76 = arith.truncf %75 : vector<2x1x8xf32> to vector<2x1x8xbf16>
    "tpu.trace_start"() <{level = 10 : i32, message = "bqk,bkd->bqd"}> : () -> ()
    %cst_28 = arith.constant dense<0.000000e+00> : vector<2x1x192xf32>
    %77 = tpu.matmul %76, %60, %cst_28 {dimension_numbers = #tpu.dot_dimension_numbers<[2], [1], [1], [2], [0, 0, 0, 1, 1, 2], [0], [0]>} : vector<2x1x8xbf16>, vector<2x8x192xbf16>, vector<2x1x192xf32> -> vector<2x1x192xf32>
    "tpu.trace_stop"() : () -> ()
    %78 = vector.shape_cast %77 : vector<2x1x192xf32> to vector<2x192xf32>
    %79 = arith.truncf %78 : vector<2x192xf32> to vector<2x192xbf16>
    %c384 = arith.constant 384 : index
    %c0_29 = arith.constant 0 : index
    %80 = vector.load %arg4[%c384, %c0_29] : memref<768x768xbf16, #tpu.memory_space<vmem>>, vector<192x768xbf16>
    %cst_30 = arith.constant dense<0.000000e+00> : vector<2x768xf32>
    %81 = tpu.matmul %79, %80, %cst_30 {dimension_numbers = #tpu.dot_dimension_numbers<[1], [0], [0], [1], [0, 0, 1, 1], [], []>} : vector<2x192xbf16>, vector<192x768xbf16>, vector<2x768xf32> -> vector<2x768xf32>
    %82 = arith.addf %57, %81 : vector<2x768xf32>
    %83 = vector.extract_strided_slice %8 {offsets = [0, 0, 576], sizes = [2, 8, 192], strides = [1, 1, 1]} : vector<2x8x2304xbf16> to vector<2x8x192xbf16>
    %84 = vector.extract_strided_slice %8 {offsets = [0, 0, 1344], sizes = [2, 8, 192], strides = [1, 1, 1]} : vector<2x8x2304xbf16> to vector<2x8x192xbf16>
    %85 = vector.extract_strided_slice %8 {offsets = [0, 0, 2112], sizes = [2, 8, 192], strides = [1, 1, 1]} : vector<2x8x2304xbf16> to vector<2x8x192xbf16>
    "tpu.trace_start"() <{level = 10 : i32, message = "bqd,bkd->bqk"}> : () -> ()
    %cst_31 = arith.constant dense<0.000000e+00> : vector<2x8x8xf32>
    %86 = tpu.matmul %83, %84, %cst_31 {dimension_numbers = #tpu.dot_dimension_numbers<[2], [2], [1], [1], [0, 0, 0, 1, 1, 1], [0], [0]>} : vector<2x8x192xbf16>, vector<2x8x192xbf16>, vector<2x8x8xf32> -> vector<2x8x8xf32>
    "tpu.trace_stop"() : () -> ()
    %cst_32 = arith.constant dense<0xFF800000> : vector<2x8xf32>
    %87 = vector.multi_reduction <maximumf>, %86, %cst_32 [2] : vector<2x8x8xf32> to vector<2x8xf32>
    %88 = vector.shape_cast %87 : vector<2x8xf32> to vector<2x8x1xf32>
    %89 = vector.broadcast %88 : vector<2x8x1xf32> to vector<2x8x8xf32>
    %90 = arith.subf %86, %89 : vector<2x8x8xf32>
    %91 = math.exp %90 : vector<2x8x8xf32>
    %cst_33 = arith.constant dense<0.000000e+00> : vector<2x8xf32>
    %92 = vector.multi_reduction <add>, %91, %cst_33 [2] : vector<2x8x8xf32> to vector<2x8xf32>
    %93 = vector.shape_cast %92 : vector<2x8xf32> to vector<2x8x1xf32>
    %94 = tpu.reciprocal %93 {approx = true} : vector<2x8x1xf32> -> vector<2x8x1xf32>
    %95 = vector.broadcast %94 : vector<2x8x1xf32> to vector<2x8x8xf32>
    %96 = arith.mulf %91, %95 : vector<2x8x8xf32>
    %cst_34 = arith.constant dense<0.000000e+00> : vector<2x8xf32>
    %97 = vector.multi_reduction <add>, %96, %cst_34 [1] : vector<2x8x8xf32> to vector<2x8xf32>
    %98 = vector.shape_cast %97 : vector<2x8xf32> to vector<2x1x8xf32>
    %cst_35 = arith.constant 8.000000e+00 : f32
    %99 = vector.broadcast %cst_35 : f32 to vector<2x1x8xf32>
    %100 = arith.divf %98, %99 : vector<2x1x8xf32>
    %101 = arith.truncf %100 : vector<2x1x8xf32> to vector<2x1x8xbf16>
    "tpu.trace_start"() <{level = 10 : i32, message = "bqk,bkd->bqd"}> : () -> ()
    %cst_36 = arith.constant dense<0.000000e+00> : vector<2x1x192xf32>
    %102 = tpu.matmul %101, %85, %cst_36 {dimension_numbers = #tpu.dot_dimension_numbers<[2], [1], [1], [2], [0, 0, 0, 1, 1, 2], [0], [0]>} : vector<2x1x8xbf16>, vector<2x8x192xbf16>, vector<2x1x192xf32> -> vector<2x1x192xf32>
    "tpu.trace_stop"() : () -> ()
    %103 = vector.shape_cast %102 : vector<2x1x192xf32> to vector<2x192xf32>
    %104 = arith.truncf %103 : vector<2x192xf32> to vector<2x192xbf16>
    %c576 = arith.constant 576 : index
    %c0_37 = arith.constant 0 : index
    %105 = vector.load %arg4[%c576, %c0_37] : memref<768x768xbf16, #tpu.memory_space<vmem>>, vector<192x768xbf16>
    %cst_38 = arith.constant dense<0.000000e+00> : vector<2x768xf32>
    %106 = tpu.matmul %104, %105, %cst_38 {dimension_numbers = #tpu.dot_dimension_numbers<[1], [0], [0], [1], [0, 0, 1, 1], [], []>} : vector<2x192xbf16>, vector<192x768xbf16>, vector<2x768xf32> -> vector<2x768xf32>
    %107 = arith.addf %82, %106 : vector<2x768xf32>
    %c0_39 = arith.constant 0 : index
    %c0_40 = arith.constant 0 : index
    %108 = vector.load %arg5[%c0_39, %c0_40] : memref<1x768xf32, #tpu.memory_space<vmem>>, vector<1x768xf32>
    %109 = vector.broadcast %108 : vector<1x768xf32> to vector<2x768xf32>
    %110 = arith.addf %107, %109 : vector<2x768xf32>
    %111 = arith.truncf %110 : vector<2x768xf32> to vector<2x768xbf16>
    %c0_41 = arith.constant 0 : index
    %c0_42 = arith.constant 0 : index
    %112 = vector.load %arg6[%c0_41, %c0_42] : memref<768x256xbf16, #tpu.memory_space<vmem>>, vector<768x256xbf16>
    %cst_43 = arith.constant dense<0.000000e+00> : vector<2x256xf32>
    %113 = tpu.matmul %111, %112, %cst_43 {dimension_numbers = #tpu.dot_dimension_numbers<[1], [0], [0], [1], [0, 0, 1, 1], [], []>} : vector<2x768xbf16>, vector<768x256xbf16>, vector<2x256xf32> -> vector<2x256xf32>
    %c0_44 = arith.constant 0 : index
    %c0_45 = arith.constant 0 : index
    %114 = vector.load %arg7[%c0_44, %c0_45] : memref<1x256xf32, #tpu.memory_space<vmem>>, vector<1x256xf32>
    %115 = vector.broadcast %114 : vector<1x256xf32> to vector<2x256xf32>
    %116 = arith.addf %113, %115 : vector<2x256xf32>
    %cst_46 = arith.constant 0.000000e+00 : f32
    %117 = vector.broadcast %cst_46 : f32 to vector<2x256xf32>
    %118 = arith.maximumf %116, %117 : vector<2x256xf32>
    %119 = arith.truncf %118 : vector<2x256xf32> to vector<2x256xbf16>
    %c0_47 = arith.constant 0 : index
    %c0_48 = arith.constant 0 : index
    %120 = vector.load %arg8[%c0_47, %c0_48] : memref<256x128xbf16, #tpu.memory_space<vmem>>, vector<256x128xbf16>
    %cst_49 = arith.constant dense<0.000000e+00> : vector<2x128xf32>
    %121 = tpu.matmul %119, %120, %cst_49 {dimension_numbers = #tpu.dot_dimension_numbers<[1], [0], [0], [1], [0, 0, 1, 1], [], []>} : vector<2x256xbf16>, vector<256x128xbf16>, vector<2x128xf32> -> vector<2x128xf32>
    %c0_50 = arith.constant 0 : index
    %c0_51 = arith.constant 0 : index
    %122 = vector.load %arg9[%c0_50, %c0_51] : memref<1x128xf32, #tpu.memory_space<vmem>>, vector<1x128xf32>
    %123 = vector.broadcast %122 : vector<1x128xf32> to vector<2x128xf32>
    %124 = arith.addf %121, %123 : vector<2x128xf32>
    %c0_52 = arith.constant 0 : index
    %c0_53 = arith.constant 0 : index
    %125 = vector.load %arg10[%c0_52, %c0_53] : memref<2x128xf32, #tpu.memory_space<vmem>>, vector<2x128xf32>
    tpu.vector_store %arg10[%c0_52, %c0_53], %124 {strides = array<i32>} : memref<2x128xf32, #tpu.memory_space<vmem>>, vector<2x128xf32>,
    return
  }
  func.func @transform_0(%arg0: i32) -> (i32, i32, i32) {
    %c0_i32 = arith.constant 0 : i32
    %c0_i32_0 = arith.constant 0 : i32
    %c0_i32_1 = arith.constant 0 : i32
    return %arg0, %c0_i32, %c0_i32_0 : i32, i32, i32
  }
  func.func @transform_1(%arg0: i32) -> (i32, i32) {
    %c0_i32 = arith.constant 0 : i32
    %c0_i32_0 = arith.constant 0 : i32
    %c0_i32_1 = arith.constant 0 : i32
    return %c0_i32, %c0_i32_0 : i32, i32
  }
  func.func @transform_2(%arg0: i32) -> (i32, i32) {
    %c0_i32 = arith.constant 0 : i32
    %c0_i32_0 = arith.constant 0 : i32
    %c0_i32_1 = arith.constant 0 : i32
    return %c0_i32, %c0_i32_0 : i32, i32
  }
  func.func @transform_3(%arg0: i32) -> (i32, i32) {
    %c0_i32 = arith.constant 0 : i32
    %c0_i32_0 = arith.constant 0 : i32
    %c0_i32_1 = arith.constant 0 : i32
    return %c0_i32, %c0_i32_0 : i32, i32
  }
  func.func @transform_4(%arg0: i32) -> (i32, i32) {
    %c0_i32 = arith.constant 0 : i32
    %c0_i32_0 = arith.constant 0 : i32
    %c0_i32_1 = arith.constant 0 : i32
    return %c0_i32, %c0_i32_0 : i32, i32
  }
  func.func @transform_5(%arg0: i32) -> (i32, i32) {
    %c0_i32 = arith.constant 0 : i32
    %c0_i32_0 = arith.constant 0 : i32
    %c0_i32_1 = arith.constant 0 : i32
    return %c0_i32, %c0_i32_0 : i32, i32
  }
  func.func @transform_6(%arg0: i32) -> (i32, i32) {
    %c0_i32 = arith.constant 0 : i32
    %c0_i32_0 = arith.constant 0 : i32
    %c0_i32_1 = arith.constant 0 : i32
    return %c0_i32, %c0_i32_0 : i32, i32
  }
  func.func @transform_7(%arg0: i32) -> (i32, i32) {
    %c0_i32 = arith.constant 0 : i32
    %c0_i32_0 = arith.constant 0 : i32
    %c0_i32_1 = arith.constant 0 : i32
    return %c0_i32, %c0_i32_0 : i32, i32
  }
  func.func @transform_8(%arg0: i32) -> (i32, i32) {
    %c0_i32 = arith.constant 0 : i32
    %c0_i32_0 = arith.constant 0 : i32
    %c0_i32_1 = arith.constant 0 : i32
    return %c0_i32, %c0_i32_0 : i32, i32
  }
  func.func @transform_9(%arg0: i32) -> (i32, i32) {
    %c0_i32 = arith.constant 0 : i32
    %c0_i32_0 = arith.constant 0 : i32
    return %arg0, %c0_i32 : i32, i32
  }
}

</mosaic_0001>

<bundles_post_ra>
// kernel: tpu_custom_call.1
= control target key start
LH: loop header
LB: loop body
LE: loop exit
PB: predicated region body
PF: predicated region fallthrough
CT: control target
= control target key end

     0   :  { %14 = vsyncpa [#allocation3], 0  ;;  %s19085_s0 = inlined_call_operand.hbm [shape: bf16[2,8,768], index: 0, kind: input, shape index: {}]   ;;  %s19086_s1 = inlined_call_operand.hbm [shape: bf16[768,2304], index: 1, kind: input, shape index: {}]   ;;  %s19087_s2 = inlined_call_operand.hbm [shape: f32[1,2304], index: 2, kind: input, shape index: {}]   ;;  %s19088_s3 = inlined_call_operand.hbm [shape: bf16[768,768], index: 3, kind: input, shape index: {}]   ;;  %s19089_s4 = inlined_call_operand.hbm [shape: f32[1,768], index: 4, kind: input, shape index: {}]   ;;  %s19090_s5 = inlined_call_operand.hbm [shape: bf16[768,256], index: 5, kind: input, shape index: {}]   ;;  %s19091_s6 = inlined_call_operand.hbm [shape: f32[1,256], index: 6, kind: input, shape index: {}]   ;;  %s19092_s7 = inlined_call_operand.hbm [shape: bf16[256,128], index: 7, kind: input, shape index: {}]   ;;  %s19093_s8 = inlined_call_operand.hbm [shape: f32[1,128], index: 8, kind: input, shape index: {}]   ;;  %s19094_s9 = inlined_call_operand.hbm [shape: f32[2,128], index: 9, kind: output, shape index: {}]  }
   0x1   :  { %15 = vsyncpa [#allocation6], 0 }
   0x2   :  { %16 = vsyncpa [#allocation9], 0 }
   0x3   :  { %17 = vsyncpa [#allocation12], 0 }
   0x4   :  { %18 = vsyncpa [#allocation15], 0  ;;  %s37_s11 = sshll.u32 %s19086_s1, 4  ;;  %s38_s11 = int_to_ptr.hbm [resolvable:$true] %s37_s11 }
   0x5   :  { %19 = vsyncpa [#allocation4], 0  ;;  %s18000_s12 = smov [#allocation5]   ;;  %s18001_s14 = smov 1152  }
   0x6   :  { %s39_s13 = sshll.u32 %s18000_s12, 4  ;;  %s18002_s15 = smov 72   ;;  %s40_s13 = int_to_ptr.vmem [resolvable:$true] %s39_s13 }
   0x7   :  { %45 = dma.hbm_to_vmem [thread:$0]  %s38_s11, 110592, %s40_s13, [#allocation6], %s18001_s14, %s18001_s14, %s18002_s15  }
   0x8   :  { %s61_s18 = sshll.u32 %s19088_s3, 4  ;;  %s18003_s19 = smov [#allocation8]   ;;  %s62_s18 = int_to_ptr.hbm [resolvable:$true] %s61_s18 }
   0x9   :  { %s63_s20 = sshll.u32 %s18003_s19, 4  ;;  %s85_s23 = sshll.u32 %s19090_s5, 4  ;;  %s64_s20 = int_to_ptr.vmem [resolvable:$true] %s63_s20  ;;  %s86_s23 = int_to_ptr.hbm [resolvable:$true] %s85_s23 }
   0xa   :  { %s18004_s1 = smov 384   ;;  %s18005_s24 = smov 24  }
   0xb   :  { %69 = dma.hbm_to_vmem [thread:$0]  %s62_s18, 36864, %s64_s20, [#allocation9], %s18004_s1, %s18004_s1, %s18005_s24  }
   0xc   :  { %s18006_s25 = smov [#allocation11]   ;;  %s109_s29 = sshll.u32 %s19092_s7, 4  ;;  %s110_s29 = int_to_ptr.hbm [resolvable:$true] %s109_s29 }
   0xd   :  { %s87_s26 = sshll.u32 %s18006_s25, 4  ;;  %s18007_s3 = smov 128   ;;  %s88_s26 = int_to_ptr.vmem [resolvable:$true] %s87_s26 }
   0xe   :  { %s18008_s30 = smov 8   ;;  %s18009_s10 = smov [#allocation14]  }
   0xf   :  { %93 = dma.hbm_to_vmem [thread:$0]  %s86_s23, 12288, %s88_s26, [#allocation12], %s18007_s3, %s18007_s3, %s18008_s30  }
  0x10   :  { %s111_s11 = sshll.u32 %s18009_s10, 4  ;;  %s18010_s5 = smov 64   ;;  %s112_s11 = int_to_ptr.vmem [resolvable:$true] %s111_s11 }
  0x11   :  { %s18011_s12 = smov 4   ;;  %s24_s15 = sshll.u32 %s19085_s0, 4  ;;  %s25_s15 = int_to_ptr.hbm [resolvable:$true] %s24_s15 }
  0x12   :  { %117 = dma.hbm_to_vmem [thread:$0]  %s110_s29, 2048, %s112_s11, [#allocation15], %s18010_s5, %s18010_s5, %s18011_s12  }
  0x13   :  { %s18012_s16 = smov [#allocation2]   ;;  %s51_s19 = sshll.u32 %s19087_s2, 4  ;;  %s52_s19 = int_to_ptr.hbm [resolvable:$true] %s51_s19 }
  0x14   :  { %s26_s17 = sshll.u32 %s18012_s16, 4  ;;  %s18013_s20 = smov [#allocation7]   ;;  %s27_s17 = int_to_ptr.vmem [resolvable:$true] %s26_s17 }
  0x15   :  { %32 = dma.hbm_to_vmem [thread:$0]  %s25_s15, 768, %s27_s17, [#allocation3], %s18004_s1, %s18004_s1, %s18005_s24  }
  0x16   :  { %s53_s21 = sshll.u32 %s18013_s20, 4  ;;  %s75_s25 = sshll.u32 %s19089_s4, 4  ;;  %s54_s21 = int_to_ptr.vmem [resolvable:$true] %s53_s21  ;;  %s76_s25 = int_to_ptr.hbm [resolvable:$true] %s75_s25 }
  0x17   :  { %56 = dma.hbm_to_vmem [thread:$0]  %s52_s19, 288, %s54_s21, [#allocation6]  }
  0x18   :  { %s99_s27 = sshll.u32 %s19091_s6, 4  ;;  %s18014_s28 = smov [#allocation10]   ;;  %s100_s27 = int_to_ptr.hbm [resolvable:$true] %s99_s27 }
  0x19   :  { %s77_s29 = sshll.u32 %s18014_s28, 4  ;;  %s18015_s2 = smov [#allocation13]   ;;  %s78_s29 = int_to_ptr.vmem [resolvable:$true] %s77_s29 }
  0x1a   :  { %80 = dma.hbm_to_vmem [thread:$0]  %s76_s25, 96, %s78_s29, [#allocation9]  }
  0x1b   :  { %s101_s1 = sshll.u32 %s18015_s2, 4  ;;  %s123_s30 = sshll.u32 %s19093_s8, 4  ;;  %s102_s1 = int_to_ptr.vmem [resolvable:$true] %s101_s1  ;;  %s124_s30 = int_to_ptr.hbm [resolvable:$true] %s123_s30 }
  0x1c   :  { %104 = dma.hbm_to_vmem [thread:$0]  %s100_s27, 32, %s102_s1, [#allocation12]  }
  0x1d   :  { %s18016_s4 = smov [#allocation16]  }
  0x1e   :  { %s125_s10 = sshll.u32 %s18016_s4, 4  ;;  %s126_s10 = int_to_ptr.vmem [resolvable:$true] %s125_s10 }
  0x1f   :  { %128 = dma.hbm_to_vmem [thread:$0]  %s124_s30, 16, %s126_s10, [#allocation15]  }
  0x20   :  { %17988 = dma.done.wait [#allocation3], 768  }
  0x21   :  { %17989 = vsyncadd [#allocation3], 4294966528 }
  0x22   :  { %17990 = dma.done.wait [#allocation6], 110880  }
  0x23   :  { %17991 = vsyncadd [#allocation6], 4294856416 }
  0x24   :  { %17992 = dma.done.wait [#allocation9], 36960  }
  0x25   :  { %17993 = vsyncadd [#allocation9], 4294930336 }
  0x26   :  { %17994 = dma.done.wait [#allocation12], 12320  }
  0x27   :  { %17995 = vsyncadd [#allocation12], 4294954976 }
  0x28   :  { %17996 = dma.done.wait [#allocation15], 2064  }
  0x29   :  { %17997 = vsyncadd [#allocation15], 4294965232  ;;  %v11823_v0 = vld [vmem:[#allocation5 + $0x3f0] sm:$0xf]  ;;  %v16562_v1 = vld [vmem:[#allocation5 + $0x434] sm:$0xf0] }
  0x2a   :  { %v12399_v2 = vld [vmem:[#allocation5 + $0x870] sm:$0xf]  ;;  %v11824_v3 = vor.u32 %v16562_v1, %v11823_v0  ;;  %v16706_v4 = vld [vmem:[#allocation5 + $0x8b4] sm:$0xf0]  ;;  %v11751_v11 = vld [vmem:[#allocation5 + $0x360] sm:$0xf] }
  0x2b   :  { %v12975_v5 = vld [vmem:[#allocation5 + $0xcf0] sm:$0xf]  ;;  %v16850_v6 = vld [vmem:[#allocation5 + $0xd34] sm:$0xf0]  ;;  %v12400_v7 = vor.u32 %v16706_v4, %v12399_v2  ;;  %v16544_v13 = vld [vmem:[#allocation5 + $0x3a4] sm:$0xf0] }
  0x2c   :  { %v12976_v8 = vor.u32 %v16850_v6, %v12975_v5  ;;  %v13551_v9 = vld [vmem:[#allocation5 + $0x1170] sm:$0xf]  ;;  %v16994_v10 = vld [vmem:[#allocation5 + $0x11b4] sm:$0xf0]  ;;  %5428 = vmatpush.bf16.msra.mxu0 %v11824_v3  ;;  %v12327_v14 = vld [vmem:[#allocation5 + $0x7e0] sm:$0xf]  ;;  %v11752_v16 = vor.u32 %v16544_v13, %v11751_v11 }
  0x2d   :  { %v13552_v12 = vor.u32 %v16994_v10, %v13551_v9  ;;  %v16688_v15 = vld [vmem:[#allocation5 + $0x824] sm:$0xf0]  ;;  %5442 = vmatpush.bf16.msra.mxu1 %v12400_v7  ;;  %v12903_v18 = vld [vmem:[#allocation5 + $0xc60] sm:$0xf]  ;;  %v11679_v23 = vld [vmem:[#allocation5 + $0x2d0] sm:$0xf] }
  0x2e   :  { %5456 = vmatpush.bf16.msra.mxu2 %v12976_v8  ;;  %v12328_v17 = vor.u32 %v16688_v15, %v12327_v14  ;;  %v16832_v19 = vld [vmem:[#allocation5 + $0xca4] sm:$0xf0]  ;;  %v13479_v20 = vld [vmem:[#allocation5 + $0x10e0] sm:$0xf]  ;;  %v16526_v24 = vld [vmem:[#allocation5 + $0x314] sm:$0xf0] }
  0x2f   :  { %5470 = vmatpush.bf16.msra.mxu3 %v13552_v12  ;;  %v12904_v21 = vor.u32 %v16832_v19, %v12903_v18  ;;  %v16976_v22 = vld [vmem:[#allocation5 + $0x1124] sm:$0xf0]  ;;  %v12255_v26 = vld [vmem:[#allocation5 + $0x750] sm:$0xf]  ;;  %v16670_v27 = vld [vmem:[#allocation5 + $0x794] sm:$0xf0]  ;;  %v11680_v29 = vor.u32 %v16526_v24, %v11679_v23 }
  0x30   :  { %v13480_v25 = vor.u32 %v16976_v22, %v13479_v20  ;;  %v12831_v28 = vld [vmem:[#allocation5 + $0xbd0] sm:$0xf]  ;;  %5429 = vmatpush.bf16.msra.mxu0 %v11752_v16  ;;  %v16814_v30 = vld [vmem:[#allocation5 + $0xc14] sm:$0xf0]  ;;  %v12256_v33 = vor.u32 %v16670_v27, %v12255_v26  ;;  %v11607_v35 = vld [vmem:[#allocation5 + $0x240] sm:$0xf] }
  0x31   :  { %v13407_v31 = vld [vmem:[#allocation5 + $0x1050] sm:$0xf]  ;;  %v16958_v32 = vld [vmem:[#allocation5 + $0x1094] sm:$0xf0]  ;;  %5443 = vmatpush.bf16.msra.mxu1 %v12328_v17  ;;  %v12832_v34 = vor.u32 %v16814_v30, %v12831_v28  ;;  %v16508_v36 = vld [vmem:[#allocation5 + $0x284] sm:$0xf0] }
  0x32   :  { %5457 = vmatpush.bf16.msra.mxu2 %v12904_v21  ;;  %v12183_v37 = vld [vmem:[#allocation5 + $0x6c0] sm:$0xf]  ;;  %v13408_v38 = vor.u32 %v16958_v32, %v13407_v31  ;;  %v16652_v39 = vld [vmem:[#allocation5 + $0x704] sm:$0xf0]  ;;  %v11608_v44 = vor.u32 %v16508_v36, %v11607_v35  ;;  %v11535_v47 = vld [vmem:[#allocation5 + $0x1b0] sm:$0xf] }
  0x33   :  { %5471 = vmatpush.bf16.msra.mxu3 %v13480_v25  ;;  %v12759_v40 = vld [vmem:[#allocation5 + $0xb40] sm:$0xf]  ;;  %v16796_v41 = vld [vmem:[#allocation5 + $0xb84] sm:$0xf0]  ;;  %v12184_v45 = vor.u32 %v16652_v39, %v12183_v37  ;;  %v16490_v48 = vld [vmem:[#allocation5 + $0x1f4] sm:$0xf0] }
  0x34   :  { %v13335_v42 = vld [vmem:[#allocation5 + $0xfc0] sm:$0xf]  ;;  %v16940_v43 = vld [vmem:[#allocation5 + $0x1004] sm:$0xf0]  ;;  %5430 = vmatpush.bf16.msra.mxu0 %v11680_v29  ;;  %v12760_v46 = vor.u32 %v16796_v41, %v12759_v40  ;;  %v12111_v49 = vld [vmem:[#allocation5 + $0x630] sm:$0xf]  ;;  %v11536_v56 = vor.u32 %v16490_v48, %v11535_v47 }
  0x35   :  { %5444 = vmatpush.bf16.msra.mxu1 %v12256_v33  ;;  %v13336_v50 = vor.u32 %v16940_v43, %v13335_v42  ;;  %v16634_v51 = vld [vmem:[#allocation5 + $0x674] sm:$0xf0]  ;;  %v12687_v52 = vld [vmem:[#allocation5 + $0xab0] sm:$0xf]  ;;  %v11463_v59 = vld [vmem:[#allocation5 + $0x120] sm:$0xf] }
  0x36   :  { %5458 = vmatpush.bf16.msra.mxu2 %v12832_v34  ;;  %v16778_v53 = vld [vmem:[#allocation5 + $0xaf4] sm:$0xf0]  ;;  %v13263_v54 = vld [vmem:[#allocation5 + $0xf30] sm:$0xf]  ;;  %v12112_v57 = vor.u32 %v16634_v51, %v12111_v49  ;;  %v16472_v60 = vld [vmem:[#allocation5 + $0x164] sm:$0xf0] }
  0x37   :  { %5472 = vmatpush.bf16.msra.mxu3 %v13408_v38  ;;  %v16922_v55 = vld [vmem:[#allocation5 + $0xf74] sm:$0xf0]  ;;  %v12688_v58 = vor.u32 %v16778_v53, %v12687_v52  ;;  %v12039_v61 = vld [vmem:[#allocation5 + $0x5a0] sm:$0xf]  ;;  %v16616_v63 = vld [vmem:[#allocation5 + $0x5e4] sm:$0xf0]  ;;  %v11464_v4 = vor.u32 %v16472_v60, %v11463_v59 }
  0x38   :  { %5431 = vmatpush.bf16.msra.mxu0 %v11608_v44  ;;  %v13264_v62 = vor.u32 %v16922_v55, %v13263_v54  ;;  %v12615_v0 = vld [vmem:[#allocation5 + $0xa20] sm:$0xf]  ;;  %v16760_v1 = vld [vmem:[#allocation5 + $0xa64] sm:$0xf0]  ;;  %v12040_v5 = vor.u32 %v16616_v63, %v12039_v61  ;;  %v11391_v7 = vld [vmem:[#allocation5 + $0x90] sm:$0xf] }
  0x39   :  { %5445 = vmatpush.bf16.msra.mxu1 %v12184_v45  ;;  %v13191_v2 = vld [vmem:[#allocation5 + $0xea0] sm:$0xf]  ;;  %v16904_v3 = vld [vmem:[#allocation5 + $0xee4] sm:$0xf0]  ;;  %v12616_v6 = vor.u32 %v16760_v1, %v12615_v0  ;;  %v16454_v8 = vld [vmem:[#allocation5 + $0xd4] sm:$0xf0] }
  0x3a   :  { %5459 = vmatpush.bf16.msra.mxu2 %v12760_v46  ;;  %v11967_v9 = vld [vmem:[#allocation5 + $0x510] sm:$0xf]  ;;  %v13192_v10 = vor.u32 %v16904_v3, %v13191_v2  ;;  %v16598_v11 = vld [vmem:[#allocation5 + $0x554] sm:$0xf0]  ;;  %v11392_v16 = vor.u32 %v16454_v8, %v11391_v7  ;;  %v11319_v17 = vld [vmem:[#allocation5] sm:$0xf] }
  0x3b   :  { %5473 = vmatpush.bf16.msra.mxu3 %v13336_v50  ;;  %v12543_v12 = vld [vmem:[#allocation5 + $0x990] sm:$0xf]  ;;  %v16742_v13 = vld [vmem:[#allocation5 + $0x9d4] sm:$0xf0]  ;;  %v16436_v18 = vld [vmem:[#allocation5 + $0x44] sm:$0xf0]  ;;  %v11968_v19 = vor.u32 %v16598_v11, %v11967_v9 }
  0x3c   :  { %5432 = vmatpush.bf16.msra.mxu0 %v11536_v56  ;;  %v13119_v14 = vld [vmem:[#allocation5 + $0xe10] sm:$0xf]  ;;  %v16886_v15 = vld [vmem:[#allocation5 + $0xe54] sm:$0xf0]  ;;  %v12544_v20 = vor.u32 %v16742_v13, %v12543_v12  ;;  %v11895_v21 = vld [vmem:[#allocation5 + $0x480] sm:$0xf]  ;;  %v11320_v31 = vor.u32 %v16436_v18, %v11319_v17 }
  0x3d   :  { %5446 = vmatpush.bf16.msra.mxu1 %v12112_v57  ;;  %v16580_v22 = vld [vmem:[#allocation5 + $0x4c4] sm:$0xf0]  ;;  %v12471_v23 = vld [vmem:[#allocation5 + $0x900] sm:$0xf]  ;;  %v13120_v24 = vor.u32 %v16886_v15, %v13119_v14  ;;  %v14127_v28 = vld [vmem:[#allocation5 + $0x15f0] sm:$0xf] }
  0x3e   :  { %5460 = vmatpush.bf16.msra.mxu2 %v12688_v58  ;;  %v16724_v25 = vld [vmem:[#allocation5 + $0x944] sm:$0xf0]  ;;  %v13047_v26 = vld [vmem:[#allocation5 + $0xd80] sm:$0xf]  ;;  %v17138_v29 = vld [vmem:[#allocation5 + $0x1634] sm:$0xf0]  ;;  %v11896_v35 = vor.u32 %v16580_v22, %v11895_v21 }
  0x3f   :  { %5474 = vmatpush.bf16.msra.mxu3 %v13264_v62  ;;  %v16868_v27 = vld [vmem:[#allocation5 + $0xdc4] sm:$0xf0]  ;;  %v14703_v30 = vld [vmem:[#allocation5 + $0x1a70] sm:$0xf]  ;;  %v17282_v32 = vld [vmem:[#allocation5 + $0x1ab4] sm:$0xf0]  ;;  %v12472_v36 = vor.u32 %v16724_v25, %v12471_v23  ;;  %v14128_v40 = vor.u32 %v17138_v29, %v14127_v28 }
  0x40   :  { %5433 = vmatpush.bf16.msra.mxu0 %v11464_v4  ;;  %v16553_v33 = vld [vmem:[#allocation5 + $0x3f4] sm:$0xf]  ;;  %v11825_v34 = vld [vmem:[#allocation5 + $0x438] sm:$0xf0]  ;;  %v13048_v39 = vor.u32 %v16868_v27, %v13047_v26  ;;  %v14055_v41 = vld [vmem:[#allocation5 + $0x1560] sm:$0xf]  ;;  %v14704_v42 = vor.u32 %v17282_v32, %v14703_v30 }
  0x41   :  { %5447 = vmatpush.bf16.msra.mxu1 %v12040_v5  ;;  %v16697_v37 = vld [vmem:[#allocation5 + $0x874] sm:$0xf]  ;;  %v12401_v38 = vld [vmem:[#allocation5 + $0x8b8] sm:$0xf0]  ;;  %v11828_v43 = vor.u32 %v16553_v33, %v11825_v34  ;;  %v17120_v44 = vld [vmem:[#allocation5 + $0x15a4] sm:$0xf0] }
  0x42   :  { %5461 = vmatpush.bf16.msra.mxu2 %v12616_v6  ;;  %v14631_v45 = vld [vmem:[#allocation5 + $0x19e0] sm:$0xf]  ;;  %v17264_v46 = vld [vmem:[#allocation5 + $0x1a24] sm:$0xf0]  ;;  %v12404_v47 = vor.u32 %v16697_v37, %v12401_v38  ;;  %v16535_v48 = vld [vmem:[#allocation5 + $0x364] sm:$0xf]  ;;  %v14056_v54 = vor.u32 %v17120_v44, %v14055_v41 }
  0x43   :  { %5475 = vmatpush.bf16.msra.mxu3 %v13192_v10  ;;  %v11753_v49 = vld [vmem:[#allocation5 + $0x3a8] sm:$0xf0]  ;;  %v16679_v50 = vld [vmem:[#allocation5 + $0x7e4] sm:$0xf]  ;;  %v11295_v52 = vld [vmem:[#allocation2] sm:$0xf]  ;;  %v14632_v58 = vor.u32 %v17264_v46, %v14631_v45 }
  0x44   :  { %5434 = vmatpush.bf16.msra.mxu0 %v11392_v16  ;;  %v12329_v51 = vld [vmem:[#allocation5 + $0x828] sm:$0xf0]  ;;  %v16424_v53 = vld [vmem:[#allocation2 + $0x14] sm:$0xf0]  ;;  %v13983_v55 = vld [vmem:[#allocation5 + $0x14d0] sm:$0xf]  ;;  %v11756_v59 = vor.u32 %v16535_v48, %v11753_v49 }
  0x45   :  { %5448 = vmatpush.bf16.msra.mxu1 %v11968_v19  ;;  %v17102_v56 = vld [vmem:[#allocation5 + $0x1514] sm:$0xf0]  ;;  %v18098_v57 = vor.u32 %v16424_v53, %v11295_v52  ;;  %v14559_v60 = vld [vmem:[#allocation5 + $0x1950] sm:$0xf]  ;;  %v16517_v62 = vld [vmem:[#allocation5 + $0x2d4] sm:$0xf]  ;;  %v12332_v63 = vor.u32 %v16679_v50, %v12329_v51 }
  0x46   :  { %5462 = vmatpush.bf16.msra.mxu2 %v12544_v20  ;;  %v17246_v61 = vld [vmem:[#allocation5 + $0x1994] sm:$0xf0]  ;;  %v11681_v0 = vld [vmem:[#allocation5 + $0x318] sm:$0xf0]  ;;  %v16421_v1 = vld [vmem:[#allocation2 + $0x4] sm:$0xf]  ;;  %v13984_v7 = vor.u32 %v17102_v56, %v13983_v55 }
  0x47   :  { %5476 = vmatpush.bf16.msra.mxu3 %v13120_v24  ;;  %v11297_v2 = vld [vmem:[#allocation2 + $0x18] sm:$0xf0]  ;;  %v16661_v3 = vld [vmem:[#allocation5 + $0x754] sm:$0xf]  ;;  %v12257_v4 = vld [vmem:[#allocation5 + $0x798] sm:$0xf0]  ;;  %v14560_v11 = vor.u32 %v17246_v61, %v14559_v60  ;;  %v11684_v12 = vor.u32 %v16517_v62, %v11681_v0 }
  0x48   :  { %5435 = vmatpush.bf16.msra.mxu0 %v11320_v31  ;;  %v13911_v5 = vld [vmem:[#allocation5 + $0x1440] sm:$0xf]  ;;  %v18101_v6 = vor.u32 %v16421_v1, %v11297_v2  ;;  %v17084_v8 = vld [vmem:[#allocation5 + $0x1484] sm:$0xf0]  ;;  %v16499_v13 = vld [vmem:[#allocation5 + $0x244] sm:$0xf]  ;;  %v12260_v16 = vor.u32 %v16661_v3, %v12257_v4 }
  0x49   :  { %5449 = vmatpush.bf16.msra.mxu1 %v11896_v35  ;;  %v14487_v9 = vld [vmem:[#allocation5 + $0x18c0] sm:$0xf]  ;;  %v17228_v10 = vld [vmem:[#allocation5 + $0x1904] sm:$0xf0]  ;;  %v11609_v14 = vld [vmem:[#allocation5 + $0x288] sm:$0xf0]  ;;  %v13912_v24 = vor.u32 %v17084_v8, %v13911_v5 }
  0x4a   :  { %5463 = vmatpush.bf16.msra.mxu2 %v12472_v36  ;;  %v11303_v15 = vld [vmem:[#allocation2 + $0x8] sm:$0xf]  ;;  %v16425_v17 = vld [vmem:[#allocation2 + $0x1c] sm:$0xf0]  ;;  %v16422_v18 = vld [vmem:[#allocation2 + $0xc] sm:$0xf]  ;;  %v14488_v25 = vor.u32 %v17228_v10, %v14487_v9  ;;  %v11612_v26 = vor.u32 %v16499_v13, %v11609_v14 }
  0x4b   :  { %5477 = vmatpush.bf16.msra.mxu3 %v13048_v39  ;;  %5436 = vmatmul.bf16.vlgmr.msra.gmra.mxu0 %v18098_v57  ;;  %v11305_v19 = vld [vmem:[#allocation2 + $0x20] sm:$0xf0]  ;;  %v16643_v20 = vld [vmem:[#allocation5 + $0x6c4] sm:$0xf]  ;;  %v12185_v21 = vld [vmem:[#allocation5 + $0x708] sm:$0xf0]  ;;  %v18104_v22 = vor.u32 %v16425_v17, %v11303_v15 }
  0x4c   :  { %5484 = vmatpush.bf16.msrb.mxu0 %v14128_v40  ;;  %5450 = vmatmul.bf16.vlgmr.msra.gmra.mxu1 %v18101_v6  ;;  %v18106_v23 = vor.u32 %v16422_v18, %v11305_v19  ;;  %v13839_v27 = vld [vmem:[#allocation5 + $0x13b0] sm:$0xf]  ;;  %v17066_v28 = vld [vmem:[#allocation5 + $0x13f4] sm:$0xf0]  ;;  %v12188_v30 = vor.u32 %v16643_v20, %v12185_v21  ;;  %v16481_v32 = vld [vmem:[#allocation5 + $0x1b4] sm:$0xf] }
  0x4d   :  { %5498 = vmatpush.bf16.msrb.mxu1 %v14704_v42  ;;  %v14415_v29 = vld [vmem:[#allocation5 + $0x1830] sm:$0xf]  ;;  %v17210_v31 = vld [vmem:[#allocation5 + $0x1874] sm:$0xf0]  ;;  %v11537_v33 = vld [vmem:[#allocation5 + $0x1f8] sm:$0xf0]  ;;  %5464 = vmatmul.bf16.vlgmr.msra.gmra.mxu2 %v18104_v22  ;;  %v13840_v36 = vor.u32 %v17066_v28, %v13839_v27 }
  0x4e   :  { %5512 = vmatpush.bf16.msrb.mxu2 %v11828_v43  ;;  %v16625_v34 = vld [vmem:[#allocation5 + $0x634] sm:$0xf]  ;;  %v12113_v35 = vld [vmem:[#allocation5 + $0x678] sm:$0xf0]  ;;  %5478 = vmatmul.bf16.vlgmr.msra.gmra.mxu3 %v18106_v23  ;;  %v14416_v37 = vor.u32 %v17210_v31, %v14415_v29  ;;  %v11540_v38 = vor.u32 %v16481_v32, %v11537_v33  ;;  %v13767_v39 = vld [vmem:[#allocation5 + $0x1320] sm:$0xf] }
  0x4f   :  { %5526 = vmatpush.bf16.msrb.mxu3 %v12404_v47  ;;  %v17048_v40 = vld [vmem:[#allocation5 + $0x1364] sm:$0xf0]  ;;  %v14343_v41 = vld [vmem:[#allocation5 + $0x17a0] sm:$0xf]  ;;  %v12116_v42 = vor.u32 %v16625_v34, %v12113_v35  ;;  %v16463_v44 = vld [vmem:[#allocation5 + $0x124] sm:$0xf] }
  0x50   :  { %5485 = vmatpush.bf16.msrb.mxu0 %v14056_v54  ;;  %v17192_v43 = vld [vmem:[#allocation5 + $0x17e4] sm:$0xf0]  ;;  %v11465_v45 = vld [vmem:[#allocation5 + $0x168] sm:$0xf0]  ;;  %v16607_v46 = vld [vmem:[#allocation5 + $0x5a4] sm:$0xf]  ;;  %v13768_v48 = vor.u32 %v17048_v40, %v13767_v39 }
  0x51   :  { %5499 = vmatpush.bf16.msrb.mxu1 %v14632_v58  ;;  %v12041_v47 = vld [vmem:[#allocation5 + $0x5e8] sm:$0xf0]  ;;  %v14344_v49 = vor.u32 %v17192_v43, %v14343_v41  ;;  %v11468_v50 = vor.u32 %v16463_v44, %v11465_v45  ;;  %v13695_v51 = vld [vmem:[#allocation5 + $0x1290] sm:$0xf]  ;;  %v17030_v52 = vld [vmem:[#allocation5 + $0x12d4] sm:$0xf0] }
  0x52   :  { %5513 = vmatpush.bf16.msrb.mxu2 %v11756_v59  ;;  %v14271_v53 = vld [vmem:[#allocation5 + $0x1710] sm:$0xf]  ;;  %v12044_v54 = vor.u32 %v16607_v46, %v12041_v47  ;;  %v17174_v55 = vld [vmem:[#allocation5 + $0x1754] sm:$0xf0]  ;;  %v16445_v56 = vld [vmem:[#allocation5 + $0x94] sm:$0xf]  ;;  %v13696_v61 = vor.u32 %v17030_v52, %v13695_v51 }
  0x53   :  { %5527 = vmatpush.bf16.msrb.mxu3 %v12332_v63  ;;  %v11393_v58 = vld [vmem:[#allocation5 + $0xd8] sm:$0xf0]  ;;  %v16589_v59 = vld [vmem:[#allocation5 + $0x514] sm:$0xf]  ;;  %v13623_v62 = vld [vmem:[#allocation5 + $0x1200] sm:$0xf]  ;;  %v14272_v1 = vor.u32 %v17174_v55, %v14271_v53 }
  0x54   :  { %5486 = vmatpush.bf16.msrb.mxu0 %v13984_v7  ;;  %v11969_v60 = vld [vmem:[#allocation5 + $0x558] sm:$0xf0]  ;;  %v17012_v63 = vld [vmem:[#allocation5 + $0x1244] sm:$0xf0]  ;;  %v14199_v0 = vld [vmem:[#allocation5 + $0x1680] sm:$0xf]  ;;  %v11396_v2 = vor.u32 %v16445_v56, %v11393_v58 }
  0x55   :  { %5500 = vmatpush.bf16.msrb.mxu1 %v14560_v11  ;;  %v17156_v3 = vld [vmem:[#allocation5 + $0x16c4] sm:$0xf0]  ;;  %v16427_v4 = vld [vmem:[#allocation5 + $0x4] sm:$0xf]  ;;  %v11321_v5 = vld [vmem:[#allocation5 + $0x48] sm:$0xf0]  ;;  %v11972_v7 = vor.u32 %v16589_v59, %v11969_v60  ;;  %v13624_v14 = vor.u32 %v17012_v63, %v13623_v62 }
  0x56   :  { %5514 = vmatpush.bf16.msrb.mxu2 %v11684_v12  ;;  %v16571_v8 = vld [vmem:[#allocation5 + $0x484] sm:$0xf]  ;;  %v11897_v9 = vld [vmem:[#allocation5 + $0x4c8] sm:$0xf0]  ;;  %v16841_v10 = vld [vmem:[#allocation5 + $0xcf4] sm:$0xf]  ;;  %v14200_v18 = vor.u32 %v17156_v3, %v14199_v0  ;;  %v11324_v19 = vor.u32 %v16427_v4, %v11321_v5 }
  0x57   :  { %5528 = vmatpush.bf16.msrb.mxu3 %v12260_v16  ;;  %v12977_v11 = vld [vmem:[#allocation5 + $0xd38] sm:$0xf0]  ;;  %v16985_v12 = vld [vmem:[#allocation5 + $0x1174] sm:$0xf]  ;;  %v11311_v21 = vld [vmem:[#allocation2 + $0x10] sm:$0xf] }
  0x58   :  { %5487 = vmatpush.bf16.msrb.mxu0 %v13912_v24  ;;  %v13553_v13 = vld [vmem:[#allocation5 + $0x11b8] sm:$0xf0]  ;;  %v17129_v15 = vld [vmem:[#allocation5 + $0x15f4] sm:$0xf]  ;;  %v16426_v24 = vld [vmem:[#allocation2 + $0x24] sm:$0xf0] }
  0x59   :  { %5501 = vmatpush.bf16.msrb.mxu1 %v14488_v25  ;;  %v14129_v16 = vld [vmem:[#allocation5 + $0x1638] sm:$0xf0]  ;;  %v17273_v17 = vld [vmem:[#allocation5 + $0x1a74] sm:$0xf]  ;;  %v11900_v25 = vor.u32 %v16571_v8, %v11897_v9  ;;  %v16423_v27 = vld [vmem:[#allocation2 + $0x14] sm:$0xf]  ;;  %v13556_v29 = vor.u32 %v16985_v12, %v13553_v13  ;;  %v18110_v35 = vor.u32 %v16426_v24, %v11311_v21 }
  0x5a   :  { %5515 = vmatpush.bf16.msrb.mxu2 %v11612_v26  ;;  %v14705_v20 = vld [vmem:[#allocation5 + $0x1ab8] sm:$0xf0]  ;;  %v12980_v26 = vor.u32 %v16841_v10, %v12977_v11  ;;  %v16823_v31 = vld [vmem:[#allocation5 + $0xc64] sm:$0xf]  ;;  %v12905_v32 = vld [vmem:[#allocation5 + $0xca8] sm:$0xf0] }
  0x5b   :  { %5529 = vmatpush.bf16.msrb.mxu3 %v12188_v30  ;;  %v11313_v28 = vld [vmem:[#allocation2 + $0x28] sm:$0xf0]  ;;  %v14132_v30 = vor.u32 %v17129_v15, %v14129_v16  ;;  %v16967_v33 = vld [vmem:[#allocation5 + $0x10e4] sm:$0xf]  ;;  %v14708_v34 = vor.u32 %v17273_v17, %v14705_v20  ;;  %v14633_v41 = vld [vmem:[#allocation5 + $0x1a28] sm:$0xf0] }
  0x5c   :  { %5488 = vmatpush.bf16.msrb.mxu0 %v13840_v36  ;;  %v13481_v36 = vld [vmem:[#allocation5 + $0x1128] sm:$0xf0]  ;;  %v18112_v39 = vor.u32 %v16423_v27, %v11313_v28  ;;  %v17255_v40 = vld [vmem:[#allocation5 + $0x19e4] sm:$0xf]  ;;  %v16805_v45 = vld [vmem:[#allocation5 + $0xbd4] sm:$0xf] }
  0x5d   :  { %5502 = vmatpush.bf16.msrb.mxu1 %v14416_v37  ;;  %v17111_v37 = vld [vmem:[#allocation5 + $0x1564] sm:$0xf]  ;;  %v13484_v43 = vor.u32 %v16967_v33, %v13481_v36  ;;  %v12833_v46 = vld [vmem:[#allocation5 + $0xc18] sm:$0xf0]  ;;  %v16949_v47 = vld [vmem:[#allocation5 + $0x1054] sm:$0xf] }
  0x5e   :  { %5516 = vmatpush.bf16.msrb.mxu2 %v11540_v38  ;;  %v14057_v38 = vld [vmem:[#allocation5 + $0x15a8] sm:$0xf0]  ;;  %v13985_v51 = vld [vmem:[#allocation5 + $0x1518] sm:$0xf0]  ;;  %v17237_v52 = vld [vmem:[#allocation5 + $0x1954] sm:$0xf] }
  0x5f   :  { %5530 = vmatpush.bf16.msrb.mxu3 %v12116_v42  ;;  %v12908_v42 = vor.u32 %v16823_v31, %v12905_v32  ;;  %v14060_v44 = vor.u32 %v17111_v37, %v14057_v38  ;;  %v14561_v53 = vld [vmem:[#allocation5 + $0x1998] sm:$0xf0]  ;;  %v16787_v58 = vld [vmem:[#allocation5 + $0xb44] sm:$0xf]  ;;  %v12761_v59 = vld [vmem:[#allocation5 + $0xb88] sm:$0xf0] }
  0x60   :  { %5489 = vmatpush.bf16.msrb.mxu0 %v13768_v48  ;;  %v14636_v48 = vor.u32 %v17255_v40, %v14633_v41  ;;  %v16931_v60 = vld [vmem:[#allocation5 + $0xfc4] sm:$0xf]  ;;  %v13337_v62 = vld [vmem:[#allocation5 + $0x1008] sm:$0xf0]  ;;  %v12764_v3 = vor.u32 %v16787_v58, %v12761_v59  ;;  %v12689_v8 = vld [vmem:[#allocation5 + $0xaf8] sm:$0xf0] }
  0x61   :  { %5503 = vmatpush.bf16.msrb.mxu1 %v14344_v49  ;;  %v13409_v49 = vld [vmem:[#allocation5 + $0x1098] sm:$0xf0]  ;;  %v17075_v63 = vld [vmem:[#allocation5 + $0x1444] sm:$0xf]  ;;  %v13913_v0 = vld [vmem:[#allocation5 + $0x1488] sm:$0xf0]  ;;  %v13340_v4 = vor.u32 %v16931_v60, %v13337_v62 }
  0x62   :  { %5517 = vmatpush.bf16.msrb.mxu2 %v11468_v50  ;;  %v17093_v50 = vld [vmem:[#allocation5 + $0x14d4] sm:$0xf]  ;;  %v13412_v55 = vor.u32 %v16949_v47, %v13409_v49  ;;  %v13916_v5 = vor.u32 %v17075_v63, %v13913_v0  ;;  %v13265_v11 = vld [vmem:[#allocation5 + $0xf78] sm:$0xf0]  ;;  %v12617_v20 = vld [vmem:[#allocation5 + $0xa68] sm:$0xf0] }
  0x63   :  { %5531 = vmatpush.bf16.msrb.mxu3 %v12044_v54  ;;  %v12836_v54 = vor.u32 %v16805_v45, %v12833_v46  ;;  %v13988_v56 = vor.u32 %v17093_v50, %v13985_v51  ;;  %v16913_v9 = vld [vmem:[#allocation5 + $0xf34] sm:$0xf]  ;;  %v13841_v13 = vld [vmem:[#allocation5 + $0x13f8] sm:$0xf0]  ;;  %v16895_v21 = vld [vmem:[#allocation5 + $0xea4] sm:$0xf] }
  0x64   :  { %5490 = vmatpush.bf16.msrb.mxu0 %v13696_v61  ;;  %v14564_v61 = vor.u32 %v17237_v52, %v14561_v53  ;;  %v17057_v12 = vld [vmem:[#allocation5 + $0x13b4] sm:$0xf]  ;;  %v14417_v15 = vld [vmem:[#allocation5 + $0x1878] sm:$0xf0]  ;;  %v13268_v17 = vor.u32 %v16913_v9, %v13265_v11  ;;  %v13769_v27 = vld [vmem:[#allocation5 + $0x1368] sm:$0xf0] }
  0x65   :  { %5504 = vmatpush.bf16.msrb.mxu1 %v14272_v1  ;;  %v17219_v1 = vld [vmem:[#allocation5 + $0x18c4] sm:$0xf]  ;;  %v16733_v33 = vld [vmem:[#allocation5 + $0x994] sm:$0xf]  ;;  %v13121_v38 = vld [vmem:[#allocation5 + $0xe58] sm:$0xf0] }
  0x66   :  { %5518 = vmatpush.bf16.msrb.mxu2 %v11396_v2  ;;  %v14489_v2 = vld [vmem:[#allocation5 + $0x1908] sm:$0xf0]  ;;  %v17183_v28 = vld [vmem:[#allocation5 + $0x17a4] sm:$0xf]  ;;  %v16877_v36 = vld [vmem:[#allocation5 + $0xe14] sm:$0xf] }
  0x67   :  { %5532 = vmatpush.bf16.msrb.mxu3 %v11972_v7  ;;  %v16769_v7 = vld [vmem:[#allocation5 + $0xab4] sm:$0xf]  ;;  %v14492_v10 = vor.u32 %v17219_v1, %v14489_v2  ;;  %v13697_v41 = vld [vmem:[#allocation5 + $0x12d8] sm:$0xf0]  ;;  %v16715_v45 = vld [vmem:[#allocation5 + $0x904] sm:$0xf] }
  0x68   :  { %5491 = vmatpush.bf16.msrb.mxu0 %v13624_v14  ;;  %v17201_v14 = vld [vmem:[#allocation5 + $0x1834] sm:$0xf]  ;;  %v12692_v16 = vor.u32 %v16769_v7, %v12689_v8  ;;  %v12473_v46 = vld [vmem:[#allocation5 + $0x948] sm:$0xf0]  ;;  %v16859_v47 = vld [vmem:[#allocation5 + $0xd84] sm:$0xf] }
  0x69   :  { %5505 = vmatpush.bf16.msrb.mxu1 %v14200_v18  ;;  %v13844_v18 = vor.u32 %v17057_v12, %v13841_v13  ;;  %v14420_v24 = vor.u32 %v17201_v14, %v14417_v15  ;;  %v17021_v40 = vld [vmem:[#allocation5 + $0x1294] sm:$0xf]  ;;  %v13049_v50 = vld [vmem:[#allocation5 + $0xdc8] sm:$0xf0]  ;;  %v17003_v51 = vld [vmem:[#allocation5 + $0x1204] sm:$0xf]  ;;  %v12476_v60 = vor.u32 %v16715_v45, %v12473_v46 }
  0x6a   :  { %5519 = vmatpush.bf16.msrb.mxu2 %v11324_v19  ;;  %v16751_v19 = vld [vmem:[#allocation5 + $0xa24] sm:$0xf]  ;;  %v13700_v49 = vor.u32 %v17021_v40, %v13697_v41  ;;  %v13625_v52 = vld [vmem:[#allocation5 + $0x1248] sm:$0xf0]  ;;  %v16563_v58 = vld [vmem:[#allocation5 + $0x43c] sm:$0xf0]  ;;  %v13052_v0 = vor.u32 %v16859_v47, %v13049_v50 }
  0x6b   :  { %5533 = vmatpush.bf16.msrb.mxu3 %v11900_v25  ;;  %5492 = vmatmul.bf16.vlgmr.msrb.gmra.mxu0 %v18110_v35  ;;  %v13193_v25 = vld [vmem:[#allocation5 + $0xee8] sm:$0xf0]  ;;  %v12407_v59 = vld [vmem:[#allocation5 + $0x878] sm:$0xf]  ;;  %v16851_v63 = vld [vmem:[#allocation5 + $0xd3c] sm:$0xf0]  ;;  %v13628_v1 = vor.u32 %v17003_v51, %v13625_v52 }
  0x6c   :  { %5540 = vmatpush.bf16.msra.mxu0 %v12980_v26  ;;  %5506 = vmatmul.bf16.vlgmr.msrb.gmra.mxu1 %v18112_v39  ;;  %v17039_v26 = vld [vmem:[#allocation5 + $0x1324] sm:$0xf]  ;;  %v13196_v31 = vor.u32 %v16895_v21, %v13193_v25  ;;  %v12983_v62 = vld [vmem:[#allocation5 + $0xcf8] sm:$0xf]  ;;  %v11759_v9 = vld [vmem:[#allocation5 + $0x368] sm:$0xf] }
  0x6d   :  { %5554 = vmatpush.bf16.msra.mxu1 %v13556_v29  ;;  %5520 = vmatmul.bf16.vlgmr.msrb.gmra.mxu2 %v18098_v57  ;;  %v14345_v29 = vld [vmem:[#allocation5 + $0x17e8] sm:$0xf0]  ;;  %v13772_v32 = vor.u32 %v17039_v26, %v13769_v27  ;;  %v13559_v2 = vld [vmem:[#allocation5 + $0x1178] sm:$0xf]  ;;  %v12984_v8 = vor.u32 %v16851_v63, %v12983_v62  ;;  %v12335_v11 = vld [vmem:[#allocation5 + $0x7e8] sm:$0xf] }
  0x6e   :  { %5568 = vmatpush.bf16.msra.mxu2 %v14132_v30  ;;  %5534 = vmatmul.bf16.vlgmr.msrb.gmra.mxu3 %v18101_v6  ;;  %v12620_v30 = vor.u32 %v16751_v19, %v12617_v20  ;;  %v14348_v37 = vor.u32 %v17183_v28, %v14345_v29  ;;  %v16689_v13 = vld [vmem:[#allocation5 + $0x82c] sm:$0xf0]  ;;  %v12911_v14 = vld [vmem:[#allocation5 + $0xc68] sm:$0xf]  ;;  %v11687_v21 = vld [vmem:[#allocation5 + $0x2d8] sm:$0xf] }
  0x6f   :  { %5582 = vmatpush.bf16.msra.mxu3 %v14708_v34  ;;  %v12545_v34 = vld [vmem:[#allocation5 + $0x9d8] sm:$0xf0]  ;;  %v16833_v15 = vld [vmem:[#allocation5 + $0xcac] sm:$0xf0]  ;;  %v12336_v19 = vor.u32 %v16689_v13, %v12335_v11  ;;  %v12263_v25 = vld [vmem:[#allocation5 + $0x758] sm:$0xf] }
  0x70   :  { %5541 = vmatpush.bf16.msra.mxu0 %v12908_v42  ;;  %v17165_v42 = vld [vmem:[#allocation5 + $0x1714] sm:$0xf]  ;;  %v12912_v20 = vor.u32 %v16833_v15, %v12911_v14  ;;  %v16671_v27 = vld [vmem:[#allocation5 + $0x79c] sm:$0xf0]  ;;  %v12839_v28 = vld [vmem:[#allocation5 + $0xbd8] sm:$0xf] }
  0x71   :  { %5555 = vmatpush.bf16.msra.mxu1 %v13484_v43  ;;  %v14273_v43 = vld [vmem:[#allocation5 + $0x1758] sm:$0xf0]  ;;  %v16815_v29 = vld [vmem:[#allocation5 + $0xc1c] sm:$0xf0]  ;;  %v16653_v41 = vld [vmem:[#allocation5 + $0x70c] sm:$0xf0] }
  0x72   :  { %5569 = vmatpush.bf16.msra.mxu2 %v14060_v44  ;;  %v12548_v44 = vor.u32 %v16733_v33, %v12545_v34  ;;  %v14276_v53 = vor.u32 %v17165_v42, %v14273_v43  ;;  %v12264_v33 = vor.u32 %v16671_v27, %v12263_v25  ;;  %v12840_v34 = vor.u32 %v16815_v29, %v12839_v28  ;;  %v12767_v42 = vld [vmem:[#allocation5 + $0xb48] sm:$0xf]  ;;  %v16797_v43 = vld [vmem:[#allocation5 + $0xb8c] sm:$0xf0]  ;;  %v16491_v50 = vld [vmem:[#allocation5 + $0x1fc] sm:$0xf0] }
  0x73   :  { %5583 = vmatpush.bf16.msra.mxu3 %v14636_v48  ;;  %v13124_v48 = vor.u32 %v16877_v36, %v13121_v38  ;;  %v11615_v36 = vld [vmem:[#allocation5 + $0x248] sm:$0xf]  ;;  %v16941_v45 = vld [vmem:[#allocation5 + $0x100c] sm:$0xf0]  ;;  %v12119_v51 = vld [vmem:[#allocation5 + $0x638] sm:$0xf] }
  0x74   :  { %5542 = vmatpush.bf16.msra.mxu0 %v12836_v54  ;;  %v17147_v54 = vld [vmem:[#allocation5 + $0x1684] sm:$0xf]  ;;  %v12191_v38 = vld [vmem:[#allocation5 + $0x6c8] sm:$0xf]  ;;  %v16473_v63 = vld [vmem:[#allocation5 + $0x16c] sm:$0xf0] }
  0x75   :  { %5556 = vmatpush.bf16.msra.mxu1 %v13412_v55  ;;  %v14201_v55 = vld [vmem:[#allocation5 + $0x16c8] sm:$0xf0]  ;;  %v12192_v47 = vor.u32 %v16653_v41, %v12191_v38  ;;  %v11471_v62 = vld [vmem:[#allocation5 + $0x128] sm:$0xf]  ;;  %v11399_v11 = vld [vmem:[#allocation5 + $0x98] sm:$0xf] }
  0x76   :  { %5570 = vmatpush.bf16.msra.mxu2 %v13988_v56  ;;  %v11831_v56 = vld [vmem:[#allocation5 + $0x3f8] sm:$0xf]  ;;  %v16599_v15 = vld [vmem:[#allocation5 + $0x55c] sm:$0xf0]  ;;  %v11903_v27 = vld [vmem:[#allocation5 + $0x488] sm:$0xf] }
  0x77   :  { %5584 = vmatpush.bf16.msra.mxu3 %v14564_v61  ;;  %v16707_v61 = vld [vmem:[#allocation5 + $0x8bc] sm:$0xf0]  ;;  %v11975_v13 = vld [vmem:[#allocation5 + $0x518] sm:$0xf]  ;;  %v16581_v28 = vld [vmem:[#allocation5 + $0x4cc] sm:$0xf0] }
  0x78   :  { %5543 = vmatpush.bf16.msra.mxu0 %v12764_v3  ;;  %v16995_v3 = vld [vmem:[#allocation5 + $0x11bc] sm:$0xf0]  ;;  %v12408_v7 = vor.u32 %v16707_v61, %v12407_v59  ;;  %v11976_v25 = vor.u32 %v16599_v15, %v11975_v13  ;;  %v12479_v29 = vld [vmem:[#allocation5 + $0x908] sm:$0xf]  ;;  %v16554_v41 = vld [vmem:[#allocation5 + $0x3fc] sm:$0xf] }
  0x79   :  { %5557 = vmatpush.bf16.msra.mxu1 %v13340_v4  ;;  %v14204_v4 = vor.u32 %v17147_v54, %v14201_v55  ;;  %v13560_v12 = vor.u32 %v16995_v3, %v13559_v2  ;;  %v12695_v54 = vld [vmem:[#allocation5 + $0xab8] sm:$0xf]  ;;  %v16779_v55 = vld [vmem:[#allocation5 + $0xafc] sm:$0xf0]  ;;  %v16617_v2 = vld [vmem:[#allocation5 + $0x5ec] sm:$0xf0] }
  0x7a   :  { %5571 = vmatpush.bf16.msra.mxu2 %v13916_v5  ;;  %v11832_v5 = vor.u32 %v16563_v58, %v11831_v56  ;;  %v13271_v56 = vld [vmem:[#allocation5 + $0xf38] sm:$0xf]  ;;  %v16923_v58 = vld [vmem:[#allocation5 + $0xf7c] sm:$0xf0]  ;;  %v12696_v61 = vor.u32 %v16779_v55, %v12695_v54  ;;  %v12623_v3 = vld [vmem:[#allocation5 + $0xa28] sm:$0xf] }
  0x7b   :  { %5585 = vmatpush.bf16.msra.mxu3 %v14492_v10  ;;  %v16545_v10 = vld [vmem:[#allocation5 + $0x3ac] sm:$0xf0]  ;;  %v13919_v13 = vld [vmem:[#allocation5 + $0x1448] sm:$0xf]  ;;  %vm7103_vm0 = vcmask 1043456   ;;  %vm6970_vm1 = vcmask 523264  }
  0x7c   :  { %5544 = vmatpush.bf16.msra.mxu0 %v12692_v16  ;;  %v13487_v16 = vld [vmem:[#allocation5 + $0x10e8] sm:$0xf]  ;;  %v17265_v55 = vld [vmem:[#allocation5 + $0x1a2c] sm:$0xf0]  ;;  %vm7047_vm2 = vcmask 64512   ;;  %vm7595_vm4 = vcmask 1041409  }
  0x7d   :  { %5558 = vmatpush.bf16.msra.mxu1 %v13268_v17  ;;  %v16977_v17 = vld [vmem:[#allocation5 + $0x112c] sm:$0xf0]  ;;  %v14495_v15 = vld [vmem:[#allocation5 + $0x18c8] sm:$0xf]  ;;  %s18018_s6 = smov [#allocation17]   ;;  %s11279_s12 = sshll.u32 %s19094_s9, 4  ;;  %s11280_s12 = int_to_ptr.hbm [resolvable:$true] %s11279_s12 }
  0x7e   :  { %5572 = vmatpush.bf16.msra.mxu2 %v13844_v18  ;;  %v11760_v18 = vor.u32 %v16545_v10, %v11759_v9  ;;  %v13488_v26 = vor.u32 %v16977_v17, %v13487_v16  ;;  %v12551_v16 = vld [vmem:[#allocation5 + $0x998] sm:$0xf]  ;;  %v16743_v17 = vld [vmem:[#allocation5 + $0x9dc] sm:$0xf0]  ;;  %s11277_s8 = sshll.u32 %s18018_s6, 4  ;;  %s11278_s8 = int_to_ptr.vmem [resolvable:$true] %s11277_s8 }
  0x7f   :  { %5586 = vmatpush.bf16.msra.mxu3 %v14420_v24  ;;  %v16527_v24 = vld [vmem:[#allocation5 + $0x31c] sm:$0xf0] }
  0x80   :  { %5545 = vmatpush.bf16.msra.mxu0 %v12620_v30  ;;  %v13415_v30 = vld [vmem:[#allocation5 + $0x1058] sm:$0xf] }
  0x81   :  { %5559 = vmatpush.bf16.msra.mxu1 %v13196_v31  ;;  %v16959_v31 = vld [vmem:[#allocation5 + $0x109c] sm:$0xf0] }
  0x82   :  { %5573 = vmatpush.bf16.msra.mxu2 %v13772_v32  ;;  %v11688_v32 = vor.u32 %v16527_v24, %v11687_v21  ;;  %v13416_v40 = vor.u32 %v16959_v31, %v13415_v30  ;;  %v11327_v21 = vld [vmem:[#allocation5 + $0x8] sm:$0xf]  ;;  %v16437_v24 = vld [vmem:[#allocation5 + $0x4c] sm:$0xf0] }
  0x83   :  { %5587 = vmatpush.bf16.msra.mxu3 %v14348_v37  ;;  %v16509_v37 = vld [vmem:[#allocation5 + $0x28c] sm:$0xf0]  ;;  %v11328_v38 = vor.u32 %v16437_v24, %v11327_v21  ;;  %v12193_v21 = vld [vmem:[#allocation5 + $0x710] sm:$0xf0] }
  0x84   :  { %5546 = vmatpush.bf16.msra.mxu0 %v12548_v44  ;;  %v13343_v44 = vld [vmem:[#allocation5 + $0xfc8] sm:$0xf]  ;;  %v11616_v46 = vor.u32 %v16509_v37, %v11615_v36  ;;  %v16725_v31 = vld [vmem:[#allocation5 + $0x94c] sm:$0xf0]  ;;  %v17139_v36 = vld [vmem:[#allocation5 + $0x163c] sm:$0xf0] }
  0x85   :  { %5560 = vmatpush.bf16.msra.mxu1 %v13124_v48  ;;  %v12768_v48 = vor.u32 %v16797_v43, %v12767_v42  ;;  %v13344_v52 = vor.u32 %v16941_v45, %v13343_v44  ;;  %v14711_v37 = vld [vmem:[#allocation5 + $0x1a78] sm:$0xf]  ;;  %v11833_v42 = vld [vmem:[#allocation5 + $0x440] sm:$0xf0]  ;;  %v11904_v43 = vor.u32 %v16581_v28, %v11903_v27  ;;  %v12480_v44 = vor.u32 %v16725_v31, %v12479_v29  ;;  %v16698_v45 = vld [vmem:[#allocation5 + $0x87c] sm:$0xf] }
  0x86   :  { %5574 = vmatpush.bf16.msra.mxu2 %v13700_v49  ;;  %v11543_v49 = vld [vmem:[#allocation5 + $0x1b8] sm:$0xf]  ;;  %v17067_v28 = vld [vmem:[#allocation5 + $0x13fc] sm:$0xf0] }
  0x87   :  { %5588 = vmatpush.bf16.msra.mxu3 %v14276_v53  ;;  %v16635_v53 = vld [vmem:[#allocation5 + $0x67c] sm:$0xf0]  ;;  %v11544_v59 = vor.u32 %v16491_v50, %v11543_v49  ;;  %v11836_v50 = vor.u32 %v16554_v41, %v11833_v42  ;;  %v13847_v27 = vld [vmem:[#allocation5 + $0x13b8] sm:$0xf]  ;;  %v13775_v41 = vld [vmem:[#allocation5 + $0x1328] sm:$0xf] }
  0x88   :  { %5547 = vmatpush.bf16.msra.mxu0 %v12476_v60  ;;  %v12120_v60 = vor.u32 %v16635_v53, %v12119_v51  ;;  %v14063_v51 = vld [vmem:[#allocation5 + $0x1568] sm:$0xf]  ;;  %v14423_v29 = vld [vmem:[#allocation5 + $0x1838] sm:$0xf]  ;;  %v17211_v31 = vld [vmem:[#allocation5 + $0x187c] sm:$0xf0] }
  0x89   :  { %5561 = vmatpush.bf16.msra.mxu1 %v13052_v0  ;;  %v12047_v0 = vld [vmem:[#allocation5 + $0x5a8] sm:$0xf]  ;;  %v17049_v42 = vld [vmem:[#allocation5 + $0x136c] sm:$0xf0] }
  0x8a   :  { %5575 = vmatpush.bf16.msra.mxu2 %v13628_v1  ;;  %v13272_v1 = vor.u32 %v16923_v58, %v13271_v56  ;;  %v12048_v9 = vor.u32 %v16617_v2, %v12047_v0  ;;  %v14639_v53 = vld [vmem:[#allocation5 + $0x19e8] sm:$0xf]  ;;  %v16536_v56 = vld [vmem:[#allocation5 + $0x36c] sm:$0xf]  ;;  %v11761_v58 = vld [vmem:[#allocation5 + $0x3b0] sm:$0xf0] }
  0x8b   :  { %5589 = vmatpush.bf16.msra.mxu3 %v14204_v4  ;;  %5548 = vmatmul.bf16.vlgmr.msra.gmra.mxu0 %v18104_v22  ;;  %v16761_v4 = vld [vmem:[#allocation5 + $0xa6c] sm:$0xf0]  ;;  %v13991_v0 = vld [vmem:[#allocation5 + $0x14d8] sm:$0xf] }
  0x8c   :  { %5596 = vmatpush.bf16.msrb.mxu0 %v11832_v5  ;;  %5562 = vmatmul.bf16.vlgmr.msra.gmra.mxu1 %v18106_v23  ;;  %v13199_v5 = vld [vmem:[#allocation5 + $0xea8] sm:$0xf]  ;;  %v12624_v10 = vor.u32 %v16761_v4, %v12623_v3  ;;  %v14567_v2 = vld [vmem:[#allocation5 + $0x1958] sm:$0xf]  ;;  %v17247_v4 = vld [vmem:[#allocation5 + $0x199c] sm:$0xf0] }
  0x8d   :  { %5610 = vmatpush.bf16.msrb.mxu1 %v12408_v7  ;;  %5576 = vmatmul.bf16.vlgmr.msra.gmra.mxu2 %v18110_v35  ;;  %v16905_v7 = vld [vmem:[#allocation5 + $0xeec] sm:$0xf0] }
  0x8e   :  { %5624 = vmatpush.bf16.msrb.mxu2 %v12984_v8  ;;  %5590 = vmatmul.bf16.vlgmr.msra.gmra.mxu3 %v18112_v39  ;;  %v11472_v8 = vor.u32 %v16473_v63, %v11471_v62  ;;  %v13200_v14 = vor.u32 %v16905_v7, %v13199_v5  ;;  %v14640_v62 = vor.u32 %v17265_v55, %v14639_v53  ;;  %v16518_v5 = vld [vmem:[#allocation5 + $0x2dc] sm:$0xf]  ;;  %v11689_v7 = vld [vmem:[#allocation5 + $0x320] sm:$0xf0]  ;;  %v13703_v53 = vld [vmem:[#allocation5 + $0x1298] sm:$0xf] }
  0x8f   :  { %5638 = vmatpush.bf16.msrb.mxu3 %v13560_v12  ;;  %v16455_v12 = vld [vmem:[#allocation5 + $0xdc] sm:$0xf0]  ;;  %v11764_v63 = vor.u32 %v16536_v56, %v11761_v58  ;;  %v14279_v55 = vld [vmem:[#allocation5 + $0x1718] sm:$0xf] }
  0x90   :  { %5597 = vmatpush.bf16.msrb.mxu0 %v11760_v18  ;;  %v13127_v18 = vld [vmem:[#allocation5 + $0xe18] sm:$0xf]  ;;  %v17175_v58 = vld [vmem:[#allocation5 + $0x175c] sm:$0xf0] }
  0x91   :  { %5611 = vmatpush.bf16.msrb.mxu1 %v12336_v19  ;;  %v16887_v19 = vld [vmem:[#allocation5 + $0xe5c] sm:$0xf0] }
  0x92   :  { %5625 = vmatpush.bf16.msrb.mxu2 %v12912_v20  ;;  %v11400_v20 = vor.u32 %v16455_v12, %v11399_v11  ;;  %v13128_v30 = vor.u32 %v16887_v19, %v13127_v18  ;;  %v14568_v11 = vor.u32 %v17247_v4, %v14567_v2  ;;  %v11692_v12 = vor.u32 %v16518_v5, %v11689_v7  ;;  %v16500_v18 = vld [vmem:[#allocation5 + $0x24c] sm:$0xf]  ;;  %v11617_v19 = vld [vmem:[#allocation5 + $0x290] sm:$0xf0]  ;;  %v14207_v4 = vld [vmem:[#allocation5 + $0x1688] sm:$0xf] }
  0x93   :  { %5639 = vmatpush.bf16.msrb.mxu3 %v13488_v26  ;;  %v12552_v26 = vor.u32 %v16743_v17, %v12551_v16  ;;  %v17229_v17 = vld [vmem:[#allocation5 + $0x190c] sm:$0xf0]  ;;  %v14280_v2 = vor.u32 %v17175_v58, %v14279_v55  ;;  %v16428_v7 = vld [vmem:[#allocation5 + $0xc] sm:$0xf] }
  0x94   :  { %5598 = vmatpush.bf16.msrb.mxu0 %v11688_v32  ;;  %v13055_v32 = vld [vmem:[#allocation5 + $0xd88] sm:$0xf]  ;;  %v17157_v5 = vld [vmem:[#allocation5 + $0x16cc] sm:$0xf0]  ;;  %v16788_v58 = vld [vmem:[#allocation5 + $0xb4c] sm:$0xf] }
  0x95   :  { %5612 = vmatpush.bf16.msrb.mxu1 %v12264_v33  ;;  %v16869_v33 = vld [vmem:[#allocation5 + $0xdcc] sm:$0xf0] }
  0x96   :  { %5626 = vmatpush.bf16.msrb.mxu2 %v12840_v34  ;;  %v14135_v34 = vld [vmem:[#allocation5 + $0x15f8] sm:$0xf] }
  0x97   :  { %5640 = vmatpush.bf16.msrb.mxu3 %v13416_v40  ;;  %v17283_v40 = vld [vmem:[#allocation5 + $0x1abc] sm:$0xf0] }
  0x98   :  { %5599 = vmatpush.bf16.msrb.mxu0 %v11616_v46  ;;  %v12409_v46 = vld [vmem:[#allocation5 + $0x8c0] sm:$0xf0]  ;;  %v14712_v49 = vor.u32 %v17283_v40, %v14711_v37  ;;  %v13848_v37 = vor.u32 %v17067_v28, %v13847_v27 }
  0x99   :  { %5613 = vmatpush.bf16.msrb.mxu1 %v12192_v47  ;;  %v13056_v47 = vor.u32 %v16869_v33, %v13055_v32  ;;  %v12412_v54 = vor.u32 %v16698_v45, %v12409_v46  ;;  %v16482_v32 = vld [vmem:[#allocation5 + $0x1bc] sm:$0xf]  ;;  %v11545_v33 = vld [vmem:[#allocation5 + $0x200] sm:$0xf0]  ;;  %v17193_v45 = vld [vmem:[#allocation5 + $0x17ec] sm:$0xf0] }
  0x9a   :  { %5627 = vmatpush.bf16.msrb.mxu2 %v12768_v48  ;;  %v14136_v48 = vor.u32 %v17139_v36, %v14135_v34  ;;  %v16626_v34 = vld [vmem:[#allocation5 + $0x63c] sm:$0xf]  ;;  %v12121_v36 = vld [vmem:[#allocation5 + $0x680] sm:$0xf0]  ;;  %v11548_v40 = vor.u32 %v16482_v32, %v11545_v33  ;;  %v16464_v46 = vld [vmem:[#allocation5 + $0x12c] sm:$0xf] }
  0x9b   :  { %5641 = vmatpush.bf16.msrb.mxu3 %v13344_v52  ;;  %v17121_v52 = vld [vmem:[#allocation5 + $0x15ac] sm:$0xf0]  ;;  %v13489_v33 = vld [vmem:[#allocation5 + $0x1130] sm:$0xf0] }
  0x9c   :  { %5600 = vmatpush.bf16.msrb.mxu0 %v11544_v59  ;;  %v16680_v59 = vld [vmem:[#allocation5 + $0x7ec] sm:$0xf] }
  0x9d   :  { %5614 = vmatpush.bf16.msrb.mxu1 %v12120_v60  ;;  %v12337_v60 = vld [vmem:[#allocation5 + $0x830] sm:$0xf0] }
  0x9e   :  { %5628 = vmatpush.bf16.msrb.mxu2 %v12696_v61  ;;  %v14064_v61 = vor.u32 %v17121_v52, %v14063_v51  ;;  %v12340_v3 = vor.u32 %v16680_v59, %v12337_v60  ;;  %v16446_v59 = vld [vmem:[#allocation5 + $0x9c] sm:$0xf]  ;;  %v11401_v60 = vld [vmem:[#allocation5 + $0xe0] sm:$0xf0] }
  0x9f   :  { %5642 = vmatpush.bf16.msrb.mxu3 %v13272_v1  ;;  %v17103_v1 = vld [vmem:[#allocation5 + $0x151c] sm:$0xf0] }
  0xa0   :  { %5601 = vmatpush.bf16.msrb.mxu0 %v11472_v8  ;;  %v16662_v8 = vld [vmem:[#allocation5 + $0x75c] sm:$0xf] }
  0xa1   :  { %5615 = vmatpush.bf16.msrb.mxu1 %v12048_v9  ;;  %v12265_v9 = vld [vmem:[#allocation5 + $0x7a0] sm:$0xf0] }
  0xa2   :  { %5629 = vmatpush.bf16.msrb.mxu2 %v12624_v10  ;;  %v13992_v10 = vor.u32 %v17103_v1, %v13991_v0  ;;  %v12268_v16 = vor.u32 %v16662_v8, %v12265_v9  ;;  %v13631_v0 = vld [vmem:[#allocation5 + $0x1208] sm:$0xf]  ;;  %v17013_v1 = vld [vmem:[#allocation5 + $0x124c] sm:$0xf0]  ;;  %v11329_v9 = vld [vmem:[#allocation5 + $0x50] sm:$0xf0] }
  0xa3   :  { %5643 = vmatpush.bf16.msrb.mxu3 %v13200_v14  ;;  %v17085_v14 = vld [vmem:[#allocation5 + $0x148c] sm:$0xf0] }
  0xa4   :  { %5602 = vmatpush.bf16.msrb.mxu0 %v11400_v20  ;;  %v16644_v20 = vld [vmem:[#allocation5 + $0x6cc] sm:$0xf]  ;;  %v13920_v24 = vor.u32 %v17085_v14, %v13919_v13  ;;  %v12985_v13 = vld [vmem:[#allocation5 + $0xd40] sm:$0xf0]  ;;  %v16986_v14 = vld [vmem:[#allocation5 + $0x117c] sm:$0xf] }
  0xa5   :  { %5616 = vmatpush.bf16.msrb.mxu1 %v11976_v25  ;;  %v14496_v25 = vor.u32 %v17229_v17, %v14495_v15  ;;  %v13632_v15 = vor.u32 %v17013_v1, %v13631_v0  ;;  %v17130_v17 = vld [vmem:[#allocation5 + $0x15fc] sm:$0xf]  ;;  %v13921_v0 = vld [vmem:[#allocation5 + $0x1490] sm:$0xf0]  ;;  %v17220_v1 = vld [vmem:[#allocation5 + $0x18cc] sm:$0xf] }
  0xa6   :  { %5630 = vmatpush.bf16.msrb.mxu2 %v12552_v26  ;;  %v11620_v26 = vor.u32 %v16500_v18, %v11617_v19  ;;  %v14137_v18 = vld [vmem:[#allocation5 + $0x1640] sm:$0xf0]  ;;  %v14208_v19 = vor.u32 %v17157_v5, %v14207_v4 }
  0xa7   :  { %5644 = vmatpush.bf16.msrb.mxu3 %v13128_v30  ;;  %v12196_v30 = vor.u32 %v16644_v20, %v12193_v21  ;;  %v11332_v20 = vor.u32 %v16428_v7, %v11329_v9  ;;  %v17274_v21 = vld [vmem:[#allocation5 + $0x1a7c] sm:$0xf]  ;;  %v14140_v28 = vor.u32 %v17130_v17, %v14137_v18  ;;  %v14425_v17 = vld [vmem:[#allocation5 + $0x1880] sm:$0xf0] }
  0xa8   :  { %5603 = vmatpush.bf16.msrb.mxu0 %v11328_v38  ;;  %v14424_v38 = vor.u32 %v17211_v31, %v14423_v29  ;;  %v16824_v29 = vld [vmem:[#allocation5 + $0xc6c] sm:$0xf]  ;;  %v16770_v9 = vld [vmem:[#allocation5 + $0xabc] sm:$0xf] }
  0xa9   :  { %5617 = vmatpush.bf16.msrb.mxu1 %v11904_v43  ;;  %v14351_v43 = vld [vmem:[#allocation5 + $0x17a8] sm:$0xf]  ;;  %v16968_v31 = vld [vmem:[#allocation5 + $0x10ec] sm:$0xf] }
  0xaa   :  { %5631 = vmatpush.bf16.msrb.mxu2 %v12480_v44  ;;  %v12124_v44 = vor.u32 %v16626_v34, %v12121_v36  ;;  %v14352_v51 = vor.u32 %v17193_v45, %v14351_v43  ;;  %v17112_v34 = vld [vmem:[#allocation5 + $0x156c] sm:$0xf]  ;;  %v14065_v36 = vld [vmem:[#allocation5 + $0x15b0] sm:$0xf0]  ;;  %v16950_v45 = vld [vmem:[#allocation5 + $0x105c] sm:$0xf] }
  0xab   :  { %5645 = vmatpush.bf16.msrb.mxu3 %v13056_v47  ;;  %5604 = vmatmul.bf16.vlgmr.msrb.gmra.mxu0 %v18098_v57  ;;  %v11473_v47 = vld [vmem:[#allocation5 + $0x170] sm:$0xf0]  ;;  %v14068_v43 = vor.u32 %v17112_v34, %v14065_v36 }
  0xac   :  { %5652 = vmatpush.bf16.msra.mxu0 %v14136_v48  ;;  %5618 = vmatmul.bf16.vlgmr.msrb.gmra.mxu1 %v18101_v6  ;;  %v16608_v48 = vld [vmem:[#allocation5 + $0x5ac] sm:$0xf]  ;;  %v11476_v52 = vor.u32 %v16464_v46, %v11473_v47  ;;  %v18126_v46 = vld [vmem:[#allocation7] sm:$0xff] }
  0xad   :  { %5666 = vmatpush.bf16.msra.mxu1 %v14712_v49  ;;  %5632 = vmatmul.bf16.vlgmr.msrb.gmra.mxu2 %v18104_v22  ;;  %v12049_v49 = vld [vmem:[#allocation5 + $0x5f0] sm:$0xf0] }
  0xae   :  { %5680 = vmatpush.bf16.msra.mxu2 %v11836_v50  ;;  %5646 = vmatmul.bf16.vlgmr.msrb.gmra.mxu3 %v18106_v23  ;;  %v13776_v50 = vor.u32 %v17049_v42, %v13775_v41  ;;  %v12052_v56 = vor.u32 %v16608_v48, %v12049_v49  ;;  %v16806_v41 = vld [vmem:[#allocation5 + $0xbdc] sm:$0xf]  ;;  %v13492_v42 = vor.u32 %v16968_v31, %v13489_v33  ;;  %v13417_v48 = vld [vmem:[#allocation5 + $0x10a0] sm:$0xf0]  ;;  %v13777_v31 = vld [vmem:[#allocation5 + $0x1370] sm:$0xf0] }
  0xaf   :  { %5694 = vmatpush.bf16.msra.mxu3 %v12412_v54  ;;  %v17031_v54 = vld [vmem:[#allocation5 + $0x12dc] sm:$0xf0]  ;;  %v17094_v49 = vld [vmem:[#allocation5 + $0x14dc] sm:$0xf]  ;;  %v13420_v55 = vor.u32 %v16950_v45, %v13417_v48  ;;  %v14353_v33 = vld [vmem:[#allocation5 + $0x17f0] sm:$0xf0] }
  0xb0   :  { %5653 = vmatpush.bf16.msra.mxu0 %v14064_v61  ;;  %v16590_v61 = vld [vmem:[#allocation5 + $0x51c] sm:$0xf]  ;;  %v13705_v45 = vld [vmem:[#allocation5 + $0x12e0] sm:$0xf0] }
  0xb1   :  { %5667 = vmatpush.bf16.msra.mxu1 %v14640_v62  ;;  %v11977_v62 = vld [vmem:[#allocation5 + $0x560] sm:$0xf0] }
  0xb2   :  { %5681 = vmatpush.bf16.msra.mxu2 %v11764_v63  ;;  %v13704_v63 = vor.u32 %v17031_v54, %v13703_v53  ;;  %v11980_v8 = vor.u32 %v16590_v61, %v11977_v62  ;;  %v1042_v54 = vperm.slane %v18126_v46, 0  ;;  %v13345_v62 = vld [vmem:[#allocation5 + $0x1010] sm:$0xf0]  ;;  %v14281_v48 = vld [vmem:[#allocation5 + $0x1760] sm:$0xf0] }
  0xb3   :  { %5695 = vmatpush.bf16.msra.mxu3 %v12340_v3  ;;  %v11404_v3 = vor.u32 %v16446_v59, %v11401_v60  ;;  %v12769_v59 = vld [vmem:[#allocation5 + $0xb90] sm:$0xf0]  ;;  %v16932_v60 = vld [vmem:[#allocation5 + $0xfcc] sm:$0xf] }
  0xb4   :  { %5654 = vmatpush.bf16.msra.mxu0 %v13992_v10  ;;  %v16572_v10 = vld [vmem:[#allocation5 + $0x48c] sm:$0xf]  ;;  %v12772_v4 = vor.u32 %v16788_v58, %v12769_v59  ;;  %v13348_v7 = vor.u32 %v16932_v60, %v13345_v62 }
  0xb5   :  { %5668 = vmatpush.bf16.msra.mxu1 %v14568_v11  ;;  %v11905_v11 = vld [vmem:[#allocation5 + $0x4d0] sm:$0xf0]  ;;  %v17004_v58 = vld [vmem:[#allocation5 + $0x120c] sm:$0xf] }
  0xb6   :  { %5682 = vmatpush.bf16.msra.mxu2 %v11692_v12  ;;  %v16842_v12 = vld [vmem:[#allocation5 + $0xcfc] sm:$0xf]  ;;  %v17148_v62 = vld [vmem:[#allocation5 + $0x168c] sm:$0xf] }
  0xb7   :  { %5696 = vmatpush.bf16.msra.mxu3 %v12268_v16  ;;  %v13561_v16 = vld [vmem:[#allocation5 + $0x11c0] sm:$0xf0] }
  0xb8   :  { %5655 = vmatpush.bf16.msra.mxu0 %v13920_v24  ;;  %v14713_v24 = vld [vmem:[#allocation5 + $0x1ac0] sm:$0xf0]  ;;  %v13564_v27 = vor.u32 %v16986_v14, %v13561_v16  ;;  %v17058_v14 = vld [vmem:[#allocation5 + $0x13bc] sm:$0xf] }
  0xb9   :  { %5669 = vmatpush.bf16.msra.mxu1 %v14496_v25  ;;  %v11908_v25 = vor.u32 %v16572_v10, %v11905_v11  ;;  %v14716_v32 = vor.u32 %v17274_v21, %v14713_v24  ;;  %v12697_v10 = vld [vmem:[#allocation5 + $0xb00] sm:$0xf0]  ;;  %v16914_v11 = vld [vmem:[#allocation5 + $0xf3c] sm:$0xf] }
  0xba   :  { %5683 = vmatpush.bf16.msra.mxu2 %v11620_v26  ;;  %v12988_v26 = vor.u32 %v16842_v12, %v12985_v13  ;;  %v13273_v13 = vld [vmem:[#allocation5 + $0xf80] sm:$0xf0]  ;;  %v17202_v16 = vld [vmem:[#allocation5 + $0x183c] sm:$0xf] }
  0xbb   :  { %5697 = vmatpush.bf16.msra.mxu3 %v12196_v30  ;;  %v12913_v30 = vld [vmem:[#allocation5 + $0xcb0] sm:$0xf0]  ;;  %v13276_v21 = vor.u32 %v16914_v11, %v13273_v13  ;;  %v13567_v13 = vld [vmem:[#allocation5 + $0x1180] sm:$0xf] }
  0xbc   :  { %5656 = vmatpush.bf16.msra.mxu0 %v13848_v37  ;;  %v17256_v37 = vld [vmem:[#allocation5 + $0x19ec] sm:$0xf] }
  0xbd   :  { %5670 = vmatpush.bf16.msra.mxu1 %v14424_v38  ;;  %v14641_v38 = vld [vmem:[#allocation5 + $0x1a30] sm:$0xf0] }
  0xbe   :  { %5684 = vmatpush.bf16.msra.mxu2 %v11548_v40  ;;  %v12916_v40 = vor.u32 %v16824_v29, %v12913_v30  ;;  %v14644_v47 = vor.u32 %v17256_v37, %v14641_v38  ;;  %v13201_v29 = vld [vmem:[#allocation5 + $0xef0] sm:$0xf0]  ;;  %v17040_v30 = vld [vmem:[#allocation5 + $0x132c] sm:$0xf]  ;;  %v16734_v38 = vld [vmem:[#allocation5 + $0x99c] sm:$0xf] }
  0xbf   :  { %5698 = vmatpush.bf16.msra.mxu3 %v12124_v44  ;;  %v12841_v44 = vld [vmem:[#allocation5 + $0xc20] sm:$0xf0]  ;;  %v13780_v37 = vor.u32 %v17040_v30, %v13777_v31  ;;  %v16978_v30 = vld [vmem:[#allocation5 + $0x1134] sm:$0xf0] }
  0xc0   :  { %5657 = vmatpush.bf16.msra.mxu0 %v13776_v50  ;;  %v13993_v50 = vld [vmem:[#allocation5 + $0x1520] sm:$0xf0]  ;;  %v12844_v53 = vor.u32 %v16806_v41, %v12841_v44  ;;  %v16878_v41 = vld [vmem:[#allocation5 + $0xe1c] sm:$0xf] }
  0xc1   :  { %5671 = vmatpush.bf16.msra.mxu1 %v14352_v51  ;;  %v17238_v51 = vld [vmem:[#allocation5 + $0x195c] sm:$0xf] }
  0xc2   :  { %5685 = vmatpush.bf16.msra.mxu2 %v11476_v52  ;;  %v14569_v52 = vld [vmem:[#allocation5 + $0x19a0] sm:$0xf0]  ;;  %v17022_v44 = vld [vmem:[#allocation5 + $0x129c] sm:$0xf] }
  0xc3   :  { %5699 = vmatpush.bf16.msra.mxu3 %v12052_v56  ;;  %v13996_v56 = vor.u32 %v17094_v49, %v13993_v50  ;;  %v14572_v61 = vor.u32 %v17238_v51, %v14569_v52  ;;  %v16716_v50 = vld [vmem:[#allocation5 + $0x90c] sm:$0xf]  ;;  %v12481_v51 = vld [vmem:[#allocation5 + $0x950] sm:$0xf0] }
  0xc4   :  { %5658 = vmatpush.bf16.msra.mxu0 %v13704_v63  ;;  %v17076_v63 = vld [vmem:[#allocation5 + $0x144c] sm:$0xf] }
  0xc5   :  { %5672 = vmatpush.bf16.msra.mxu1 %v14280_v2  ;;  %v14497_v2 = vld [vmem:[#allocation5 + $0x1910] sm:$0xf0] }
  0xc6   :  { %5686 = vmatpush.bf16.msra.mxu2 %v11404_v3  ;;  %v14500_v12 = vor.u32 %v17220_v1, %v14497_v2  ;;  %v11839_v1 = vld [vmem:[#allocation5 + $0x400] sm:$0xf]  ;;  %v16564_v2 = vld [vmem:[#allocation5 + $0x444] sm:$0xf0] }
  0xc7   :  { %5700 = vmatpush.bf16.msra.mxu3 %v11980_v8  ;;  %v13924_v8 = vor.u32 %v17076_v63, %v13921_v0  ;;  %v14209_v63 = vld [vmem:[#allocation5 + $0x16d0] sm:$0xf0] }
  0xc8   :  { %5659 = vmatpush.bf16.msra.mxu0 %v13632_v15  ;;  %v5437_v3 = vpop.f32.mrf.mxu0  ;;  %v13849_v15 = vld [vmem:[#allocation5 + $0x1400] sm:$0xf0] }
  0xc9   :  { %5673 = vmatpush.bf16.msra.mxu1 %v14208_v19  ;;  %v5438_v5 = vadd.f32 %v5437_v3, %v1042_v54  ;;  %v5451_v18 = vpop.f32.mrf.mxu1  ;;  %v12700_v19 = vor.u32 %v16770_v9, %v12697_v10  ;;  %v13852_v24 = vor.u32 %v17058_v14, %v13849_v15  ;;  %v12415_v3 = vld [vmem:[#allocation5 + $0x880] sm:$0xf]  ;;  %v16852_v9 = vld [vmem:[#allocation5 + $0xd44] sm:$0xf0]  ;;  %v14212_v15 = vor.u32 %v17148_v62, %v14209_v63  ;;  %v16942_v62 = vld [vmem:[#allocation5 + $0x1014] sm:$0xf0] }
  0xca   :  { %5687 = vmatpush.bf16.msra.mxu2 %v11332_v20  ;;  %v16996_v14 = vld [vmem:[#allocation5 + $0x11c4] sm:$0xf0] }
  0xcb   :  { %5701 = vmatpush.bf16.msra.mxu3 %v11908_v25  ;;  %5660 = vmatmul.bf16.vlgmr.msra.gmra.mxu0 %v18110_v35  ;;  %v5452_v20 = vadd.f32 %v5451_v18, %v5438_v5  ;;  %v16752_v25 = vld [vmem:[#allocation5 + $0xa2c] sm:$0xf]  ;;  %v12484_v5 = vor.u32 %v16716_v50, %v12481_v51  ;;  %v11623_v50 = vld [vmem:[#allocation5 + $0x250] sm:$0xf]  ;;  %v16510_v51 = vld [vmem:[#allocation5 + $0x294] sm:$0xf0] }
  0xcc   :  { %5708 = vmatpush.bf16.msrb.mxu0 %v12988_v26  ;;  %5674 = vmatmul.bf16.vlgmr.msra.gmra.mxu1 %v18112_v39  ;;  %v12625_v26 = vld [vmem:[#allocation5 + $0xa70] sm:$0xf0] }
  0xcd   :  { %5722 = vmatpush.bf16.msrb.mxu1 %v13564_v27  ;;  %5688 = vmatmul.bf16.vlgmr.msra.gmra.mxu2 %v18098_v57  ;;  %v16896_v27 = vld [vmem:[#allocation5 + $0xeac] sm:$0xf]  ;;  %v12628_v34 = vor.u32 %v16752_v25, %v12625_v26  ;;  %v13568_v25 = vor.u32 %v16996_v14, %v13567_v13  ;;  %v16690_v26 = vld [vmem:[#allocation5 + $0x834] sm:$0xf0]  ;;  %v12703_v13 = vld [vmem:[#allocation5 + $0xac0] sm:$0xf] }
  0xce   :  { %5736 = vmatpush.bf16.msrb.mxu2 %v14140_v28  ;;  %5702 = vmatmul.bf16.vlgmr.msra.gmra.mxu3 %v18101_v6  ;;  %v14428_v28 = vor.u32 %v17202_v16, %v14425_v17  ;;  %v13204_v36 = vor.u32 %v16896_v27, %v13201_v29  ;;  %v11840_v16 = vor.u32 %v16564_v2, %v11839_v1  ;;  %v12919_v27 = vld [vmem:[#allocation5 + $0xc70] sm:$0xf]  ;;  %v16780_v14 = vld [vmem:[#allocation5 + $0xb04] sm:$0xf0] }
  0xcf   :  { %5750 = vmatpush.bf16.msrb.mxu3 %v14716_v32  ;;  %v17184_v32 = vld [vmem:[#allocation5 + $0x17ac] sm:$0xf]  ;;  %v13495_v29 = vld [vmem:[#allocation5 + $0x10f0] sm:$0xf] }
  0xd0   :  { %5709 = vmatpush.bf16.msrb.mxu0 %v12916_v40  ;;  %v12553_v40 = vld [vmem:[#allocation5 + $0x9e0] sm:$0xf0]  ;;  %v5465_v59 = vpop.f32.mrf.mxu2 }
  0xd1   :  { %5723 = vmatpush.bf16.msrb.mxu1 %v13492_v42  ;;  %v14356_v42 = vor.u32 %v17184_v32, %v14353_v33  ;;  %v12556_v49 = vor.u32 %v16734_v38, %v12553_v40  ;;  %v5466_v0 = vadd.f32 %v5465_v59, %v5452_v20  ;;  %v11767_v20 = vld [vmem:[#allocation5 + $0x370] sm:$0xf]  ;;  %v18139_v31 = vpop.f32.mrf.mxu1  ;;  %v12271_v38 = vld [vmem:[#allocation5 + $0x760] sm:$0xf]  ;;  %v13496_v40 = vor.u32 %v16978_v30, %v13495_v29  ;;  %v16762_v29 = vld [vmem:[#allocation5 + $0xa74] sm:$0xf0] }
  0xd2   :  { %5737 = vmatpush.bf16.msrb.mxu2 %v14068_v43  ;;  %v13129_v43 = vld [vmem:[#allocation5 + $0xe60] sm:$0xf0] }
  0xd3   :  { %5751 = vmatpush.bf16.msrb.mxu3 %v14644_v47  ;;  %v17166_v47 = vld [vmem:[#allocation5 + $0x171c] sm:$0xf]  ;;  %v13132_v52 = vor.u32 %v16878_v41, %v13129_v43  ;;  %v16672_v41 = vld [vmem:[#allocation5 + $0x7a4] sm:$0xf0] }
  0xd4   :  { %5710 = vmatpush.bf16.msrb.mxu0 %v12844_v53  ;;  %v13708_v53 = vor.u32 %v17022_v44, %v13705_v45  ;;  %v14284_v60 = vor.u32 %v17166_v47, %v14281_v48  ;;  %v16816_v43 = vld [vmem:[#allocation5 + $0xc24] sm:$0xf0]  ;;  %v13423_v44 = vld [vmem:[#allocation5 + $0x1060] sm:$0xf]  ;;  %v12272_v48 = vor.u32 %v16672_v41, %v12271_v38 }
  0xd5   :  { %5724 = vmatpush.bf16.msrb.mxu1 %v13420_v55  ;;  %v16860_v55 = vld [vmem:[#allocation5 + $0xd8c] sm:$0xf]  ;;  %v16960_v45 = vld [vmem:[#allocation5 + $0x10a4] sm:$0xf0]  ;;  %v11407_v41 = vld [vmem:[#allocation5 + $0xa0] sm:$0xf] }
  0xd6   :  { %5738 = vmatpush.bf16.msrb.mxu2 %v13996_v56  ;;  %v13057_v56 = vld [vmem:[#allocation5 + $0xdd0] sm:$0xf0] }
  0xd7   :  { %5752 = vmatpush.bf16.msrb.mxu3 %v14572_v61  ;;  %v13633_v61 = vld [vmem:[#allocation5 + $0x1250] sm:$0xf0]  ;;  %v13060_v11 = vor.u32 %v16860_v55, %v13057_v56  ;;  %v16654_v55 = vld [vmem:[#allocation5 + $0x714] sm:$0xf0]  ;;  %v12775_v56 = vld [vmem:[#allocation5 + $0xb50] sm:$0xf] }
  0xd8   :  { %5711 = vmatpush.bf16.msrb.mxu0 %v12772_v4  ;;  %v5479_v4 = vpop.f32.mrf.mxu3  ;;  %v18145_v59 = vpop.f32.mrf.mxu2 }
  0xd9   :  { %5725 = vmatpush.bf16.msrb.mxu1 %v13348_v7  ;;  %v16708_v7 = vld [vmem:[#allocation5 + $0x8c4] sm:$0xf0]  ;;  %v18135_v10 = vadd.f32 %v5479_v4, %v5466_v0  ;;  %v11624_v0 = vor.u32 %v16510_v51, %v11623_v50  ;;  %v13135_v50 = vld [vmem:[#allocation5 + $0xe20] sm:$0xf] }
  0xda   :  { %5739 = vmatpush.bf16.msrb.mxu2 %v13924_v8  ;;  %v12991_v8 = vld [vmem:[#allocation5 + $0xd00] sm:$0xf]  ;;  %v12416_v17 = vor.u32 %v16708_v7, %v12415_v3  ;;  %v16492_v7 = vld [vmem:[#allocation5 + $0x204] sm:$0xf0] }
  0xdb   :  { %5753 = vmatpush.bf16.msrb.mxu3 %v14500_v12  ;;  %v13636_v12 = vor.u32 %v17004_v58, %v13633_v61  ;;  %v12992_v18 = vor.u32 %v16852_v9, %v12991_v8  ;;  %v16798_v58 = vld [vmem:[#allocation5 + $0xb94] sm:$0xf0]  ;;  %v13351_v61 = vld [vmem:[#allocation5 + $0xfd0] sm:$0xf]  ;;  %v12127_v8 = vld [vmem:[#allocation5 + $0x640] sm:$0xf] }
  0xdc   :  { %5712 = vmatpush.bf16.msrb.mxu0 %v12700_v19  ;;  %v18137_v19 = vpop.f32.mrf.mxu0  ;;  %v12776_v3 = vor.u32 %v16798_v58, %v12775_v56  ;;  %v13352_v9 = vor.u32 %v16942_v62, %v13351_v61  ;;  %v16888_v51 = vld [vmem:[#allocation5 + $0xe64] sm:$0xf0]  ;;  %v16582_v61 = vld [vmem:[#allocation5 + $0x4d4] sm:$0xf0]  ;;  %v12487_v62 = vld [vmem:[#allocation5 + $0x910] sm:$0xf] }
  0xdd   :  { %5726 = vmatpush.bf16.msrb.mxu1 %v13276_v21  ;;  %v16546_v21 = vld [vmem:[#allocation5 + $0x3b4] sm:$0xf0] }
  0xde   :  { %5740 = vmatpush.bf16.msrb.mxu2 %v13852_v24  ;;  %v12343_v24 = vld [vmem:[#allocation5 + $0x7f0] sm:$0xf]  ;;  %v11768_v32 = vor.u32 %v16546_v21, %v11767_v20  ;;  %v12704_v20 = vor.u32 %v16780_v14, %v12703_v13  ;;  %v11841_v13 = vld [vmem:[#allocation5 + $0x448] sm:$0xf0] }
  0xdf   :  { %5754 = vmatpush.bf16.msrb.mxu3 %v14428_v28  ;;  %v16834_v28 = vld [vmem:[#allocation5 + $0xcb4] sm:$0xf0]  ;;  %v12344_v33 = vor.u32 %v16690_v26, %v12343_v24  ;;  %v11479_v21 = vld [vmem:[#allocation5 + $0x130] sm:$0xf] }
  0xe0   :  { %5713 = vmatpush.bf16.msrb.mxu0 %v12628_v34  ;;  %v12920_v34 = vor.u32 %v16834_v28, %v12919_v27  ;;  %v18148_v1 = vpop.f32.mrf.mxu3  ;;  %v16474_v24 = vld [vmem:[#allocation5 + $0x174] sm:$0xf0]  ;;  %v12631_v28 = vld [vmem:[#allocation5 + $0xa30] sm:$0xf] }
  0xe1   :  { %5727 = vmatpush.bf16.msrb.mxu1 %v13204_v36  ;;  %v11695_v36 = vld [vmem:[#allocation5 + $0x2e0] sm:$0xf]  ;;  %v16618_v27 = vld [vmem:[#allocation5 + $0x5f4] sm:$0xf0] }
  0xe2   :  { %5741 = vmatpush.bf16.msrb.mxu2 %v13780_v37  ;;  %v16528_v37 = vld [vmem:[#allocation5 + $0x324] sm:$0xf0] }
  0xe3   :  { %5755 = vmatpush.bf16.msrb.mxu3 %v14356_v42  ;;  %v12847_v42 = vld [vmem:[#allocation5 + $0xbe0] sm:$0xf]  ;;  %v11696_v47 = vor.u32 %v16528_v37, %v11695_v36  ;;  %v11480_v36 = vor.u32 %v16474_v24, %v11479_v21 }
  0xe4   :  { %5714 = vmatpush.bf16.msrb.mxu0 %v12556_v49  ;;  %v12848_v49 = vor.u32 %v16816_v43, %v12847_v42  ;;  %v16456_v42 = vld [vmem:[#allocation5 + $0xe4] sm:$0xf0]  ;;  %v11983_v43 = vld [vmem:[#allocation5 + $0x520] sm:$0xf] }
  0xe5   :  { %5728 = vmatpush.bf16.msrb.mxu1 %v13132_v52  ;;  %v12199_v52 = vld [vmem:[#allocation5 + $0x6d0] sm:$0xf] }
  0xe6   :  { %5742 = vmatpush.bf16.msrb.mxu2 %v13708_v53  ;;  %v13424_v53 = vor.u32 %v16960_v45, %v13423_v44  ;;  %v12200_v2 = vor.u32 %v16654_v55, %v12199_v52  ;;  %v11408_v52 = vor.u32 %v16456_v42, %v11407_v41  ;;  %v16438_v55 = vld [vmem:[#allocation5 + $0x54] sm:$0xf0]  ;;  %v13999_v42 = vld [vmem:[#allocation5 + $0x14e0] sm:$0xf] }
  0xe7   :  { %5756 = vmatpush.bf16.msrb.mxu3 %v14284_v60 }
  0xe8   :  { %5715 = vmatpush.bf16.msrb.mxu0 %v12484_v5  ;;  %v5493_v60 = vpop.f32.mrf.mxu0  ;;  %v11551_v5 = vld [vmem:[#allocation5 + $0x1c0] sm:$0xf] }
  0xe9   :  { %5729 = vmatpush.bf16.msrb.mxu1 %v13060_v11  ;;  %v5494_v63 = vadd.f32 %v5493_v60, %v18135_v10  ;;  %v5507_v4 = vpop.f32.mrf.mxu1  ;;  %v16924_v10 = vld [vmem:[#allocation5 + $0xf84] sm:$0xf0]  ;;  %v11911_v60 = vld [vmem:[#allocation5 + $0x490] sm:$0xf] }
  0xea   :  { %5743 = vmatpush.bf16.msrb.mxu2 %v13636_v12  ;;  %v16636_v12 = vld [vmem:[#allocation5 + $0x684] sm:$0xf0]  ;;  %v11912_v14 = vor.u32 %v16582_v61, %v11911_v60 }
  0xeb   :  { %5757 = vmatpush.bf16.msrb.mxu3 %v14212_v15  ;;  %5716 = vmatmul.bf16.vlgmr.msrb.gmra.mxu0 %v18104_v22  ;;  %v18150_v11 = vadd.f32 %v5507_v4, %v5494_v63  ;;  %v13279_v15 = vld [vmem:[#allocation5 + $0xf40] sm:$0xf]  ;;  %v13136_v63 = vor.u32 %v16888_v51, %v13135_v50  ;;  %v11697_v50 = vld [vmem:[#allocation5 + $0x328] sm:$0xf0]  ;;  %v16663_v51 = vld [vmem:[#allocation5 + $0x764] sm:$0xf] }
  0xec   :  { %5764 = vmatpush.bf16.msra.mxu0 %v11840_v16  ;;  %5730 = vmatmul.bf16.vlgmr.msrb.gmra.mxu1 %v18106_v23  ;;  %v1043_v16 = vperm.slane %v18126_v46, 1  ;;  %v13280_v26 = vor.u32 %v16924_v10, %v13279_v15  ;;  %v14143_v4 = vld [vmem:[#allocation5 + $0x1600] sm:$0xf]  ;;  %v16699_v10 = vld [vmem:[#allocation5 + $0x884] sm:$0xf] }
  0xed   :  { %5778 = vmatpush.bf16.msra.mxu1 %v12416_v17  ;;  %5744 = vmatmul.bf16.vlgmr.msrb.gmra.mxu2 %v18110_v35  ;;  %v11552_v17 = vor.u32 %v16492_v7, %v11551_v5  ;;  %v17140_v5 = vld [vmem:[#allocation5 + $0x1644] sm:$0xf0]  ;;  %v14719_v7 = vld [vmem:[#allocation5 + $0x1a80] sm:$0xf] }
  0xee   :  { %5792 = vmatpush.bf16.msra.mxu2 %v12992_v18  ;;  %5758 = vmatmul.bf16.vlgmr.msrb.gmra.mxu3 %v18112_v39  ;;  %v12128_v18 = vor.u32 %v16636_v12, %v12127_v8  ;;  %v16555_v12 = vld [vmem:[#allocation5 + $0x404] sm:$0xf] }
  0xef   :  { %5806 = vmatpush.bf16.msra.mxu3 %v13568_v25  ;;  %v12055_v25 = vld [vmem:[#allocation5 + $0x5b0] sm:$0xf]  ;;  %v11844_v24 = vor.u32 %v16555_v12, %v11841_v13 }
  0xf0   :  { %5765 = vmatpush.bf16.msra.mxu0 %v11768_v32  ;;  %v5521_v30 = vpop.f32.mrf.mxu2  ;;  %v13207_v32 = vld [vmem:[#allocation5 + $0xeb0] sm:$0xf]  ;;  %v12056_v38 = vor.u32 %v16618_v27, %v12055_v25 }
  0xf1   :  { %5779 = vmatpush.bf16.msra.mxu1 %v12344_v33  ;;  %v16906_v33 = vld [vmem:[#allocation5 + $0xef4] sm:$0xf0]  ;;  %v5535_v37 = vpop.f32.mrf.mxu3  ;;  %v14071_v25 = vld [vmem:[#allocation5 + $0x1570] sm:$0xf] }
  0xf2   :  { %5793 = vmatpush.bf16.msra.mxu2 %v12920_v34  ;;  %v5522_v34 = vadd.f32 %v5521_v30, %v1043_v16  ;;  %v13208_v45 = vor.u32 %v16906_v33, %v13207_v32  ;;  %v14647_v27 = vld [vmem:[#allocation5 + $0x19f0] sm:$0xf]  ;;  %v16537_v30 = vld [vmem:[#allocation5 + $0x374] sm:$0xf]  ;;  %v11769_v32 = vld [vmem:[#allocation5 + $0x3b8] sm:$0xf0]  ;;  %v18157_v33 = vpop.f32.mrf.mxu0 }
  0xf3   :  { %5807 = vmatpush.bf16.msra.mxu3 %v13496_v40  ;;  %v12632_v40 = vor.u32 %v16762_v29, %v12631_v28  ;;  %v17266_v29 = vld [vmem:[#allocation5 + $0x1a34] sm:$0xf0]  ;;  %v11772_v41 = vor.u32 %v16537_v30, %v11769_v32  ;;  %v13783_v30 = vld [vmem:[#allocation5 + $0x1330] sm:$0xf] }
  0xf4   :  { %5766 = vmatpush.bf16.msra.mxu0 %v11696_v47  ;;  %v18155_v44 = vadd.f32 %v5535_v37, %v5522_v34  ;;  %v16600_v47 = vld [vmem:[#allocation5 + $0x564] sm:$0xf0]  ;;  %v16681_v34 = vld [vmem:[#allocation5 + $0x7f4] sm:$0xf]  ;;  %v18159_v37 = vpop.f32.mrf.mxu1 }
  0xf5   :  { %5780 = vmatpush.bf16.msra.mxu1 %v12272_v48  ;;  %v12559_v48 = vld [vmem:[#allocation5 + $0x9a0] sm:$0xf]  ;;  %v11984_v56 = vor.u32 %v16600_v47, %v11983_v43  ;;  %v17104_v43 = vld [vmem:[#allocation5 + $0x1524] sm:$0xf0] }
  0xf6   :  { %5794 = vmatpush.bf16.msra.mxu2 %v12848_v49  ;;  %v16744_v49 = vld [vmem:[#allocation5 + $0x9e4] sm:$0xf0] }
  0xf7   :  { %5808 = vmatpush.bf16.msra.mxu3 %v13424_v53  ;;  %v11335_v53 = vld [vmem:[#allocation5 + $0x10] sm:$0xf]  ;;  %v12560_v58 = vor.u32 %v16744_v49, %v12559_v48  ;;  %v17248_v48 = vld [vmem:[#allocation5 + $0x19a4] sm:$0xf0]  ;;  %v16519_v49 = vld [vmem:[#allocation5 + $0x2e4] sm:$0xf] }
  0xf8   :  { %5767 = vmatpush.bf16.msra.mxu0 %v11624_v0  ;;  %v16726_v0 = vld [vmem:[#allocation5 + $0x954] sm:$0xf0]  ;;  %v11336_v8 = vor.u32 %v16438_v55, %v11335_v53  ;;  %v5440_v53 = vadd.f32 %v18137_v19, %v1042_v54  ;;  %v14000_v55 = vor.u32 %v17104_v43, %v13999_v42  ;;  %v11700_v60 = vor.u32 %v16519_v49, %v11697_v50  ;;  %v16645_v54 = vld [vmem:[#allocation5 + $0x6d4] sm:$0xf]  ;;  %v12201_v19 = vld [vmem:[#allocation5 + $0x718] sm:$0xf0] }
  0xf9   :  { %5781 = vmatpush.bf16.msra.mxu1 %v12200_v2  ;;  %v13063_v2 = vld [vmem:[#allocation5 + $0xd90] sm:$0xf]  ;;  %v12488_v15 = vor.u32 %v16726_v0, %v12487_v62  ;;  %v5537_v61 = vpop.f32.mrf.mxu3  ;;  %v16465_v43 = vld [vmem:[#allocation5 + $0x134] sm:$0xf]  ;;  %v12057_v50 = vld [vmem:[#allocation5 + $0x5f8] sm:$0xf0] }
  0xfa   :  { %5795 = vmatpush.bf16.msra.mxu2 %v12776_v3  ;;  %v16870_v3 = vld [vmem:[#allocation5 + $0xdd4] sm:$0xf0]  ;;  %v13927_v62 = vld [vmem:[#allocation5 + $0x1450] sm:$0xf] }
  0xfb   :  { %5809 = vmatpush.bf16.msra.mxu3 %v13352_v9  ;;  %v17284_v9 = vld [vmem:[#allocation5 + $0x1ac4] sm:$0xf0]  ;;  %v14503_v0 = vld [vmem:[#allocation5 + $0x18d0] sm:$0xf] }
  0xfc   :  { %5768 = vmatpush.bf16.msra.mxu0 %v11552_v17  ;;  %v12417_v17 = vld [vmem:[#allocation5 + $0x8c8] sm:$0xf0]  ;;  %v14720_v21 = vor.u32 %v17284_v9, %v14719_v7 }
  0xfd   :  { %5782 = vmatpush.bf16.msra.mxu1 %v12128_v18  ;;  %v13064_v18 = vor.u32 %v16870_v3, %v13063_v2  ;;  %v12420_v28 = vor.u32 %v16699_v10, %v12417_v17  ;;  %v17230_v3 = vld [vmem:[#allocation5 + $0x1914] sm:$0xf0]  ;;  %v13855_v17 = vld [vmem:[#allocation5 + $0x13c0] sm:$0xf] }
  0xfe   :  { %5796 = vmatpush.bf16.msra.mxu2 %v12704_v20  ;;  %v14144_v20 = vor.u32 %v17140_v5, %v14143_v4  ;;  %v16501_v4 = vld [vmem:[#allocation5 + $0x254] sm:$0xf]  ;;  %v11625_v5 = vld [vmem:[#allocation5 + $0x298] sm:$0xf0] }
  0xff   :  { %5810 = vmatpush.bf16.msra.mxu3 %v13280_v26  ;;  %v17122_v26 = vld [vmem:[#allocation5 + $0x15b4] sm:$0xf0]  ;;  %v11628_v10 = vor.u32 %v16501_v4, %v11625_v5  ;;  %v11409_v4 = vld [vmem:[#allocation5 + $0xe8] sm:$0xf0] }
 0x100   :  { %5769 = vmatpush.bf16.msra.mxu0 %v11480_v36  ;;  %v12345_v36 = vld [vmem:[#allocation5 + $0x838] sm:$0xf0] }
 0x101   :  { %5783 = vmatpush.bf16.msra.mxu1 %v12056_v38  ;;  %v14072_v38 = vor.u32 %v17122_v26, %v14071_v25  ;;  %v12348_v47 = vor.u32 %v16681_v34, %v12345_v36  ;;  %v17212_v25 = vld [vmem:[#allocation5 + $0x1884] sm:$0xf0]  ;;  %v11553_v26 = vld [vmem:[#allocation5 + $0x208] sm:$0xf0]  ;;  %v17050_v36 = vld [vmem:[#allocation5 + $0x1374] sm:$0xf0] }
 0x102   :  { %5797 = vmatpush.bf16.msra.mxu2 %v12632_v40  ;;  %v14648_v40 = vor.u32 %v17266_v29, %v14647_v27  ;;  %v16627_v27 = vld [vmem:[#allocation5 + $0x644] sm:$0xf] }
 0x103   :  { %5811 = vmatpush.bf16.msra.mxu3 %v13208_v45  ;;  %v14575_v45 = vld [vmem:[#allocation5 + $0x1960] sm:$0xf] }
 0x104   :  { %5770 = vmatpush.bf16.msra.mxu0 %v11408_v52  ;;  %v12273_v52 = vld [vmem:[#allocation5 + $0x7a8] sm:$0xf0] }
 0x105   :  { %5784 = vmatpush.bf16.msra.mxu1 %v11984_v56  ;;  %v5523_v56 = vpop.f32.mrf.mxu2  ;;  %v12276_v2 = vor.u32 %v16663_v51, %v12273_v52  ;;  %v13784_v52 = vor.u32 %v17050_v36, %v13783_v30  ;;  %v17131_v30 = vld [vmem:[#allocation5 + $0x1604] sm:$0xf] }
 0x106   :  { %5798 = vmatpush.bf16.msra.mxu2 %v12560_v58  ;;  %v14576_v58 = vor.u32 %v17248_v48, %v14575_v45  ;;  %v11481_v45 = vld [vmem:[#allocation5 + $0x178] sm:$0xf0] }
 0x107   :  { %5812 = vmatpush.bf16.msra.mxu3 %v13136_v63  ;;  %v17086_v63 = vld [vmem:[#allocation5 + $0x1494] sm:$0xf0] }
 0x108   :  { %5771 = vmatpush.bf16.msra.mxu0 %v11336_v8  ;;  %v5549_v7 = vpop.f32.mrf.mxu0  ;;  %v5454_v8 = vadd.f32 %v18139_v31, %v5440_v53  ;;  %v13928_v12 = vor.u32 %v17086_v63, %v13927_v62  ;;  %v16483_v31 = vld [vmem:[#allocation5 + $0x1c4] sm:$0xf]  ;;  %v14287_v62 = vld [vmem:[#allocation5 + $0x1720] sm:$0xf] }
 0x109   :  { %5785 = vmatpush.bf16.msra.mxu1 %v11912_v14  ;;  %v5550_v9 = vadd.f32 %v5549_v7, %v18155_v44  ;;  %v5563_v13 = vpop.f32.mrf.mxu1  ;;  %v5524_v14 = vadd.f32 %v5523_v56, %v1043_v16  ;;  %v12129_v44 = vld [vmem:[#allocation5 + $0x688] sm:$0xf0]  ;;  %v11556_v34 = vor.u32 %v16483_v31, %v11553_v26  ;;  %v16843_v31 = vld [vmem:[#allocation5 + $0xd04] sm:$0xf] }
 0x10a   :  { %5799 = vmatpush.bf16.msra.mxu2 %v12488_v15  ;;  %v14504_v15 = vor.u32 %v17230_v3, %v14503_v0  ;;  %v16447_v3 = vld [vmem:[#allocation5 + $0xa4] sm:$0xf]  ;;  %v11985_v7 = vld [vmem:[#allocation5 + $0x568] sm:$0xf0] }
 0x10b   :  { %5813 = vmatpush.bf16.msra.mxu3 %v13064_v18  ;;  %5772 = vmatmul.bf16.vlgmr.msra.gmra.mxu0 %v18098_v57  ;;  %v17068_v18 = vld [vmem:[#allocation5 + $0x1404] sm:$0xf0]  ;;  %v5538_v32 = vadd.f32 %v5537_v61, %v5524_v14  ;;  %v11412_v14 = vor.u32 %v16447_v3, %v11409_v4  ;;  %v12993_v26 = vld [vmem:[#allocation5 + $0xd48] sm:$0xf0]  ;;  %v17095_v3 = vld [vmem:[#allocation5 + $0x14e4] sm:$0xf] }
 0x10c   :  { %5820 = vmatpush.bf16.msrb.mxu0 %v14144_v20  ;;  %5786 = vmatmul.bf16.vlgmr.msra.gmra.mxu1 %v18101_v6  ;;  %v14431_v20 = vld [vmem:[#allocation5 + $0x1840] sm:$0xf]  ;;  %v13856_v29 = vor.u32 %v17068_v18, %v13855_v17  ;;  %v17032_v61 = vld [vmem:[#allocation5 + $0x12e4] sm:$0xf0]  ;;  %v16429_v17 = vld [vmem:[#allocation5 + $0x14] sm:$0xf] }
 0x10d   :  { %5834 = vmatpush.bf16.msrb.mxu1 %v14720_v21  ;;  %5800 = vmatmul.bf16.vlgmr.msra.gmra.mxu2 %v18104_v22  ;;  %v12204_v21 = vor.u32 %v16645_v54, %v12201_v19  ;;  %v14432_v16 = vor.u32 %v17212_v25, %v14431_v20  ;;  %v11337_v20 = vld [vmem:[#allocation5 + $0x58] sm:$0xf0]  ;;  %v14001_v4 = vld [vmem:[#allocation5 + $0x1528] sm:$0xf0] }
 0x10e   :  { %5848 = vmatpush.bf16.msrb.mxu2 %v11844_v24  ;;  %5814 = vmatmul.bf16.vlgmr.msra.gmra.mxu3 %v18106_v23  ;;  %v5564_v24 = vadd.f32 %v5563_v13, %v5550_v9  ;;  %v17014_v9 = vld [vmem:[#allocation5 + $0x1254] sm:$0xf0]  ;;  %v11340_v36 = vor.u32 %v16429_v17, %v11337_v20  ;;  %v17077_v17 = vld [vmem:[#allocation5 + $0x1454] sm:$0xf]  ;;  %v14505_v20 = vld [vmem:[#allocation5 + $0x1918] sm:$0xf0] }
 0x10f   :  { %5862 = vmatpush.bf16.msrb.mxu3 %v12420_v28  ;;  %v5468_v28 = vadd.f32 %v18145_v59, %v5454_v8  ;;  %v16609_v59 = vld [vmem:[#allocation5 + $0x5b4] sm:$0xf]  ;;  %v13639_v8 = vld [vmem:[#allocation5 + $0x1210] sm:$0xf] }
 0x110   :  { %5821 = vmatpush.bf16.msrb.mxu0 %v14072_v38  ;;  %v14359_v38 = vld [vmem:[#allocation5 + $0x17b0] sm:$0xf]  ;;  %v5577_v42 = vpop.f32.mrf.mxu2  ;;  %v5551_v48 = vpop.f32.mrf.mxu0  ;;  %v12060_v63 = vor.u32 %v16609_v59, %v12057_v50  ;;  %v13497_v50 = vld [vmem:[#allocation5 + $0x1138] sm:$0xf0] }
 0x111   :  { %5835 = vmatpush.bf16.msrb.mxu1 %v14648_v40  ;;  %v17194_v40 = vld [vmem:[#allocation5 + $0x17f4] sm:$0xf0]  ;;  %v5591_v49 = vpop.f32.mrf.mxu3  ;;  %v5482_v51 = vadd.f32 %v18148_v1, %v5468_v28  ;;  %v5565_v0 = vpop.f32.mrf.mxu1  ;;  %v16591_v1 = vld [vmem:[#allocation5 + $0x524] sm:$0xf]  ;;  %v13640_v28 = vor.u32 %v17014_v9, %v13639_v8  ;;  %v14004_v9 = vor.u32 %v17095_v3, %v14001_v4  ;;  %v13137_v4 = vld [vmem:[#allocation5 + $0xe68] sm:$0xf0] }
 0x112   :  { %5849 = vmatpush.bf16.msrb.mxu2 %v11772_v41  ;;  %v12132_v41 = vor.u32 %v16627_v27, %v12129_v44  ;;  %v14360_v53 = vor.u32 %v17194_v40, %v14359_v38  ;;  %v11988_v18 = vor.u32 %v16591_v1, %v11985_v7  ;;  %v16987_v27 = vld [vmem:[#allocation5 + $0x1184] sm:$0xf]  ;;  %v14721_v40 = vld [vmem:[#allocation5 + $0x1ac8] sm:$0xf0] }
 0x113   :  { %5863 = vmatpush.bf16.msrb.mxu3 %v12348_v47  ;;  %v5578_v47 = vadd.f32 %v5577_v42, %v5564_v24  ;;  %v5496_v54 = vadd.f32 %v18157_v33, %v5482_v51  ;;  %v11913_v24 = vld [vmem:[#allocation5 + $0x4d8] sm:$0xf0]  ;;  %v17275_v38 = vld [vmem:[#allocation5 + $0x1a84] sm:$0xf]  ;;  %v12996_v42 = vor.u32 %v16843_v31, %v12993_v26  ;;  %v17113_v51 = vld [vmem:[#allocation5 + $0x1574] sm:$0xf] }
 0x114   :  { %5822 = vmatpush.bf16.msrb.mxu0 %v14000_v55  ;;  %v5552_v55 = vadd.f32 %v5551_v48, %v5538_v32  ;;  %v14145_v32 = vld [vmem:[#allocation5 + $0x1648] sm:$0xf0]  ;;  %v12921_v48 = vld [vmem:[#allocation5 + $0xcb8] sm:$0xf0]  ;;  %v14724_v59 = vor.u32 %v17275_v38, %v14721_v40  ;;  %v17239_v1 = vld [vmem:[#allocation5 + $0x1964] sm:$0xf] }
 0x115   :  { %5836 = vmatpush.bf16.msrb.mxu1 %v14576_v58  ;;  %v5592_v56 = vadd.f32 %v5591_v49, %v5578_v47  ;;  %v11484_v58 = vor.u32 %v16465_v43, %v11481_v45  ;;  %v5510_v44 = vadd.f32 %v18159_v37, %v5496_v54  ;;  %v14148_v47 = vor.u32 %v17131_v30, %v14145_v32  ;;  %v16825_v37 = vld [vmem:[#allocation5 + $0xc74] sm:$0xf]  ;;  %v14577_v7 = vld [vmem:[#allocation5 + $0x19a8] sm:$0xf0]  ;;  %v16771_v26 = vld [vmem:[#allocation5 + $0xac4] sm:$0xf] }
 0x116   :  { %5850 = vmatpush.bf16.msrb.mxu2 %v11700_v60  ;;  %v13711_v60 = vld [vmem:[#allocation5 + $0x12a0] sm:$0xf]  ;;  %v16969_v49 = vld [vmem:[#allocation5 + $0x10f4] sm:$0xf]  ;;  %v13281_v30 = vld [vmem:[#allocation5 + $0xf88] sm:$0xf0] }
 0x117   :  { %5864 = vmatpush.bf16.msrb.mxu3 %v12276_v2  ;;  %v17176_v2 = vld [vmem:[#allocation5 + $0x1764] sm:$0xf0]  ;;  %v18175_v5 = vpack.c.bf16 %v5592_v56, %v18150_v11  ;;  %v13712_v19 = vor.u32 %v17032_v61, %v13711_v60  ;;  %v12924_v56 = vor.u32 %v16825_v37, %v12921_v48  ;;  %v16807_v61 = vld [vmem:[#allocation5 + $0xbe4] sm:$0xf]  ;;  %v14433_v38 = vld [vmem:[#allocation5 + $0x1888] sm:$0xf0] }
 0x118   :  { %5823 = vmatpush.bf16.msrb.mxu0 %v13928_v12  ;;  %v5566_v12 = vadd.f32 %v5565_v0, %v5552_v55  ;;  %v14288_v13 = vor.u32 %v17176_v2, %v14287_v62  ;;  %v5579_v11 = vpop.f32.mrf.mxu2  ;;  %v14649_v55 = vld [vmem:[#allocation5 + $0x1a38] sm:$0xf0]  ;;  %v12849_v62 = vld [vmem:[#allocation5 + $0xc28] sm:$0xf0]  ;;  %v17059_v32 = vld [vmem:[#allocation5 + $0x13c4] sm:$0xf] }
 0x119   :  { %5837 = vmatpush.bf16.msrb.mxu1 %v14504_v15  ;;  %v14215_v15 = vld [vmem:[#allocation5 + $0x1690] sm:$0xf]  ;;  %v5593_v33 = vpop.f32.mrf.mxu3  ;;  %v13425_v2 = vld [vmem:[#allocation5 + $0x10a8] sm:$0xf0]  ;;  %v12852_v54 = vor.u32 %v16807_v61, %v12849_v62  ;;  %v16897_v37 = vld [vmem:[#allocation5 + $0xeb4] sm:$0xf] }
 0x11a   :  { %5851 = vmatpush.bf16.msrb.mxu2 %v11628_v10  ;;  %v17158_v10 = vld [vmem:[#allocation5 + $0x16d4] sm:$0xf0]  ;;  %v5580_v25 = vadd.f32 %v5579_v11, %v5566_v12  ;;  %v16789_v12 = vld [vmem:[#allocation5 + $0xb54] sm:$0xf]  ;;  %v16735_v62 = vld [vmem:[#allocation5 + $0x9a4] sm:$0xf] }
 0x11b   :  { %5865 = vmatpush.bf16.msrb.mxu3 %v12204_v21  ;;  %v16573_v21 = vld [vmem:[#allocation5 + $0x494] sm:$0xf] }
 0x11c   :  { %5824 = vmatpush.bf16.msrb.mxu0 %v13856_v29  ;;  %v13569_v29 = vld [vmem:[#allocation5 + $0x11c8] sm:$0xf0]  ;;  %v17221_v11 = vld [vmem:[#allocation5 + $0x18d4] sm:$0xf] }
 0x11d   :  { %5838 = vmatpush.bf16.msrb.mxu1 %v14432_v16  ;;  %v5594_v16 = vadd.f32 %v5593_v33, %v5580_v25  ;;  %v13572_v45 = vor.u32 %v16987_v27, %v13569_v29  ;;  %v12705_v27 = vld [vmem:[#allocation5 + $0xb08] sm:$0xf0]  ;;  %v14508_v29 = vor.u32 %v17221_v11, %v14505_v20  ;;  %v13641_v20 = vld [vmem:[#allocation5 + $0x1258] sm:$0xf0] }
 0x11e   :  { %5852 = vmatpush.bf16.msrb.mxu2 %v11556_v34  ;;  %v14216_v34 = vor.u32 %v17158_v10, %v14215_v15  ;;  %v14580_v15 = vor.u32 %v17239_v1, %v14577_v7  ;;  %v13353_v10 = vld [vmem:[#allocation5 + $0x1018] sm:$0xf0]  ;;  %v12708_v40 = vor.u32 %v16771_v26, %v12705_v27  ;;  %v17023_v1 = vld [vmem:[#allocation5 + $0x12a4] sm:$0xf]  ;;  %v13713_v7 = vld [vmem:[#allocation5 + $0x12e8] sm:$0xf0] }
 0x11f   :  { %5866 = vmatpush.bf16.msrb.mxu3 %v12132_v41  ;;  %v11916_v41 = vor.u32 %v16573_v21, %v11913_v24  ;;  %v18179_v43 = vpack.c.bf16 %v5594_v16, %v5510_v44  ;;  %v16915_v44 = vld [vmem:[#allocation5 + $0xf44] sm:$0xf]  ;;  %v13857_v16 = vld [vmem:[#allocation5 + $0x1408] sm:$0xf0]  ;;  %v16709_v27 = vld [vmem:[#allocation5 + $0x8cc] sm:$0xf0] }
 0x120   :  { %5825 = vmatpush.bf16.msrb.mxu0 %v13784_v52  ;;  %v14073_v52 = vld [vmem:[#allocation5 + $0x15b8] sm:$0xf0] }
 0x121   :  { %5839 = vmatpush.bf16.msrb.mxu1 %v14360_v53  ;;  %v17257_v53 = vld [vmem:[#allocation5 + $0x19f4] sm:$0xf]  ;;  %v14076_v60 = vor.u32 %v17113_v51, %v14073_v52 }
 0x122   :  { %5853 = vmatpush.bf16.msrb.mxu2 %v11484_v58  ;;  %v13500_v58 = vor.u32 %v16969_v49, %v13497_v50  ;;  %v14652_v0 = vor.u32 %v17257_v53, %v14649_v55  ;;  %v13209_v49 = vld [vmem:[#allocation5 + $0xef8] sm:$0xf0]  ;;  %v17185_v52 = vld [vmem:[#allocation5 + $0x17b4] sm:$0xf] }
 0x123   :  { %5867 = vmatpush.bf16.msrb.mxu3 %v12060_v63  ;;  %v16951_v63 = vld [vmem:[#allocation5 + $0x1064] sm:$0xf]  ;;  %v13785_v50 = vld [vmem:[#allocation5 + $0x1378] sm:$0xf0] }
 0x124   :  { %5826 = vmatpush.bf16.msrb.mxu0 %v13712_v19  ;;  %v1044_v19 = vperm.slane %v18126_v46, 2  ;;  %v13428_v8 = vor.u32 %v16951_v63, %v13425_v2  ;;  %v14361_v53 = vld [vmem:[#allocation5 + $0x17f8] sm:$0xf0]  ;;  %v12561_v63 = vld [vmem:[#allocation5 + $0x9e8] sm:$0xf0] }
 0x125   :  { %5840 = vmatpush.bf16.msrb.mxu1 %v14288_v13  ;;  %v12777_v13 = vld [vmem:[#allocation5 + $0xb98] sm:$0xf0]  ;;  %v14364_v3 = vor.u32 %v17185_v52, %v14361_v53  ;;  %v11633_v46 = vld [vmem:[#allocation5 + $0x2a0] sm:$0xf0] }
 0x126   :  { %5854 = vmatpush.bf16.msrb.mxu2 %v11412_v14  ;;  %v16933_v14 = vld [vmem:[#allocation5 + $0xfd4] sm:$0xf]  ;;  %v12780_v24 = vor.u32 %v16789_v12, %v12777_v13  ;;  %v12489_v13 = vld [vmem:[#allocation5 + $0x958] sm:$0xf0] }
 0x127   :  { %5868 = vmatpush.bf16.msrb.mxu3 %v11988_v18  ;;  %v13929_v18 = vld [vmem:[#allocation5 + $0x1498] sm:$0xf0]  ;;  %v13356_v33 = vor.u32 %v16933_v14, %v13353_v10  ;;  %v16717_v12 = vld [vmem:[#allocation5 + $0x914] sm:$0xf] }
 0x128   :  { %5827 = vmatpush.bf16.msrb.mxu0 %v13640_v28  ;;  %v5605_v21 = vpop.f32.mrf.mxu0  ;;  %v13932_v31 = vor.u32 %v17077_v17, %v13929_v18  ;;  %v16861_v10 = vld [vmem:[#allocation5 + $0xd94] sm:$0xf]  ;;  %v13065_v17 = vld [vmem:[#allocation5 + $0xdd8] sm:$0xf0]  ;;  %v12492_v26 = vor.u32 %v16717_v12, %v12489_v13  ;;  %v16511_v12 = vld [vmem:[#allocation5 + $0x29c] sm:$0xf0] }
 0x129   :  { %5841 = vmatpush.bf16.msrb.mxu1 %v14216_v34  ;;  %v5606_v25 = vadd.f32 %v5605_v21, %v1044_v19  ;;  %v5619_v28 = vpop.f32.mrf.mxu1  ;;  %v17005_v18 = vld [vmem:[#allocation5 + $0x1214] sm:$0xf]  ;;  %v12207_v13 = vld [vmem:[#allocation5 + $0x6d8] sm:$0xf] }
 0x12a   :  { %5855 = vmatpush.bf16.msrb.mxu2 %v11340_v36  ;;  %v17203_v36 = vld [vmem:[#allocation5 + $0x1844] sm:$0xf]  ;;  %v17149_v21 = vld [vmem:[#allocation5 + $0x1694] sm:$0xf] }
 0x12b   :  { %5869 = vmatpush.bf16.msrb.mxu3 %v11916_v41  ;;  %5828 = vmatmul.bf16.vlgmr.msrb.gmra.mxu0 %v18110_v35  ;;  %v5620_v34 = vadd.f32 %v5619_v28, %v5606_v25  ;;  %v13284_v41 = vor.u32 %v16915_v44, %v13281_v30  ;;  %v14436_v48 = vor.u32 %v17203_v36, %v14433_v38  ;;  %v11847_v25 = vld [vmem:[#allocation5 + $0x408] sm:$0xf]  ;;  %v16853_v28 = vld [vmem:[#allocation5 + $0xd4c] sm:$0xf0] }
 0x12c   :  { %5876 = vmatpush.bf16.msra.mxu0 %v12996_v42  ;;  %5842 = vmatmul.bf16.vlgmr.msrb.gmra.mxu1 %v18112_v39  ;;  %v13860_v42 = vor.u32 %v17059_v32, %v13857_v16  ;;  %v12999_v44 = vld [vmem:[#allocation5 + $0xd08] sm:$0xf]  ;;  %v13644_v30 = vor.u32 %v17005_v18, %v13641_v20  ;;  %v16997_v16 = vld [vmem:[#allocation5 + $0x11cc] sm:$0xf0]  ;;  %v13359_v20 = vld [vmem:[#allocation5 + $0xfd8] sm:$0xf] }
 0x12d   :  { %5890 = vmatpush.bf16.msra.mxu1 %v13572_v45  ;;  %5856 = vmatmul.bf16.vlgmr.msrb.gmra.mxu2 %v18098_v57  ;;  %v16753_v45 = vld [vmem:[#allocation5 + $0xa34] sm:$0xf]  ;;  %v13575_v32 = vld [vmem:[#allocation5 + $0x1188] sm:$0xf] }
 0x12e   :  { %5904 = vmatpush.bf16.msra.mxu2 %v14148_v47  ;;  %5870 = vmatmul.bf16.vlgmr.msrb.gmra.mxu3 %v18101_v6  ;;  %v12633_v47 = vld [vmem:[#allocation5 + $0xa78] sm:$0xf0] }
 0x12f   :  { %5918 = vmatpush.bf16.msra.mxu3 %v14724_v59  ;;  %v17041_v59 = vld [vmem:[#allocation5 + $0x1334] sm:$0xf] }
 0x130   :  { %5877 = vmatpush.bf16.msra.mxu0 %v12924_v56  ;;  %v5633_v51 = vpop.f32.mrf.mxu2  ;;  %v12636_v56 = vor.u32 %v16753_v45, %v12633_v47  ;;  %v13788_v61 = vor.u32 %v17041_v59, %v13785_v50  ;;  %v16547_v45 = vld [vmem:[#allocation5 + $0x3bc] sm:$0xf0]  ;;  %v12351_v47 = vld [vmem:[#allocation5 + $0x7f8] sm:$0xf] }
 0x131   :  { %5891 = vmatpush.bf16.msra.mxu1 %v13500_v58  ;;  %v5634_v55 = vadd.f32 %v5633_v51, %v5620_v34  ;;  %v5647_v58 = vpop.f32.mrf.mxu3  ;;  %v16835_v59 = vld [vmem:[#allocation5 + $0xcbc] sm:$0xf0]  ;;  %v13503_v50 = vld [vmem:[#allocation5 + $0x10f8] sm:$0xf]  ;;  %v18192_v52 = vpop.f32.mrf.mxu1 }
 0x132   :  { %5905 = vmatpush.bf16.msra.mxu2 %v14076_v60  ;;  %v13212_v60 = vor.u32 %v16897_v37, %v13209_v49  ;;  %v13576_v37 = vor.u32 %v16997_v16, %v13575_v32  ;;  %v12927_v49 = vld [vmem:[#allocation5 + $0xc78] sm:$0xf]  ;;  %v16979_v51 = vld [vmem:[#allocation5 + $0x113c] sm:$0xf0]  ;;  %v16637_v16 = vld [vmem:[#allocation5 + $0x68c] sm:$0xf0] }
 0x133   :  { %5919 = vmatpush.bf16.msra.mxu3 %v14652_v0  ;;  %v16879_v0 = vld [vmem:[#allocation5 + $0xe24] sm:$0xf]  ;;  %v18188_v2 = vadd.f32 %v5647_v58, %v5634_v55  ;;  %v11703_v58 = vld [vmem:[#allocation5 + $0x2e8] sm:$0xf] }
 0x134   :  { %5878 = vmatpush.bf16.msra.mxu0 %v12852_v54  ;;  %v17167_v54 = vld [vmem:[#allocation5 + $0x1724] sm:$0xf]  ;;  %v13140_v14 = vor.u32 %v16879_v0, %v13137_v4  ;;  %v12855_v0 = vld [vmem:[#allocation5 + $0xbe8] sm:$0xf] }
 0x135   :  { %5892 = vmatpush.bf16.msra.mxu1 %v13428_v8  ;;  %v14289_v8 = vld [vmem:[#allocation5 + $0x1768] sm:$0xf0]  ;;  %v13431_v4 = vld [vmem:[#allocation5 + $0x1068] sm:$0xf] }
 0x136   :  { %5906 = vmatpush.bf16.msra.mxu2 %v14004_v9  ;;  %v12564_v9 = vor.u32 %v16735_v62, %v12561_v63  ;;  %v14292_v11 = vor.u32 %v17167_v54, %v14289_v8  ;;  %v13504_v62 = vor.u32 %v16979_v51, %v13503_v50  ;;  %v16673_v63 = vld [vmem:[#allocation5 + $0x7ac] sm:$0xf0]  ;;  %v16619_v51 = vld [vmem:[#allocation5 + $0x5fc] sm:$0xf0] }
 0x137   :  { %5920 = vmatpush.bf16.msra.mxu3 %v14580_v15  ;;  %v13716_v15 = vor.u32 %v17023_v1, %v13713_v7  ;;  %v16961_v1 = vld [vmem:[#allocation5 + $0x10ac] sm:$0xf0] }
 0x138   :  { %5879 = vmatpush.bf16.msra.mxu0 %v12780_v24  ;;  %v14217_v24 = vld [vmem:[#allocation5 + $0x16d8] sm:$0xf0]  ;;  %v18198_v18 = vpop.f32.mrf.mxu2 }
 0x139   :  { %5893 = vmatpush.bf16.msra.mxu1 %v13356_v33  ;;  %v16565_v33 = vld [vmem:[#allocation5 + $0x44c] sm:$0xf0]  ;;  %v14220_v34 = vor.u32 %v17149_v21, %v14217_v24  ;;  %v16943_v21 = vld [vmem:[#allocation5 + $0x101c] sm:$0xf0] }
 0x13a   :  { %5907 = vmatpush.bf16.msra.mxu2 %v13932_v31  ;;  %v12423_v31 = vld [vmem:[#allocation5 + $0x888] sm:$0xf]  ;;  %v11848_v36 = vor.u32 %v16565_v33, %v11847_v25  ;;  %v18201_v33 = vpop.f32.mrf.mxu3 }
 0x13b   :  { %5921 = vmatpush.bf16.msra.mxu3 %v14508_v29  ;;  %v13068_v29 = vor.u32 %v16861_v10, %v13065_v17  ;;  %v12424_v38 = vor.u32 %v16709_v27, %v12423_v31  ;;  %v12783_v10 = vld [vmem:[#allocation5 + $0xb58] sm:$0xf]  ;;  %v16799_v17 = vld [vmem:[#allocation5 + $0xb9c] sm:$0xf0] }
 0x13c   :  { %5880 = vmatpush.bf16.msra.mxu0 %v12708_v40  ;;  %v13000_v40 = vor.u32 %v16853_v28, %v12999_v44  ;;  %v11559_v44 = vld [vmem:[#allocation5 + $0x1c8] sm:$0xf]  ;;  %v16493_v28 = vld [vmem:[#allocation5 + $0x20c] sm:$0xf0] }
 0x13d   :  { %5894 = vmatpush.bf16.msra.mxu1 %v13284_v41  ;;  %v18190_v41 = vpop.f32.mrf.mxu0 }
 0x13e   :  { %5908 = vmatpush.bf16.msra.mxu2 %v13860_v42  ;;  %v11775_v42 = vld [vmem:[#allocation5 + $0x378] sm:$0xf] }
 0x13f   :  { %5922 = vmatpush.bf16.msra.mxu3 %v14436_v48  ;;  %v16691_v48 = vld [vmem:[#allocation5 + $0x83c] sm:$0xf0]  ;;  %v11776_v53 = vor.u32 %v16547_v45, %v11775_v42  ;;  %v11560_v45 = vor.u32 %v16493_v28, %v11559_v44  ;;  %v13071_v44 = vld [vmem:[#allocation5 + $0xd98] sm:$0xf] }
 0x140   :  { %5881 = vmatpush.bf16.msra.mxu0 %v12636_v56  ;;  %v12352_v55 = vor.u32 %v16691_v48, %v12351_v47  ;;  %v12928_v56 = vor.u32 %v16835_v59, %v12927_v49  ;;  %v11487_v48 = vld [vmem:[#allocation5 + $0x138] sm:$0xf]  ;;  %v16475_v49 = vld [vmem:[#allocation5 + $0x17c] sm:$0xf0] }
 0x141   :  { %5895 = vmatpush.bf16.msra.mxu1 %v13212_v60  ;;  %v16529_v60 = vld [vmem:[#allocation5 + $0x32c] sm:$0xf0]  ;;  %v12063_v59 = vld [vmem:[#allocation5 + $0x5b8] sm:$0xf]  ;;  %v16871_v28 = vld [vmem:[#allocation5 + $0xddc] sm:$0xf0] }
 0x142   :  { %5909 = vmatpush.bf16.msra.mxu2 %v13788_v61  ;;  %v12279_v61 = vld [vmem:[#allocation5 + $0x768] sm:$0xf]  ;;  %v11704_v7 = vor.u32 %v16529_v60, %v11703_v58  ;;  %v13215_v58 = vld [vmem:[#allocation5 + $0xeb8] sm:$0xf]  ;;  %v16907_v60 = vld [vmem:[#allocation5 + $0xefc] sm:$0xf0] }
 0x143   :  { %5923 = vmatpush.bf16.msra.mxu3 %v14364_v3  ;;  %v16817_v3 = vld [vmem:[#allocation5 + $0xc2c] sm:$0xf0]  ;;  %v12280_v54 = vor.u32 %v16673_v63, %v12279_v61 }
 0x144   :  { %5882 = vmatpush.bf16.msra.mxu0 %v12564_v9  ;;  %v12856_v8 = vor.u32 %v16817_v3, %v12855_v0  ;;  %v11631_v9 = vld [vmem:[#allocation5 + $0x258] sm:$0xf]  ;;  %v12064_v0 = vor.u32 %v16619_v51, %v12063_v59 }
 0x145   :  { %5896 = vmatpush.bf16.msra.mxu1 %v13140_v14  ;;  %v13432_v14 = vor.u32 %v16961_v1, %v13431_v4  ;;  %v11632_v25 = vor.u32 %v16511_v12, %v11631_v9  ;;  %v11415_v4 = vld [vmem:[#allocation5 + $0xa8] sm:$0xf]  ;;  %v16457_v1 = vld [vmem:[#allocation5 + $0xec] sm:$0xf0] }
 0x146   :  { %5910 = vmatpush.bf16.msra.mxu2 %v13716_v15  ;;  %v16655_v15 = vld [vmem:[#allocation5 + $0x71c] sm:$0xf0]  ;;  %v16601_v9 = vld [vmem:[#allocation5 + $0x56c] sm:$0xf0]  ;;  %v12567_v12 = vld [vmem:[#allocation5 + $0x9a8] sm:$0xf] }
 0x147   :  { %5924 = vmatpush.bf16.msra.mxu3 %v14292_v11  ;;  %v12208_v31 = vor.u32 %v16655_v15, %v12207_v13  ;;  %v16745_v13 = vld [vmem:[#allocation5 + $0x9ec] sm:$0xf0] }
 0x148   :  { %5883 = vmatpush.bf16.msra.mxu0 %v12492_v26  ;;  %v5661_v11 = vpop.f32.mrf.mxu0  ;;  %v12784_v26 = vor.u32 %v16799_v17, %v12783_v10  ;;  %v16889_v15 = vld [vmem:[#allocation5 + $0xe6c] sm:$0xf0]  ;;  %v11416_v10 = vor.u32 %v16457_v1, %v11415_v4  ;;  %v11343_v17 = vld [vmem:[#allocation5 + $0x18] sm:$0xf] }
 0x149   :  { %5897 = vmatpush.bf16.msra.mxu1 %v13068_v29  ;;  %v5662_v24 = vadd.f32 %v5661_v11, %v18188_v2  ;;  %v5675_v27 = vpop.f32.mrf.mxu1  ;;  %v12135_v29 = vld [vmem:[#allocation5 + $0x648] sm:$0xf]  ;;  %v16925_v2 = vld [vmem:[#allocation5 + $0xf8c] sm:$0xf0]  ;;  %v16439_v11 = vld [vmem:[#allocation5 + $0x5c] sm:$0xf0] }
 0x14a   :  { %5911 = vmatpush.bf16.msra.mxu2 %v13644_v30  ;;  %v13360_v30 = vor.u32 %v16943_v21, %v13359_v20  ;;  %v12136_v47 = vor.u32 %v16637_v16, %v12135_v29  ;;  %v12568_v21 = vor.u32 %v16745_v13, %v12567_v12  ;;  %v14151_v29 = vld [vmem:[#allocation5 + $0x1608] sm:$0xf]  ;;  %v17105_v12 = vld [vmem:[#allocation5 + $0x152c] sm:$0xf0] }
 0x14b   :  { %5925 = vmatpush.bf16.msra.mxu3 %v14220_v34  ;;  %5884 = vmatmul.bf16.vlgmr.msra.gmra.mxu0 %v18104_v22  ;;  %v18203_v32 = vadd.f32 %v5675_v27, %v5662_v24  ;;  %v12711_v34 = vld [vmem:[#allocation5 + $0xac8] sm:$0xf]  ;;  %v11919_v24 = vld [vmem:[#allocation5 + $0x498] sm:$0xf]  ;;  %v16727_v27 = vld [vmem:[#allocation5 + $0x95c] sm:$0xf0] }
 0x14c   :  { %5932 = vmatpush.bf16.msrb.mxu0 %v11848_v36  ;;  %5898 = vmatmul.bf16.vlgmr.msra.gmra.mxu1 %v18106_v23  ;;  %v16781_v36 = vld [vmem:[#allocation5 + $0xb0c] sm:$0xf0]  ;;  %v14727_v16 = vld [vmem:[#allocation5 + $0x1a88] sm:$0xf] }
 0x14d   :  { %5946 = vmatpush.bf16.msrb.mxu1 %v12424_v38  ;;  %5912 = vmatmul.bf16.vlgmr.msra.gmra.mxu2 %v18110_v35  ;;  %v13287_v38 = vld [vmem:[#allocation5 + $0xf48] sm:$0xf] }
 0x14e   :  { %5960 = vmatpush.bf16.msrb.mxu2 %v13000_v40  ;;  %5926 = vmatmul.bf16.vlgmr.msra.gmra.mxu3 %v18112_v39  ;;  %v18205_v40 = vld [vmem:[#allocation7] sm:$0xff]  ;;  %v13288_v50 = vor.u32 %v16925_v2, %v13287_v38  ;;  %v16556_v38 = vld [vmem:[#allocation5 + $0x40c] sm:$0xf]  ;;  %v11849_v2 = vld [vmem:[#allocation5 + $0x450] sm:$0xf0] }
 0x14f   :  { %5974 = vmatpush.bf16.msrb.mxu3 %v13576_v37  ;;  %19112 = vst [vmem:[#allocation24_spill] sm:$0xff] %v18205_v40  ;;  %v1045_v42 = vperm.slane %v18205_v40, 3  ;;  %v12712_v37 = vor.u32 %v16781_v36, %v12711_v34  ;;  %v11344_v34 = vor.u32 %v16439_v11, %v11343_v17  ;;  %v17285_v36 = vld [vmem:[#allocation5 + $0x1acc] sm:$0xf0]  ;;  %v11852_v51 = vor.u32 %v16556_v38, %v11849_v2  ;;  %v14583_v13 = vld [vmem:[#allocation5 + $0x1968] sm:$0xf] }
 0x150   :  { %5933 = vmatpush.bf16.msrb.mxu0 %v11776_v53  ;;  %v12639_v53 = vld [vmem:[#allocation5 + $0xa38] sm:$0xf]  ;;  %v11705_v17 = vld [vmem:[#allocation5 + $0x330] sm:$0xf0]  ;;  %v16664_v11 = vld [vmem:[#allocation5 + $0x76c] sm:$0xf] }
 0x151   :  { %5947 = vmatpush.bf16.msrb.mxu1 %v12352_v55  ;;  %v16763_v55 = vld [vmem:[#allocation5 + $0xa7c] sm:$0xf0]  ;;  %v5703_v63 = vpop.f32.mrf.mxu3  ;;  %v18214_v4 = vpop.f32.mrf.mxu1 }
 0x152   :  { %5961 = vmatpush.bf16.msrb.mxu2 %v12928_v56  ;;  %v5689_v56 = vpop.f32.mrf.mxu2  ;;  %v12640_v3 = vor.u32 %v16763_v55, %v12639_v53  ;;  %v14079_v53 = vld [vmem:[#allocation5 + $0x1578] sm:$0xf]  ;;  %v17123_v55 = vld [vmem:[#allocation5 + $0x15bc] sm:$0xf0] }
 0x153   :  { %5975 = vmatpush.bf16.msrb.mxu3 %v13504_v62  ;;  %v5690_v61 = vadd.f32 %v5689_v56, %v1045_v42  ;;  %v11488_v62 = vor.u32 %v16475_v49, %v11487_v48  ;;  %v12425_v48 = vld [vmem:[#allocation5 + $0x8d0] sm:$0xf0]  ;;  %v13072_v49 = vor.u32 %v16871_v28, %v13071_v44  ;;  %v14655_v56 = vld [vmem:[#allocation5 + $0x19f8] sm:$0xf]  ;;  %v14080_v1 = vor.u32 %v17123_v55, %v14079_v53  ;;  %v17087_v28 = vld [vmem:[#allocation5 + $0x149c] sm:$0xf0] }
 0x154   :  { %5934 = vmatpush.bf16.msrb.mxu0 %v11704_v7  ;;  %v11991_v7 = vld [vmem:[#allocation5 + $0x528] sm:$0xf]  ;;  %v13935_v44 = vld [vmem:[#allocation5 + $0x1458] sm:$0xf] }
 0x155   :  { %5948 = vmatpush.bf16.msrb.mxu1 %v12280_v54  ;;  %v18210_v54 = vadd.f32 %v5703_v63, %v5690_v61  ;;  %v11992_v20 = vor.u32 %v16601_v9, %v11991_v7  ;;  %v16538_v61 = vld [vmem:[#allocation5 + $0x37c] sm:$0xf]  ;;  %v18212_v63 = vpop.f32.mrf.mxu0  ;;  %v14007_v9 = vld [vmem:[#allocation5 + $0x14e8] sm:$0xf] }
 0x156   :  { %5962 = vmatpush.bf16.msrb.mxu2 %v12856_v8  ;;  %v13216_v8 = vor.u32 %v16907_v60, %v13215_v58  ;;  %v17267_v60 = vld [vmem:[#allocation5 + $0x1a3c] sm:$0xf0] }
 0x157   :  { %5976 = vmatpush.bf16.msrb.mxu3 %v13432_v14  ;;  %v13143_v14 = vld [vmem:[#allocation5 + $0xe28] sm:$0xf]  ;;  %v14656_v7 = vor.u32 %v17267_v60, %v14655_v56  ;;  %v17213_v56 = vld [vmem:[#allocation5 + $0x188c] sm:$0xf0]  ;;  %v16628_v60 = vld [vmem:[#allocation5 + $0x64c] sm:$0xf] }
 0x158   :  { %5935 = vmatpush.bf16.msrb.mxu0 %v11632_v25  ;;  %v16583_v25 = vld [vmem:[#allocation5 + $0x4dc] sm:$0xf0] }
 0x159   :  { %5949 = vmatpush.bf16.msrb.mxu1 %v12208_v31  ;;  %v12495_v31 = vld [vmem:[#allocation5 + $0x918] sm:$0xf] }
 0x15a   :  { %5963 = vmatpush.bf16.msrb.mxu2 %v12784_v26  ;;  %v13144_v26 = vor.u32 %v16889_v15, %v13143_v14  ;;  %v17249_v15 = vld [vmem:[#allocation5 + $0x19ac] sm:$0xf0] }
 0x15b   :  { %5977 = vmatpush.bf16.msrb.mxu3 %v13360_v30  ;;  %v17141_v30 = vld [vmem:[#allocation5 + $0x164c] sm:$0xf0] }
 0x15c   :  { %5936 = vmatpush.bf16.msrb.mxu0 %v11560_v45  ;;  %v11920_v45 = vor.u32 %v16583_v25, %v11919_v24  ;;  %v14152_v59 = vor.u32 %v17141_v30, %v14151_v29  ;;  %v14008_v24 = vor.u32 %v17105_v12, %v14007_v9  ;;  %v5691_v25 = vpop.f32.mrf.mxu2  ;;  %v14511_v29 = vld [vmem:[#allocation5 + $0x18d8] sm:$0xf]  ;;  %v17195_v9 = vld [vmem:[#allocation5 + $0x17fc] sm:$0xf0] }
 0x15d   :  { %5950 = vmatpush.bf16.msrb.mxu1 %v12136_v47  ;;  %v12496_v47 = vor.u32 %v16727_v27, %v12495_v31  ;;  %v14584_v31 = vor.u32 %v17249_v15, %v14583_v13  ;;  %v5705_v27 = vpop.f32.mrf.mxu3  ;;  %v11489_v15 = vld [vmem:[#allocation5 + $0x180] sm:$0xf0] }
 0x15e   :  { %5964 = vmatpush.bf16.msrb.mxu2 %v12712_v37  ;;  %v16700_v37 = vld [vmem:[#allocation5 + $0x88c] sm:$0xf] }
 0x15f   :  { %5978 = vmatpush.bf16.msrb.mxu3 %v13288_v50  ;;  %v14728_v50 = vor.u32 %v17285_v36, %v14727_v16  ;;  %v12428_v58 = vor.u32 %v16700_v37, %v12425_v48  ;;  %v17231_v16 = vld [vmem:[#allocation5 + $0x191c] sm:$0xf0]  ;;  %v5692_v37 = vadd.f32 %v5691_v25, %v1045_v42 }
 0x160   :  { %5937 = vmatpush.bf16.msrb.mxu0 %v11488_v62  ;;  %v11777_v62 = vld [vmem:[#allocation5 + $0x3c0] sm:$0xf0]  ;;  %v14512_v48 = vor.u32 %v17231_v16, %v14511_v29  ;;  %v14295_v29 = vld [vmem:[#allocation5 + $0x1728] sm:$0xf] }
 0x161   :  { %5951 = vmatpush.bf16.msrb.mxu1 %v12064_v0  ;;  %v16682_v0 = vld [vmem:[#allocation5 + $0x7fc] sm:$0xf] }
 0x162   :  { %5965 = vmatpush.bf16.msrb.mxu2 %v12640_v3  ;;  %v12353_v3 = vld [vmem:[#allocation5 + $0x840] sm:$0xf0] }
 0x163   :  { %5979 = vmatpush.bf16.msrb.mxu3 %v13216_v8  ;;  %v11780_v8 = vor.u32 %v16538_v61, %v11777_v62  ;;  %v12356_v14 = vor.u32 %v16682_v0, %v12353_v3  ;;  %v13791_v0 = vld [vmem:[#allocation5 + $0x1338] sm:$0xf]  ;;  %v5706_v3 = vadd.f32 %v5705_v27, %v5692_v37 }
 0x164   :  { %5938 = vmatpush.bf16.msrb.mxu0 %v11416_v10  ;;  %v16520_v10 = vld [vmem:[#allocation5 + $0x2ec] sm:$0xf] }
 0x165   :  { %5952 = vmatpush.bf16.msrb.mxu1 %v11992_v20  ;;  %v12281_v20 = vld [vmem:[#allocation5 + $0x7b0] sm:$0xf0] }
 0x166   :  { %5966 = vmatpush.bf16.msrb.mxu2 %v12568_v21  ;;  %v5608_v21 = vadd.f32 %v18190_v41, %v1044_v19  ;;  %v12284_v30 = vor.u32 %v16664_v11, %v12281_v20  ;;  %v16646_v19 = vld [vmem:[#allocation5 + $0x6dc] sm:$0xf]  ;;  %v12209_v41 = vld [vmem:[#allocation5 + $0x720] sm:$0xf0] }
 0x167   :  { %5980 = vmatpush.bf16.msrb.mxu3 %v13144_v26  ;;  %v11708_v26 = vor.u32 %v16520_v10, %v11705_v17  ;;  %v12212_v53 = vor.u32 %v16646_v19, %v12209_v41  ;;  %v12065_v20 = vld [vmem:[#allocation5 + $0x600] sm:$0xf0]  ;;  %v16592_v19 = vld [vmem:[#allocation5 + $0x52c] sm:$0xf]  ;;  %v11993_v41 = vld [vmem:[#allocation5 + $0x570] sm:$0xf0] }
 0x168   :  { %5939 = vmatpush.bf16.msrb.mxu0 %v11344_v34  ;;  %v16502_v34 = vld [vmem:[#allocation5 + $0x25c] sm:$0xf]  ;;  %v5717_v36 = vpop.f32.mrf.mxu0  ;;  %v5622_v38 = vadd.f32 %v18192_v52, %v5608_v21  ;;  %v16484_v52 = vld [vmem:[#allocation5 + $0x1cc] sm:$0xf] }
 0x169   :  { %5953 = vmatpush.bf16.msrb.mxu1 %v11920_v45  ;;  %v5718_v2 = vadd.f32 %v5717_v36, %v18210_v54  ;;  %v13936_v45 = vor.u32 %v17087_v28, %v13935_v44  ;;  %v12137_v54 = vld [vmem:[#allocation5 + $0x690] sm:$0xf0]  ;;  %v13719_v44 = vld [vmem:[#allocation5 + $0x12a8] sm:$0xf]  ;;  %v17033_v28 = vld [vmem:[#allocation5 + $0x12ec] sm:$0xf0] }
 0x16a   :  { %5967 = vmatpush.bf16.msrb.mxu2 %v12496_v47  ;;  %v5731_v47 = vpop.f32.mrf.mxu1  ;;  %v5636_v61 = vadd.f32 %v18198_v18, %v5622_v38  ;;  %v12140_v12 = vor.u32 %v16628_v60, %v12137_v54  ;;  %v16610_v18 = vld [vmem:[#allocation5 + $0x5bc] sm:$0xf]  ;;  %v11417_v36 = vld [vmem:[#allocation5 + $0xf0] sm:$0xf0]  ;;  %v16844_v60 = vld [vmem:[#allocation5 + $0xd0c] sm:$0xf] }
 0x16b   :  { %5981 = vmatpush.bf16.msrb.mxu3 %v13072_v49  ;;  %5940 = vmatmul.bf16.vlgmr.msrb.gmra.mxu0 %v18098_v57  ;;  %v11636_v49 = vor.u32 %v16502_v34, %v11633_v46  ;;  %v5732_v55 = vadd.f32 %v5731_v47, %v5718_v2  ;;  %v17177_v34 = vld [vmem:[#allocation5 + $0x176c] sm:$0xf0]  ;;  %v16448_v46 = vld [vmem:[#allocation5 + $0xac] sm:$0xf]  ;;  %v13720_v2 = vor.u32 %v17033_v28, %v13719_v44  ;;  %v17015_v47 = vld [vmem:[#allocation5 + $0x125c] sm:$0xf0] }
 0x16c   :  { %5988 = vmatpush.bf16.msra.mxu0 %v14152_v59  ;;  %5954 = vmatmul.bf16.vlgmr.msrb.gmra.mxu1 %v18101_v6  ;;  %v13863_v59 = vld [vmem:[#allocation5 + $0x13c8] sm:$0xf]  ;;  %v5650_v21 = vadd.f32 %v18201_v33, %v5636_v61  ;;  %v13001_v54 = vld [vmem:[#allocation5 + $0xd50] sm:$0xf0]  ;;  %v16988_v61 = vld [vmem:[#allocation5 + $0x118c] sm:$0xf] }
 0x16d   :  { %6002 = vmatpush.bf16.msra.mxu1 %v14728_v50  ;;  %5968 = vmatmul.bf16.vlgmr.msrb.gmra.mxu2 %v18104_v22  ;;  %v17069_v50 = vld [vmem:[#allocation5 + $0x140c] sm:$0xf0] }
 0x16e   :  { %6016 = vmatpush.bf16.msra.mxu2 %v11852_v51  ;;  %5982 = vmatmul.bf16.vlgmr.msrb.gmra.mxu3 %v18106_v23  ;;  %v14439_v51 = vld [vmem:[#allocation5 + $0x1848] sm:$0xf]  ;;  %v13864_v62 = vor.u32 %v17069_v50, %v13863_v59  ;;  %v5664_v38 = vadd.f32 %v18212_v63, %v5650_v21  ;;  %v14223_v59 = vld [vmem:[#allocation5 + $0x1698] sm:$0xf]  ;;  %v17159_v50 = vld [vmem:[#allocation5 + $0x16dc] sm:$0xf0] }
 0x16f   :  { %6030 = vmatpush.bf16.msra.mxu3 %v12428_v58  ;;  %v11561_v58 = vld [vmem:[#allocation5 + $0x210] sm:$0xf0]  ;;  %v14440_v42 = vor.u32 %v17213_v56, %v14439_v51  ;;  %v16430_v51 = vld [vmem:[#allocation5 + $0x1c] sm:$0xf]  ;;  %v11345_v56 = vld [vmem:[#allocation5 + $0x60] sm:$0xf0] }
 0x170   :  { %5989 = vmatpush.bf16.msra.mxu0 %v14080_v1  ;;  %v11564_v1 = vor.u32 %v16484_v52, %v11561_v58  ;;  %v5745_v13 = vpop.f32.mrf.mxu2  ;;  %v5719_v17 = vpop.f32.mrf.mxu0  ;;  %v11921_v52 = vld [vmem:[#allocation5 + $0x4e0] sm:$0xf0] }
 0x171   :  { %6003 = vmatpush.bf16.msra.mxu1 %v14656_v7  ;;  %v17051_v7 = vld [vmem:[#allocation5 + $0x137c] sm:$0xf0]  ;;  %v5746_v10 = vadd.f32 %v5745_v13, %v5732_v55  ;;  %v5759_v11 = vpop.f32.mrf.mxu3  ;;  %v14729_v13 = vld [vmem:[#allocation5 + $0x1ad0] sm:$0xf0] }
 0x172   :  { %6017 = vmatpush.bf16.msra.mxu2 %v11780_v8  ;;  %v14367_v8 = vld [vmem:[#allocation5 + $0x17b8] sm:$0xf]  ;;  %v5733_v16 = vpop.f32.mrf.mxu1 }
 0x173   :  { %6031 = vmatpush.bf16.msra.mxu3 %v12356_v14  ;;  %v16466_v14 = vld [vmem:[#allocation5 + $0x13c] sm:$0xf]  ;;  %v14368_v25 = vor.u32 %v17195_v9, %v14367_v8  ;;  %v14224_v8 = vor.u32 %v17159_v50, %v14223_v59  ;;  %v11348_v9 = vor.u32 %v16430_v51, %v11345_v56  ;;  %v12785_v59 = vld [vmem:[#allocation5 + $0xba0] sm:$0xf0] }
 0x174   :  { %5990 = vmatpush.bf16.msra.mxu0 %v14008_v24  ;;  %v13792_v24 = vor.u32 %v17051_v7, %v13791_v0  ;;  %v11492_v27 = vor.u32 %v16466_v14, %v11489_v15  ;;  %v13004_v15 = vor.u32 %v16844_v60, %v13001_v54  ;;  %v16934_v50 = vld [vmem:[#allocation5 + $0xfdc] sm:$0xf]  ;;  %v13937_v56 = vld [vmem:[#allocation5 + $0x14a0] sm:$0xf0] }
 0x175   :  { %6004 = vmatpush.bf16.msra.mxu1 %v14584_v31  ;;  %v5720_v31 = vadd.f32 %v5719_v17, %v5706_v3  ;;  %v13577_v3 = vld [vmem:[#allocation5 + $0x11d0] sm:$0xf0] }
 0x176   :  { %6018 = vmatpush.bf16.msra.mxu2 %v11708_v26  ;;  %v5760_v26 = vadd.f32 %v5759_v11, %v5746_v10  ;;  %v13580_v10 = vor.u32 %v16988_v61, %v13577_v3  ;;  %v16826_v11 = vld [vmem:[#allocation5 + $0xc7c] sm:$0xf]  ;;  %v16916_v3 = vld [vmem:[#allocation5 + $0xf4c] sm:$0xf] }
 0x177   :  { %6032 = vmatpush.bf16.msra.mxu3 %v12284_v30  ;;  %v12068_v30 = vor.u32 %v16610_v18, %v12065_v20  ;;  %v5734_v37 = vadd.f32 %v5733_v16, %v5720_v31  ;;  %v12929_v18 = vld [vmem:[#allocation5 + $0xcc0] sm:$0xf0]  ;;  %v12857_v16 = vld [vmem:[#allocation5 + $0xc30] sm:$0xf0] }
 0x178   :  { %5991 = vmatpush.bf16.msra.mxu0 %v13936_v45  ;;  %v18230_v33 = vpack.c.bf16 %v5760_v26, %v18203_v32  ;;  %v13647_v45 = vld [vmem:[#allocation5 + $0x1218] sm:$0xf]  ;;  %v5747_v55 = vpop.f32.mrf.mxu2  ;;  %v16574_v32 = vld [vmem:[#allocation5 + $0x49c] sm:$0xf]  ;;  %v14081_v31 = vld [vmem:[#allocation5 + $0x15c0] sm:$0xf0]  ;;  %v12932_v44 = vor.u32 %v16826_v11, %v12929_v18 }
 0x179   :  { %6005 = vmatpush.bf16.msra.mxu1 %v14512_v48  ;;  %v14296_v48 = vor.u32 %v17177_v34, %v14295_v29  ;;  %v5748_v58 = vadd.f32 %v5747_v55, %v5734_v37  ;;  %v5761_v63 = vpop.f32.mrf.mxu3  ;;  %v13648_v0 = vor.u32 %v17015_v47, %v13647_v45  ;;  %v11924_v14 = vor.u32 %v16574_v32, %v11921_v52  ;;  %v17258_v26 = vld [vmem:[#allocation5 + $0x19fc] sm:$0xf]  ;;  %v16952_v34 = vld [vmem:[#allocation5 + $0x106c] sm:$0xf]  ;;  %v14513_v52 = vld [vmem:[#allocation5 + $0x1920] sm:$0xf0] }
 0x17a   :  { %6019 = vmatpush.bf16.msra.mxu2 %v11636_v49  ;;  %v11420_v49 = vor.u32 %v16448_v46, %v11417_v36  ;;  %v13433_v36 = vld [vmem:[#allocation5 + $0x10b0] sm:$0xf0]  ;;  %v19096_v47 = vperm.slane %v18205_v40, 4  ;;  %v17078_v55 = vld [vmem:[#allocation5 + $0x145c] sm:$0xf] }
 0x17b   :  { %6033 = vmatpush.bf16.msra.mxu3 %v12212_v53  ;;  %v11996_v53 = vor.u32 %v16592_v19, %v11993_v41  ;;  %v5762_v7 = vadd.f32 %v5761_v63, %v5748_v58  ;;  %v17096_v19 = vld [vmem:[#allocation5 + $0x14ec] sm:$0xf]  ;;  %v14009_v41 = vld [vmem:[#allocation5 + $0x1530] sm:$0xf0]  ;;  %v13436_v37 = vor.u32 %v16952_v34, %v13433_v36  ;;  %v17222_v32 = vld [vmem:[#allocation5 + $0x18dc] sm:$0xf]  ;;  %v13940_v61 = vor.u32 %v17078_v55, %v13937_v56 }
 0x17c   :  { %5992 = vmatpush.bf16.msra.mxu0 %v13864_v62  ;;  %v5678_v62 = vadd.f32 %v18214_v4, %v5664_v38  ;;  %v16970_v4 = vld [vmem:[#allocation5 + $0x10fc] sm:$0xf]  ;;  %v17240_v38 = vld [vmem:[#allocation5 + $0x196c] sm:$0xf]  ;;  %v12641_v18 = vld [vmem:[#allocation5 + $0xa80] sm:$0xf0] }
 0x17d   :  { %6006 = vmatpush.bf16.msra.mxu1 %v14440_v42  ;;  %v17132_v42 = vld [vmem:[#allocation5 + $0x160c] sm:$0xf]  ;;  %v16754_v11 = vld [vmem:[#allocation5 + $0xa3c] sm:$0xf]  ;;  %v12569_v36 = vld [vmem:[#allocation5 + $0x9f0] sm:$0xf0] }
 0x17e   :  { %6020 = vmatpush.bf16.msra.mxu2 %v11564_v1  ;;  %v14153_v1 = vld [vmem:[#allocation5 + $0x1650] sm:$0xf0]  ;;  %v18234_v20 = vpack.c.bf16 %v5762_v7, %v5678_v62  ;;  %v16772_v62 = vld [vmem:[#allocation5 + $0xacc] sm:$0xf]  ;;  %v16862_v56 = vld [vmem:[#allocation5 + $0xd9c] sm:$0xf] }
 0x17f   :  { %6034 = vmatpush.bf16.msra.mxu3 %v12140_v12  ;;  %v17276_v12 = vld [vmem:[#allocation5 + $0x1a8c] sm:$0xf]  ;;  %v14156_v17 = vor.u32 %v17132_v42, %v14153_v1  ;;  %v14516_v1 = vor.u32 %v17222_v32, %v14513_v52  ;;  %v13289_v7 = vld [vmem:[#allocation5 + $0xf90] sm:$0xf0]  ;;  %v13073_v32 = vld [vmem:[#allocation5 + $0xde0] sm:$0xf0] }
 0x180   :  { %5993 = vmatpush.bf16.msra.mxu0 %v13792_v24  ;;  %19113 = vst [vmem:[#allocation25_spill] sm:$0xff] %v18234_v20  ;;  %v14732_v21 = vor.u32 %v17276_v12, %v14729_v13  ;;  %v13505_v24 = vld [vmem:[#allocation5 + $0x1140] sm:$0xf0]  ;;  %v17204_v13 = vld [vmem:[#allocation5 + $0x184c] sm:$0xf] }
 0x181   :  { %6007 = vmatpush.bf16.msra.mxu1 %v14368_v25  ;;  %v17114_v25 = vld [vmem:[#allocation5 + $0x157c] sm:$0xf]  ;;  %v13508_v28 = vor.u32 %v16970_v4, %v13505_v24  ;;  %v13217_v24 = vld [vmem:[#allocation5 + $0xf00] sm:$0xf0] }
 0x182   :  { %6021 = vmatpush.bf16.msra.mxu2 %v11492_v27  ;;  %v14657_v27 = vld [vmem:[#allocation5 + $0x1a40] sm:$0xf0]  ;;  %v14084_v29 = vor.u32 %v17114_v25, %v14081_v31  ;;  %v16898_v4 = vld [vmem:[#allocation5 + $0xebc] sm:$0xf] }
 0x183   :  { %6035 = vmatpush.bf16.msra.mxu3 %v12068_v30  ;;  %v16808_v30 = vld [vmem:[#allocation5 + $0xbec] sm:$0xf]  ;;  %v14660_v46 = vor.u32 %v17258_v26, %v14657_v27  ;;  %v17042_v25 = vld [vmem:[#allocation5 + $0x133c] sm:$0xf]  ;;  %v13793_v31 = vld [vmem:[#allocation5 + $0x1380] sm:$0xf0] }
 0x184   :  { %5994 = vmatpush.bf16.msra.mxu0 %v13720_v2  ;;  %v14585_v2 = vld [vmem:[#allocation5 + $0x19b0] sm:$0xf0]  ;;  %v12860_v45 = vor.u32 %v16808_v30, %v12857_v16  ;;  %v17186_v27 = vld [vmem:[#allocation5 + $0x17bc] sm:$0xf]  ;;  %v13220_v16 = vor.u32 %v16898_v4, %v13217_v24  ;;  %v13796_v34 = vor.u32 %v17042_v25, %v13793_v31  ;;  %v16548_v4 = vld [vmem:[#allocation5 + $0x3c4] sm:$0xf0] }
 0x185   :  { %6008 = vmatpush.bf16.msra.mxu1 %v14296_v48  ;;  %v14012_v48 = vor.u32 %v17096_v19, %v14009_v41  ;;  %v14588_v51 = vor.u32 %v17240_v38, %v14585_v2  ;;  %v16880_v19 = vld [vmem:[#allocation5 + $0xe2c] sm:$0xf]  ;;  %v13145_v2 = vld [vmem:[#allocation5 + $0xe70] sm:$0xf0]  ;;  %v17006_v52 = vld [vmem:[#allocation5 + $0x121c] sm:$0xf] }
 0x186   :  { %6022 = vmatpush.bf16.msra.mxu2 %v11420_v49  ;;  %v16790_v49 = vld [vmem:[#allocation5 + $0xb5c] sm:$0xf]  ;;  %v16692_v25 = vld [vmem:[#allocation5 + $0x844] sm:$0xf0]  ;;  %v12935_v31 = vld [vmem:[#allocation5 + $0xc80] sm:$0xf] }
 0x187   :  { %6036 = vmatpush.bf16.msra.mxu3 %v11996_v53  ;;  %v13361_v53 = vld [vmem:[#allocation5 + $0x1020] sm:$0xf0]  ;;  %v12788_v63 = vor.u32 %v16790_v49, %v12785_v59  ;;  %v14297_v49 = vld [vmem:[#allocation5 + $0x1770] sm:$0xf0] }
 0x188   :  { %5995 = vmatpush.bf16.msra.mxu0 %v13648_v0  ;;  %v5773_v58 = vpop.f32.mrf.mxu0  ;;  %v13364_v54 = vor.u32 %v16934_v50, %v13361_v53  ;;  %v12713_v0 = vld [vmem:[#allocation5 + $0xb10] sm:$0xf0]  ;;  %v16718_v50 = vld [vmem:[#allocation5 + $0x91c] sm:$0xf]  ;;  %v13148_v53 = vor.u32 %v16880_v19, %v13145_v2  ;;  %v12863_v2 = vld [vmem:[#allocation5 + $0xbf0] sm:$0xf] }
 0x189   :  { %6009 = vmatpush.bf16.msra.mxu1 %v14224_v8  ;;  %v5774_v60 = vadd.f32 %v5773_v58, %v19096_v47  ;;  %v5787_v42 = vpop.f32.mrf.mxu1  ;;  %v17060_v8 = vld [vmem:[#allocation5 + $0x13cc] sm:$0xf]  ;;  %v11793_v47 = vld [vmem:[#allocation5 + $0x3d0] sm:$0xf0] }
 0x18a   :  { %6023 = vmatpush.bf16.msra.mxu2 %v11348_v9  ;;  %v13865_v9 = vld [vmem:[#allocation5 + $0x1410] sm:$0xf0] }
 0x18b   :  { %6037 = vmatpush.bf16.msra.mxu3 %v11924_v14  ;;  %5996 = vmatmul.bf16.vlgmr.msra.gmra.mxu0 %v18110_v35  ;;  %v5788_v12 = vadd.f32 %v5787_v42, %v5774_v60  ;;  %v14441_v14 = vld [vmem:[#allocation5 + $0x1890] sm:$0xf0]  ;;  %v17150_v60 = vld [vmem:[#allocation5 + $0x169c] sm:$0xf]  ;;  %v16710_v42 = vld [vmem:[#allocation5 + $0x8d4] sm:$0xf0] }
 0x18c   :  { %6044 = vmatpush.bf16.msrb.mxu0 %v13004_v15  ;;  %6010 = vmatmul.bf16.vlgmr.msra.gmra.mxu1 %v18112_v39  ;;  %v12716_v15 = vor.u32 %v16772_v62, %v12713_v0  ;;  %v16566_v62 = vld [vmem:[#allocation5 + $0x454] sm:$0xf0]  ;;  %v12431_v0 = vld [vmem:[#allocation5 + $0x890] sm:$0xf] }
 0x18d   :  { %6058 = vmatpush.bf16.msrb.mxu1 %v13580_v10  ;;  %6024 = vmatmul.bf16.vlgmr.msra.gmra.mxu2 %v18098_v57  ;;  %v13292_v10 = vor.u32 %v16916_v3, %v13289_v7  ;;  %v16854_v7 = vld [vmem:[#allocation5 + $0xd54] sm:$0xf0] }
 0x18e   :  { %6072 = vmatpush.bf16.msrb.mxu2 %v14156_v17  ;;  %6038 = vmatmul.bf16.vlgmr.msra.gmra.mxu3 %v18101_v6  ;;  %v13868_v17 = vor.u32 %v17060_v8, %v13865_v9  ;;  %v13076_v8 = vor.u32 %v16862_v56, %v13073_v32  ;;  %v16656_v32 = vld [vmem:[#allocation5 + $0x724] sm:$0xf0] }
 0x18f   :  { %6086 = vmatpush.bf16.msrb.mxu3 %v14732_v21  ;;  %v14444_v21 = vor.u32 %v17204_v13, %v14441_v14  ;;  %v16998_v13 = vld [vmem:[#allocation5 + $0x11d4] sm:$0xf0] }
 0x190   :  { %6045 = vmatpush.bf16.msrb.mxu0 %v12932_v44  ;;  %v5801_v26 = vpop.f32.mrf.mxu2  ;;  %v14369_v44 = vld [vmem:[#allocation5 + $0x1800] sm:$0xf0] }
 0x191   :  { %6059 = vmatpush.bf16.msrb.mxu1 %v13508_v28  ;;  %v5802_v28 = vadd.f32 %v5801_v26, %v5788_v12  ;;  %v5815_v30 = vpop.f32.mrf.mxu3  ;;  %v14372_v38 = vor.u32 %v17186_v27, %v14369_v44  ;;  %v13583_v12 = vld [vmem:[#allocation5 + $0x1190] sm:$0xf]  ;;  %v16836_v26 = vld [vmem:[#allocation5 + $0xcc4] sm:$0xf0]  ;;  %v13511_v27 = vld [vmem:[#allocation5 + $0x1100] sm:$0xf] }
 0x192   :  { %6073 = vmatpush.bf16.msrb.mxu2 %v14084_v29  ;;  %v12644_v29 = vor.u32 %v16754_v11, %v12641_v18  ;;  %v18245_v11 = vpop.f32.mrf.mxu0  ;;  %v11783_v18 = vld [vmem:[#allocation5 + $0x380] sm:$0xf]  ;;  %v13584_v24 = vor.u32 %v16998_v13, %v13583_v12  ;;  %v16980_v44 = vld [vmem:[#allocation5 + $0x1144] sm:$0xf0]  ;;  %v12143_v12 = vld [vmem:[#allocation5 + $0x650] sm:$0xf] }
 0x193   :  { %6087 = vmatpush.bf16.msrb.mxu3 %v14660_v46  ;;  %v16736_v46 = vld [vmem:[#allocation5 + $0x9ac] sm:$0xf]  ;;  %v18243_v41 = vadd.f32 %v5815_v30, %v5802_v28  ;;  %19114 = vst [vmem:[#allocation26_spill] sm:$0xff] %v18245_v11  ;;  %v18247_v28 = vpop.f32.mrf.mxu1  ;;  %v13512_v19 = vor.u32 %v16980_v44, %v13511_v27  ;;  %v12071_v27 = vld [vmem:[#allocation5 + $0x5c0] sm:$0xf] }
 0x194   :  { %6046 = vmatpush.bf16.msrb.mxu0 %v12860_v45  ;;  %v17024_v45 = vld [vmem:[#allocation5 + $0x12ac] sm:$0xf]  ;;  %v12572_v59 = vor.u32 %v16736_v46, %v12569_v36  ;;  %19115 = vst [vmem:[#allocation27_spill] sm:$0xff] %v18247_v28  ;;  %v16530_v46 = vld [vmem:[#allocation5 + $0x334] sm:$0xf0] }
 0x195   :  { %6060 = vmatpush.bf16.msrb.mxu1 %v13436_v37  ;;  %v13721_v37 = vld [vmem:[#allocation5 + $0x12f0] sm:$0xf0]  ;;  %v12287_v36 = vld [vmem:[#allocation5 + $0x770] sm:$0xf]  ;;  %v14695_v28 = vld [vmem:[#allocation5 + $0x1a20] sm:$0xf] }
 0x196   :  { %6074 = vmatpush.bf16.msrb.mxu2 %v14012_v48  ;;  %v17168_v48 = vld [vmem:[#allocation5 + $0x172c] sm:$0xf]  ;;  %v13724_v55 = vor.u32 %v17024_v45, %v13721_v37  ;;  %v16818_v45 = vld [vmem:[#allocation5 + $0xc34] sm:$0xf0]  ;;  %v13439_v37 = vld [vmem:[#allocation5 + $0x1070] sm:$0xf] }
 0x197   :  { %6088 = vmatpush.bf16.msrb.mxu3 %v14588_v51  ;;  %v12497_v51 = vld [vmem:[#allocation5 + $0x960] sm:$0xf0]  ;;  %v14300_v58 = vor.u32 %v17168_v48, %v14297_v49  ;;  %v16962_v48 = vld [vmem:[#allocation5 + $0x10b4] sm:$0xf0] }
 0x198   :  { %6047 = vmatpush.bf16.msrb.mxu0 %v12788_v63  ;;  %v13649_v63 = vld [vmem:[#allocation5 + $0x1260] sm:$0xf0]  ;;  %v12500_v3 = vor.u32 %v16718_v50, %v12497_v51  ;;  %v12864_v50 = vor.u32 %v16818_v45, %v12863_v2  ;;  %v11639_v51 = vld [vmem:[#allocation5 + $0x260] sm:$0xf]  ;;  %v13440_v56 = vor.u32 %v16962_v48, %v13439_v37  ;;  %v11423_v48 = vld [vmem:[#allocation5 + $0xb0] sm:$0xf] }
 0x199   :  { %6061 = vmatpush.bf16.msrb.mxu1 %v13364_v54  ;;  %v14225_v54 = vld [vmem:[#allocation5 + $0x16e0] sm:$0xf0]  ;;  %v13652_v9 = vor.u32 %v17006_v52, %v13649_v63  ;;  %v12791_v52 = vld [vmem:[#allocation5 + $0xb60] sm:$0xf]  ;;  %v18253_v63 = vpop.f32.mrf.mxu2 }
 0x19a   :  { %6075 = vmatpush.bf16.msrb.mxu2 %v13940_v61  ;;  %v11855_v61 = vld [vmem:[#allocation5 + $0x410] sm:$0xf]  ;;  %v14228_v14 = vor.u32 %v17150_v60, %v14225_v54  ;;  %19116 = vst [vmem:[#allocation28_spill] sm:$0xff] %v18253_v63  ;;  %v13367_v54 = vld [vmem:[#allocation5 + $0xfe0] sm:$0xf] }
 0x19b   :  { %6089 = vmatpush.bf16.msrb.mxu3 %v14516_v1  ;;  %v13007_v1 = vld [vmem:[#allocation5 + $0xd10] sm:$0xf] }
 0x19c   :  { %6048 = vmatpush.bf16.msrb.mxu0 %v12716_v15  ;;  %v11856_v15 = vor.u32 %v16566_v62, %v11855_v61  ;;  %v16944_v61 = vld [vmem:[#allocation5 + $0x1024] sm:$0xf0] }
 0x19d   :  { %6062 = vmatpush.bf16.msrb.mxu1 %v13292_v10  ;;  %v12432_v10 = vor.u32 %v16710_v42, %v12431_v0  ;;  %v13368_v13 = vor.u32 %v16944_v61, %v13367_v54  ;;  %v16440_v54 = vld [vmem:[#allocation5 + $0x64] sm:$0xf0] }
 0x19e   :  { %6076 = vmatpush.bf16.msrb.mxu2 %v13868_v17  ;;  %v13008_v17 = vor.u32 %v16854_v7, %v13007_v1 }
 0x19f   :  { %6090 = vmatpush.bf16.msrb.mxu3 %v14444_v21  ;;  %v12359_v21 = vld [vmem:[#allocation5 + $0x800] sm:$0xf] }
 0x1a0   :  { %6049 = vmatpush.bf16.msrb.mxu0 %v12644_v29  ;;  %v11784_v29 = vor.u32 %v16548_v4, %v11783_v18  ;;  %v12360_v30 = vor.u32 %v16692_v25, %v12359_v21  ;;  %v13295_v18 = vld [vmem:[#allocation5 + $0xf50] sm:$0xf]  ;;  %v19095_v4 = vperm.slane %v18205_v40, 5  ;;  %v12105_v40 = vld [vmem:[#allocation5 + $0x628] sm:$0xf0] }
 0x1a1   :  { %6063 = vmatpush.bf16.msrb.mxu1 %v13220_v16  ;;  %v12936_v16 = vor.u32 %v16836_v26, %v12935_v31  ;;  %v11495_v31 = vld [vmem:[#allocation5 + $0x140] sm:$0xf]  ;;  %v16476_v26 = vld [vmem:[#allocation5 + $0x184] sm:$0xf0] }
 0x1a2   :  { %6077 = vmatpush.bf16.msrb.mxu2 %v13796_v34  ;;  %v11711_v34 = vld [vmem:[#allocation5 + $0x2f0] sm:$0xf] }
 0x1a3   :  { %6091 = vmatpush.bf16.msrb.mxu3 %v14372_v38  ;;  %v16674_v38 = vld [vmem:[#allocation5 + $0x7b4] sm:$0xf0]  ;;  %v11712_v49 = vor.u32 %v16530_v46, %v11711_v34  ;;  %v13223_v46 = vld [vmem:[#allocation5 + $0xec0] sm:$0xf] }
 0x1a4   :  { %6050 = vmatpush.bf16.msrb.mxu0 %v12572_v59  ;;  %v12288_v59 = vor.u32 %v16674_v38, %v12287_v36  ;;  %v16908_v36 = vld [vmem:[#allocation5 + $0xf04] sm:$0xf0]  ;;  %v11496_v38 = vor.u32 %v16476_v26, %v11495_v31  ;;  %v16701_v31 = vld [vmem:[#allocation5 + $0x894] sm:$0xf]  ;;  %v12433_v26 = vld [vmem:[#allocation5 + $0x8d8] sm:$0xf0] }
 0x1a5   :  { %6064 = vmatpush.bf16.msrb.mxu1 %v13148_v53  ;;  %v16512_v53 = vld [vmem:[#allocation5 + $0x2a4] sm:$0xf0] }
 0x1a6   :  { %6078 = vmatpush.bf16.msrb.mxu2 %v13724_v55  ;;  %v12215_v55 = vld [vmem:[#allocation5 + $0x6e0] sm:$0xf]  ;;  %v11640_v0 = vor.u32 %v16512_v53, %v11639_v51  ;;  %v13224_v51 = vor.u32 %v16908_v36, %v13223_v46  ;;  %v16602_v53 = vld [vmem:[#allocation5 + $0x574] sm:$0xf0]  ;;  %v12436_v36 = vor.u32 %v16701_v31, %v12433_v26 }
 0x1a7   :  { %6092 = vmatpush.bf16.msrb.mxu3 %v14300_v58  ;;  %v16800_v58 = vld [vmem:[#allocation5 + $0xba4] sm:$0xf0]  ;;  %v12216_v42 = vor.u32 %v16656_v32, %v12215_v55  ;;  %v12575_v55 = vld [vmem:[#allocation5 + $0x9b0] sm:$0xf]  ;;  %v14663_v46 = vld [vmem:[#allocation5 + $0x1a00] sm:$0xf] }
 0x1a8   :  { %6051 = vmatpush.bf16.msrb.mxu0 %v12500_v3  ;;  %v5829_v60 = vpop.f32.mrf.mxu0  ;;  %v18256_v3 = vpop.f32.mrf.mxu3  ;;  %v12792_v1 = vor.u32 %v16800_v58, %v12791_v52  ;;  %v13151_v32 = vld [vmem:[#allocation5 + $0xe30] sm:$0xf]  ;;  %v16890_v52 = vld [vmem:[#allocation5 + $0xe74] sm:$0xf0] }
 0x1a9   :  { %6065 = vmatpush.bf16.msrb.mxu1 %v13076_v8  ;;  %v5830_v62 = vadd.f32 %v5829_v60, %v18243_v41  ;;  %19117 = vst [vmem:[#allocation29_spill] sm:$0xff] %v18256_v3  ;;  %v5843_v7 = vpop.f32.mrf.mxu1  ;;  %v11567_v8 = vld [vmem:[#allocation5 + $0x1d0] sm:$0xf]  ;;  %v16926_v41 = vld [vmem:[#allocation5 + $0xf94] sm:$0xf0] }
 0x1aa   :  { %6079 = vmatpush.bf16.msrb.mxu2 %v13652_v9  ;;  %v16494_v9 = vld [vmem:[#allocation5 + $0x214] sm:$0xf0]  ;;  %v13296_v44 = vor.u32 %v16926_v41, %v13295_v18  ;;  %v11351_v60 = vld [vmem:[#allocation5 + $0x20] sm:$0xf]  ;;  %v16557_v41 = vld [vmem:[#allocation5 + $0x414] sm:$0xf] }
 0x1ab   :  { %6093 = vmatpush.bf16.msrb.mxu3 %v14228_v14  ;;  %6052 = vmatmul.bf16.vlgmr.msrb.gmra.mxu0 %v18104_v22  ;;  %v18258_v14 = vadd.f32 %v5843_v7, %v5830_v62  ;;  %v11568_v21 = vor.u32 %v16494_v9, %v11567_v8  ;;  %v13152_v7 = vor.u32 %v16890_v52, %v13151_v32  ;;  %v16728_v8 = vld [vmem:[#allocation5 + $0x964] sm:$0xf0]  ;;  %v13079_v9 = vld [vmem:[#allocation5 + $0xda0] sm:$0xf]  ;;  %v17286_v18 = vld [vmem:[#allocation5 + $0x1ad4] sm:$0xf0] }
 0x1ac   :  { %6100 = vmatpush.bf16.msra.mxu0 %v11856_v15  ;;  %6066 = vmatmul.bf16.vlgmr.msrb.gmra.mxu1 %v18106_v23  ;;  %v16638_v15 = vld [vmem:[#allocation5 + $0x694] sm:$0xf0]  ;;  %v14591_v32 = vld [vmem:[#allocation5 + $0x1970] sm:$0xf]  ;;  %v16595_v3 = vld [vmem:[#allocation5 + $0x544] sm:$0xf] }
 0x1ad   :  { %6114 = vmatpush.bf16.msra.mxu1 %v12432_v10  ;;  %6080 = vmatmul.bf16.vlgmr.msrb.gmra.mxu2 %v18110_v35  ;;  %v12719_v10 = vld [vmem:[#allocation5 + $0xad0] sm:$0xf] }
 0x1ae   :  { %6128 = vmatpush.bf16.msra.mxu2 %v13008_v17  ;;  %6094 = vmatmul.bf16.vlgmr.msrb.gmra.mxu3 %v18112_v39  ;;  %v16782_v17 = vld [vmem:[#allocation5 + $0xb14] sm:$0xf0] }
 0x1af   :  { %6142 = vmatpush.bf16.msra.mxu3 %v13584_v24  ;;  %v12144_v24 = vor.u32 %v16638_v15, %v12143_v12  ;;  %v12720_v25 = vor.u32 %v16782_v17, %v12719_v10  ;;  %v16872_v12 = vld [vmem:[#allocation5 + $0xde4] sm:$0xf0]  ;;  %v17142_v15 = vld [vmem:[#allocation5 + $0x1654] sm:$0xf0]  ;;  %v14735_v10 = vld [vmem:[#allocation5 + $0x1a90] sm:$0xf]  ;;  %v11352_v17 = vor.u32 %v16440_v54, %v11351_v60 }
 0x1b0   :  { %6101 = vmatpush.bf16.msra.mxu0 %v11784_v29  ;;  %v16620_v29 = vld [vmem:[#allocation5 + $0x604] sm:$0xf0]  ;;  %v5857_v34 = vpop.f32.mrf.mxu2  ;;  %v16521_v60 = vld [vmem:[#allocation5 + $0x2f4] sm:$0xf]  ;;  %v11713_v54 = vld [vmem:[#allocation5 + $0x338] sm:$0xf0] }
 0x1b1   :  { %6115 = vmatpush.bf16.msra.mxu1 %v12360_v30  ;;  %v12647_v30 = vld [vmem:[#allocation5 + $0xa40] sm:$0xf]  ;;  %v5871_v2 = vpop.f32.mrf.mxu3  ;;  %v12072_v45 = vor.u32 %v16620_v29, %v12071_v27  ;;  %v13080_v27 = vor.u32 %v16872_v12, %v13079_v9  ;;  %v14736_v29 = vor.u32 %v17286_v18, %v14735_v10  ;;  %v17088_v12 = vld [vmem:[#allocation5 + $0x14a4] sm:$0xf0]  ;;  %v11641_v18 = vld [vmem:[#allocation5 + $0x2a8] sm:$0xf0] }
 0x1b2   :  { %6129 = vmatpush.bf16.msra.mxu2 %v12936_v16  ;;  %v16764_v16 = vld [vmem:[#allocation5 + $0xa84] sm:$0xf0]  ;;  %v13943_v9 = vld [vmem:[#allocation5 + $0x1460] sm:$0xf] }
 0x1b3   :  { %6143 = vmatpush.bf16.msra.mxu3 %v13512_v19  ;;  %v5858_v19 = vadd.f32 %v5857_v34, %v19095_v4  ;;  %v12648_v37 = vor.u32 %v16764_v16, %v12647_v30  ;;  %v14087_v16 = vld [vmem:[#allocation5 + $0x1580] sm:$0xf]  ;;  %v17124_v34 = vld [vmem:[#allocation5 + $0x15c4] sm:$0xf0]  ;;  %v13944_v31 = vor.u32 %v17088_v12, %v13943_v9 }
 0x1b4   :  { %6102 = vmatpush.bf16.msra.mxu0 %v11712_v49  ;;  %v16458_v49 = vld [vmem:[#allocation5 + $0xf4] sm:$0xf0]  ;;  %v17232_v10 = vld [vmem:[#allocation5 + $0x1924] sm:$0xf0] }
 0x1b5   :  { %6116 = vmatpush.bf16.msra.mxu1 %v12288_v59  ;;  %v11999_v59 = vld [vmem:[#allocation5 + $0x530] sm:$0xf]  ;;  %v11424_v58 = vor.u32 %v16458_v49, %v11423_v48  ;;  %v12361_v48 = vld [vmem:[#allocation5 + $0x848] sm:$0xf0]  ;;  %v14088_v49 = vor.u32 %v17124_v34, %v14087_v16  ;;  %v14671_v4 = vld [vmem:[#allocation5 + $0x1a08] sm:$0xf] }
 0x1b6   :  { %6130 = vmatpush.bf16.msra.mxu2 %v12864_v50  ;;  %v18263_v50 = vadd.f32 %v5871_v2, %v5858_v19  ;;  %v12000_v61 = vor.u32 %v16602_v53, %v11999_v59  ;;  %v17268_v19 = vld [vmem:[#allocation5 + $0x1a44] sm:$0xf0]  ;;  %v11785_v2 = vld [vmem:[#allocation5 + $0x3c8] sm:$0xf0]  ;;  %v18267_v59 = vpop.f32.mrf.mxu1  ;;  %v14447_v16 = vld [vmem:[#allocation5 + $0x1850] sm:$0xf] }
 0x1b7   :  { %6144 = vmatpush.bf16.msra.mxu3 %v13440_v56  ;;  %v16746_v56 = vld [vmem:[#allocation5 + $0x9f4] sm:$0xf0]  ;;  %19119 = vst [vmem:[#allocation31_spill] sm:$0xff] %v18267_v59 }
 0x1b8   :  { %6103 = vmatpush.bf16.msra.mxu0 %v11640_v0  ;;  %v12576_v62 = vor.u32 %v16746_v56, %v12575_v55  ;;  %v11927_v0 = vld [vmem:[#allocation5 + $0x4a0] sm:$0xf]  ;;  %v14015_v55 = vld [vmem:[#allocation5 + $0x14f0] sm:$0xf]  ;;  %v17106_v56 = vld [vmem:[#allocation5 + $0x1534] sm:$0xf0] }
 0x1b9   :  { %6117 = vmatpush.bf16.msra.mxu1 %v12216_v42  ;;  %v16584_v42 = vld [vmem:[#allocation5 + $0x4e4] sm:$0xf0] }
 0x1ba   :  { %6131 = vmatpush.bf16.msra.mxu2 %v12792_v1  ;;  %v12503_v1 = vld [vmem:[#allocation5 + $0x920] sm:$0xf] }
 0x1bb   :  { %6145 = vmatpush.bf16.msra.mxu3 %v13368_v13  ;;  %v14159_v13 = vld [vmem:[#allocation5 + $0x1610] sm:$0xf] }
 0x1bc   :  { %6104 = vmatpush.bf16.msra.mxu0 %v11568_v21  ;;  %v11857_v21 = vld [vmem:[#allocation5 + $0x458] sm:$0xf0] }
 0x1bd   :  { %6118 = vmatpush.bf16.msra.mxu1 %v12144_v24  ;;  %v11928_v24 = vor.u32 %v16584_v42, %v11927_v0  ;;  %v11860_v30 = vor.u32 %v16557_v41, %v11857_v21  ;;  %v14016_v0 = vor.u32 %v17106_v56, %v14015_v55  ;;  %v18272_v42 = vpop.f32.mrf.mxu2  ;;  %v16647_v21 = vld [vmem:[#allocation5 + $0x6e4] sm:$0xf]  ;;  %v14375_v55 = vld [vmem:[#allocation5 + $0x17c0] sm:$0xf] }
 0x1be   :  { %6132 = vmatpush.bf16.msra.mxu2 %v12720_v25  ;;  %v12504_v25 = vor.u32 %v16728_v8, %v12503_v1  ;;  %19120 = vst [vmem:[#allocation32_spill] sm:$0xff] %v18272_v42  ;;  %v18275_v8 = vpop.f32.mrf.mxu3 }
 0x1bf   :  { %6146 = vmatpush.bf16.msra.mxu3 %v13296_v44  ;;  %v14160_v44 = vor.u32 %v17142_v15, %v14159_v13  ;;  %19121 = vst [vmem:[#allocation33_spill] sm:$0xff] %v18275_v8  ;;  %v14519_v13 = vld [vmem:[#allocation5 + $0x18e0] sm:$0xf]  ;;  %v17128_v8 = vld [vmem:[#allocation5 + $0x15e4] sm:$0xf0] }
 0x1c0   :  { %6105 = vmatpush.bf16.msra.mxu0 %v11496_v38  ;;  %v16539_v38 = vld [vmem:[#allocation5 + $0x384] sm:$0xf]  ;;  %v14520_v26 = vor.u32 %v17232_v10, %v14519_v13  ;;  %v13727_v13 = vld [vmem:[#allocation5 + $0x12b0] sm:$0xf] }
 0x1c1   :  { %6119 = vmatpush.bf16.msra.mxu1 %v12072_v45  ;;  %v18265_v45 = vpop.f32.mrf.mxu0  ;;  %v11788_v53 = vor.u32 %v16539_v38, %v11785_v2  ;;  %v11569_v38 = vld [vmem:[#allocation5 + $0x218] sm:$0xf0]  ;;  %v16629_v2 = vld [vmem:[#allocation5 + $0x654] sm:$0xf]  ;;  %v14303_v10 = vld [vmem:[#allocation5 + $0x1730] sm:$0xf] }
 0x1c2   :  { %6133 = vmatpush.bf16.msra.mxu2 %v12648_v37  ;;  %19118 = vst [vmem:[#allocation30_spill] sm:$0xff] %v18265_v45  ;;  %v16683_v37 = vld [vmem:[#allocation5 + $0x804] sm:$0xf]  ;;  %v16541_v45 = vld [vmem:[#allocation5 + $0x394] sm:$0xf] }
 0x1c3   :  { %6147 = vmatpush.bf16.msra.mxu3 %v13224_v51  ;;  %v14664_v51 = vor.u32 %v17268_v19, %v14663_v46  ;;  %v12364_v52 = vor.u32 %v16683_v37, %v12361_v48  ;;  %v16485_v19 = vld [vmem:[#allocation5 + $0x1d4] sm:$0xf]  ;;  %v12145_v37 = vld [vmem:[#allocation5 + $0x698] sm:$0xf0] }
 0x1c4   :  { %6106 = vmatpush.bf16.msra.mxu0 %v11424_v58  ;;  %v17250_v58 = vld [vmem:[#allocation5 + $0x19b4] sm:$0xf0]  ;;  %v12148_v56 = vor.u32 %v16629_v2, %v12145_v37  ;;  %v11929_v2 = vld [vmem:[#allocation5 + $0x4e8] sm:$0xf0]  ;;  %v13009_v37 = vld [vmem:[#allocation5 + $0xd58] sm:$0xf0] }
 0x1c5   :  { %6120 = vmatpush.bf16.msra.mxu1 %v12000_v61  ;;  %v16665_v61 = vld [vmem:[#allocation5 + $0x774] sm:$0xf]  ;;  %v14592_v1 = vor.u32 %v17250_v58, %v14591_v32  ;;  %v16467_v58 = vld [vmem:[#allocation5 + $0x144] sm:$0xf] }
 0x1c6   :  { %6134 = vmatpush.bf16.msra.mxu2 %v12576_v62  ;;  %v12289_v62 = vld [vmem:[#allocation5 + $0x7b8] sm:$0xf0] }
 0x1c7   :  { %6148 = vmatpush.bf16.msra.mxu3 %v13152_v7  ;;  %v11716_v7 = vor.u32 %v16521_v60, %v11713_v54  ;;  %v12292_v15 = vor.u32 %v16665_v61, %v12289_v62  ;;  %v11497_v60 = vld [vmem:[#allocation5 + $0x188] sm:$0xf0]  ;;  %v16611_v62 = vld [vmem:[#allocation5 + $0x5c4] sm:$0xf] }
 0x1c8   :  { %6107 = vmatpush.bf16.msra.mxu0 %v11352_v17  ;;  %v16503_v17 = vld [vmem:[#allocation5 + $0x264] sm:$0xf]  ;;  %v11500_v12 = vor.u32 %v16467_v58, %v11497_v60 }
 0x1c9   :  { %6121 = vmatpush.bf16.msra.mxu1 %v11928_v24  ;;  %v5885_v41 = vpop.f32.mrf.mxu0  ;;  %v12217_v24 = vld [vmem:[#allocation5 + $0x728] sm:$0xf0] }
 0x1ca   :  { %6135 = vmatpush.bf16.msra.mxu2 %v12504_v25  ;;  %v5886_v25 = vadd.f32 %v5885_v41, %v18263_v50  ;;  %v12220_v34 = vor.u32 %v16647_v21, %v12217_v24  ;;  %v16449_v41 = vld [vmem:[#allocation5 + $0xb4] sm:$0xf]  ;;  %v11425_v21 = vld [vmem:[#allocation5 + $0xf8] sm:$0xf0] }
 0x1cb   :  { %6149 = vmatpush.bf16.msra.mxu3 %v13080_v27  ;;  %6108 = vmatmul.bf16.vlgmr.msra.gmra.mxu0 %v18098_v57  ;;  %v11644_v27 = vor.u32 %v16503_v17, %v11641_v18  ;;  %v17178_v18 = vld [vmem:[#allocation5 + $0x1774] sm:$0xf0] }
 0x1cc   :  { %6156 = vmatpush.bf16.msrb.mxu0 %v14160_v44  ;;  %6122 = vmatmul.bf16.vlgmr.msra.gmra.mxu1 %v18101_v6  ;;  %v5899_v44 = vpop.f32.mrf.mxu1 }
 0x1cd   :  { %6170 = vmatpush.bf16.msrb.mxu1 %v14736_v29  ;;  %6136 = vmatmul.bf16.vlgmr.msra.gmra.mxu2 %v18104_v22  ;;  %v13871_v29 = vld [vmem:[#allocation5 + $0x13d0] sm:$0xf]  ;;  %v5900_v46 = vadd.f32 %v5899_v44, %v5886_v25  ;;  %v16593_v25 = vld [vmem:[#allocation5 + $0x534] sm:$0xf]  ;;  %v17016_v44 = vld [vmem:[#allocation5 + $0x1264] sm:$0xf0] }
 0x1ce   :  { %6184 = vmatpush.bf16.msrb.mxu2 %v11860_v30  ;;  %6150 = vmatmul.bf16.vlgmr.msra.gmra.mxu3 %v18106_v23  ;;  %v17070_v30 = vld [vmem:[#allocation5 + $0x1414] sm:$0xf0] }
 0x1cf   :  { %6198 = vmatpush.bf16.msrb.mxu3 %v12436_v36  ;;  %v17214_v36 = vld [vmem:[#allocation5 + $0x1894] sm:$0xf0]  ;;  %v13872_v48 = vor.u32 %v17070_v30, %v13871_v29  ;;  %v14304_v29 = vor.u32 %v17178_v18, %v14303_v10  ;;  %v11428_v30 = vor.u32 %v16449_v41, %v11425_v21  ;;  %v17259_v10 = vld [vmem:[#allocation5 + $0x1a04] sm:$0xf] }
 0x1d0   :  { %6157 = vmatpush.bf16.msrb.mxu0 %v14088_v49  ;;  %v14448_v50 = vor.u32 %v17214_v36, %v14447_v16  ;;  %v11572_v49 = vor.u32 %v16485_v19, %v11569_v38  ;;  %v5913_v32 = vpop.f32.mrf.mxu2  ;;  %v14231_v16 = vld [vmem:[#allocation5 + $0x16a0] sm:$0xf]  ;;  %v11353_v19 = vld [vmem:[#allocation5 + $0x68] sm:$0xf0]  ;;  %v16575_v38 = vld [vmem:[#allocation5 + $0x4a4] sm:$0xf] }
 0x1d1   :  { %6171 = vmatpush.bf16.msrb.mxu1 %v14664_v51  ;;  %v13799_v51 = vld [vmem:[#allocation5 + $0x1340] sm:$0xf]  ;;  %v5914_v54 = vadd.f32 %v5913_v32, %v5900_v46  ;;  %v5927_v61 = vpop.f32.mrf.mxu3  ;;  %v16431_v46 = vld [vmem:[#allocation5 + $0x24] sm:$0xf]  ;;  %v17277_v32 = vld [vmem:[#allocation5 + $0x1a94] sm:$0xf]  ;;  %v11932_v58 = vor.u32 %v16575_v38, %v11929_v2 }
 0x1d2   :  { %6185 = vmatpush.bf16.msrb.mxu2 %v11788_v53  ;;  %v17052_v53 = vld [vmem:[#allocation5 + $0x1384] sm:$0xf0] }
 0x1d3   :  { %6199 = vmatpush.bf16.msrb.mxu3 %v12364_v52  ;;  %v17196_v52 = vld [vmem:[#allocation5 + $0x1804] sm:$0xf0] }
 0x1d4   :  { %6158 = vmatpush.bf16.msrb.mxu0 %v14016_v0  ;;  %v12073_v0 = vld [vmem:[#allocation5 + $0x608] sm:$0xf0]  ;;  %v14376_v9 = vor.u32 %v17196_v52, %v14375_v55  ;;  %v14737_v52 = vld [vmem:[#allocation5 + $0x1ad8] sm:$0xf0]  ;;  %v18283_v41 = vpop.f32.mrf.mxu1 }
 0x1d5   :  { %6172 = vmatpush.bf16.msrb.mxu1 %v14592_v1  ;;  %v13800_v1 = vor.u32 %v17052_v53, %v13799_v51  ;;  %v12076_v17 = vor.u32 %v16611_v62, %v12073_v0  ;;  %v17133_v51 = vld [vmem:[#allocation5 + $0x1614] sm:$0xf]  ;;  %v14161_v53 = vld [vmem:[#allocation5 + $0x1658] sm:$0xf0]  ;;  %v16827_v62 = vld [vmem:[#allocation5 + $0xc84] sm:$0xf] }
 0x1d6   :  { %6186 = vmatpush.bf16.msrb.mxu2 %v11716_v7  ;;  %v5928_v7 = vadd.f32 %v5927_v61, %v5914_v54  ;;  %v14164_v61 = vor.u32 %v17133_v51, %v14161_v53  ;;  %v12937_v0 = vld [vmem:[#allocation5 + $0xcc8] sm:$0xf0]  ;;  %19124 = vst [vmem:[#allocation36_spill] sm:$0xff] %v18283_v41  ;;  %v11513_v41 = vld [vmem:[#allocation5 + $0x198] sm:$0xf0] }
 0x1d7   :  { %6200 = vmatpush.bf16.msrb.mxu3 %v12292_v15  ;;  %v17034_v15 = vld [vmem:[#allocation5 + $0x12f4] sm:$0xf0]  ;;  %v12940_v18 = vor.u32 %v16827_v62, %v12937_v0  ;;  %v13369_v53 = vld [vmem:[#allocation5 + $0x1028] sm:$0xf0] }
 0x1d8   :  { %6159 = vmatpush.bf16.msrb.mxu0 %v13944_v31  ;;  %v18279_v24 = vpack.c.bf16 %v5928_v7, %v18258_v14  ;;  %v12001_v31 = vld [vmem:[#allocation5 + $0x578] sm:$0xf0]  ;;  %v16845_v14 = vld [vmem:[#allocation5 + $0xd14] sm:$0xf]  ;;  %v14740_v7 = vor.u32 %v17277_v32, %v14737_v52  ;;  %v17223_v32 = vld [vmem:[#allocation5 + $0x18e4] sm:$0xf] }
 0x1d9   :  { %6173 = vmatpush.bf16.msrb.mxu1 %v14520_v26  ;;  %v13728_v26 = vor.u32 %v17034_v15, %v13727_v13  ;;  %v12004_v36 = vor.u32 %v16593_v25, %v12001_v31  ;;  %v13012_v60 = vor.u32 %v16845_v14, %v13009_v37  ;;  %v14089_v13 = vld [vmem:[#allocation5 + $0x15c8] sm:$0xf0]  ;;  %v18281_v15 = vpop.f32.mrf.mxu0  ;;  %v16809_v31 = vld [vmem:[#allocation5 + $0xbf4] sm:$0xf]  ;;  %v16791_v37 = vld [vmem:[#allocation5 + $0xb64] sm:$0xf] }
 0x1da   :  { %6187 = vmatpush.bf16.msrb.mxu2 %v11644_v27  ;;  %19122 = vst [vmem:[#allocation34_spill] sm:$0xff] %v18279_v24  ;;  %v13655_v27 = vld [vmem:[#allocation5 + $0x1220] sm:$0xf]  ;;  %v14521_v52 = vld [vmem:[#allocation5 + $0x1928] sm:$0xf0] }
 0x1db   :  { %6201 = vmatpush.bf16.msrb.mxu3 %v12220_v34  ;;  %v17160_v34 = vld [vmem:[#allocation5 + $0x16e4] sm:$0xf0]  ;;  %19123 = vst [vmem:[#allocation35_spill] sm:$0xff] %v18281_v15  ;;  %v12017_v15 = vld [vmem:[#allocation5 + $0x588] sm:$0xf0] }
 0x1dc   :  { %6160 = vmatpush.bf16.msrb.mxu0 %v13872_v48  ;;  %v16989_v48 = vld [vmem:[#allocation5 + $0x1194] sm:$0xf]  ;;  %v14232_v55 = vor.u32 %v17160_v34, %v14231_v16  ;;  %v14017_v16 = vld [vmem:[#allocation5 + $0x1538] sm:$0xf0] }
 0x1dd   :  { %6174 = vmatpush.bf16.msrb.mxu1 %v14448_v50  ;;  %v13656_v50 = vor.u32 %v17016_v44, %v13655_v27  ;;  %v16953_v27 = vld [vmem:[#allocation5 + $0x1074] sm:$0xf] }
 0x1de   :  { %6188 = vmatpush.bf16.msrb.mxu2 %v11572_v49  ;;  %v13585_v49 = vld [vmem:[#allocation5 + $0x11d8] sm:$0xf0]  ;;  %v17241_v34 = vld [vmem:[#allocation5 + $0x1974] sm:$0xf] }
 0x1df   :  { %6202 = vmatpush.bf16.msrb.mxu3 %v12148_v56  ;;  %v11356_v56 = vor.u32 %v16431_v46, %v11353_v19  ;;  %v13588_v54 = vor.u32 %v16989_v48, %v13585_v49  ;;  %v14593_v46 = vld [vmem:[#allocation5 + $0x19b8] sm:$0xf0]  ;;  %v18289_v19 = vld [vmem:[#allocation7] sm:$0xff]  ;;  %v12793_v48 = vld [vmem:[#allocation5 + $0xba8] sm:$0xf0]  ;;  %v18292_v49 = vpop.f32.mrf.mxu2 }
 0x1e0   :  { %6161 = vmatpush.bf16.msrb.mxu0 %v13800_v1  ;;  %v16971_v1 = vld [vmem:[#allocation5 + $0x1104] sm:$0xf]  ;;  %v1048_v38 = vperm.slane %v18289_v19, 6  ;;  %19125 = vst [vmem:[#allocation37_spill] sm:$0xff] %v18292_v49  ;;  %v14596_v51 = vor.u32 %v17241_v34, %v14593_v46  ;;  %v13225_v46 = vld [vmem:[#allocation5 + $0xf08] sm:$0xf0] }
 0x1e1   :  { %6175 = vmatpush.bf16.msrb.mxu1 %v14376_v9  ;;  %v13513_v9 = vld [vmem:[#allocation5 + $0x1148] sm:$0xf0] }
 0x1e2   :  { %6189 = vmatpush.bf16.msrb.mxu2 %v11500_v12  ;;  %v17115_v12 = vld [vmem:[#allocation5 + $0x1584] sm:$0xf]  ;;  %v13516_v21 = vor.u32 %v16971_v1, %v13513_v9  ;;  %v16773_v1 = vld [vmem:[#allocation5 + $0xad4] sm:$0xf]  ;;  %v11585_v49 = vld [vmem:[#allocation5 + $0x228] sm:$0xf0] }
 0x1e3   :  { %6203 = vmatpush.bf16.msrb.mxu3 %v12076_v17  ;;  %v14665_v17 = vld [vmem:[#allocation5 + $0x1a48] sm:$0xf0]  ;;  %v14092_v25 = vor.u32 %v17115_v12, %v14089_v13  ;;  %v16917_v9 = vld [vmem:[#allocation5 + $0xf54] sm:$0xf]  ;;  %v14524_v13 = vor.u32 %v17223_v32, %v14521_v52  ;;  %v12577_v52 = vld [vmem:[#allocation5 + $0x9f8] sm:$0xf0] }
 0x1e4   :  { %6162 = vmatpush.bf16.msrb.mxu0 %v13728_v26  ;;  %v12865_v26 = vld [vmem:[#allocation5 + $0xc38] sm:$0xf0]  ;;  %v14668_v44 = vor.u32 %v17259_v10, %v14665_v17  ;;  %v17061_v17 = vld [vmem:[#allocation5 + $0x13d4] sm:$0xf] }
 0x1e5   :  { %6176 = vmatpush.bf16.msrb.mxu1 %v14304_v29  ;;  %v13441_v29 = vld [vmem:[#allocation5 + $0x10b8] sm:$0xf0]  ;;  %v16737_v32 = vld [vmem:[#allocation5 + $0x9b4] sm:$0xf] }
 0x1e6   :  { %6190 = vmatpush.bf16.msrb.mxu2 %v11428_v30  ;;  %v17097_v30 = vld [vmem:[#allocation5 + $0x14f4] sm:$0xf]  ;;  %v13444_v2 = vor.u32 %v16953_v27, %v13441_v29  ;;  %v13297_v10 = vld [vmem:[#allocation5 + $0xf98] sm:$0xf0]  ;;  %v16755_v29 = vld [vmem:[#allocation5 + $0xa44] sm:$0xf] }
 0x1e7   :  { %6204 = vmatpush.bf16.msrb.mxu3 %v12004_v36  ;;  %v12868_v36 = vor.u32 %v16809_v31, %v12865_v26  ;;  %v14020_v14 = vor.u32 %v17097_v30, %v14017_v16  ;;  %v14449_v31 = vld [vmem:[#allocation5 + $0x1898] sm:$0xf0]  ;;  %v13300_v27 = vor.u32 %v16917_v9, %v13297_v10  ;;  %v12649_v30 = vld [vmem:[#allocation5 + $0xa88] sm:$0xf0]  ;;  %v16899_v16 = vld [vmem:[#allocation5 + $0xec4] sm:$0xf] }
 0x1e8   :  { %6163 = vmatpush.bf16.msrb.mxu0 %v13656_v50  ;;  %v16935_v50 = vld [vmem:[#allocation5 + $0xfe4] sm:$0xf]  ;;  %v14305_v9 = vld [vmem:[#allocation5 + $0x1778] sm:$0xf0]  ;;  %v12505_v10 = vld [vmem:[#allocation5 + $0x968] sm:$0xf0] }
 0x1e9   :  { %6177 = vmatpush.bf16.msrb.mxu1 %v14232_v55  ;;  %v17079_v55 = vld [vmem:[#allocation5 + $0x1464] sm:$0xf]  ;;  %v13372_v62 = vor.u32 %v16935_v50, %v13369_v53  ;;  %v5955_v12 = vpop.f32.mrf.mxu1 }
 0x1ea   :  { %6191 = vmatpush.bf16.msrb.mxu2 %v11356_v56  ;;  %v13945_v56 = vld [vmem:[#allocation5 + $0x14a8] sm:$0xf0] }
 0x1eb   :  { %6205 = vmatpush.bf16.msrb.mxu3 %v11932_v58  ;;  %6164 = vmatmul.bf16.vlgmr.msrb.gmra.mxu0 %v18110_v35  ;;  %v5941_v58 = vpop.f32.mrf.mxu0  ;;  %v13948_v0 = vor.u32 %v17079_v55, %v13945_v56  ;;  %v13228_v55 = vor.u32 %v16899_v16, %v13225_v46  ;;  %v16567_v16 = vld [vmem:[#allocation5 + $0x45c] sm:$0xf0] }
 0x1ec   :  { %6212 = vmatpush.bf16.msra.mxu0 %v13012_v60  ;;  %6178 = vmatmul.bf16.vlgmr.msrb.gmra.mxu1 %v18112_v39  ;;  %v18294_v60 = vpop.f32.mrf.mxu3 }
 0x1ed   :  { %6226 = vmatpush.bf16.msra.mxu1 %v13588_v54  ;;  %6192 = vmatmul.bf16.vlgmr.msrb.gmra.mxu2 %v18098_v57  ;;  %19126 = vst [vmem:[#allocation38_spill] sm:$0xff] %v18294_v60  ;;  %v12796_v54 = vor.u32 %v16791_v37, %v12793_v48  ;;  %v17187_v37 = vld [vmem:[#allocation5 + $0x17c4] sm:$0xf]  ;;  %v14377_v48 = vld [vmem:[#allocation5 + $0x1808] sm:$0xf0] }
 0x1ee   :  { %6240 = vmatpush.bf16.msra.mxu2 %v14164_v61  ;;  %6206 = vmatmul.bf16.vlgmr.msrb.gmra.mxu3 %v18101_v6  ;;  %v5942_v61 = vadd.f32 %v5941_v58, %v1048_v38  ;;  %v16881_v58 = vld [vmem:[#allocation5 + $0xe34] sm:$0xf]  ;;  %v17270_v60 = vld [vmem:[#allocation5 + $0x1a54] sm:$0xf0] }
 0x1ef   :  { %6254 = vmatpush.bf16.msra.mxu3 %v14740_v7  ;;  %v12721_v7 = vld [vmem:[#allocation5 + $0xb18] sm:$0xf0] }
 0x1f0   :  { %6213 = vmatpush.bf16.msra.mxu0 %v12940_v18  ;;  %v13873_v18 = vld [vmem:[#allocation5 + $0x1418] sm:$0xf0]  ;;  %v12724_v26 = vor.u32 %v16773_v1, %v12721_v7  ;;  %v17169_v7 = vld [vmem:[#allocation5 + $0x1734] sm:$0xf] }
 0x1f1   :  { %6227 = vmatpush.bf16.msra.mxu1 %v13516_v21  ;;  %v5956_v21 = vadd.f32 %v5955_v12, %v5942_v61  ;;  %v14380_v61 = vor.u32 %v17187_v37, %v14377_v48  ;;  %v13729_v1 = vld [vmem:[#allocation5 + $0x12f8] sm:$0xf0]  ;;  %v12580_v12 = vor.u32 %v16737_v32, %v12577_v52 }
 0x1f2   :  { %6241 = vmatpush.bf16.msra.mxu2 %v14092_v25  ;;  %v17205_v25 = vld [vmem:[#allocation5 + $0x1854] sm:$0xf] }
 0x1f3   :  { %6255 = vmatpush.bf16.msra.mxu3 %v14668_v44  ;;  %v13876_v44 = vor.u32 %v17061_v17, %v13873_v18  ;;  %v14452_v34 = vor.u32 %v17205_v25, %v14449_v31  ;;  %v13081_v25 = vld [vmem:[#allocation5 + $0xde8] sm:$0xf0]  ;;  %v17007_v31 = vld [vmem:[#allocation5 + $0x1224] sm:$0xf]  ;;  %v18300_v52 = vpop.f32.mrf.mxu0 }
 0x1f4   :  { %6214 = vmatpush.bf16.msra.mxu0 %v12868_v36  ;;  %v17043_v36 = vld [vmem:[#allocation5 + $0x1344] sm:$0xf]  ;;  %v5983_v53 = vpop.f32.mrf.mxu3 }
 0x1f5   :  { %6228 = vmatpush.bf16.msra.mxu1 %v13444_v2  ;;  %v13801_v2 = vld [vmem:[#allocation5 + $0x1388] sm:$0xf0] }
 0x1f6   :  { %6242 = vmatpush.bf16.msra.mxu2 %v14020_v14  ;;  %v5969_v14 = vpop.f32.mrf.mxu2  ;;  %v13804_v56 = vor.u32 %v17043_v36, %v13801_v2  ;;  %v16711_v36 = vld [vmem:[#allocation5 + $0x8dc] sm:$0xf0]  ;;  %v13015_v2 = vld [vmem:[#allocation5 + $0xd18] sm:$0xf] }
 0x1f7   :  { %6256 = vmatpush.bf16.msra.mxu3 %v14596_v51  ;;  %v5970_v50 = vadd.f32 %v5969_v14, %v5956_v21  ;;  %v12652_v51 = vor.u32 %v16755_v29, %v12649_v30  ;;  %v16863_v21 = vld [vmem:[#allocation5 + $0xda4] sm:$0xf]  ;;  %v14233_v29 = vld [vmem:[#allocation5 + $0x16e8] sm:$0xf0]  ;;  %v11863_v30 = vld [vmem:[#allocation5 + $0x418] sm:$0xf] }
 0x1f8   :  { %6215 = vmatpush.bf16.msra.mxu0 %v12796_v54  ;;  %v16855_v14 = vld [vmem:[#allocation5 + $0xd5c] sm:$0xf0]  ;;  %v13084_v37 = vor.u32 %v16863_v21, %v13081_v25  ;;  %v11719_v25 = vld [vmem:[#allocation5 + $0x2f8] sm:$0xf] }
 0x1f9   :  { %6229 = vmatpush.bf16.msra.mxu1 %v13372_v62  ;;  %v18298_v54 = vadd.f32 %v5983_v53, %v5970_v50  ;;  %v13153_v62 = vld [vmem:[#allocation5 + $0xe78] sm:$0xf0]  ;;  %v13591_v50 = vld [vmem:[#allocation5 + $0x1198] sm:$0xf]  ;;  %v13016_v32 = vor.u32 %v16855_v14, %v13015_v2  ;;  %v11647_v14 = vld [vmem:[#allocation5 + $0x268] sm:$0xf] }
 0x1fa   :  { %6243 = vmatpush.bf16.msra.mxu2 %v13948_v0  ;;  %v17025_v0 = vld [vmem:[#allocation5 + $0x12b4] sm:$0xf]  ;;  %v13156_v17 = vor.u32 %v16881_v58, %v13153_v62  ;;  %v11791_v58 = vld [vmem:[#allocation5 + $0x388] sm:$0xf] }
 0x1fb   :  { %6257 = vmatpush.bf16.msra.mxu3 %v14524_v13  ;;  %v16719_v13 = vld [vmem:[#allocation5 + $0x924] sm:$0xf]  ;;  %v13732_v18 = vor.u32 %v17025_v0, %v13729_v1  ;;  %v12367_v62 = vld [vmem:[#allocation5 + $0x808] sm:$0xf]  ;;  %v16693_v1 = vld [vmem:[#allocation5 + $0x84c] sm:$0xf0] }
 0x1fc   :  { %6216 = vmatpush.bf16.msra.mxu0 %v12724_v26  ;;  %v14308_v26 = vor.u32 %v17169_v7, %v14305_v9  ;;  %v12508_v46 = vor.u32 %v16719_v13, %v12505_v10  ;;  %v12943_v7 = vld [vmem:[#allocation5 + $0xc88] sm:$0xf]  ;;  %v16837_v9 = vld [vmem:[#allocation5 + $0xccc] sm:$0xf0]  ;;  %v18302_v10 = vpop.f32.mrf.mxu1 }
 0x1fd   :  { %6230 = vmatpush.bf16.msra.mxu1 %v13300_v27  ;;  %v13657_v27 = vld [vmem:[#allocation5 + $0x1268] sm:$0xf0]  ;;  %v16981_v13 = vld [vmem:[#allocation5 + $0x114c] sm:$0xf0]  ;;  %v12944_v21 = vor.u32 %v16837_v9, %v12943_v7 }
 0x1fe   :  { %6244 = vmatpush.bf16.msra.mxu2 %v13876_v44  ;;  %v17151_v44 = vld [vmem:[#allocation5 + $0x16a4] sm:$0xf]  ;;  %v13660_v48 = vor.u32 %v17007_v31, %v13657_v27  ;;  %v16531_v31 = vld [vmem:[#allocation5 + $0x33c] sm:$0xf0] }
 0x1ff   :  { %6258 = vmatpush.bf16.msra.mxu3 %v14452_v34  ;;  %v12439_v34 = vld [vmem:[#allocation5 + $0x898] sm:$0xf]  ;;  %v14236_v53 = vor.u32 %v17151_v44, %v14233_v29  ;;  %v16675_v44 = vld [vmem:[#allocation5 + $0x7bc] sm:$0xf0] }
 0x200   :  { %6217 = vmatpush.bf16.msra.mxu0 %v12652_v51  ;;  %v16999_v51 = vld [vmem:[#allocation5 + $0x11dc] sm:$0xf0]  ;;  %v12871_v29 = vld [vmem:[#allocation5 + $0xbf8] sm:$0xf] }
 0x201   :  { %6231 = vmatpush.bf16.msra.mxu1 %v13228_v55  ;;  %v11864_v55 = vor.u32 %v16567_v16, %v11863_v30  ;;  %v13592_v0 = vor.u32 %v16999_v51, %v13591_v50  ;;  %v16819_v30 = vld [vmem:[#allocation5 + $0xc3c] sm:$0xf0]  ;;  %v13447_v16 = vld [vmem:[#allocation5 + $0x1078] sm:$0xf]  ;;  %v16657_v51 = vld [vmem:[#allocation5 + $0x72c] sm:$0xf0] }
 0x202   :  { %6245 = vmatpush.bf16.msra.mxu2 %v13804_v56  ;;  %v12440_v56 = vor.u32 %v16711_v36, %v12439_v34  ;;  %v16963_v34 = vld [vmem:[#allocation5 + $0x10bc] sm:$0xf0]  ;;  %v12872_v2 = vor.u32 %v16819_v30, %v12871_v29  ;;  %v19097_v29 = vperm.slane %v18289_v19, 7 }
 0x203   :  { %6259 = vmatpush.bf16.msra.mxu3 %v14380_v61  ;;  %v16549_v61 = vld [vmem:[#allocation5 + $0x3cc] sm:$0xf0]  ;;  %v13448_v50 = vor.u32 %v16963_v34, %v13447_v16 }
 0x204   :  { %6218 = vmatpush.bf16.msra.mxu0 %v12580_v12  ;;  %v13519_v12 = vld [vmem:[#allocation5 + $0x1108] sm:$0xf] }
 0x205   :  { %6232 = vmatpush.bf16.msra.mxu1 %v13156_v17  ;;  %v11792_v17 = vor.u32 %v16549_v61, %v11791_v58  ;;  %v13520_v27 = vor.u32 %v16981_v13, %v13519_v12  ;;  %v13375_v58 = vld [vmem:[#allocation5 + $0xfe8] sm:$0xf]  ;;  %v16945_v61 = vld [vmem:[#allocation5 + $0x102c] sm:$0xf0]  ;;  %v11575_v13 = vld [vmem:[#allocation5 + $0x1d8] sm:$0xf] }
 0x206   :  { %6246 = vmatpush.bf16.msra.mxu2 %v13732_v18  ;;  %v12368_v18 = vor.u32 %v16693_v1, %v12367_v62  ;;  %v18311_v1 = vpop.f32.mrf.mxu3 }
 0x207   :  { %6260 = vmatpush.bf16.msra.mxu3 %v14308_v26  ;;  %v12295_v26 = vld [vmem:[#allocation5 + $0x778] sm:$0xf] }
 0x208   :  { %6219 = vmatpush.bf16.msra.mxu0 %v12508_v46  ;;  %v11720_v46 = vor.u32 %v16531_v31, %v11719_v25  ;;  %v12296_v36 = vor.u32 %v16675_v44, %v12295_v26  ;;  %v16639_v31 = vld [vmem:[#allocation5 + $0x69c] sm:$0xf0]  ;;  %v12727_v26 = vld [vmem:[#allocation5 + $0xad8] sm:$0xf] }
 0x209   :  { %6233 = vmatpush.bf16.msra.mxu1 %v13084_v37  ;;  %v16513_v37 = vld [vmem:[#allocation5 + $0x2ac] sm:$0xf0]  ;;  %v6011_v12 = vpop.f32.mrf.mxu1  ;;  %v13303_v44 = vld [vmem:[#allocation5 + $0xf58] sm:$0xf] }
 0x20a   :  { %6247 = vmatpush.bf16.msra.mxu2 %v13660_v48  ;;  %v12223_v48 = vld [vmem:[#allocation5 + $0x6e8] sm:$0xf] }
 0x20b   :  { %6261 = vmatpush.bf16.msra.mxu3 %v14236_v53  ;;  %6220 = vmatmul.bf16.vlgmr.msra.gmra.mxu0 %v18104_v22  ;;  %v12799_v53 = vld [vmem:[#allocation5 + $0xb68] sm:$0xf]  ;;  %v12224_v7 = vor.u32 %v16657_v51, %v12223_v48 }
 0x20c   :  { %6268 = vmatpush.bf16.msrb.mxu0 %v11864_v55  ;;  %6234 = vmatmul.bf16.vlgmr.msra.gmra.mxu1 %v18106_v23  ;;  %v16801_v55 = vld [vmem:[#allocation5 + $0xbac] sm:$0xf0]  ;;  %v12655_v48 = vld [vmem:[#allocation5 + $0xa48] sm:$0xf] }
 0x20d   :  { %6282 = vmatpush.bf16.msrb.mxu1 %v12440_v56  ;;  %6248 = vmatmul.bf16.vlgmr.msra.gmra.mxu2 %v18110_v35  ;;  %v18308_v56 = vpop.f32.mrf.mxu2  ;;  %v12800_v9 = vor.u32 %v16801_v55, %v12799_v53  ;;  %v13231_v53 = vld [vmem:[#allocation5 + $0xec8] sm:$0xf]  ;;  %v16909_v55 = vld [vmem:[#allocation5 + $0xf0c] sm:$0xf0] }
 0x20e   :  { %6296 = vmatpush.bf16.msrb.mxu2 %v13016_v32  ;;  %6262 = vmatmul.bf16.vlgmr.msra.gmra.mxu3 %v18112_v39  ;;  %v5997_v32 = vpop.f32.mrf.mxu0 }
 0x20f   :  { %6310 = vmatpush.bf16.msrb.mxu3 %v13592_v0  ;;  %v5998_v62 = vadd.f32 %v5997_v32, %v18298_v54  ;;  %v11648_v0 = vor.u32 %v16513_v37, %v11647_v14  ;;  %v16927_v54 = vld [vmem:[#allocation5 + $0xf9c] sm:$0xf0]  ;;  %v16621_v37 = vld [vmem:[#allocation5 + $0x60c] sm:$0xf0] }
 0x210   :  { %6269 = vmatpush.bf16.msrb.mxu0 %v11792_v17  ;;  %v16495_v17 = vld [vmem:[#allocation5 + $0x21c] sm:$0xf0]  ;;  %v13304_v14 = vor.u32 %v16927_v54, %v13303_v44  ;;  %v11359_v54 = vld [vmem:[#allocation5 + $0x28] sm:$0xf] }
 0x211   :  { %6283 = vmatpush.bf16.msrb.mxu1 %v12368_v18  ;;  %v12151_v18 = vld [vmem:[#allocation5 + $0x658] sm:$0xf]  ;;  %v18313_v25 = vadd.f32 %v6011_v12, %v5998_v62  ;;  %v11576_v30 = vor.u32 %v16495_v17, %v11575_v13  ;;  %v13232_v17 = vor.u32 %v16909_v55, %v13231_v53  ;;  %v17143_v53 = vld [vmem:[#allocation5 + $0x165c] sm:$0xf0] }
 0x212   :  { %6297 = vmatpush.bf16.msrb.mxu2 %v12944_v21  ;;  %v13376_v21 = vor.u32 %v16945_v61, %v13375_v58  ;;  %v12152_v16 = vor.u32 %v16639_v31, %v12151_v18  ;;  %v6039_v61 = vpop.f32.mrf.mxu3  ;;  %v12007_v12 = vld [vmem:[#allocation5 + $0x538] sm:$0xf]  ;;  %v16603_v18 = vld [vmem:[#allocation5 + $0x57c] sm:$0xf0] }
 0x213   :  { %6311 = vmatpush.bf16.msrb.mxu3 %v13520_v27  ;;  %v16783_v27 = vld [vmem:[#allocation5 + $0xb1c] sm:$0xf0]  ;;  %v14743_v55 = vld [vmem:[#allocation5 + $0x1a98] sm:$0xf] }
 0x214   :  { %6270 = vmatpush.bf16.msrb.mxu0 %v11720_v46  ;;  %v12728_v34 = vor.u32 %v16783_v27, %v12727_v26  ;;  %v11503_v46 = vld [vmem:[#allocation5 + $0x148] sm:$0xf]  ;;  %v16747_v31 = vld [vmem:[#allocation5 + $0x9fc] sm:$0xf0]  ;;  %v13159_v26 = vld [vmem:[#allocation5 + $0xe38] sm:$0xf] }
 0x215   :  { %6284 = vmatpush.bf16.msrb.mxu1 %v12296_v36  ;;  %v16477_v36 = vld [vmem:[#allocation5 + $0x18c] sm:$0xf0]  ;;  %v6025_v51 = vpop.f32.mrf.mxu2  ;;  %v16891_v27 = vld [vmem:[#allocation5 + $0xe7c] sm:$0xf0] }
 0x216   :  { %6298 = vmatpush.bf16.msrb.mxu2 %v12872_v2  ;;  %v12079_v2 = vld [vmem:[#allocation5 + $0x5c8] sm:$0xf]  ;;  %v6026_v32 = vadd.f32 %v6025_v51, %v19097_v29  ;;  %v11504_v58 = vor.u32 %v16477_v36, %v11503_v46  ;;  %v16585_v36 = vld [vmem:[#allocation5 + $0x4ec] sm:$0xf0]  ;;  %v14167_v51 = vld [vmem:[#allocation5 + $0x1618] sm:$0xf]  ;;  %v18320_v29 = vpop.f32.mrf.mxu0 }
 0x217   :  { %6312 = vmatpush.bf16.msrb.mxu3 %v13448_v50  ;;  %v16765_v50 = vld [vmem:[#allocation5 + $0xa8c] sm:$0xf0]  ;;  %v12080_v62 = vor.u32 %v16621_v37, %v12079_v2  ;;  %v11935_v46 = vld [vmem:[#allocation5 + $0x4a8] sm:$0xf]  ;;  %v13160_v37 = vor.u32 %v16891_v27, %v13159_v26 }
 0x218   :  { %6271 = vmatpush.bf16.msrb.mxu0 %v11648_v0  ;;  %v12656_v0 = vor.u32 %v16765_v50, %v12655_v48  ;;  %v18318_v13 = vadd.f32 %v6039_v61, %v6026_v32  ;;  %v12511_v2 = vld [vmem:[#allocation5 + $0x928] sm:$0xf]  ;;  %v16873_v50 = vld [vmem:[#allocation5 + $0xdec] sm:$0xf0]  ;;  %v16558_v61 = vld [vmem:[#allocation5 + $0x41c] sm:$0xf] }
 0x219   :  { %6285 = vmatpush.bf16.msrb.mxu1 %v12224_v7  ;;  %v11431_v7 = vld [vmem:[#allocation5 + $0xb8] sm:$0xf]  ;;  %v13087_v48 = vld [vmem:[#allocation5 + $0xda8] sm:$0xf]  ;;  %v17125_v27 = vld [vmem:[#allocation5 + $0x15cc] sm:$0xf0] }
 0x21a   :  { %6299 = vmatpush.bf16.msrb.mxu2 %v12800_v9  ;;  %v16459_v9 = vld [vmem:[#allocation5 + $0xfc] sm:$0xf0]  ;;  %v14095_v26 = vld [vmem:[#allocation5 + $0x1588] sm:$0xf] }
 0x21b   :  { %6313 = vmatpush.bf16.msrb.mxu3 %v13376_v21  ;;  %v12583_v21 = vld [vmem:[#allocation5 + $0x9b8] sm:$0xf]  ;;  %v11432_v44 = vor.u32 %v16459_v9, %v11431_v7  ;;  %v11865_v7 = vld [vmem:[#allocation5 + $0x460] sm:$0xf0]  ;;  %v16702_v9 = vld [vmem:[#allocation5 + $0x89c] sm:$0xf] }
 0x21c   :  { %6272 = vmatpush.bf16.msrb.mxu0 %v11576_v30  ;;  %v16441_v30 = vld [vmem:[#allocation5 + $0x6c] sm:$0xf0] }
 0x21d   :  { %6286 = vmatpush.bf16.msrb.mxu1 %v12152_v16  ;;  %v12008_v16 = vor.u32 %v16603_v18, %v12007_v12  ;;  %v11360_v32 = vor.u32 %v16441_v30, %v11359_v54  ;;  %v12441_v12 = vld [vmem:[#allocation5 + $0x8e0] sm:$0xf0]  ;;  %v14168_v18 = vor.u32 %v17143_v53, %v14167_v51  ;;  %v17269_v54 = vld [vmem:[#allocation5 + $0x1a4c] sm:$0xf0]  ;;  %v16540_v30 = vld [vmem:[#allocation5 + $0x38c] sm:$0xf] }
 0x21e   :  { %6300 = vmatpush.bf16.msrb.mxu2 %v12728_v34  ;;  %v12584_v34 = vor.u32 %v16747_v31, %v12583_v21  ;;  %v11868_v31 = vor.u32 %v16558_v61, %v11865_v7  ;;  %v17251_v53 = vld [vmem:[#allocation5 + $0x19bc] sm:$0xf0]  ;;  %v12297_v61 = vld [vmem:[#allocation5 + $0x7c0] sm:$0xf0] }
 0x21f   :  { %6314 = vmatpush.bf16.msrb.mxu3 %v13304_v14  ;;  %v16729_v14 = vld [vmem:[#allocation5 + $0x96c] sm:$0xf0] }
 0x220   :  { %6273 = vmatpush.bf16.msrb.mxu0 %v11504_v58  ;;  %v17287_v58 = vld [vmem:[#allocation5 + $0x1adc] sm:$0xf0] }
 0x221   :  { %6287 = vmatpush.bf16.msrb.mxu1 %v12080_v62  ;;  %v11936_v62 = vor.u32 %v16585_v36, %v11935_v46  ;;  %v14744_v21 = vor.u32 %v17287_v58, %v14743_v55  ;;  %v18322_v46 = vpop.f32.mrf.mxu1  ;;  %v14096_v36 = vor.u32 %v17125_v27, %v14095_v26  ;;  %v16522_v55 = vld [vmem:[#allocation5 + $0x2fc] sm:$0xf]  ;;  %v11649_v26 = vld [vmem:[#allocation5 + $0x2b0] sm:$0xf0]  ;;  %v5944_v27 = vadd.f32 %v18300_v52, %v1048_v38 }
 0x222   :  { %6301 = vmatpush.bf16.msrb.mxu2 %v12656_v0  ;;  %v12512_v0 = vor.u32 %v16729_v14, %v12511_v2  ;;  %v14672_v2 = vor.u32 %v17269_v54, %v14671_v4  ;;  %v14023_v14 = vld [vmem:[#allocation5 + $0x14f8] sm:$0xf]  ;;  %v16666_v58 = vld [vmem:[#allocation5 + $0x77c] sm:$0xf]  ;;  %v6027_v4 = vpop.f32.mrf.mxu2  ;;  %v16648_v54 = vld [vmem:[#allocation5 + $0x6ec] sm:$0xf] }
 0x223   :  { %6315 = vmatpush.bf16.msrb.mxu3 %v13232_v17  ;;  %v13088_v17 = vor.u32 %v16873_v50, %v13087_v48  ;;  %v17107_v48 = vld [vmem:[#allocation5 + $0x153c] sm:$0xf0]  ;;  %v14599_v50 = vld [vmem:[#allocation5 + $0x1978] sm:$0xf] }
 0x224   :  { %6274 = vmatpush.bf16.msrb.mxu0 %v11432_v44  ;;  %v12444_v44 = vor.u32 %v16702_v9, %v12441_v12  ;;  %v14024_v7 = vor.u32 %v17107_v48, %v14023_v14  ;;  %v13951_v9 = vld [vmem:[#allocation5 + $0x1468] sm:$0xf]  ;;  %v17089_v12 = vld [vmem:[#allocation5 + $0x14ac] sm:$0xf0] }
 0x225   :  { %6288 = vmatpush.bf16.msrb.mxu1 %v12008_v16  ;;  %v16684_v16 = vld [vmem:[#allocation5 + $0x80c] sm:$0xf] }
 0x226   :  { %6302 = vmatpush.bf16.msrb.mxu2 %v12584_v34  ;;  %v12369_v34 = vld [vmem:[#allocation5 + $0x850] sm:$0xf0] }
 0x227   :  { %6316 = vmatpush.bf16.msrb.mxu3 %v13160_v37  ;;  %v11796_v37 = vor.u32 %v16540_v30, %v11793_v47  ;;  %v12372_v51 = vor.u32 %v16684_v16, %v12369_v34  ;;  %v14600_v47 = vor.u32 %v17251_v53, %v14599_v50  ;;  %v12225_v30 = vld [vmem:[#allocation5 + $0x730] sm:$0xf0]  ;;  %v13952_v34 = vor.u32 %v17089_v12, %v13951_v9  ;;  %v13879_v50 = vld [vmem:[#allocation5 + $0x13d8] sm:$0xf]  ;;  %v17053_v12 = vld [vmem:[#allocation5 + $0x138c] sm:$0xf0] }
 0x228   :  { %6275 = vmatpush.bf16.msrb.mxu0 %v11360_v32  ;;  %v11721_v32 = vld [vmem:[#allocation5 + $0x340] sm:$0xf0]  ;;  %v14455_v53 = vld [vmem:[#allocation5 + $0x1858] sm:$0xf]  ;;  %v12228_v38 = vor.u32 %v16648_v54, %v12225_v30 }
 0x229   :  { %6289 = vmatpush.bf16.msrb.mxu1 %v11936_v62  ;;  %v11724_v62 = vor.u32 %v16522_v55, %v11721_v32  ;;  %v17215_v55 = vld [vmem:[#allocation5 + $0x189c] sm:$0xf0]  ;;  %v16486_v32 = vld [vmem:[#allocation5 + $0x1dc] sm:$0xf] }
 0x22a   :  { %6303 = vmatpush.bf16.msrb.mxu2 %v12512_v0  ;;  %v6041_v0 = vpop.f32.mrf.mxu3 }
 0x22b   :  { %6317 = vmatpush.bf16.msrb.mxu3 %v13088_v17  ;;  %6276 = vmatmul.bf16.vlgmr.msrb.gmra.mxu0 %v18098_v57  ;;  %v14527_v17 = vld [vmem:[#allocation5 + $0x18e8] sm:$0xf] }
 0x22c   :  { %6324 = vmatpush.bf16.msra.mxu0 %v14168_v18  ;;  %6290 = vmatmul.bf16.vlgmr.msrb.gmra.mxu1 %v18101_v6  ;;  %v12300_v18 = vor.u32 %v16666_v58, %v12297_v61  ;;  %v11577_v58 = vld [vmem:[#allocation5 + $0x220] sm:$0xf0]  ;;  %v16630_v61 = vld [vmem:[#allocation5 + $0x65c] sm:$0xf] }
 0x22d   :  { %6338 = vmatpush.bf16.msra.mxu1 %v14744_v21  ;;  %6304 = vmatmul.bf16.vlgmr.msrb.gmra.mxu2 %v18104_v22  ;;  %v17233_v21 = vld [vmem:[#allocation5 + $0x192c] sm:$0xf0]  ;;  %v11580_v9 = vor.u32 %v16486_v32, %v11577_v58 }
 0x22e   :  { %6352 = vmatpush.bf16.msra.mxu2 %v11868_v31  ;;  %6318 = vmatmul.bf16.vlgmr.msrb.gmra.mxu3 %v18106_v23  ;;  %v16504_v31 = vld [vmem:[#allocation5 + $0x26c] sm:$0xf]  ;;  %v14528_v14 = vor.u32 %v17233_v21, %v14527_v17  ;;  %v14383_v17 = vld [vmem:[#allocation5 + $0x17c8] sm:$0xf] }
 0x22f   :  { %6366 = vmatpush.bf16.msra.mxu3 %v12444_v44  ;;  %v6053_v44 = vpop.f32.mrf.mxu0  ;;  %v11652_v48 = vor.u32 %v16504_v31, %v11649_v26  ;;  %v16468_v26 = vld [vmem:[#allocation5 + $0x14c] sm:$0xf] }
 0x230   :  { %6325 = vmatpush.bf16.msra.mxu0 %v14096_v36  ;;  %v6054_v16 = vadd.f32 %v6053_v44, %v18318_v13  ;;  %v6067_v36 = vpop.f32.mrf.mxu1  ;;  %v5958_v13 = vadd.f32 %v18302_v10, %v5944_v27  ;;  %v6081_v31 = vpop.f32.mrf.mxu2  ;;  %v11505_v44 = vld [vmem:[#allocation5 + $0x190] sm:$0xf0] }
 0x231   :  { %6339 = vmatpush.bf16.msra.mxu1 %v14672_v2  ;;  %v19127_v2 = vperm.slane %v18289_v19, 7 }
 0x232   :  { %6353 = vmatpush.bf16.msra.mxu2 %v11796_v37  ;;  %v6068_v52 = vadd.f32 %v6067_v36, %v6054_v16  ;;  %v5972_v10 = vadd.f32 %v18308_v56, %v5958_v13  ;;  %v6095_v30 = vpop.f32.mrf.mxu3  ;;  %v16612_v16 = vld [vmem:[#allocation5 + $0x5cc] sm:$0xf]  ;;  %v17179_v56 = vld [vmem:[#allocation5 + $0x177c] sm:$0xf0]  ;;  %v16594_v13 = vld [vmem:[#allocation5 + $0x53c] sm:$0xf] }
 0x233   :  { %6367 = vmatpush.bf16.msra.mxu3 %v12372_v51  ;;  %v6028_v37 = vadd.f32 %v6027_v4, %v19127_v2  ;;  %v17071_v51 = vld [vmem:[#allocation5 + $0x141c] sm:$0xf0]  ;;  %v14456_v4 = vor.u32 %v17215_v55, %v14455_v53  ;;  %v11433_v55 = vld [vmem:[#allocation5 + $0x100] sm:$0xf0] }
 0x234   :  { %6326 = vmatpush.bf16.msra.mxu0 %v14024_v7  ;;  %v12153_v7 = vld [vmem:[#allocation5 + $0x6a0] sm:$0xf0]  ;;  %v6082_v27 = vadd.f32 %v6081_v31, %v6068_v52  ;;  %v16450_v52 = vld [vmem:[#allocation5 + $0xbc] sm:$0xf]  ;;  %v5986_v32 = vadd.f32 %v18311_v1, %v5972_v10  ;;  %v11361_v31 = vld [vmem:[#allocation5 + $0x70] sm:$0xf0] }
 0x235   :  { %6340 = vmatpush.bf16.msra.mxu1 %v14600_v47  ;;  %v13880_v47 = vor.u32 %v17071_v51, %v13879_v50  ;;  %v6042_v19 = vadd.f32 %v6041_v0, %v6028_v37  ;;  %v12156_v21 = vor.u32 %v16630_v61, %v12153_v7  ;;  %v17035_v50 = vld [vmem:[#allocation5 + $0x12fc] sm:$0xf0]  ;;  %v14311_v51 = vld [vmem:[#allocation5 + $0x1738] sm:$0xf]  ;;  %v12009_v61 = vld [vmem:[#allocation5 + $0x580] sm:$0xf0] }
 0x236   :  { %6354 = vmatpush.bf16.msra.mxu2 %v11724_v62  ;;  %v13807_v62 = vld [vmem:[#allocation5 + $0x1348] sm:$0xf]  ;;  %v6096_v37 = vadd.f32 %v6095_v30, %v6082_v27  ;;  %v13017_v30 = vld [vmem:[#allocation5 + $0xd60] sm:$0xf0] }
 0x237   :  { %6368 = vmatpush.bf16.msra.mxu3 %v12300_v18  ;;  %v17197_v18 = vld [vmem:[#allocation5 + $0x180c] sm:$0xf0]  ;;  %v6055_v54 = vpop.f32.mrf.mxu0  ;;  %v13808_v0 = vor.u32 %v17053_v12, %v13807_v62  ;;  %v14239_v12 = vld [vmem:[#allocation5 + $0x16a8] sm:$0xf] }
 0x238   :  { %6327 = vmatpush.bf16.msra.mxu0 %v13952_v34  ;;  %v12081_v34 = vld [vmem:[#allocation5 + $0x610] sm:$0xf0]  ;;  %v14384_v36 = vor.u32 %v17197_v18, %v14383_v17  ;;  %v6056_v2 = vadd.f32 %v6055_v54, %v6042_v19  ;;  %v18338_v58 = vpack.c.bf16 %v6096_v37, %v18313_v25  ;;  %v17017_v62 = vld [vmem:[#allocation5 + $0x126c] sm:$0xf0]  ;;  %v16432_v18 = vld [vmem:[#allocation5 + $0x2c] sm:$0xf]  ;;  %v6083_v1 = vpop.f32.mrf.mxu2 }
 0x239   :  { %6341 = vmatpush.bf16.msra.mxu1 %v14528_v14  ;;  %v11508_v14 = vor.u32 %v16468_v26, %v11505_v44  ;;  %v12084_v53 = vor.u32 %v16612_v16, %v12081_v34  ;;  %v17161_v17 = vld [vmem:[#allocation5 + $0x16ec] sm:$0xf0]  ;;  %v16576_v25 = vld [vmem:[#allocation5 + $0x4ac] sm:$0xf]  ;;  %v11937_v26 = vld [vmem:[#allocation5 + $0x4f0] sm:$0xf0]  ;;  %v6000_v44 = vadd.f32 %v18320_v29, %v5986_v32 }
 0x23a   :  { %6355 = vmatpush.bf16.msra.mxu2 %v11652_v48  ;;  %v13735_v48 = vld [vmem:[#allocation5 + $0x12b8] sm:$0xf]  ;;  %v6097_v27 = vpop.f32.mrf.mxu3  ;;  %v16846_v54 = vld [vmem:[#allocation5 + $0xd1c] sm:$0xf]  ;;  %v12945_v32 = vld [vmem:[#allocation5 + $0xcd0] sm:$0xf0] }
 0x23b   :  { %6369 = vmatpush.bf16.msra.mxu3 %v12228_v38  ;;  %v6069_v38 = vpop.f32.mrf.mxu1  ;;  %v13736_v7 = vor.u32 %v17035_v50, %v13735_v48  ;;  %v16990_v16 = vld [vmem:[#allocation5 + $0x119c] sm:$0xf]  ;;  %v11364_v48 = vor.u32 %v16432_v18, %v11361_v31  ;;  %v13020_v29 = vor.u32 %v16846_v54, %v13017_v30 }
 0x23c   :  { %6328 = vmatpush.bf16.msra.mxu0 %v13880_v47  ;;  %v13663_v47 = vld [vmem:[#allocation5 + $0x1228] sm:$0xf]  ;;  %v6070_v19 = vadd.f32 %v6069_v38, %v6056_v2  ;;  %v14169_v2 = vld [vmem:[#allocation5 + $0x1660] sm:$0xf0]  ;;  %v17278_v50 = vld [vmem:[#allocation5 + $0x1a9c] sm:$0xf]  ;;  %v6014_v38 = vadd.f32 %v18322_v46, %v6000_v44 }
 0x23d   :  { %6342 = vmatpush.bf16.msra.mxu1 %v14456_v4  ;;  %v14312_v4 = vor.u32 %v17179_v56, %v14311_v51  ;;  %v13664_v34 = vor.u32 %v17017_v62, %v13663_v47  ;;  %v14745_v51 = vld [vmem:[#allocation5 + $0x1ae0] sm:$0xf0]  ;;  %v17116_v47 = vld [vmem:[#allocation5 + $0x158c] sm:$0xf]  ;;  %v14097_v62 = vld [vmem:[#allocation5 + $0x15d0] sm:$0xf0] }
 0x23e   :  { %6356 = vmatpush.bf16.msra.mxu2 %v11580_v9  ;;  %v11436_v9 = vor.u32 %v16450_v52, %v11433_v55  ;;  %v6084_v10 = vadd.f32 %v6083_v1, %v6070_v19  ;;  %v16828_v55 = vld [vmem:[#allocation5 + $0xc8c] sm:$0xf]  ;;  %v16810_v18 = vld [vmem:[#allocation5 + $0xbfc] sm:$0xf]  ;;  %v14025_v44 = vld [vmem:[#allocation5 + $0x1540] sm:$0xf0] }
 0x23f   :  { %6370 = vmatpush.bf16.msra.mxu3 %v12156_v21  ;;  %v12012_v21 = vor.u32 %v16594_v13, %v12009_v61  ;;  %v16972_v13 = vld [vmem:[#allocation5 + $0x110c] sm:$0xf]  ;;  %v14748_v61 = vor.u32 %v17278_v50, %v14745_v51  ;;  %v16954_v1 = vld [vmem:[#allocation5 + $0x107c] sm:$0xf]  ;;  %v14529_v51 = vld [vmem:[#allocation5 + $0x1930] sm:$0xf0] }
 0x240   :  { %6329 = vmatpush.bf16.msra.mxu0 %v13808_v0  ;;  %v13593_v0 = vld [vmem:[#allocation5 + $0x11e0] sm:$0xf0]  ;;  %v6098_v37 = vadd.f32 %v6097_v27, %v6084_v10  ;;  %v17242_v10 = vld [vmem:[#allocation5 + $0x197c] sm:$0xf]  ;;  %v17224_v50 = vld [vmem:[#allocation5 + $0x18ec] sm:$0xf] }
 0x241   :  { %6343 = vmatpush.bf16.msra.mxu1 %v14384_v36  ;;  %v17134_v36 = vld [vmem:[#allocation5 + $0x161c] sm:$0xf]  ;;  %v13596_v56 = vor.u32 %v16990_v16, %v13593_v0  ;;  %v14601_v27 = vld [vmem:[#allocation5 + $0x19c0] sm:$0xf0]  ;;  %v12801_v0 = vld [vmem:[#allocation5 + $0xbb0] sm:$0xf0] }
 0x242   :  { %6357 = vmatpush.bf16.msra.mxu2 %v11508_v14  ;;  %v14240_v14 = vor.u32 %v17161_v17, %v14239_v12  ;;  %v14172_v52 = vor.u32 %v17134_v36, %v14169_v2  ;;  %v18342_v19 = vpack.c.bf16 %v6098_v37, %v6014_v38  ;;  %v12948_v12 = vor.u32 %v16828_v55, %v12945_v32  ;;  %v16936_v36 = vld [vmem:[#allocation5 + $0xfec] sm:$0xf]  ;;  %v13377_v37 = vld [vmem:[#allocation5 + $0x1030] sm:$0xf0]  ;;  %v16918_v55 = vld [vmem:[#allocation5 + $0xf5c] sm:$0xf] }
 0x243   :  { %6371 = vmatpush.bf16.msra.mxu3 %v12084_v53  ;;  %v11940_v53 = vor.u32 %v16576_v25, %v11937_v26  ;;  %v14100_v17 = vor.u32 %v17116_v47, %v14097_v62  ;;  %v13449_v25 = vld [vmem:[#allocation5 + $0x10c0] sm:$0xf0]  ;;  %v17098_v26 = vld [vmem:[#allocation5 + $0x14fc] sm:$0xf]  ;;  %v14604_v2 = vor.u32 %v17242_v10, %v14601_v27  ;;  %v14532_v32 = vor.u32 %v17224_v50, %v14529_v51  ;;  %v16720_v51 = vld [vmem:[#allocation5 + $0x92c] sm:$0xf] }
 0x244   :  { %6330 = vmatpush.bf16.msra.mxu0 %v13736_v7  ;;  %v13521_v7 = vld [vmem:[#allocation5 + $0x1150] sm:$0xf0]  ;;  %7324 = vrot.lane.b32.xlu2 %v18342_v19, %s18010_s5  ;;  %v13452_v30 = vor.u32 %v16954_v1, %v13449_v25  ;;  %v14028_v16 = vor.u32 %v17098_v26, %v14025_v44  ;;  %v17206_v47 = vld [vmem:[#allocation5 + $0x185c] sm:$0xf]  ;;  %v14457_v62 = vld [vmem:[#allocation5 + $0x18a0] sm:$0xf0] }
 0x245   :  { %6344 = vmatpush.bf16.msra.mxu1 %v14312_v4  ;;  %v17260_v4 = vld [vmem:[#allocation5 + $0x1a0c] sm:$0xf]  ;;  %v13524_v46 = vor.u32 %v16972_v13, %v13521_v7  ;;  %v13305_v13 = vld [vmem:[#allocation5 + $0xfa0] sm:$0xf0]  ;;  %v13233_v1 = vld [vmem:[#allocation5 + $0xf10] sm:$0xf0] }
 0x246   :  { %6358 = vmatpush.bf16.msra.mxu2 %v11436_v9  ;;  %v14673_v9 = vld [vmem:[#allocation5 + $0x1a50] sm:$0xf0]  ;;  %v13881_v7 = vld [vmem:[#allocation5 + $0x1420] sm:$0xf0]  ;;  %v17188_v26 = vld [vmem:[#allocation5 + $0x17cc] sm:$0xf] }
 0x247   :  { %6372 = vmatpush.bf16.msra.mxu3 %v12012_v21  ;;  %v12873_v21 = vld [vmem:[#allocation5 + $0xc40] sm:$0xf0]  ;;  %v14676_v31 = vor.u32 %v17260_v4, %v14673_v9  ;;  %v13308_v9 = vor.u32 %v16918_v55, %v13305_v13  ;;  %v13809_v25 = vld [vmem:[#allocation5 + $0x1390] sm:$0xf0]  ;;  %v17008_v55 = vld [vmem:[#allocation5 + $0x122c] sm:$0xf] }
 0x248   :  { %6331 = vmatpush.bf16.msra.mxu0 %v13664_v34  ;;  %v12876_v54 = vor.u32 %v16810_v18, %v12873_v21  ;;  %v16792_v34 = vld [vmem:[#allocation5 + $0xb6c] sm:$0xf]  ;;  %v14460_v21 = vor.u32 %v17206_v47, %v14457_v62  ;;  %v14385_v44 = vld [vmem:[#allocation5 + $0x1810] sm:$0xf0]  ;;  %v11871_v47 = vld [vmem:[#allocation5 + $0x420] sm:$0xf] }
 0x249   :  { %6345 = vmatpush.bf16.msra.mxu1 %v14240_v14  ;;  %v17080_v14 = vld [vmem:[#allocation5 + $0x146c] sm:$0xf]  ;;  %v13665_v13 = vld [vmem:[#allocation5 + $0x1270] sm:$0xf0]  ;;  %v16568_v62 = vld [vmem:[#allocation5 + $0x464] sm:$0xf0] }
 0x24a   :  { %6359 = vmatpush.bf16.msra.mxu2 %v11364_v48  ;;  %v13953_v48 = vld [vmem:[#allocation5 + $0x14b0] sm:$0xf0]  ;;  %v16900_v18 = vld [vmem:[#allocation5 + $0xecc] sm:$0xf] }
 0x24b   :  { %6373 = vmatpush.bf16.msra.mxu3 %v11940_v53  ;;  %6332 = vmatmul.bf16.vlgmr.msra.gmra.mxu0 %v18110_v35  ;;  %v12804_v53 = vor.u32 %v16792_v34, %v12801_v0  ;;  %v13956_v38 = vor.u32 %v17080_v14, %v13953_v48  ;;  %v13236_v27 = vor.u32 %v16900_v18, %v13233_v1  ;;  %v16882_v34 = vld [vmem:[#allocation5 + $0xe3c] sm:$0xf]  ;;  %v14313_v48 = vld [vmem:[#allocation5 + $0x1780] sm:$0xf0]  ;;  %v13599_v1 = vld [vmem:[#allocation5 + $0x11a0] sm:$0xf] }
 0x24c   :  { %6380 = vmatpush.bf16.msrb.mxu0 %v13020_v29  ;;  %6346 = vmatmul.bf16.vlgmr.msra.gmra.mxu1 %v18112_v39  ;;  %v13380_v29 = vor.u32 %v16936_v36, %v13377_v37  ;;  %v14388_v0 = vor.u32 %v17188_v26, %v14385_v44  ;;  %v13161_v36 = vld [vmem:[#allocation5 + $0xe80] sm:$0xf0]  ;;  %v17170_v14 = vld [vmem:[#allocation5 + $0x173c] sm:$0xf]  ;;  %v11872_v26 = vor.u32 %v16568_v62, %v11871_v47 }
 0x24d   :  { %6394 = vmatpush.bf16.msrb.mxu1 %v13596_v56  ;;  %6360 = vmatmul.bf16.vlgmr.msra.gmra.mxu2 %v18098_v57  ;;  %v16774_v56 = vld [vmem:[#allocation5 + $0xadc] sm:$0xf]  ;;  %v13737_v37 = vld [vmem:[#allocation5 + $0x1300] sm:$0xf0] }
 0x24e   :  { %6408 = vmatpush.bf16.msrb.mxu2 %v14172_v52  ;;  %6374 = vmatmul.bf16.vlgmr.msra.gmra.mxu3 %v18101_v6  ;;  %v12729_v52 = vld [vmem:[#allocation5 + $0xb20] sm:$0xf0] }
 0x24f   :  { %6422 = vmatpush.bf16.msrb.mxu3 %v14748_v61  ;;  %v17062_v61 = vld [vmem:[#allocation5 + $0x13dc] sm:$0xf]  ;;  %v12732_v4 = vor.u32 %v16774_v56, %v12729_v52  ;;  %v16864_v56 = vld [vmem:[#allocation5 + $0xdac] sm:$0xf]  ;;  %v13089_v52 = vld [vmem:[#allocation5 + $0xdf0] sm:$0xf0] }
 0x250   :  { %6381 = vmatpush.bf16.msrb.mxu0 %v12948_v12  ;;  %v13884_v12 = vor.u32 %v17062_v61, %v13881_v7  ;;  %v17152_v61 = vld [vmem:[#allocation5 + $0x16ac] sm:$0xf]  ;;  %v14241_v7 = vld [vmem:[#allocation5 + $0x16f0] sm:$0xf0]  ;;  %v13092_v18 = vor.u32 %v16864_v56, %v13089_v52  ;;  %v12303_v56 = vld [vmem:[#allocation5 + $0x780] sm:$0xf] }
 0x251   :  { %6395 = vmatpush.bf16.msrb.mxu1 %v13524_v46  ;;  %v16756_v46 = vld [vmem:[#allocation5 + $0xa4c] sm:$0xf] }
 0x252   :  { %6409 = vmatpush.bf16.msrb.mxu2 %v14100_v17  ;;  %v12657_v17 = vld [vmem:[#allocation5 + $0xa90] sm:$0xf0] }
 0x253   :  { %6423 = vmatpush.bf16.msrb.mxu3 %v14676_v31  ;;  %v17044_v31 = vld [vmem:[#allocation5 + $0x134c] sm:$0xf]  ;;  %v12660_v10 = vor.u32 %v16756_v46, %v12657_v17  ;;  %v13023_v46 = vld [vmem:[#allocation5 + $0xd20] sm:$0xf]  ;;  %v16856_v17 = vld [vmem:[#allocation5 + $0xd64] sm:$0xf0] }
 0x254   :  { %6382 = vmatpush.bf16.msrb.mxu0 %v12876_v54  ;;  %v13812_v54 = vor.u32 %v17044_v31, %v13809_v25  ;;  %v17000_v31 = vld [vmem:[#allocation5 + $0x11e4] sm:$0xf0]  ;;  %v14244_v25 = vor.u32 %v17152_v61, %v14241_v7  ;;  %v13455_v61 = vld [vmem:[#allocation5 + $0x1080] sm:$0xf] }
 0x255   :  { %6396 = vmatpush.bf16.msrb.mxu1 %v13452_v30  ;;  %v16738_v30 = vld [vmem:[#allocation5 + $0x9bc] sm:$0xf]  ;;  %v16964_v7 = vld [vmem:[#allocation5 + $0x10c4] sm:$0xf0] }
 0x256   :  { %6410 = vmatpush.bf16.msrb.mxu2 %v14028_v16  ;;  %v12585_v16 = vld [vmem:[#allocation5 + $0xa00] sm:$0xf0] }
 0x257   :  { %6424 = vmatpush.bf16.msrb.mxu3 %v14604_v2  ;;  %v17026_v2 = vld [vmem:[#allocation5 + $0x12bc] sm:$0xf]  ;;  %v12588_v50 = vor.u32 %v16738_v30, %v12585_v16  ;;  %v12375_v30 = vld [vmem:[#allocation5 + $0x810] sm:$0xf]  ;;  %v13600_v16 = vor.u32 %v17000_v31, %v13599_v1  ;;  %v16802_v31 = vld [vmem:[#allocation5 + $0xbb4] sm:$0xf0] }
 0x258   :  { %6383 = vmatpush.bf16.msrb.mxu0 %v12804_v53  ;;  %v12513_v53 = vld [vmem:[#allocation5 + $0x970] sm:$0xf0]  ;;  %v12807_v1 = vld [vmem:[#allocation5 + $0xb70] sm:$0xf] }
 0x259   :  { %6397 = vmatpush.bf16.msrb.mxu1 %v13380_v29  ;;  %v13164_v29 = vor.u32 %v16882_v34, %v13161_v36  ;;  %v16694_v34 = vld [vmem:[#allocation5 + $0x854] sm:$0xf0] }
 0x25a   :  { %6411 = vmatpush.bf16.msrb.mxu2 %v13956_v38  ;;  %v13740_v38 = vor.u32 %v17026_v2, %v13737_v37  ;;  %v16838_v36 = vld [vmem:[#allocation5 + $0xcd4] sm:$0xf0]  ;;  %v18350_v2 = vpop.f32.mrf.mxu0  ;;  %v13527_v37 = vld [vmem:[#allocation5 + $0x1110] sm:$0xf] }
 0x25b   :  { %6425 = vmatpush.bf16.msrb.mxu3 %v14532_v32  ;;  %v14316_v32 = vor.u32 %v17170_v14, %v14313_v48  ;;  %v16982_v14 = vld [vmem:[#allocation5 + $0x1154] sm:$0xf0]  ;;  %v18352_v48 = vpop.f32.mrf.mxu1 }
 0x25c   :  { %6384 = vmatpush.bf16.msrb.mxu0 %v12732_v4  ;;  %v12447_v4 = vld [vmem:[#allocation5 + $0x8a0] sm:$0xf]  ;;  %v13528_v52 = vor.u32 %v16982_v14, %v13527_v37  ;;  %v16640_v14 = vld [vmem:[#allocation5 + $0x6a4] sm:$0xf0] }
 0x25d   :  { %6398 = vmatpush.bf16.msrb.mxu1 %v13308_v9  ;;  %v12516_v9 = vor.u32 %v16720_v51, %v12513_v53  ;;  %v12376_v51 = vor.u32 %v16694_v34, %v12375_v30  ;;  %v12808_v30 = vor.u32 %v16802_v31, %v12807_v1  ;;  %v16496_v34 = vld [vmem:[#allocation5 + $0x224] sm:$0xf0]  ;;  %v11439_v31 = vld [vmem:[#allocation5 + $0xc0] sm:$0xf] }
 0x25e   :  { %6412 = vmatpush.bf16.msrb.mxu2 %v13884_v12  ;;  %v16712_v12 = vld [vmem:[#allocation5 + $0x8e4] sm:$0xf0] }
 0x25f   :  { %6426 = vmatpush.bf16.msrb.mxu3 %v14460_v21  ;;  %v13668_v21 = vor.u32 %v17008_v55, %v13665_v13  ;;  %v12448_v44 = vor.u32 %v16712_v12, %v12447_v4  ;;  %v16676_v55 = vld [vmem:[#allocation5 + $0x7c4] sm:$0xf0]  ;;  %v16514_v12 = vld [vmem:[#allocation5 + $0x2b4] sm:$0xf0] }
 0x260   :  { %6385 = vmatpush.bf16.msrb.mxu0 %v12660_v10  ;;  %v13024_v10 = vor.u32 %v16856_v17, %v13023_v46  ;;  %v16820_v13 = vld [vmem:[#allocation5 + $0xc44] sm:$0xf0]  ;;  %v12304_v62 = vor.u32 %v16676_v55, %v12303_v56  ;;  %v12231_v46 = vld [vmem:[#allocation5 + $0x6f0] sm:$0xf]  ;;  %v18358_v17 = vpop.f32.mrf.mxu2 }
 0x261   :  { %6399 = vmatpush.bf16.msrb.mxu1 %v13236_v27  ;;  %v11799_v27 = vld [vmem:[#allocation5 + $0x390] sm:$0xf] }
 0x262   :  { %6413 = vmatpush.bf16.msrb.mxu2 %v13812_v54  ;;  %v16550_v54 = vld [vmem:[#allocation5 + $0x3d4] sm:$0xf0]  ;;  %v11511_v55 = vld [vmem:[#allocation5 + $0x150] sm:$0xf] }
 0x263   :  { %6427 = vmatpush.bf16.msrb.mxu3 %v14388_v0  ;;  %v12951_v0 = vld [vmem:[#allocation5 + $0xc90] sm:$0xf] }
 0x264   :  { %6386 = vmatpush.bf16.msrb.mxu0 %v12588_v50  ;;  %v11800_v50 = vor.u32 %v16550_v54, %v11799_v27  ;;  %v12952_v53 = vor.u32 %v16838_v36, %v12951_v0  ;;  %v18362_v27 = vpop.f32.mrf.mxu0  ;;  %v12159_v0 = vld [vmem:[#allocation5 + $0x660] sm:$0xf]  ;;  %v18364_v36 = vpop.f32.mrf.mxu1 }
 0x265   :  { %6400 = vmatpush.bf16.msrb.mxu1 %v13164_v29  ;;  %v11727_v29 = vld [vmem:[#allocation5 + $0x300] sm:$0xf]  ;;  %v12160_v56 = vor.u32 %v16640_v14, %v12159_v0 }
 0x266   :  { %6414 = vmatpush.bf16.msrb.mxu2 %v13740_v38  ;;  %v16532_v38 = vld [vmem:[#allocation5 + $0x344] sm:$0xf0]  ;;  %v13167_v0 = vld [vmem:[#allocation5 + $0xe40] sm:$0xf] }
 0x267   :  { %6428 = vmatpush.bf16.msrb.mxu3 %v14316_v32  ;;  %v12879_v32 = vld [vmem:[#allocation5 + $0xc00] sm:$0xf]  ;;  %v11728_v47 = vor.u32 %v16532_v38, %v11727_v29  ;;  %v16928_v29 = vld [vmem:[#allocation5 + $0xfa4] sm:$0xf0] }
 0x268   :  { %6387 = vmatpush.bf16.msrb.mxu0 %v12516_v9  ;;  %v12880_v4 = vor.u32 %v16820_v13, %v12879_v32  ;;  %v11655_v9 = vld [vmem:[#allocation5 + $0x270] sm:$0xf]  ;;  %v16478_v32 = vld [vmem:[#allocation5 + $0x194] sm:$0xf0] }
 0x269   :  { %6401 = vmatpush.bf16.msrb.mxu1 %v13092_v18  ;;  %v13456_v18 = vor.u32 %v16964_v7, %v13455_v61  ;;  %v12087_v13 = vld [vmem:[#allocation5 + $0x5d0] sm:$0xf]  ;;  %v16622_v7 = vld [vmem:[#allocation5 + $0x614] sm:$0xf0] }
 0x26a   :  { %6415 = vmatpush.bf16.msrb.mxu2 %v13668_v21  ;;  %v16658_v21 = vld [vmem:[#allocation5 + $0x734] sm:$0xf0] }
 0x26b   :  { %6429 = vmatpush.bf16.msrb.mxu3 %v14244_v25  ;;  %6388 = vmatmul.bf16.vlgmr.msrb.gmra.mxu0 %v18104_v22  ;;  %v18360_v25 = vpop.f32.mrf.mxu3  ;;  %v12232_v54 = vor.u32 %v16658_v21, %v12231_v46  ;;  %v11512_v46 = vor.u32 %v16478_v32, %v11511_v55  ;;  %v12088_v21 = vor.u32 %v16622_v7, %v12087_v13  ;;  %v12519_v55 = vld [vmem:[#allocation5 + $0x930] sm:$0xf]  ;;  %v16730_v13 = vld [vmem:[#allocation5 + $0x974] sm:$0xf0] }
 0x26c   :  { %6436 = vmatpush.bf16.msra.mxu0 %v11872_v26  ;;  %6402 = vmatmul.bf16.vlgmr.msrb.gmra.mxu1 %v18106_v23  ;;  %v13383_v26 = vld [vmem:[#allocation5 + $0xff0] sm:$0xf]  ;;  %v18372_v14 = vpop.f32.mrf.mxu1  ;;  %v16874_v7 = vld [vmem:[#allocation5 + $0xdf4] sm:$0xf0] }
 0x26d   :  { %6450 = vmatpush.bf16.msra.mxu1 %v12448_v44  ;;  %6416 = vmatmul.bf16.vlgmr.msrb.gmra.mxu2 %v18110_v35  ;;  %v16946_v44 = vld [vmem:[#allocation5 + $0x1034] sm:$0xf0] }
 0x26e   :  { %6464 = vmatpush.bf16.msra.mxu2 %v13024_v10  ;;  %6430 = vmatmul.bf16.vlgmr.msrb.gmra.mxu3 %v18112_v39  ;;  %v11656_v10 = vor.u32 %v16514_v12, %v11655_v9  ;;  %v13384_v37 = vor.u32 %v16946_v44, %v13383_v26  ;;  %v16910_v9 = vld [vmem:[#allocation5 + $0xf14] sm:$0xf0]  ;;  %v18366_v12 = vpop.f32.mrf.mxu2  ;;  %v16460_v26 = vld [vmem:[#allocation5 + $0x104] sm:$0xf0]  ;;  %v12015_v44 = vld [vmem:[#allocation5 + $0x540] sm:$0xf] }
 0x26f   :  { %6478 = vmatpush.bf16.msra.mxu3 %v13600_v16  ;;  %v11583_v16 = vld [vmem:[#allocation5 + $0x1e0] sm:$0xf] }
 0x270   :  { %6437 = vmatpush.bf16.msra.mxu0 %v11800_v50  ;;  %v12735_v50 = vld [vmem:[#allocation5 + $0xae0] sm:$0xf]  ;;  %v11584_v38 = vor.u32 %v16496_v34, %v11583_v16  ;;  %v16748_v16 = vld [vmem:[#allocation5 + $0xa04] sm:$0xf0]  ;;  %v18370_v34 = vpop.f32.mrf.mxu0 }
 0x271   :  { %6451 = vmatpush.bf16.msra.mxu1 %v12376_v51  ;;  %v16784_v51 = vld [vmem:[#allocation5 + $0xb24] sm:$0xf0] }
 0x272   :  { %6465 = vmatpush.bf16.msra.mxu2 %v12952_v53  ;;  %v13311_v53 = vld [vmem:[#allocation5 + $0xf60] sm:$0xf] }
 0x273   :  { %6479 = vmatpush.bf16.msra.mxu3 %v13528_v52  ;;  %v12736_v52 = vor.u32 %v16784_v51, %v12735_v50  ;;  %v13312_v61 = vor.u32 %v16928_v29, %v13311_v53  ;;  %v11440_v50 = vor.u32 %v16460_v26, %v11439_v31  ;;  %v11367_v51 = vld [vmem:[#allocation5 + $0x30] sm:$0xf]  ;;  %v16442_v53 = vld [vmem:[#allocation5 + $0x74] sm:$0xf0]  ;;  %v16559_v31 = vld [vmem:[#allocation5 + $0x424] sm:$0xf] }
 0x274   :  { %6438 = vmatpush.bf16.msra.mxu0 %v11728_v47  ;;  %v12663_v47 = vld [vmem:[#allocation5 + $0xa50] sm:$0xf]  ;;  %v11873_v26 = vld [vmem:[#allocation5 + $0x468] sm:$0xf0] }
 0x275   :  { %6452 = vmatpush.bf16.msra.mxu1 %v12304_v62  ;;  %v16766_v62 = vld [vmem:[#allocation5 + $0xa94] sm:$0xf0]  ;;  %v11876_v24 = vor.u32 %v16559_v31, %v11873_v26  ;;  %v16523_v31 = vld [vmem:[#allocation5 + $0x304] sm:$0xf]  ;;  %v11729_v26 = vld [vmem:[#allocation5 + $0x348] sm:$0xf0] }
 0x276   :  { %6466 = vmatpush.bf16.msra.mxu2 %v12880_v4  ;;  %v13239_v4 = vld [vmem:[#allocation5 + $0xed0] sm:$0xf]  ;;  %v12664_v1 = vor.u32 %v16766_v62, %v12663_v47  ;;  %v14175_v47 = vld [vmem:[#allocation5 + $0x1620] sm:$0xf]  ;;  %v17144_v62 = vld [vmem:[#allocation5 + $0x1664] sm:$0xf0] }
 0x277   :  { %6480 = vmatpush.bf16.msra.mxu3 %v13456_v18  ;;  %v18368_v18 = vpop.f32.mrf.mxu3 }
 0x278   :  { %6439 = vmatpush.bf16.msra.mxu0 %v11656_v10  ;;  %v13240_v10 = vor.u32 %v16910_v9, %v13239_v4  ;;  %v14751_v4 = vld [vmem:[#allocation5 + $0x1aa0] sm:$0xf]  ;;  %v11368_v9 = vor.u32 %v16442_v53, %v11367_v51  ;;  %v17126_v51 = vld [vmem:[#allocation5 + $0x15d4] sm:$0xf0]  ;;  %v14679_v53 = vld [vmem:[#allocation5 + $0x1a10] sm:$0xf] }
 0x279   :  { %6453 = vmatpush.bf16.msra.mxu1 %v12232_v54  ;;  %v16604_v54 = vld [vmem:[#allocation5 + $0x584] sm:$0xf0] }
 0x27a   :  { %6467 = vmatpush.bf16.msra.mxu2 %v12808_v30  ;;  %v12591_v30 = vld [vmem:[#allocation5 + $0x9c0] sm:$0xf]  ;;  %v12016_v29 = vor.u32 %v16604_v54, %v12015_v44  ;;  %v12520_v44 = vor.u32 %v16730_v13, %v12519_v55  ;;  %v16703_v54 = vld [vmem:[#allocation5 + $0x8a4] sm:$0xf]  ;;  %v18380_v55 = vld [vmem:[#allocation7 + $0x8] sm:$0xff] }
 0x27b   :  { %6481 = vmatpush.bf16.msra.mxu3 %v13384_v37  ;;  %v16892_v37 = vld [vmem:[#allocation5 + $0xe84] sm:$0xf0]  ;;  %19128 = vst [vmem:[#allocation39_spill] sm:$0xff] %v18380_v55 }
 0x27c   :  { %6440 = vmatpush.bf16.msra.mxu0 %v11584_v38  ;;  %v12592_v38 = vor.u32 %v16748_v16, %v12591_v30  ;;  %v13168_v32 = vor.u32 %v16892_v37, %v13167_v0  ;;  %v14176_v0 = vor.u32 %v17144_v62, %v14175_v47  ;;  %v14031_v47 = vld [vmem:[#allocation5 + $0x1500] sm:$0xf]  ;;  %v17108_v62 = vld [vmem:[#allocation5 + $0x1544] sm:$0xf0] }
 0x27d   :  { %6454 = vmatpush.bf16.msra.mxu1 %v12160_v56  ;;  %v11943_v56 = vld [vmem:[#allocation5 + $0x4b0] sm:$0xf] }
 0x27e   :  { %6468 = vmatpush.bf16.msra.mxu2 %v12736_v52  ;;  %v16586_v52 = vld [vmem:[#allocation5 + $0x4f4] sm:$0xf0] }
 0x27f   :  { %6482 = vmatpush.bf16.msra.mxu3 %v13312_v61  ;;  %v13095_v61 = vld [vmem:[#allocation5 + $0xdb0] sm:$0xf]  ;;  %v18376_v30 = vpop.f32.mrf.mxu3 }
 0x280   :  { %6441 = vmatpush.bf16.msra.mxu0 %v11512_v46  ;;  %v17288_v46 = vld [vmem:[#allocation5 + $0x1ae4] sm:$0xf0]  ;;  %v13096_v16 = vor.u32 %v16874_v7, %v13095_v61  ;;  %v14680_v61 = vor.u32 %v17270_v60, %v14679_v53  ;;  %v11732_v60 = vor.u32 %v16523_v31, %v11729_v26  ;;  %v16505_v53 = vld [vmem:[#allocation5 + $0x274] sm:$0xf]  ;;  %v13887_v31 = vld [vmem:[#allocation5 + $0x13e0] sm:$0xf] }
 0x281   :  { %6455 = vmatpush.bf16.msra.mxu1 %v12088_v21  ;;  %v18374_v21 = vpop.f32.mrf.mxu2  ;;  %v14752_v37 = vor.u32 %v17288_v46, %v14751_v4  ;;  %v14607_v4 = vld [vmem:[#allocation5 + $0x1980] sm:$0xf]  ;;  %v17252_v46 = vld [vmem:[#allocation5 + $0x19c4] sm:$0xf0] }
 0x282   :  { %6469 = vmatpush.bf16.msra.mxu2 %v12664_v1  ;;  %v11944_v1 = vor.u32 %v16586_v52, %v11943_v56  ;;  %v16685_v56 = vld [vmem:[#allocation5 + $0x814] sm:$0xf]  ;;  %v12377_v52 = vld [vmem:[#allocation5 + $0x858] sm:$0xf0]  ;;  %v17072_v26 = vld [vmem:[#allocation5 + $0x1424] sm:$0xf0] }
 0x283   :  { %6483 = vmatpush.bf16.msra.mxu3 %v13240_v10  ;;  %v12449_v10 = vld [vmem:[#allocation5 + $0x8e8] sm:$0xf0] }
 0x284   :  { %6442 = vmatpush.bf16.msra.mxu0 %v11440_v50  ;;  %v14103_v50 = vld [vmem:[#allocation5 + $0x1590] sm:$0xf]  ;;  %v12452_v59 = vor.u32 %v16703_v54, %v12449_v10  ;;  %v12305_v54 = vld [vmem:[#allocation5 + $0x7c8] sm:$0xf0] }
 0x285   :  { %6456 = vmatpush.bf16.msra.mxu1 %v12016_v29  ;;  %v11801_v29 = vld [vmem:[#allocation5 + $0x3d8] sm:$0xf0]  ;;  %v14104_v13 = vor.u32 %v17126_v51, %v14103_v50  ;;  %v17234_v51 = vld [vmem:[#allocation5 + $0x1934] sm:$0xf0] }
 0x286   :  { %6470 = vmatpush.bf16.msra.mxu2 %v12592_v38  ;;  %v18378_v38 = vpop.f32.mrf.mxu0  ;;  %v11804_v7 = vor.u32 %v16541_v45, %v11801_v29  ;;  %v14032_v45 = vor.u32 %v17108_v62, %v14031_v47  ;;  %v11657_v29 = vld [vmem:[#allocation5 + $0x2b8] sm:$0xf0] }
 0x287   :  { %6484 = vmatpush.bf16.msra.mxu3 %v13168_v32  ;;  %v18382_v32 = vpop.f32.mrf.mxu1  ;;  %v6209_v10 = vpop.f32.mrf.mxu3 }
 0x288   :  { %6443 = vmatpush.bf16.msra.mxu0 %v11368_v9  ;;  %v12380_v9 = vor.u32 %v16685_v56, %v12377_v52  ;;  %v19100_v52 = vperm.slane %v18380_v55, 1 }
 0x289   :  { %6457 = vmatpush.bf16.msra.mxu1 %v11944_v1  ;;  %v19099_v1 = vperm.slane %v18380_v55, 0 }
 0x28a   :  { %6471 = vmatpush.bf16.msra.mxu2 %v12520_v44  ;;  %v16667_v44 = vld [vmem:[#allocation5 + $0x784] sm:$0xf] }
 0x28b   :  { %6485 = vmatpush.bf16.msra.mxu3 %v13096_v16  ;;  %6444 = vmatmul.bf16.vlgmr.msra.gmra.mxu0 %v18098_v57  ;;  %v13959_v16 = vld [vmem:[#allocation5 + $0x1470] sm:$0xf]  ;;  %v12308_v50 = vor.u32 %v16667_v44, %v12305_v54  ;;  %v6112_v56 = vadd.f32 %v18362_v27, %v19099_v1  ;;  %v14463_v27 = vld [vmem:[#allocation5 + $0x1860] sm:$0xf]  ;;  %v17216_v54 = vld [vmem:[#allocation5 + $0x18a4] sm:$0xf0] }
 0x28c   :  { %6492 = vmatpush.bf16.msrb.mxu0 %v14176_v0  ;;  %6458 = vmatmul.bf16.vlgmr.msra.gmra.mxu1 %v18101_v6  ;;  %v17090_v0 = vld [vmem:[#allocation5 + $0x14b4] sm:$0xf0]  ;;  %v16487_v1 = vld [vmem:[#allocation5 + $0x1e4] sm:$0xf] }
 0x28d   :  { %6506 = vmatpush.bf16.msrb.mxu1 %v14752_v37  ;;  %6472 = vmatmul.bf16.vlgmr.msra.gmra.mxu2 %v18104_v22  ;;  %v14535_v37 = vld [vmem:[#allocation5 + $0x18f0] sm:$0xf]  ;;  %v13960_v47 = vor.u32 %v17090_v0, %v13959_v16  ;;  %v16631_v16 = vld [vmem:[#allocation5 + $0x664] sm:$0xf]  ;;  %v12161_v0 = vld [vmem:[#allocation5 + $0x6a8] sm:$0xf0] }
 0x28e   :  { %6520 = vmatpush.bf16.msrb.mxu2 %v11876_v24  ;;  %v6195_v24 = vpop.f32.mrf.mxu2  ;;  %6486 = vmatmul.bf16.vlgmr.msra.gmra.mxu3 %v18106_v23 }
 0x28f   :  { %6534 = vmatpush.bf16.msrb.mxu3 %v12452_v59  ;;  %v14608_v59 = vor.u32 %v17252_v46, %v14607_v4  ;;  %v18395_v62 = vpop.f32.mrf.mxu1  ;;  %v6196_v4 = vadd.f32 %v6195_v24, %v19100_v52  ;;  %v11660_v46 = vor.u32 %v16505_v53, %v11657_v29  ;;  %v14464_v24 = vor.u32 %v17216_v54, %v14463_v27  ;;  %v17054_v53 = vld [vmem:[#allocation5 + $0x1394] sm:$0xf0]  ;;  %v14391_v29 = vld [vmem:[#allocation5 + $0x17d0] sm:$0xf]  ;;  %v16469_v52 = vld [vmem:[#allocation5 + $0x154] sm:$0xf] }
 0x290   :  { %6493 = vmatpush.bf16.msrb.mxu0 %v14104_v13  ;;  %v18393_v13 = vpop.f32.mrf.mxu0  ;;  %v14319_v27 = vld [vmem:[#allocation5 + $0x1740] sm:$0xf] }
 0x291   :  { %6507 = vmatpush.bf16.msrb.mxu1 %v14680_v61  ;;  %v16649_v61 = vld [vmem:[#allocation5 + $0x6f4] sm:$0xf] }
 0x292   :  { %6521 = vmatpush.bf16.msrb.mxu2 %v11804_v7  ;;  %v12233_v7 = vld [vmem:[#allocation5 + $0x738] sm:$0xf0] }
 0x293   :  { %6535 = vmatpush.bf16.msrb.mxu3 %v12380_v9  ;;  %v14536_v9 = vor.u32 %v17234_v51, %v14535_v37  ;;  %v12236_v44 = vor.u32 %v16649_v61, %v12233_v7  ;;  %v11588_v37 = vor.u32 %v16487_v1, %v11585_v49  ;;  %v13815_v51 = vld [vmem:[#allocation5 + $0x1350] sm:$0xf]  ;;  %v17198_v7 = vld [vmem:[#allocation5 + $0x1814] sm:$0xf0] }
 0x294   :  { %6494 = vmatpush.bf16.msrb.mxu0 %v14032_v45  ;;  %v6126_v45 = vadd.f32 %v18364_v36, %v6112_v56  ;;  %v14392_v1 = vor.u32 %v17198_v7, %v14391_v29  ;;  %v16433_v29 = vld [vmem:[#allocation5 + $0x34] sm:$0xf] }
 0x295   :  { %6508 = vmatpush.bf16.msrb.mxu1 %v14608_v59  ;;  %v13888_v59 = vor.u32 %v17072_v26, %v13887_v31  ;;  %v13743_v31 = vld [vmem:[#allocation5 + $0x12c0] sm:$0xf]  ;;  %v17036_v26 = vld [vmem:[#allocation5 + $0x1304] sm:$0xf0] }
 0x296   :  { %6522 = vmatpush.bf16.msrb.mxu2 %v11732_v60  ;;  %v6210_v60 = vadd.f32 %v6209_v10, %v6196_v4  ;;  %v18400_v61 = vpop.f32.mrf.mxu2  ;;  %v6140_v36 = vadd.f32 %v18366_v12, %v6126_v45  ;;  %v16613_v10 = vld [vmem:[#allocation5 + $0x5d4] sm:$0xf]  ;;  %v12089_v4 = vld [vmem:[#allocation5 + $0x618] sm:$0xf0]  ;;  %v16451_v12 = vld [vmem:[#allocation5 + $0xc4] sm:$0xf] }
 0x297   :  { %6536 = vmatpush.bf16.msrb.mxu3 %v12308_v50  ;;  %v12164_v50 = vor.u32 %v16631_v16, %v12161_v0  ;;  %v6237_v54 = vpop.f32.mrf.mxu1  ;;  %v17180_v16 = vld [vmem:[#allocation5 + $0x1784] sm:$0xf0]  ;;  %v11441_v45 = vld [vmem:[#allocation5 + $0x108] sm:$0xf0] }
 0x298   :  { %6495 = vmatpush.bf16.msrb.mxu0 %v13960_v47  ;;  %v6223_v56 = vpop.f32.mrf.mxu0  ;;  %v18403_v47 = vpop.f32.mrf.mxu3  ;;  %v6154_v0 = vadd.f32 %v18368_v18, %v6140_v36  ;;  %v12020_v18 = vor.u32 %v16595_v3, %v12017_v15  ;;  %v14177_v3 = vld [vmem:[#allocation5 + $0x1668] sm:$0xf0] }
 0x299   :  { %6509 = vmatpush.bf16.msrb.mxu1 %v14536_v9  ;;  %v13816_v9 = vor.u32 %v17054_v53, %v13815_v51  ;;  %v6224_v49 = vadd.f32 %v6223_v56, %v6210_v60  ;;  %v11444_v60 = vor.u32 %v16451_v12, %v11441_v45  ;;  %v14247_v51 = vld [vmem:[#allocation5 + $0x16b0] sm:$0xf]  ;;  %v17162_v53 = vld [vmem:[#allocation5 + $0x16f4] sm:$0xf0]  ;;  %v11369_v56 = vld [vmem:[#allocation5 + $0x78] sm:$0xf0] }
 0x29a   :  { %6523 = vmatpush.bf16.msrb.mxu2 %v11660_v46  ;;  %v11516_v46 = vor.u32 %v16469_v52, %v11513_v41  ;;  %v14320_v52 = vor.u32 %v17180_v16, %v14319_v27  ;;  %v19130_v27 = vperm.slane %v18380_v55, 0  ;;  %v14248_v12 = vor.u32 %v17162_v53, %v14247_v51  ;;  %v13529_v51 = vld [vmem:[#allocation5 + $0x1158] sm:$0xf0]  ;;  %v17117_v53 = vld [vmem:[#allocation5 + $0x1594] sm:$0xf] }
 0x29b   :  { %6537 = vmatpush.bf16.msrb.mxu3 %v12236_v44  ;;  %v12092_v44 = vor.u32 %v16613_v10, %v12089_v4  ;;  %v6238_v41 = vadd.f32 %v6237_v54, %v6224_v49  ;;  %v16577_v10 = vld [vmem:[#allocation5 + $0x4b4] sm:$0xf]  ;;  %v11945_v4 = vld [vmem:[#allocation5 + $0x4f8] sm:$0xf0]  ;;  %v16847_v49 = vld [vmem:[#allocation5 + $0xd24] sm:$0xf]  ;;  %v11372_v45 = vor.u32 %v16433_v29, %v11369_v56 }
 0x29c   :  { %6496 = vmatpush.bf16.msrb.mxu0 %v13888_v59  ;;  %v13744_v59 = vor.u32 %v17036_v26, %v13743_v31  ;;  %v13025_v31 = vld [vmem:[#allocation5 + $0xd68] sm:$0xf0]  ;;  %v16991_v26 = vld [vmem:[#allocation5 + $0x11a4] sm:$0xf]  ;;  %v6110_v54 = vadd.f32 %v18350_v2, %v19130_v27  ;;  %v16973_v27 = vld [vmem:[#allocation5 + $0x1114] sm:$0xf] }
 0x29d   :  { %6510 = vmatpush.bf16.msrb.mxu1 %v14464_v24  ;;  %v13671_v24 = vld [vmem:[#allocation5 + $0x1230] sm:$0xf]  ;;  %v14105_v29 = vld [vmem:[#allocation5 + $0x15d8] sm:$0xf0] }
 0x29e   :  { %6524 = vmatpush.bf16.msrb.mxu2 %v11588_v37  ;;  %v17018_v37 = vld [vmem:[#allocation5 + $0x1274] sm:$0xf0]  ;;  %v6251_v36 = vpop.f32.mrf.mxu2 }
 0x29f   :  { %6538 = vmatpush.bf16.msrb.mxu3 %v12164_v50  ;;  %v19129_v50 = vperm.slane %v18380_v55, 1  ;;  %v13672_v16 = vor.u32 %v17018_v37, %v13671_v24  ;;  %v16829_v24 = vld [vmem:[#allocation5 + $0xc94] sm:$0xf]  ;;  %v12953_v37 = vld [vmem:[#allocation5 + $0xcd8] sm:$0xf0] }
 0x2a0   :  { %6497 = vmatpush.bf16.msrb.mxu0 %v13816_v9  ;;  %v6168_v9 = vadd.f32 %v18378_v38, %v6154_v0  ;;  %v17279_v38 = vld [vmem:[#allocation5 + $0x1aa4] sm:$0xf]  ;;  %v14753_v0 = vld [vmem:[#allocation5 + $0x1ae8] sm:$0xf0]  ;;  %v12956_v56 = vor.u32 %v16829_v24, %v12953_v37 }
 0x2a1   :  { %6511 = vmatpush.bf16.msrb.mxu1 %v14392_v1  ;;  %v6194_v7 = vadd.f32 %v18374_v21, %v19129_v50  ;;  %v6252_v1 = vadd.f32 %v6251_v36, %v6238_v41  ;;  %v13601_v21 = vld [vmem:[#allocation5 + $0x11e8] sm:$0xf0]  ;;  %v11948_v50 = vor.u32 %v16577_v10, %v11945_v4  ;;  %v13028_v36 = vor.u32 %v16847_v49, %v13025_v31  ;;  %v16811_v4 = vld [vmem:[#allocation5 + $0xc04] sm:$0xf] }
 0x2a2   :  { %6525 = vmatpush.bf16.msrb.mxu2 %v11516_v46  ;;  %v6265_v46 = vpop.f32.mrf.mxu3  ;;  %v6182_v63 = vadd.f32 %v18382_v32, %v6168_v9  ;;  %v13604_v2 = vor.u32 %v16991_v26, %v13601_v21  ;;  %v13532_v10 = vor.u32 %v16973_v27, %v13529_v51  ;;  %v12881_v9 = vld [vmem:[#allocation5 + $0xc48] sm:$0xf0]  ;;  %v17099_v31 = vld [vmem:[#allocation5 + $0x1504] sm:$0xf] }
 0x2a3   :  { %6539 = vmatpush.bf16.msrb.mxu3 %v12092_v44  ;;  %v17135_v44 = vld [vmem:[#allocation5 + $0x1624] sm:$0xf]  ;;  %v6266_v15 = vadd.f32 %v6265_v46, %v6252_v1  ;;  %v6208_v41 = vadd.f32 %v18376_v30, %v6194_v7  ;;  %v17261_v7 = vld [vmem:[#allocation5 + $0x1a14] sm:$0xf]  ;;  %v13457_v49 = vld [vmem:[#allocation5 + $0x10c8] sm:$0xf0]  ;;  %v12884_v21 = vor.u32 %v16811_v4, %v12881_v9 }
 0x2a4   :  { %6498 = vmatpush.bf16.msrb.mxu0 %v13744_v59  ;;  %v14180_v59 = vor.u32 %v17135_v44, %v14177_v3  ;;  %v16955_v1 = vld [vmem:[#allocation5 + $0x1084] sm:$0xf]  ;;  %v14033_v26 = vld [vmem:[#allocation5 + $0x1548] sm:$0xf0] }
 0x2a5   :  { %6512 = vmatpush.bf16.msrb.mxu1 %v14320_v52  ;;  %v6124_v52 = vadd.f32 %v18352_v48, %v6110_v54  ;;  %v18416_v30 = vpack.c.bf16 %v6266_v15, %v6182_v63  ;;  %v6222_v32 = vadd.f32 %v18393_v13, %v6208_v41  ;;  %v14108_v48 = vor.u32 %v17117_v53, %v14105_v29  ;;  %v17243_v13 = vld [vmem:[#allocation5 + $0x1984] sm:$0xf]  ;;  %v14609_v54 = vld [vmem:[#allocation5 + $0x19c8] sm:$0xf0]  ;;  %v16793_v15 = vld [vmem:[#allocation5 + $0xb74] sm:$0xf] }
 0x2a6   :  { %6526 = vmatpush.bf16.msrb.mxu2 %v11444_v60  ;;  %v14756_v60 = vor.u32 %v17279_v38, %v14753_v0  ;;  %v13460_v44 = vor.u32 %v16955_v1, %v13457_v49  ;;  %v14036_v3 = vor.u32 %v17099_v31, %v14033_v26  ;;  %v14612_v0 = vor.u32 %v17243_v13, %v14609_v54  ;;  %v13385_v41 = vld [vmem:[#allocation5 + $0x1038] sm:$0xf0]  ;;  %v12737_v51 = vld [vmem:[#allocation5 + $0xb28] sm:$0xf0]  ;;  %v16919_v53 = vld [vmem:[#allocation5 + $0xf64] sm:$0xf] }
 0x2a7   :  { %6540 = vmatpush.bf16.msrb.mxu3 %v12020_v18  ;;  %19131 = vst [vmem:[#allocation40_spill] sm:$0xff] %v18416_v30  ;;  %v14681_v18 = vld [vmem:[#allocation5 + $0x1a58] sm:$0xf0]  ;;  %v6138_v46 = vadd.f32 %v18358_v17, %v6124_v52  ;;  %7326 = vrot.lane.b32.xlu2 %v18416_v30, %s18010_s5  ;;  %v19102_v17 = vperm.slane %v18380_v55, 2  ;;  %v14465_v4 = vld [vmem:[#allocation5 + $0x18a8] sm:$0xf0] }
 0x2a8   :  { %6499 = vmatpush.bf16.msrb.mxu0 %v13672_v16  ;;  %v14684_v63 = vor.u32 %v17261_v7, %v14681_v18  ;;  %v6236_v16 = vadd.f32 %v18395_v62, %v6222_v32  ;;  %v13961_v62 = vld [vmem:[#allocation5 + $0x14b8] sm:$0xf0]  ;;  %v13313_v32 = vld [vmem:[#allocation5 + $0xfa8] sm:$0xf0]  ;;  %v16901_v31 = vld [vmem:[#allocation5 + $0xed4] sm:$0xf] }
 0x2a9   :  { %6513 = vmatpush.bf16.msrb.mxu1 %v14248_v12  ;;  %v12809_v12 = vld [vmem:[#allocation5 + $0xbb8] sm:$0xf0]  ;;  %v6152_v38 = vadd.f32 %v18360_v25, %v6138_v46  ;;  %v6291_v29 = vpop.f32.mrf.mxu1  ;;  %v13316_v46 = vor.u32 %v16919_v53, %v13313_v32  ;;  %v17009_v32 = vld [vmem:[#allocation5 + $0x1234] sm:$0xf]  ;;  %v14119_v30 = vld [vmem:[#allocation5 + $0x15a0] sm:$0xf] }
 0x2aa   :  { %6527 = vmatpush.bf16.msrb.mxu2 %v11372_v45  ;;  %v16937_v45 = vld [vmem:[#allocation5 + $0xff4] sm:$0xf]  ;;  %v6250_v24 = vadd.f32 %v18400_v61, %v6236_v16  ;;  %v12812_v37 = vor.u32 %v16793_v15, %v12809_v12  ;;  %v13889_v61 = vld [vmem:[#allocation5 + $0x1428] sm:$0xf0]  ;;  %v12665_v49 = vld [vmem:[#allocation5 + $0xa98] sm:$0xf0] }
 0x2ab   :  { %6541 = vmatpush.bf16.msrb.mxu3 %v11948_v50  ;;  %6500 = vmatmul.bf16.vlgmr.msrb.gmra.mxu0 %v18110_v35  ;;  %v17081_v50 = vld [vmem:[#allocation5 + $0x1474] sm:$0xf]  ;;  %v13388_v25 = vor.u32 %v16937_v45, %v13385_v41  ;;  %v6166_v7 = vadd.f32 %v18370_v34, %v6152_v38  ;;  %v13241_v54 = vld [vmem:[#allocation5 + $0xf18] sm:$0xf0] }
 0x2ac   :  { %6548 = vmatpush.bf16.msra.mxu0 %v13028_v36  ;;  %6514 = vmatmul.bf16.vlgmr.msrb.gmra.mxu1 %v18112_v39  ;;  %v17225_v36 = vld [vmem:[#allocation5 + $0x18f4] sm:$0xf]  ;;  %v13964_v52 = vor.u32 %v17081_v50, %v13961_v62  ;;  %v6264_v9 = vadd.f32 %v18403_v47, %v6250_v24  ;;  %v14393_v15 = vld [vmem:[#allocation5 + $0x1818] sm:$0xf0]  ;;  %v16739_v50 = vld [vmem:[#allocation5 + $0x9c4] sm:$0xf] }
 0x2ad   :  { %6562 = vmatpush.bf16.msra.mxu1 %v13604_v2  ;;  %6528 = vmatmul.bf16.vlgmr.msrb.gmra.mxu2 %v18098_v57  ;;  %v14537_v2 = vld [vmem:[#allocation5 + $0x1938] sm:$0xf0]  ;;  %v16757_v34 = vld [vmem:[#allocation5 + $0xa54] sm:$0xf]  ;;  %v6180_v26 = vadd.f32 %v18372_v14, %v6166_v7  ;;  %v12593_v14 = vld [vmem:[#allocation5 + $0xa08] sm:$0xf0] }
 0x2ae   :  { %6576 = vmatpush.bf16.msra.mxu2 %v14180_v59  ;;  %6542 = vmatmul.bf16.vlgmr.msrb.gmra.mxu3 %v18101_v6  ;;  %v6277_v59 = vpop.f32.mrf.mxu0  ;;  %v14540_v18 = vor.u32 %v17225_v36, %v14537_v2  ;;  %v17045_v16 = vld [vmem:[#allocation5 + $0x1354] sm:$0xf]  ;;  %v12668_v45 = vor.u32 %v16757_v34, %v12665_v49  ;;  %v16883_v62 = vld [vmem:[#allocation5 + $0xe44] sm:$0xf]  ;;  %v13031_v34 = vld [vmem:[#allocation5 + $0xd28] sm:$0xf] }
 0x2af   :  { %6590 = vmatpush.bf16.msra.mxu3 %v14756_v60  ;;  %v6278_v27 = vadd.f32 %v6277_v59, %v19102_v17  ;;  %v16775_v60 = vld [vmem:[#allocation5 + $0xae4] sm:$0xf]  ;;  %7264 = vrot.lane.b32.xlu2 %v18338_v58, %s18010_s5  ;;  %v18437_v12 = vpack.c.bf16 %v6264_v9, %v6180_v26  ;;  %v13169_v59 = vld [vmem:[#allocation5 + $0xe88] sm:$0xf0]  ;;  %v16865_v7 = vld [vmem:[#allocation5 + $0xdb4] sm:$0xf] }
 0x2b0   :  { %6549 = vmatpush.bf16.msra.mxu0 %v12956_v56  ;;  %v17063_v56 = vld [vmem:[#allocation5 + $0x13e4] sm:$0xf]  ;;  %v12740_v1 = vor.u32 %v16775_v60, %v12737_v51  ;;  %v16721_v60 = vld [vmem:[#allocation5 + $0x934] sm:$0xf]  ;;  %v12521_v51 = vld [vmem:[#allocation5 + $0x978] sm:$0xf0]  ;;  %v13172_v53 = vor.u32 %v16883_v62, %v13169_v59 }
 0x2b1   :  { %6563 = vmatpush.bf16.msra.mxu1 %v13532_v10  ;;  %v6292_v10 = vadd.f32 %v6291_v29, %v6278_v27  ;;  %v6319_v38 = vpop.f32.mrf.mxu3  ;;  %v17027_v24 = vld [vmem:[#allocation5 + $0x12c4] sm:$0xf]  ;;  %v16569_v9 = vld [vmem:[#allocation5 + $0x46c] sm:$0xf0]  ;;  %v13535_v62 = vld [vmem:[#allocation5 + $0x1118] sm:$0xf]  ;;  %v18447_v59 = vpop.f32.mrf.mxu1 }
 0x2b2   :  { %6577 = vmatpush.bf16.msra.mxu2 %v14108_v48  ;;  %v17207_v48 = vld [vmem:[#allocation5 + $0x1864] sm:$0xf]  ;;  %v16857_v49 = vld [vmem:[#allocation5 + $0xd6c] sm:$0xf0]  ;;  %19133 = vst [vmem:[#allocation42_spill] sm:$0xff] %v18447_v59 }
 0x2b3   :  { %6591 = vmatpush.bf16.msra.mxu3 %v14684_v63  ;;  %v13892_v63 = vor.u32 %v17063_v56, %v13889_v61  ;;  %v14468_v13 = vor.u32 %v17207_v48, %v14465_v4  ;;  %v17171_v27 = vld [vmem:[#allocation5 + $0x1744] sm:$0xf]  ;;  %v13673_v61 = vld [vmem:[#allocation5 + $0x1278] sm:$0xf0]  ;;  %v11879_v4 = vld [vmem:[#allocation5 + $0x428] sm:$0xf] }
 0x2b4   :  { %6550 = vmatpush.bf16.msra.mxu0 %v12884_v21  ;;  %v13817_v21 = vld [vmem:[#allocation5 + $0x1398] sm:$0xf0]  ;;  %v13676_v26 = vor.u32 %v17009_v32, %v13673_v61  ;;  %v16965_v32 = vld [vmem:[#allocation5 + $0x10cc] sm:$0xf0] }
 0x2b5   :  { %6564 = vmatpush.bf16.msra.mxu1 %v13460_v44  ;;  %v6305_v44 = vpop.f32.mrf.mxu2  ;;  %v13820_v41 = vor.u32 %v17045_v16, %v13817_v21  ;;  %v14249_v48 = vld [vmem:[#allocation5 + $0x16f8] sm:$0xf0]  ;;  %v11880_v21 = vor.u32 %v16569_v9, %v11879_v4  ;;  %v16515_v4 = vld [vmem:[#allocation5 + $0x2bc] sm:$0xf0]  ;;  %v12239_v9 = vld [vmem:[#allocation5 + $0x6f8] sm:$0xf] }
 0x2b6   :  { %6578 = vmatpush.bf16.msra.mxu2 %v14036_v3  ;;  %v17189_v3 = vld [vmem:[#allocation5 + $0x17d4] sm:$0xf]  ;;  %v6306_v47 = vadd.f32 %v6305_v44, %v6292_v10 }
 0x2b7   :  { %6592 = vmatpush.bf16.msra.mxu3 %v14612_v0  ;;  %v13244_v0 = vor.u32 %v16901_v31, %v13241_v54  ;;  %v14396_v2 = vor.u32 %v17189_v3, %v14393_v15  ;;  %7266 = vrot.lane.b32.xlu2 %v18437_v12, %s18010_s5  ;;  %v17153_v10 = vld [vmem:[#allocation5 + $0x16b4] sm:$0xf]  ;;  %v17001_v54 = vld [vmem:[#allocation5 + $0x11ec] sm:$0xf0]  ;;  %v13032_v3 = vor.u32 %v16857_v49, %v13031_v34  ;;  %v18445_v15 = vpop.f32.mrf.mxu0  ;;  %v16803_v34 = vld [vmem:[#allocation5 + $0xbbc] sm:$0xf0] }
 0x2b8   :  { %6551 = vmatpush.bf16.msra.mxu0 %v12812_v37  ;;  %v18439_v36 = vadd.f32 %v6319_v38, %v6306_v47  ;;  %v13745_v37 = vld [vmem:[#allocation5 + $0x1308] sm:$0xf0]  ;;  %v14252_v16 = vor.u32 %v17153_v10, %v14249_v48  ;;  %19132 = vst [vmem:[#allocation41_spill] sm:$0xff] %v18445_v15  ;;  %v11807_v47 = vld [vmem:[#allocation5 + $0x398] sm:$0xf] }
 0x2b9   :  { %6565 = vmatpush.bf16.msra.mxu1 %v13388_v25  ;;  %v14321_v25 = vld [vmem:[#allocation5 + $0x1788] sm:$0xf0]  ;;  %v13748_v29 = vor.u32 %v17027_v24, %v13745_v37  ;;  %v12383_v38 = vld [vmem:[#allocation5 + $0x818] sm:$0xf] }
 0x2ba   :  { %6579 = vmatpush.bf16.msra.mxu2 %v13964_v52  ;;  %v12596_v52 = vor.u32 %v16739_v50, %v12593_v14  ;;  %v14324_v56 = vor.u32 %v17171_v27, %v14321_v25  ;;  %v12959_v50 = vld [vmem:[#allocation5 + $0xc98] sm:$0xf]  ;;  %v16839_v14 = vld [vmem:[#allocation5 + $0xcdc] sm:$0xf0]  ;;  %v11735_v25 = vld [vmem:[#allocation5 + $0x308] sm:$0xf] }
 0x2bb   :  { %6593 = vmatpush.bf16.msra.mxu3 %v14540_v18  ;;  %v13097_v18 = vld [vmem:[#allocation5 + $0xdf8] sm:$0xf0]  ;;  %v12960_v27 = vor.u32 %v16839_v14, %v12959_v50  ;;  %v11663_v48 = vld [vmem:[#allocation5 + $0x278] sm:$0xf]  ;;  %v16641_v50 = vld [vmem:[#allocation5 + $0x6ac] sm:$0xf0] }
 0x2bc   :  { %6552 = vmatpush.bf16.msra.mxu0 %v12740_v1  ;;  %v12455_v1 = vld [vmem:[#allocation5 + $0x8a8] sm:$0xf]  ;;  %v13100_v31 = vor.u32 %v16865_v7, %v13097_v18  ;;  %v16821_v7 = vld [vmem:[#allocation5 + $0xc4c] sm:$0xf0] }
 0x2bd   :  { %6566 = vmatpush.bf16.msra.mxu1 %v13316_v46  ;;  %v12524_v46 = vor.u32 %v16721_v60, %v12521_v51  ;;  %v12311_v60 = vld [vmem:[#allocation5 + $0x788] sm:$0xf] }
 0x2be   :  { %6580 = vmatpush.bf16.msra.mxu2 %v13892_v63  ;;  %v16713_v63 = vld [vmem:[#allocation5 + $0x8ec] sm:$0xf0]  ;;  %v13463_v18 = vld [vmem:[#allocation5 + $0x1088] sm:$0xf] }
 0x2bf   :  { %6594 = vmatpush.bf16.msra.mxu3 %v14468_v13  ;;  %v13607_v13 = vld [vmem:[#allocation5 + $0x11a8] sm:$0xf]  ;;  %7253 = vrot.lane.b32.xlu2 %v18175_v5, %s18010_s5  ;;  %v12456_v44 = vor.u32 %v16713_v63, %v12455_v1  ;;  %v13464_v1 = vor.u32 %v16965_v32, %v13463_v18  ;;  %v12815_v63 = vld [vmem:[#allocation5 + $0xb78] sm:$0xf]  ;;  %v16767_v32 = vld [vmem:[#allocation5 + $0xa9c] sm:$0xf0] }
 0x2c0   :  { %6553 = vmatpush.bf16.msra.mxu0 %v12668_v45  ;;  %v16551_v45 = vld [vmem:[#allocation5 + $0x3dc] sm:$0xf0]  ;;  %v12743_v14 = vld [vmem:[#allocation5 + $0xae8] sm:$0xf]  ;;  %v12671_v18 = vld [vmem:[#allocation5 + $0xa58] sm:$0xf] }
 0x2c1   :  { %6567 = vmatpush.bf16.msra.mxu1 %v13244_v0  ;;  %v13608_v0 = vor.u32 %v17001_v54, %v13607_v13  ;;  %v11808_v24 = vor.u32 %v16551_v45, %v11807_v47  ;;  %v18453_v13 = vpop.f32.mrf.mxu2  ;;  %v11591_v47 = vld [vmem:[#allocation5 + $0x1e8] sm:$0xf]  ;;  %v16497_v45 = vld [vmem:[#allocation5 + $0x22c] sm:$0xf0] }
 0x2c2   :  { %6581 = vmatpush.bf16.msra.mxu2 %v13820_v41  ;;  %v16695_v41 = vld [vmem:[#allocation5 + $0x85c] sm:$0xf0]  ;;  %19134 = vst [vmem:[#allocation43_spill] sm:$0xff] %v18453_v13 }
 0x2c3   :  { %6595 = vmatpush.bf16.msra.mxu3 %v14396_v2  ;;  %v16983_v2 = vld [vmem:[#allocation5 + $0x115c] sm:$0xf0]  ;;  %v12384_v37 = vor.u32 %v16695_v41, %v12383_v38  ;;  %v12167_v38 = vld [vmem:[#allocation5 + $0x668] sm:$0xf] }
 0x2c4   :  { %6554 = vmatpush.bf16.msra.mxu0 %v12596_v52  ;;  %v16533_v52 = vld [vmem:[#allocation5 + $0x34c] sm:$0xf0]  ;;  %v13536_v51 = vor.u32 %v16983_v2, %v13535_v62  ;;  %v18458_v2 = vpop.f32.mrf.mxu3 }
 0x2c5   :  { %6568 = vmatpush.bf16.msra.mxu1 %v13172_v53  ;;  %v16677_v53 = vld [vmem:[#allocation5 + $0x7cc] sm:$0xf0]  ;;  %19135 = vst [vmem:[#allocation44_spill] sm:$0xff] %v18458_v2  ;;  %v16579_v2 = vld [vmem:[#allocation5 + $0x4c4] sm:$0xf] }
 0x2c6   :  { %6582 = vmatpush.bf16.msra.mxu2 %v13748_v29  ;;  %v12887_v29 = vld [vmem:[#allocation5 + $0xc08] sm:$0xf]  ;;  %v12312_v61 = vor.u32 %v16677_v53, %v12311_v60  ;;  %v16785_v62 = vld [vmem:[#allocation5 + $0xb2c] sm:$0xf0]  ;;  %v11519_v60 = vld [vmem:[#allocation5 + $0x158] sm:$0xf] }
 0x2c7   :  { %6596 = vmatpush.bf16.msra.mxu3 %v14324_v56  ;;  %v11736_v56 = vor.u32 %v16533_v52, %v11735_v25  ;;  %v12888_v10 = vor.u32 %v16821_v7, %v12887_v29  ;;  %v12168_v25 = vor.u32 %v16641_v50, %v12167_v38  ;;  %v12744_v52 = vor.u32 %v16785_v62, %v12743_v14  ;;  %v12095_v53 = vld [vmem:[#allocation5 + $0x5d8] sm:$0xf]  ;;  %v16623_v7 = vld [vmem:[#allocation5 + $0x61c] sm:$0xf0] }
 0x2c8   :  { %6555 = vmatpush.bf16.msra.mxu0 %v12524_v46  ;;  %v16659_v46 = vld [vmem:[#allocation5 + $0x73c] sm:$0xf0]  ;;  %v6333_v49 = vpop.f32.mrf.mxu0  ;;  %v11951_v14 = vld [vmem:[#allocation5 + $0x4b8] sm:$0xf] }
 0x2c9   :  { %6569 = vmatpush.bf16.msra.mxu1 %v13100_v31  ;;  %v13391_v31 = vld [vmem:[#allocation5 + $0xff8] sm:$0xf]  ;;  %v6334_v54 = vadd.f32 %v6333_v49, %v18439_v36  ;;  %v16929_v36 = vld [vmem:[#allocation5 + $0xfac] sm:$0xf0]  ;;  %v16443_v38 = vld [vmem:[#allocation5 + $0x7c] sm:$0xf0] }
 0x2ca   :  { %6583 = vmatpush.bf16.msra.mxu2 %v13676_v26  ;;  %v16947_v26 = vld [vmem:[#allocation5 + $0x103c] sm:$0xf0] }
 0x2cb   :  { %6597 = vmatpush.bf16.msra.mxu3 %v14252_v16  ;;  %6556 = vmatmul.bf16.vlgmr.msra.gmra.mxu0 %v18104_v22  ;;  %v11664_v16 = vor.u32 %v16515_v4, %v11663_v48  ;;  %v16587_v62 = vld [vmem:[#allocation5 + $0x4fc] sm:$0xf0] }
 0x2cc   :  { %6604 = vmatpush.bf16.msrb.mxu0 %v11880_v21  ;;  %6570 = vmatmul.bf16.vlgmr.msra.gmra.mxu1 %v18106_v23  ;;  %v12240_v21 = vor.u32 %v16659_v46, %v12239_v9  ;;  %v12096_v9 = vor.u32 %v16623_v7, %v12095_v53  ;;  %v11447_v46 = vld [vmem:[#allocation5 + $0xc8] sm:$0xf]  ;;  %v17289_v7 = vld [vmem:[#allocation5 + $0x1aec] sm:$0xf0] }
 0x2cd   :  { %6618 = vmatpush.bf16.msrb.mxu1 %v12456_v44  ;;  %6584 = vmatmul.bf16.vlgmr.msra.gmra.mxu2 %v18110_v35  ;;  %v12816_v44 = vor.u32 %v16803_v34, %v12815_v63  ;;  %v16461_v63 = vld [vmem:[#allocation5 + $0x10c] sm:$0xf0]  ;;  %v12023_v34 = vld [vmem:[#allocation5 + $0x548] sm:$0xf] }
 0x2ce   :  { %6632 = vmatpush.bf16.msrb.mxu2 %v13032_v3  ;;  %6598 = vmatmul.bf16.vlgmr.msra.gmra.mxu3 %v18112_v39  ;;  %v6347_v3 = vpop.f32.mrf.mxu1  ;;  %v14759_v53 = vld [vmem:[#allocation5 + $0x1aa8] sm:$0xf] }
 0x2cf   :  { %6646 = vmatpush.bf16.msrb.mxu3 %v13608_v0  ;;  %v13392_v0 = vor.u32 %v16947_v26, %v13391_v31  ;;  %v18456_v41 = vadd.f32 %v6347_v3, %v6334_v54  ;;  %v16605_v31 = vld [vmem:[#allocation5 + $0x58c] sm:$0xf0]  ;;  %v12599_v26 = vld [vmem:[#allocation5 + $0x9c8] sm:$0xf] }
 0x2d0   :  { %6605 = vmatpush.bf16.msrb.mxu0 %v11808_v24  ;;  %v13319_v24 = vld [vmem:[#allocation5 + $0xf68] sm:$0xf]  ;;  %v16749_v54 = vld [vmem:[#allocation5 + $0xa0c] sm:$0xf0] }
 0x2d1   :  { %6619 = vmatpush.bf16.msrb.mxu1 %v12384_v37  ;;  %v11592_v37 = vor.u32 %v16497_v45, %v11591_v47  ;;  %v13320_v29 = vor.u32 %v16929_v36, %v13319_v24  ;;  %v11448_v47 = vor.u32 %v16461_v63, %v11447_v46  ;;  %v11375_v45 = vld [vmem:[#allocation5 + $0x38] sm:$0xf]  ;;  %v12600_v50 = vor.u32 %v16749_v54, %v12599_v26  ;;  %v17271_v26 = vld [vmem:[#allocation5 + $0x1a5c] sm:$0xf0]  ;;  %v16542_v54 = vld [vmem:[#allocation5 + $0x39c] sm:$0xf] }
 0x2d2   :  { %6633 = vmatpush.bf16.msrb.mxu2 %v12960_v27  ;;  %v19101_v27 = vperm.slane %v18380_v55, 3  ;;  %v12527_v24 = vld [vmem:[#allocation5 + $0x938] sm:$0xf] }
 0x2d3   :  { %6647 = vmatpush.bf16.msrb.mxu3 %v13536_v51  ;;  %v16479_v51 = vld [vmem:[#allocation5 + $0x19c] sm:$0xf0]  ;;  %v14111_v63 = vld [vmem:[#allocation5 + $0x1598] sm:$0xf] }
 0x2d4   :  { %6606 = vmatpush.bf16.msrb.mxu0 %v11736_v56  ;;  %v13247_v56 = vld [vmem:[#allocation5 + $0xed8] sm:$0xf]  ;;  %v11520_v48 = vor.u32 %v16479_v51, %v11519_v60  ;;  %v14183_v60 = vld [vmem:[#allocation5 + $0x1628] sm:$0xf]  ;;  %v17145_v51 = vld [vmem:[#allocation5 + $0x166c] sm:$0xf0] }
 0x2d5   :  { %6620 = vmatpush.bf16.msrb.mxu1 %v12312_v61  ;;  %v16911_v61 = vld [vmem:[#allocation5 + $0xf1c] sm:$0xf0] }
 0x2d6   :  { %6634 = vmatpush.bf16.msrb.mxu2 %v12888_v10  ;;  %v6361_v10 = vpop.f32.mrf.mxu2  ;;  %v13248_v49 = vor.u32 %v16911_v61, %v13247_v56  ;;  %v11952_v56 = vor.u32 %v16587_v62, %v11951_v14  ;;  %v14039_v14 = vld [vmem:[#allocation5 + $0x1508] sm:$0xf]  ;;  %v17109_v62 = vld [vmem:[#allocation5 + $0x154c] sm:$0xf0] }
 0x2d7   :  { %6648 = vmatpush.bf16.msrb.mxu3 %v13464_v1  ;;  %v6362_v4 = vadd.f32 %v6361_v10, %v19101_v27  ;;  %v12672_v1 = vor.u32 %v16767_v32, %v12671_v18  ;;  %v16560_v18 = vld [vmem:[#allocation5 + $0x42c] sm:$0xf]  ;;  %v11881_v32 = vld [vmem:[#allocation5 + $0x470] sm:$0xf0] }
 0x2d8   :  { %6607 = vmatpush.bf16.msrb.mxu0 %v11664_v16  ;;  %v6375_v16 = vpop.f32.mrf.mxu3  ;;  %v16704_v10 = vld [vmem:[#allocation5 + $0x8ac] sm:$0xf]  ;;  %v11884_v46 = vor.u32 %v16560_v18, %v11881_v32 }
 0x2d9   :  { %6621 = vmatpush.bf16.msrb.mxu1 %v12240_v21  ;;  %v13175_v21 = vld [vmem:[#allocation5 + $0xe48] sm:$0xf]  ;;  %v18463_v3 = vadd.f32 %v6375_v16, %v6362_v4  ;;  %v11809_v16 = vld [vmem:[#allocation5 + $0x3e0] sm:$0xf0] }
 0x2da   :  { %6635 = vmatpush.bf16.msrb.mxu2 %v12816_v44  ;;  %v16893_v44 = vld [vmem:[#allocation5 + $0xe8c] sm:$0xf0] }
 0x2db   :  { %6649 = vmatpush.bf16.msrb.mxu3 %v13392_v0  ;;  %v12024_v0 = vor.u32 %v16605_v31, %v12023_v34  ;;  %v13176_v36 = vor.u32 %v16893_v44, %v13175_v21  ;;  %v17127_v34 = vld [vmem:[#allocation5 + $0x15dc] sm:$0xf0]  ;;  %v18465_v21 = vpop.f32.mrf.mxu0  ;;  %v16686_v44 = vld [vmem:[#allocation5 + $0x81c] sm:$0xf] }
 0x2dc   :  { %6608 = vmatpush.bf16.msrb.mxu0 %v11592_v37  ;;  %v16731_v37 = vld [vmem:[#allocation5 + $0x97c] sm:$0xf0]  ;;  %19136 = vst [vmem:[#allocation45_spill] sm:$0xff] %v18465_v21  ;;  %v12033_v21 = vld [vmem:[#allocation5 + $0x598] sm:$0xf0] }
 0x2dd   :  { %6622 = vmatpush.bf16.msrb.mxu1 %v12168_v25  ;;  %v13103_v25 = vld [vmem:[#allocation5 + $0xdb8] sm:$0xf]  ;;  %v12528_v61 = vor.u32 %v16731_v37, %v12527_v24  ;;  %v14615_v24 = vld [vmem:[#allocation5 + $0x1988] sm:$0xf]  ;;  %v17253_v37 = vld [vmem:[#allocation5 + $0x19cc] sm:$0xf0] }
 0x2de   :  { %6636 = vmatpush.bf16.msrb.mxu2 %v12744_v52  ;;  %v16875_v52 = vld [vmem:[#allocation5 + $0xdfc] sm:$0xf0] }
 0x2df   :  { %6650 = vmatpush.bf16.msrb.mxu3 %v13320_v29  ;;  %v11376_v29 = vor.u32 %v16443_v38, %v11375_v45  ;;  %v13104_v4 = vor.u32 %v16875_v52, %v13103_v25  ;;  %v14112_v45 = vor.u32 %v17127_v34, %v14111_v63  ;;  %v18467_v38 = vpop.f32.mrf.mxu1  ;;  %v16524_v25 = vld [vmem:[#allocation5 + $0x30c] sm:$0xf]  ;;  %v11737_v52 = vld [vmem:[#allocation5 + $0x350] sm:$0xf0]  ;;  %v16650_v63 = vld [vmem:[#allocation5 + $0x6fc] sm:$0xf] }
 0x2e0   :  { %6609 = vmatpush.bf16.msrb.mxu0 %v11520_v48  ;;  %v12457_v48 = vld [vmem:[#allocation5 + $0x8f0] sm:$0xf0]  ;;  %19137 = vst [vmem:[#allocation46_spill] sm:$0xff] %v18467_v38  ;;  %v11740_v18 = vor.u32 %v16524_v25, %v11737_v52  ;;  %v18475_v32 = vpop.f32.mrf.mxu3  ;;  %v12241_v34 = vld [vmem:[#allocation5 + $0x740] sm:$0xf0] }
 0x2e1   :  { %6623 = vmatpush.bf16.msrb.mxu1 %v12096_v9  ;;  %v14184_v9 = vor.u32 %v17145_v51, %v14183_v60  ;;  %v12460_v31 = vor.u32 %v16704_v10, %v12457_v48  ;;  %v16668_v60 = vld [vmem:[#allocation5 + $0x78c] sm:$0xf]  ;;  %v12313_v51 = vld [vmem:[#allocation5 + $0x7d0] sm:$0xf0]  ;;  %19139 = vst [vmem:[#allocation48_spill] sm:$0xff] %v18475_v32 }
 0x2e2   :  { %6637 = vmatpush.bf16.msrb.mxu2 %v12672_v1  ;;  %v14760_v1 = vor.u32 %v17289_v7, %v14759_v53  ;;  %v14040_v53 = vor.u32 %v17109_v62, %v14039_v14  ;;  %v14616_v7 = vor.u32 %v17253_v37, %v14615_v24  ;;  %v14543_v10 = vld [vmem:[#allocation5 + $0x18f8] sm:$0xf]  ;;  %v12316_v48 = vor.u32 %v16668_v60, %v12313_v51  ;;  %v17217_v14 = vld [vmem:[#allocation5 + $0x18ac] sm:$0xf0]  ;;  %v16488_v62 = vld [vmem:[#allocation5 + $0x1ec] sm:$0xf] }
 0x2e3   :  { %6651 = vmatpush.bf16.msrb.mxu3 %v13248_v49  ;;  %v14687_v49 = vld [vmem:[#allocation5 + $0x1a18] sm:$0xf]  ;;  %v11593_v24 = vld [vmem:[#allocation5 + $0x230] sm:$0xf0]  ;;  %v17055_v51 = vld [vmem:[#allocation5 + $0x139c] sm:$0xf0] }
 0x2e4   :  { %6610 = vmatpush.bf16.msrb.mxu0 %v11448_v47  ;;  %v12385_v47 = vld [vmem:[#allocation5 + $0x860] sm:$0xf0]  ;;  %v12169_v37 = vld [vmem:[#allocation5 + $0x6b0] sm:$0xf0]  ;;  %v11596_v52 = vor.u32 %v16488_v62, %v11593_v24  ;;  %v13823_v60 = vld [vmem:[#allocation5 + $0x1358] sm:$0xf] }
 0x2e5   :  { %6624 = vmatpush.bf16.msrb.mxu1 %v12024_v0  ;;  %v14688_v0 = vor.u32 %v17271_v26, %v14687_v49  ;;  %v13679_v24 = vld [vmem:[#allocation5 + $0x1238] sm:$0xf] }
 0x2e6   :  { %6638 = vmatpush.bf16.msrb.mxu2 %v12600_v50  ;;  %v11812_v50 = vor.u32 %v16542_v54, %v11809_v16 }
 0x2e7   :  { %6652 = vmatpush.bf16.msrb.mxu3 %v13176_v36  ;;  %v12388_v36 = vor.u32 %v16686_v44, %v12385_v47  ;;  %v13895_v44 = vld [vmem:[#allocation5 + $0x13e8] sm:$0xf]  ;;  %v17073_v47 = vld [vmem:[#allocation5 + $0x142c] sm:$0xf0] }
 0x2e8   :  { %6611 = vmatpush.bf16.msrb.mxu0 %v11376_v29  ;;  %v18472_v29 = vpop.f32.mrf.mxu2  ;;  %v13896_v25 = vor.u32 %v17073_v47, %v13895_v44  ;;  %v17181_v44 = vld [vmem:[#allocation5 + $0x178c] sm:$0xf0]  ;;  %v16452_v47 = vld [vmem:[#allocation5 + $0xcc] sm:$0xf] }
 0x2e9   :  { %6625 = vmatpush.bf16.msrb.mxu1 %v11952_v56  ;;  %19138 = vst [vmem:[#allocation47_spill] sm:$0xff] %v18472_v29  ;;  %v13967_v56 = vld [vmem:[#allocation5 + $0x1478] sm:$0xf]  ;;  %v6403_v16 = vpop.f32.mrf.mxu1 }
 0x2ea   :  { %6639 = vmatpush.bf16.msrb.mxu2 %v12528_v61  ;;  %v17091_v61 = vld [vmem:[#allocation5 + $0x14bc] sm:$0xf0] }
 0x2eb   :  { %6653 = vmatpush.bf16.msrb.mxu3 %v13104_v4  ;;  %6612 = vmatmul.bf16.vlgmr.msrb.gmra.mxu0 %v18098_v57  ;;  %v17235_v4 = vld [vmem:[#allocation5 + $0x193c] sm:$0xf0] }
 0x2ec   :  { %6660 = vmatpush.bf16.msra.mxu0 %v14184_v9  ;;  %6626 = vmatmul.bf16.vlgmr.msrb.gmra.mxu1 %v18101_v6  ;;  %v16506_v9 = vld [vmem:[#allocation5 + $0x27c] sm:$0xf]  ;;  %v14544_v26 = vor.u32 %v17235_v4, %v14543_v10  ;;  %v11521_v10 = vld [vmem:[#allocation5 + $0x1a0] sm:$0xf0] }
 0x2ed   :  { %6674 = vmatpush.bf16.msra.mxu1 %v14760_v1  ;;  %6640 = vmatmul.bf16.vlgmr.msrb.gmra.mxu2 %v18104_v22  ;;  %v11665_v1 = vld [vmem:[#allocation5 + $0x2c0] sm:$0xf0] }
 0x2ee   :  { %6688 = vmatpush.bf16.msra.mxu2 %v11884_v46  ;;  %6654 = vmatmul.bf16.vlgmr.msrb.gmra.mxu3 %v18106_v23  ;;  %v6389_v46 = vpop.f32.mrf.mxu0  ;;  %v11668_v54 = vor.u32 %v16506_v9, %v11665_v1  ;;  %v16614_v9 = vld [vmem:[#allocation5 + $0x5dc] sm:$0xf]  ;;  %v12097_v1 = vld [vmem:[#allocation5 + $0x620] sm:$0xf0] }
 0x2ef   :  { %6702 = vmatpush.bf16.msra.mxu3 %v12460_v31  ;;  %v6390_v49 = vadd.f32 %v6389_v46, %v18463_v3  ;;  %v13968_v31 = vor.u32 %v17091_v61, %v13967_v56  ;;  %v17199_v56 = vld [vmem:[#allocation5 + $0x181c] sm:$0xf0]  ;;  %v16470_v61 = vld [vmem:[#allocation5 + $0x15c] sm:$0xf]  ;;  %v13824_v46 = vor.u32 %v17055_v51, %v13823_v60 }
 0x2f0   :  { %6661 = vmatpush.bf16.msra.mxu0 %v14112_v45  ;;  %v14471_v45 = vld [vmem:[#allocation5 + $0x1868] sm:$0xf]  ;;  %v17163_v51 = vld [vmem:[#allocation5 + $0x16fc] sm:$0xf0] }
 0x2f1   :  { %6675 = vmatpush.bf16.msra.mxu1 %v14688_v0  ;;  %v12244_v0 = vor.u32 %v16650_v63, %v12241_v34  ;;  %v14472_v3 = vor.u32 %v17217_v14, %v14471_v45  ;;  %v6431_v4 = vpop.f32.mrf.mxu3  ;;  %v11449_v45 = vld [vmem:[#allocation5 + $0x110] sm:$0xf0] }
 0x2f2   :  { %6689 = vmatpush.bf16.msra.mxu2 %v11812_v50  ;;  %v6404_v50 = vadd.f32 %v6403_v16, %v6390_v49  ;;  %v11524_v49 = vor.u32 %v16470_v61, %v11521_v10  ;;  %v12100_v16 = vor.u32 %v16614_v9, %v12097_v1  ;;  %v12025_v14 = vld [vmem:[#allocation5 + $0x590] sm:$0xf0]  ;;  %v11452_v60 = vor.u32 %v16452_v47, %v11449_v45  ;;  %v16848_v61 = vld [vmem:[#allocation5 + $0xd2c] sm:$0xf]  ;;  %v16830_v47 = vld [vmem:[#allocation5 + $0xc9c] sm:$0xf] }
 0x2f3   :  { %6703 = vmatpush.bf16.msra.mxu3 %v12388_v36  ;;  %v16632_v36 = vld [vmem:[#allocation5 + $0x66c] sm:$0xf]  ;;  %v13033_v10 = vld [vmem:[#allocation5 + $0xd70] sm:$0xf0]  ;;  %v12961_v45 = vld [vmem:[#allocation5 + $0xce0] sm:$0xf0] }
 0x2f4   :  { %6662 = vmatpush.bf16.msra.mxu0 %v14040_v53  ;;  %v14399_v53 = vld [vmem:[#allocation5 + $0x17d8] sm:$0xf]  ;;  %v13609_v9 = vld [vmem:[#allocation5 + $0x11f0] sm:$0xf0]  ;;  %v17136_v1 = vld [vmem:[#allocation5 + $0x162c] sm:$0xf] }
 0x2f5   :  { %6676 = vmatpush.bf16.msra.mxu1 %v14616_v7  ;;  %v12172_v7 = vor.u32 %v16632_v36, %v12169_v37  ;;  %v14400_v34 = vor.u32 %v17199_v56, %v14399_v53  ;;  %v17019_v36 = vld [vmem:[#allocation5 + $0x127c] sm:$0xf0]  ;;  %v14255_v37 = vld [vmem:[#allocation5 + $0x16b8] sm:$0xf]  ;;  %v16434_v53 = vld [vmem:[#allocation5 + $0x3c] sm:$0xf] }
 0x2f6   :  { %6690 = vmatpush.bf16.msra.mxu2 %v11740_v18  ;;  %v6417_v18 = vpop.f32.mrf.mxu2  ;;  %v11953_v56 = vld [vmem:[#allocation5 + $0x500] sm:$0xf0] }
 0x2f7   :  { %6704 = vmatpush.bf16.msra.mxu3 %v12316_v48  ;;  %v6418_v48 = vadd.f32 %v6417_v18, %v6404_v50  ;;  %v16596_v50 = vld [vmem:[#allocation5 + $0x54c] sm:$0xf]  ;;  %v16578_v18 = vld [vmem:[#allocation5 + $0x4bc] sm:$0xf] }
 0x2f8   :  { %6663 = vmatpush.bf16.msra.mxu0 %v13968_v31  ;;  %v13751_v31 = vld [vmem:[#allocation5 + $0x12c8] sm:$0xf] }
 0x2f9   :  { %6677 = vmatpush.bf16.msra.mxu1 %v14544_v26  ;;  %v6432_v63 = vadd.f32 %v6431_v4, %v6418_v48  ;;  %v17037_v26 = vld [vmem:[#allocation5 + $0x130c] sm:$0xf0]  ;;  %v16992_v48 = vld [vmem:[#allocation5 + $0x11ac] sm:$0xf] }
 0x2fa   :  { %6691 = vmatpush.bf16.msra.mxu2 %v11668_v54  ;;  %v14327_v54 = vld [vmem:[#allocation5 + $0x1748] sm:$0xf]  ;;  %v13752_v62 = vor.u32 %v17037_v26, %v13751_v31  ;;  %v14761_v31 = vld [vmem:[#allocation5 + $0x1af0] sm:$0xf0]  ;;  %v11956_v26 = vor.u32 %v16578_v18, %v11953_v56  ;;  %v17100_v56 = vld [vmem:[#allocation5 + $0x150c] sm:$0xf] }
 0x2fb   :  { %6705 = vmatpush.bf16.msra.mxu3 %v12244_v0  ;;  %v18479_v0 = vpack.c.bf16 %v6432_v63, %v18456_v41  ;;  %v12028_v41 = vor.u32 %v16596_v50, %v12025_v14  ;;  %v14256_v63 = vor.u32 %v17163_v51, %v14255_v37  ;;  %v16974_v50 = vld [vmem:[#allocation5 + $0x111c] sm:$0xf]  ;;  %v14689_v37 = vld [vmem:[#allocation5 + $0x1a60] sm:$0xf0]  ;;  %v16812_v51 = vld [vmem:[#allocation5 + $0xc0c] sm:$0xf] }
 0x2fc   :  { %6664 = vmatpush.bf16.msra.mxu0 %v13896_v25  ;;  %v8660_v25 = vrot.slane %v18437_v12, 4  ;;  %v13680_v12 = vor.u32 %v17019_v36, %v13679_v24  ;;  %v17118_v24 = vld [vmem:[#allocation5 + $0x159c] sm:$0xf]  ;;  %v14113_v36 = vld [vmem:[#allocation5 + $0x15e0] sm:$0xf0] }
 0x2fd   :  { %6678 = vmatpush.bf16.msra.mxu1 %v14472_v3  ;;  %19140 = vst [vmem:[#allocation49_spill] sm:$0xff] %v18479_v0  ;;  %v8661_v3 = vrot.slane %v18479_v0, 4  ;;  %v13465_v18 = vld [vmem:[#allocation5 + $0x10d0] sm:$0xf0]  ;;  %v17290_v0 = vld [vmem:[#allocation5 + $0x1af4] sm:$0xf0] }
 0x2fe   :  { %6692 = vmatpush.bf16.msra.mxu2 %v11596_v52  ;;  %v14328_v52 = vor.u32 %v17181_v44, %v14327_v54  ;;  %v13036_v54 = vor.u32 %v16848_v61, %v13033_v10  ;;  %v14041_v61 = vld [vmem:[#allocation5 + $0x1550] sm:$0xf0]  ;;  %v17244_v10 = vld [vmem:[#allocation5 + $0x198c] sm:$0xf] }
 0x2ff   :  { %6706 = vmatpush.bf16.msra.mxu3 %v12172_v7  ;;  %v11377_v7 = vld [vmem:[#allocation5 + $0x80] sm:$0xf0]  ;;  %v18484_v4 = vsel %vm7103_vm0, %v8660_v25, %v8661_v3  ;;  %v17262_v25 = vld [vmem:[#allocation5 + $0x1a1c] sm:$0xf]  ;;  %v12964_v3 = vor.u32 %v16830_v47, %v12961_v45 }
 0x300   :  { %6665 = vmatpush.bf16.msra.mxu0 %v13824_v46  ;;  %19141 = vst [vmem:[#allocation50_spill] sm:$0xff] %v18484_v4  ;;  %v14185_v46 = vld [vmem:[#allocation5 + $0x1670] sm:$0xf0] }
 0x301   :  { %6679 = vmatpush.bf16.msra.mxu1 %v14400_v34  ;;  %v11380_v34 = vor.u32 %v16434_v53, %v11377_v7  ;;  %v14188_v44 = vor.u32 %v17136_v1, %v14185_v46  ;;  %v12889_v53 = vld [vmem:[#allocation5 + $0xc50] sm:$0xf0]  ;;  %v14692_v7 = vor.u32 %v17262_v25, %v14689_v37  ;;  %v14044_v1 = vor.u32 %v17100_v56, %v14041_v61  ;;  %v16794_v46 = vld [vmem:[#allocation5 + $0xb7c] sm:$0xf]  ;;  %v17064_v37 = vld [vmem:[#allocation5 + $0x13ec] sm:$0xf] }
 0x302   :  { %6693 = vmatpush.bf16.msra.mxu2 %v11524_v49  ;;  %v17280_v49 = vld [vmem:[#allocation5 + $0x1aac] sm:$0xf]  ;;  %v13321_v25 = vld [vmem:[#allocation5 + $0xfb0] sm:$0xf0]  ;;  %v16902_v56 = vld [vmem:[#allocation5 + $0xedc] sm:$0xf] }
 0x303   :  { %6707 = vmatpush.bf16.msra.mxu3 %v12100_v16  ;;  %v13612_v16 = vor.u32 %v16992_v48, %v13609_v9  ;;  %v14764_v14 = vor.u32 %v17280_v49, %v14761_v31  ;;  %v14617_v48 = vld [vmem:[#allocation5 + $0x19d0] sm:$0xf0]  ;;  %v13393_v31 = vld [vmem:[#allocation5 + $0x1040] sm:$0xf0] }
 0x304   :  { %6666 = vmatpush.bf16.msra.mxu0 %v13752_v62  ;;  %v13537_v62 = vld [vmem:[#allocation5 + $0x1160] sm:$0xf0]  ;;  %v14620_v49 = vor.u32 %v17244_v10, %v14617_v48  ;;  %v17046_v48 = vld [vmem:[#allocation5 + $0x135c] sm:$0xf] }
 0x305   :  { %6680 = vmatpush.bf16.msra.mxu1 %v14328_v52  ;;  %v13540_v52 = vor.u32 %v16974_v50, %v13537_v62  ;;  %v12745_v62 = vld [vmem:[#allocation5 + $0xb30] sm:$0xf0]  ;;  %v13249_v10 = vld [vmem:[#allocation5 + $0xf20] sm:$0xf0] }
 0x306   :  { %6694 = vmatpush.bf16.msra.mxu2 %v11452_v60  ;;  %v14116_v60 = vor.u32 %v17118_v24, %v14113_v36  ;;  %v16920_v24 = vld [vmem:[#allocation5 + $0xf6c] sm:$0xf] }
 0x307   :  { %6708 = vmatpush.bf16.msra.mxu3 %v12028_v41  ;;  %v16956_v41 = vld [vmem:[#allocation5 + $0x108c] sm:$0xf] }
 0x308   :  { %6667 = vmatpush.bf16.msra.mxu0 %v13680_v12  ;;  %v12892_v12 = vor.u32 %v16812_v51, %v12889_v53  ;;  %v13468_v9 = vor.u32 %v16956_v41, %v13465_v18  ;;  %v13324_v53 = vor.u32 %v16920_v24, %v13321_v25  ;;  %v12673_v18 = vld [vmem:[#allocation5 + $0xaa0] sm:$0xf0] }
 0x309   :  { %6681 = vmatpush.bf16.msra.mxu1 %v14256_v63  ;;  %v12817_v63 = vld [vmem:[#allocation5 + $0xbc0] sm:$0xf0] }
 0x30a   :  { %6695 = vmatpush.bf16.msra.mxu2 %v11380_v34  ;;  %v16938_v34 = vld [vmem:[#allocation5 + $0xffc] sm:$0xf]  ;;  %v12820_v47 = vor.u32 %v16794_v46, %v12817_v63  ;;  %v13252_v63 = vor.u32 %v16902_v56, %v13249_v10  ;;  %v12529_v24 = vld [vmem:[#allocation5 + $0x980] sm:$0xf0]  ;;  %v12463_v56 = vld [vmem:[#allocation5 + $0x8b0] sm:$0xf] }
 0x30b   :  { %6709 = vmatpush.bf16.msra.mxu3 %v11956_v26  ;;  %6668 = vmatmul.bf16.vlgmr.msra.gmra.mxu0 %v18110_v35  ;;  %v17082_v26 = vld [vmem:[#allocation5 + $0x147c] sm:$0xf]  ;;  %v13396_v45 = vor.u32 %v16938_v34, %v13393_v31  ;;  %v12601_v31 = vld [vmem:[#allocation5 + $0xa10] sm:$0xf0]  ;;  %v16714_v10 = vld [vmem:[#allocation5 + $0x8f4] sm:$0xf0] }
 0x30c   :  { %6716 = vmatpush.bf16.msrb.mxu0 %v13036_v54  ;;  %6682 = vmatmul.bf16.vlgmr.msra.gmra.mxu1 %v18112_v39  ;;  %v13969_v54 = vld [vmem:[#allocation5 + $0x14c0] sm:$0xf0] }
 0x30d   :  { %6730 = vmatpush.bf16.msrb.mxu1 %v13612_v16  ;;  %6696 = vmatmul.bf16.vlgmr.msra.gmra.mxu2 %v18098_v57  ;;  %v17226_v16 = vld [vmem:[#allocation5 + $0x18fc] sm:$0xf]  ;;  %v13972_v50 = vor.u32 %v17082_v26, %v13969_v54  ;;  %v16884_v26 = vld [vmem:[#allocation5 + $0xe4c] sm:$0xf] }
 0x30e   :  { %6744 = vmatpush.bf16.msrb.mxu2 %v14188_v44  ;;  %6710 = vmatmul.bf16.vlgmr.msra.gmra.mxu3 %v18101_v6  ;;  %v14545_v44 = vld [vmem:[#allocation5 + $0x1940] sm:$0xf0] }
 0x30f   :  { %6758 = vmatpush.bf16.msrb.mxu3 %v14764_v14  ;;  %v16776_v14 = vld [vmem:[#allocation5 + $0xaec] sm:$0xf]  ;;  %v14548_v36 = vor.u32 %v17226_v16, %v14545_v44  ;;  %v13177_v16 = vld [vmem:[#allocation5 + $0xe90] sm:$0xf0] }
 0x310   :  { %6717 = vmatpush.bf16.msrb.mxu0 %v12964_v3  ;;  %v13897_v3 = vld [vmem:[#allocation5 + $0x1430] sm:$0xf0]  ;;  %v12748_v51 = vor.u32 %v16776_v14, %v12745_v62  ;;  %v17028_v44 = vld [vmem:[#allocation5 + $0x12cc] sm:$0xf]  ;;  %v16722_v62 = vld [vmem:[#allocation5 + $0x93c] sm:$0xf] }
 0x311   :  { %6731 = vmatpush.bf16.msrb.mxu1 %v13540_v52  ;;  %v17208_v52 = vld [vmem:[#allocation5 + $0x186c] sm:$0xf]  ;;  %v13900_v41 = vor.u32 %v17064_v37, %v13897_v3  ;;  %v16866_v37 = vld [vmem:[#allocation5 + $0xdbc] sm:$0xf]  ;;  %v13105_v3 = vld [vmem:[#allocation5 + $0xe00] sm:$0xf0] }
 0x312   :  { %6745 = vmatpush.bf16.msrb.mxu2 %v14116_v60  ;;  %v14473_v60 = vld [vmem:[#allocation5 + $0x18b0] sm:$0xf0] }
 0x313   :  { %6759 = vmatpush.bf16.msrb.mxu3 %v14692_v7  ;;  %v16758_v7 = vld [vmem:[#allocation5 + $0xa5c] sm:$0xf]  ;;  %v14476_v61 = vor.u32 %v17208_v52, %v14473_v60 }
 0x314   :  { %6718 = vmatpush.bf16.msrb.mxu0 %v12892_v12  ;;  %v13825_v12 = vld [vmem:[#allocation5 + $0x13a0] sm:$0xf0]  ;;  %v12676_v46 = vor.u32 %v16758_v7, %v12673_v18  ;;  %v17010_v52 = vld [vmem:[#allocation5 + $0x123c] sm:$0xf]  ;;  %v11887_v7 = vld [vmem:[#allocation5 + $0x430] sm:$0xf] }
 0x315   :  { %6732 = vmatpush.bf16.msrb.mxu1 %v13468_v9  ;;  %v17190_v9 = vld [vmem:[#allocation5 + $0x17dc] sm:$0xf]  ;;  %v13828_v34 = vor.u32 %v17046_v48, %v13825_v12  ;;  %v16570_v18 = vld [vmem:[#allocation5 + $0x474] sm:$0xf0]  ;;  %v13039_v48 = vld [vmem:[#allocation5 + $0xd30] sm:$0xf] }
 0x316   :  { %6746 = vmatpush.bf16.msrb.mxu2 %v14044_v1  ;;  %v14401_v1 = vld [vmem:[#allocation5 + $0x1820] sm:$0xf0]  ;;  %v16858_v12 = vld [vmem:[#allocation5 + $0xd74] sm:$0xf0] }
 0x317   :  { %6760 = vmatpush.bf16.msrb.mxu3 %v14620_v49  ;;  %v16740_v49 = vld [vmem:[#allocation5 + $0x9cc] sm:$0xf]  ;;  %v14404_v54 = vor.u32 %v17190_v9, %v14401_v1  ;;  %v13108_v9 = vor.u32 %v16866_v37, %v13105_v3  ;;  %v11743_v3 = vld [vmem:[#allocation5 + $0x310] sm:$0xf] }
 0x318   :  { %6719 = vmatpush.bf16.msrb.mxu0 %v12820_v47  ;;  %v13753_v47 = vld [vmem:[#allocation5 + $0x1310] sm:$0xf0]  ;;  %v12604_v14 = vor.u32 %v16740_v49, %v12601_v31  ;;  %v11888_v49 = vor.u32 %v16570_v18, %v11887_v7  ;;  %v12464_v31 = vor.u32 %v16714_v10, %v12463_v56  ;;  %v16822_v7 = vld [vmem:[#allocation5 + $0xc54] sm:$0xf0]  ;;  %v18491_v18 = vpop.f32.mrf.mxu0  ;;  %v13471_v56 = vld [vmem:[#allocation5 + $0x1090] sm:$0xf] }
 0x319   :  { %6733 = vmatpush.bf16.msrb.mxu1 %v13396_v45  ;;  %v17172_v45 = vld [vmem:[#allocation5 + $0x174c] sm:$0xf]  ;;  %v13756_v25 = vor.u32 %v17028_v44, %v13753_v47  ;;  %v12391_v44 = vld [vmem:[#allocation5 + $0x820] sm:$0xf]  ;;  %19142 = vst [vmem:[#allocation51_spill] sm:$0xff] %v18491_v18 }
 0x31a   :  { %6747 = vmatpush.bf16.msrb.mxu2 %v13972_v50  ;;  %v14329_v50 = vld [vmem:[#allocation5 + $0x1790] sm:$0xf0]  ;;  %v11961_v18 = vld [vmem:[#allocation5 + $0x508] sm:$0xf0] }
 0x31b   :  { %6761 = vmatpush.bf16.msrb.mxu3 %v14548_v36  ;;  %v13180_v36 = vor.u32 %v16884_v26, %v13177_v16  ;;  %v14332_v60 = vor.u32 %v17172_v45, %v14329_v50  ;;  %v13040_v26 = vor.u32 %v16858_v12, %v13039_v48  ;;  %v16552_v16 = vld [vmem:[#allocation5 + $0x3e4] sm:$0xf0]  ;;  %v12967_v50 = vld [vmem:[#allocation5 + $0xca0] sm:$0xf]  ;;  %v18496_v48 = vpop.f32.mrf.mxu1  ;;  %v11964_v29 = vor.u32 %v16579_v2, %v11961_v18  ;;  %v17263_v2 = vld [vmem:[#allocation5 + $0x1a24] sm:$0xf] }
 0x31c   :  { %6720 = vmatpush.bf16.msrb.mxu0 %v12748_v51  ;;  %v13681_v51 = vld [vmem:[#allocation5 + $0x1280] sm:$0xf0]  ;;  %v16696_v45 = vld [vmem:[#allocation5 + $0x864] sm:$0xf0]  ;;  %19143 = vst [vmem:[#allocation52_spill] sm:$0xff] %v18496_v48 }
 0x31d   :  { %6734 = vmatpush.bf16.msrb.mxu1 %v13324_v53  ;;  %v17154_v53 = vld [vmem:[#allocation5 + $0x16bc] sm:$0xf]  ;;  %v13684_v1 = vor.u32 %v17010_v52, %v13681_v51  ;;  %v16534_v52 = vld [vmem:[#allocation5 + $0x354] sm:$0xf0]  ;;  %v11385_v48 = vld [vmem:[#allocation5 + $0x88] sm:$0xf0] }
 0x31e   :  { %6748 = vmatpush.bf16.msrb.mxu2 %v13900_v41  ;;  %v14257_v41 = vld [vmem:[#allocation5 + $0x1700] sm:$0xf0]  ;;  %v11744_v10 = vor.u32 %v16534_v52, %v11743_v3  ;;  %v16786_v3 = vld [vmem:[#allocation5 + $0xb34] sm:$0xf0]  ;;  %v14697_v18 = vld [vmem:[#allocation5 + $0x1a68] sm:$0xf0] }
 0x31f   :  { %6762 = vmatpush.bf16.msrb.mxu3 %v14476_v61  ;;  %v12532_v61 = vor.u32 %v16722_v62, %v12529_v24  ;;  %v13543_v62 = vld [vmem:[#allocation5 + $0x1120] sm:$0xf]  ;;  %v16984_v24 = vld [vmem:[#allocation5 + $0x1164] sm:$0xf0] }
 0x320   :  { %6721 = vmatpush.bf16.msrb.mxu0 %v12676_v46  ;;  %v13615_v46 = vld [vmem:[#allocation5 + $0x11b0] sm:$0xf]  ;;  %v13544_v51 = vor.u32 %v16984_v24, %v13543_v62  ;;  %v18498_v24 = vpop.f32.mrf.mxu2  ;;  %v18500_v52 = vpop.f32.mrf.mxu0 }
 0x321   :  { %6735 = vmatpush.bf16.msrb.mxu1 %v13252_v63  ;;  %v17002_v63 = vld [vmem:[#allocation5 + $0x11f4] sm:$0xf0]  ;;  %v12175_v62 = vld [vmem:[#allocation5 + $0x670] sm:$0xf]  ;;  %19144 = vst [vmem:[#allocation53_spill] sm:$0xff] %v18498_v24 }
 0x322   :  { %6749 = vmatpush.bf16.msrb.mxu2 %v13828_v34  ;;  %v14260_v34 = vor.u32 %v17154_v53, %v14257_v41  ;;  %v13616_v47 = vor.u32 %v17002_v63, %v13615_v46  ;;  %v16678_v53 = vld [vmem:[#allocation5 + $0x7d4] sm:$0xf0]  ;;  %v12895_v41 = vld [vmem:[#allocation5 + $0xc10] sm:$0xf]  ;;  %v16516_v46 = vld [vmem:[#allocation5 + $0x2c4] sm:$0xf0] }
 0x323   :  { %6763 = vmatpush.bf16.msrb.mxu3 %v14404_v54  ;;  %v11815_v54 = vld [vmem:[#allocation5 + $0x3a0] sm:$0xf] }
 0x324   :  { %6722 = vmatpush.bf16.msrb.mxu0 %v12604_v14  ;;  %v16840_v14 = vld [vmem:[#allocation5 + $0xce4] sm:$0xf0]  ;;  %v12247_v63 = vld [vmem:[#allocation5 + $0x700] sm:$0xf] }
 0x325   :  { %6736 = vmatpush.bf16.msrb.mxu1 %v13180_v36  ;;  %v11816_v36 = vor.u32 %v16552_v16, %v11815_v54  ;;  %v12968_v37 = vor.u32 %v16840_v14, %v12967_v50  ;;  %v13399_v54 = vld [vmem:[#allocation5 + $0x1000] sm:$0xf]  ;;  %v16948_v16 = vld [vmem:[#allocation5 + $0x1044] sm:$0xf0]  ;;  %v11599_v50 = vld [vmem:[#allocation5 + $0x1f0] sm:$0xf] }
 0x326   :  { %6750 = vmatpush.bf16.msrb.mxu2 %v13756_v25  ;;  %v12392_v25 = vor.u32 %v16696_v45, %v12391_v44  ;;  %v16498_v14 = vld [vmem:[#allocation5 + $0x234] sm:$0xf0] }
 0x327   :  { %6764 = vmatpush.bf16.msrb.mxu3 %v14332_v60  ;;  %v12319_v60 = vld [vmem:[#allocation5 + $0x790] sm:$0xf] }
 0x328   :  { %6723 = vmatpush.bf16.msrb.mxu0 %v12532_v61  ;;  %v16966_v61 = vld [vmem:[#allocation5 + $0x10d4] sm:$0xf0]  ;;  %v12320_v12 = vor.u32 %v16678_v53, %v12319_v60  ;;  %v13327_v60 = vld [vmem:[#allocation5 + $0xf70] sm:$0xf]  ;;  %v18502_v53 = vpop.f32.mrf.mxu3 }
 0x329   :  { %6737 = vmatpush.bf16.msrb.mxu1 %v13108_v9  ;;  %v12896_v9 = vor.u32 %v16822_v7, %v12895_v41  ;;  %19145 = vst [vmem:[#allocation54_spill] sm:$0xff] %v18502_v53  ;;  %v11600_v41 = vor.u32 %v16498_v14, %v11599_v50  ;;  %v18504_v7 = vpop.f32.mrf.mxu1  ;;  %v18506_v50 = vpop.f32.mrf.mxu2  ;;  %v16597_v53 = vld [vmem:[#allocation5 + $0x554] sm:$0xf] }
 0x32a   :  { %6751 = vmatpush.bf16.msrb.mxu2 %v13684_v1  ;;  %v11671_v1 = vld [vmem:[#allocation5 + $0x280] sm:$0xf]  ;;  %v12036_v24 = vor.u32 %v16597_v53, %v12033_v21 }
 0x32b   :  { %6765 = vmatpush.bf16.msrb.mxu3 %v14260_v34  ;;  %6724 = vmatmul.bf16.vlgmr.msrb.gmra.mxu0 %v18104_v22  ;;  %v13472_v34 = vor.u32 %v16966_v61, %v13471_v56  ;;  %v11672_v44 = vor.u32 %v16516_v46, %v11671_v1  ;;  %v16624_v46 = vld [vmem:[#allocation5 + $0x624] sm:$0xf0] }
 0x32c   :  { %6772 = vmatpush.bf16.msra.mxu0 %v11888_v49  ;;  %6738 = vmatmul.bf16.vlgmr.msrb.gmra.mxu1 %v18106_v23  ;;  %v16660_v49 = vld [vmem:[#allocation5 + $0x744] sm:$0xf0] }
 0x32d   :  { %6786 = vmatpush.bf16.msra.mxu1 %v12464_v31  ;;  %6752 = vmatmul.bf16.vlgmr.msrb.gmra.mxu2 %v18110_v35  ;;  %v12823_v31 = vld [vmem:[#allocation5 + $0xb80] sm:$0xf] }
 0x32e   :  { %6800 = vmatpush.bf16.msra.mxu2 %v13040_v26  ;;  %6766 = vmatmul.bf16.vlgmr.msrb.gmra.mxu3 %v18112_v39  ;;  %v16804_v26 = vld [vmem:[#allocation5 + $0xbc4] sm:$0xf0] }
 0x32f   :  { %6814 = vmatpush.bf16.msra.mxu3 %v13616_v47  ;;  %v12248_v47 = vor.u32 %v16660_v49, %v12247_v63  ;;  %v12824_v45 = vor.u32 %v16804_v26, %v12823_v31  ;;  %v12679_v63 = vld [vmem:[#allocation5 + $0xa60] sm:$0xf]  ;;  %v16912_v31 = vld [vmem:[#allocation5 + $0xf24] sm:$0xf0] }
 0x330   :  { %6773 = vmatpush.bf16.msra.mxu0 %v11816_v36  ;;  %v13400_v36 = vor.u32 %v16948_v16, %v13399_v54  ;;  %v13255_v49 = vld [vmem:[#allocation5 + $0xee0] sm:$0xf] }
 0x331   :  { %6787 = vmatpush.bf16.msra.mxu1 %v12392_v25  ;;  %v16642_v25 = vld [vmem:[#allocation5 + $0x6b4] sm:$0xf0]  ;;  %v13256_v14 = vor.u32 %v16912_v31, %v13255_v49  ;;  %v13111_v49 = vld [vmem:[#allocation5 + $0xdc0] sm:$0xf]  ;;  %v16876_v31 = vld [vmem:[#allocation5 + $0xe04] sm:$0xf0]  ;;  %v18512_v27 = vpop.f32.mrf.mxu1  ;;  %v18514_v42 = vpop.f32.mrf.mxu2 }
 0x332   :  { %6801 = vmatpush.bf16.msra.mxu2 %v12968_v37  ;;  %v12751_v37 = vld [vmem:[#allocation5 + $0xaf0] sm:$0xf]  ;;  %v12176_v56 = vor.u32 %v16642_v25, %v12175_v62  ;;  %v16606_v62 = vld [vmem:[#allocation5 + $0x594] sm:$0xf0] }
 0x333   :  { %6815 = vmatpush.bf16.msra.mxu3 %v13544_v51  ;;  %v16930_v51 = vld [vmem:[#allocation5 + $0xfb4] sm:$0xf0]  ;;  %v12752_v61 = vor.u32 %v16786_v3, %v12751_v37  ;;  %v13183_v37 = vld [vmem:[#allocation5 + $0xe50] sm:$0xf] }
 0x334   :  { %6774 = vmatpush.bf16.msra.mxu0 %v11744_v10  ;;  %v11527_v10 = vld [vmem:[#allocation5 + $0x160] sm:$0xf]  ;;  %v13328_v1 = vor.u32 %v16930_v51, %v13327_v60  ;;  %v16750_v25 = vld [vmem:[#allocation5 + $0xa14] sm:$0xf0]  ;;  %v18508_v60 = vpop.f32.mrf.mxu3 }
 0x335   :  { %6788 = vmatpush.bf16.msra.mxu1 %v12320_v12  ;;  %v16480_v12 = vld [vmem:[#allocation5 + $0x1a4] sm:$0xf0]  ;;  %v16894_v3 = vld [vmem:[#allocation5 + $0xe94] sm:$0xf0] }
 0x336   :  { %6802 = vmatpush.bf16.msra.mxu2 %v12896_v9  ;;  %v12103_v9 = vld [vmem:[#allocation5 + $0x5e0] sm:$0xf]  ;;  %v11528_v26 = vor.u32 %v16480_v12, %v11527_v10 }
 0x337   :  { %6816 = vmatpush.bf16.msra.mxu3 %v13472_v34  ;;  %v16768_v34 = vld [vmem:[#allocation5 + $0xaa4] sm:$0xf0]  ;;  %v12104_v54 = vor.u32 %v16624_v46, %v12103_v9  ;;  %v11959_v9 = vld [vmem:[#allocation5 + $0x4c0] sm:$0xf] }
 0x338   :  { %6775 = vmatpush.bf16.msra.mxu0 %v11672_v44  ;;  %v12680_v16 = vor.u32 %v16768_v34, %v12679_v63  ;;  %v11455_v44 = vld [vmem:[#allocation5 + $0xd0] sm:$0xf]  ;;  %v12535_v46 = vld [vmem:[#allocation5 + $0x940] sm:$0xf]  ;;  %v13184_v63 = vor.u32 %v16894_v3, %v13183_v37  ;;  %v16732_v34 = vld [vmem:[#allocation5 + $0x984] sm:$0xf0] }
 0x339   :  { %6789 = vmatpush.bf16.msra.mxu1 %v12248_v47  ;;  %v16462_v47 = vld [vmem:[#allocation5 + $0x114] sm:$0xf0] }
 0x33a   :  { %6803 = vmatpush.bf16.msra.mxu2 %v12824_v45  ;;  %v12031_v45 = vld [vmem:[#allocation5 + $0x550] sm:$0xf]  ;;  %v11456_v51 = vor.u32 %v16462_v47, %v11455_v44  ;;  %v17146_v44 = vld [vmem:[#allocation5 + $0x1674] sm:$0xf0] }
 0x33b   :  { %6817 = vmatpush.bf16.msra.mxu3 %v13400_v36  ;;  %v12607_v36 = vld [vmem:[#allocation5 + $0x9d0] sm:$0xf]  ;;  %v12032_v10 = vor.u32 %v16606_v62, %v12031_v45  ;;  %v12536_v62 = vor.u32 %v16732_v34, %v12535_v46 }
 0x33c   :  { %6776 = vmatpush.bf16.msra.mxu0 %v11600_v41  ;;  %v11383_v41 = vld [vmem:[#allocation5 + $0x40] sm:$0xf]  ;;  %v12608_v12 = vor.u32 %v16750_v25, %v12607_v36  ;;  %v14767_v47 = vld [vmem:[#allocation5 + $0x1ab0] sm:$0xf]  ;;  %v16705_v36 = vld [vmem:[#allocation5 + $0x8b4] sm:$0xf]  ;;  %v13112_v25 = vor.u32 %v16876_v31, %v13111_v49 }
 0x33d   :  { %6790 = vmatpush.bf16.msra.mxu1 %v12176_v56  ;;  %v16444_v56 = vld [vmem:[#allocation5 + $0x84] sm:$0xf0]  ;;  %v14768_v3 = vor.u32 %v17290_v0, %v14767_v47  ;;  %v14120_v0 = vor.u32 %v17128_v8, %v14119_v30  ;;  %v17110_v49 = vld [vmem:[#allocation5 + $0x1554] sm:$0xf0]  ;;  %v14623_v31 = vld [vmem:[#allocation5 + $0x1990] sm:$0xf] }
 0x33e   :  { %6804 = vmatpush.bf16.msra.mxu2 %v12752_v61  ;;  %v18510_v61 = vpop.f32.mrf.mxu0  ;;  %v11384_v17 = vor.u32 %v16444_v56, %v11383_v41  ;;  %v17272_v41 = vld [vmem:[#allocation5 + $0x1a64] sm:$0xf0]  ;;  %v16543_v56 = vld [vmem:[#allocation5 + $0x3a4] sm:$0xf]  ;;  %v16525_v47 = vld [vmem:[#allocation5 + $0x314] sm:$0xf] }
 0x33f   :  { %6818 = vmatpush.bf16.msra.mxu3 %v13328_v1  ;;  %v16588_v1 = vld [vmem:[#allocation5 + $0x504] sm:$0xf0]  ;;  %v12321_v8 = vld [vmem:[#allocation5 + $0x7d8] sm:$0xf0] }
 0x340   :  { %6777 = vmatpush.bf16.msra.mxu0 %v11528_v26  ;;  %v14191_v26 = vld [vmem:[#allocation5 + $0x1630] sm:$0xf]  ;;  %v11960_v45 = vor.u32 %v16588_v1, %v11959_v9  ;;  %v12393_v9 = vld [vmem:[#allocation5 + $0x868] sm:$0xf0]  ;;  %v18516_v1 = vpop.f32.mrf.mxu3 }
 0x341   :  { %6791 = vmatpush.bf16.msra.mxu1 %v12104_v54  ;;  %v16561_v54 = vld [vmem:[#allocation5 + $0x434] sm:$0xf]  ;;  %v14192_v37 = vor.u32 %v17146_v44, %v14191_v26  ;;  %v17254_v44 = vld [vmem:[#allocation5 + $0x19d4] sm:$0xf0] }
 0x342   :  { %6805 = vmatpush.bf16.msra.mxu2 %v12680_v16  ;;  %v11889_v16 = vld [vmem:[#allocation5 + $0x478] sm:$0xf0]  ;;  %v14624_v30 = vor.u32 %v17254_v44, %v14623_v31  ;;  %v16489_v44 = vld [vmem:[#allocation5 + $0x1f4] sm:$0xf] }
 0x343   :  { %6819 = vmatpush.bf16.msra.mxu3 %v13256_v14  ;;  %v12465_v14 = vld [vmem:[#allocation5 + $0x8f8] sm:$0xf0]  ;;  %v11892_v4 = vor.u32 %v16561_v54, %v11889_v16  ;;  %v18521_v16 = vpop.f32.mrf.mxu1 }
 0x344   :  { %6778 = vmatpush.bf16.msra.mxu0 %v11456_v51  ;;  %v12468_v51 = vor.u32 %v16705_v36, %v12465_v14  ;;  %v11745_v54 = vld [vmem:[#allocation5 + $0x358] sm:$0xf0]  ;;  %v17092_v36 = vld [vmem:[#allocation5 + $0x14c4] sm:$0xf0]  ;;  %v14551_v14 = vld [vmem:[#allocation5 + $0x1900] sm:$0xf] }
 0x345   :  { %6792 = vmatpush.bf16.msra.mxu1 %v12032_v10  ;;  %v11817_v10 = vld [vmem:[#allocation5 + $0x3e8] sm:$0xf0] }
 0x346   :  { %6806 = vmatpush.bf16.msra.mxu2 %v12608_v12  ;;  %v16687_v12 = vld [vmem:[#allocation5 + $0x824] sm:$0xf]  ;;  %v18518_v46 = vpop.f32.mrf.mxu0  ;;  %v11820_v34 = vor.u32 %v16543_v56, %v11817_v10  ;;  %v12249_v10 = vld [vmem:[#allocation5 + $0x748] sm:$0xf0] }
 0x347   :  { %6820 = vmatpush.bf16.msra.mxu3 %v13184_v63  ;;  %v14696_v63 = vor.u32 %v17272_v41, %v14695_v28  ;;  %v12396_v26 = vor.u32 %v16687_v12, %v12393_v9  ;;  %v11673_v41 = vld [vmem:[#allocation5 + $0x2c8] sm:$0xf0]  ;;  %v16651_v56 = vld [vmem:[#allocation5 + $0x704] sm:$0xf] }
 0x348   :  { %6779 = vmatpush.bf16.msra.mxu0 %v11384_v17  ;;  %v14047_v17 = vld [vmem:[#allocation5 + $0x1510] sm:$0xf]  ;;  %v18528_v12 = vpop.f32.mrf.mxu3  ;;  %v12252_v31 = vor.u32 %v16651_v56, %v12249_v10  ;;  %v18534_v56 = vpop.permute.xlu2 %7324  ;;  %v16615_v10 = vld [vmem:[#allocation5 + $0x5e4] sm:$0xf] }
 0x349   :  { %6793 = vmatpush.bf16.msra.mxu1 %v11960_v45  ;;  %v16669_v45 = vld [vmem:[#allocation5 + $0x794] sm:$0xf]  ;;  %v14048_v28 = vor.u32 %v17110_v49, %v14047_v17  ;;  %v17074_v17 = vld [vmem:[#allocation5 + $0x1434] sm:$0xf0]  ;;  %v14479_v49 = vld [vmem:[#allocation5 + $0x1870] sm:$0xf] }
 0x34a   :  { %6807 = vmatpush.bf16.msra.mxu2 %v12536_v62  ;;  %v13975_v62 = vld [vmem:[#allocation5 + $0x1480] sm:$0xf] }
 0x34b   :  { %6821 = vmatpush.bf16.msra.mxu3 %v13112_v25  ;;  %6780 = vmatmul.bf16.vlgmr.msra.gmra.mxu0 %v18098_v57  ;;  %v18526_v25 = vpop.f32.mrf.mxu2  ;;  %v13976_v9 = vor.u32 %v17092_v36, %v13975_v62  ;;  %v13831_v62 = vld [vmem:[#allocation5 + $0x1360] sm:$0xf]  ;;  %v17056_v36 = vld [vmem:[#allocation5 + $0x13a4] sm:$0xf0] }
 0x34c   :  { %6828 = vmatpush.bf16.msrb.mxu0 %v14192_v37  ;;  %6794 = vmatmul.bf16.vlgmr.msra.gmra.mxu1 %v18101_v6  ;;  %v12324_v37 = vor.u32 %v16669_v45, %v12321_v8  ;;  %v16633_v45 = vld [vmem:[#allocation5 + $0x674] sm:$0xf]  ;;  %v12177_v8 = vld [vmem:[#allocation5 + $0x6b8] sm:$0xf0] }
 0x34d   :  { %6842 = vmatpush.bf16.msrb.mxu1 %v14768_v3  ;;  %6808 = vmatmul.bf16.vlgmr.msra.gmra.mxu2 %v18104_v22  ;;  %v17236_v3 = vld [vmem:[#allocation5 + $0x1944] sm:$0xf0] }
 0x34e   :  { %6856 = vmatpush.bf16.msrb.mxu2 %v11892_v4  ;;  %6822 = vmatmul.bf16.vlgmr.msra.gmra.mxu3 %v18106_v23  ;;  %v11748_v4 = vor.u32 %v16525_v47, %v11745_v54  ;;  %v11601_v47 = vld [vmem:[#allocation5 + $0x238] sm:$0xf0]  ;;  %v18530_v54 = vpop.f32.mrf.mxu0 }
 0x34f   :  { %6870 = vmatpush.bf16.msrb.mxu3 %v12468_v51  ;;  %v16507_v51 = vld [vmem:[#allocation5 + $0x284] sm:$0xf] }
 0x350   :  { %6829 = vmatpush.bf16.msrb.mxu0 %v14120_v0  ;;  %v14552_v0 = vor.u32 %v17236_v3, %v14551_v14  ;;  %v14407_v14 = vld [vmem:[#allocation5 + $0x17e0] sm:$0xf]  ;;  %v17200_v3 = vld [vmem:[#allocation5 + $0x1824] sm:$0xf0]  ;;  %v18548_v13 = vpop.permute.xlu2 %7326 }
 0x351   :  { %6843 = vmatpush.bf16.msrb.mxu1 %v14696_v63  ;;  %v11676_v63 = vor.u32 %v16507_v51, %v11673_v41  ;;  %v16471_v51 = vld [vmem:[#allocation5 + $0x164] sm:$0xf]  ;;  %v11529_v41 = vld [vmem:[#allocation5 + $0x1a8] sm:$0xf0] }
 0x352   :  { %6857 = vmatpush.bf16.msrb.mxu2 %v11820_v34  ;;  %v13903_v34 = vld [vmem:[#allocation5 + $0x13f0] sm:$0xf] }
 0x353   :  { %6871 = vmatpush.bf16.msrb.mxu3 %v12396_v26  ;;  %v17218_v26 = vld [vmem:[#allocation5 + $0x18b4] sm:$0xf0]  ;;  %v13904_v11 = vor.u32 %v17074_v17, %v13903_v34  ;;  %v13832_v34 = vor.u32 %v17056_v36, %v13831_v62  ;;  %v13759_v17 = vld [vmem:[#allocation5 + $0x12d0] sm:$0xf]  ;;  %v13687_v36 = vld [vmem:[#allocation5 + $0x1240] sm:$0xf] }
 0x354   :  { %6830 = vmatpush.bf16.msrb.mxu0 %v14048_v28  ;;  %v18532_v28 = vpop.f32.mrf.mxu1 }
 0x355   :  { %6844 = vmatpush.bf16.msrb.mxu1 %v14624_v30  ;;  %v14480_v30 = vor.u32 %v17218_v26, %v14479_v49  ;;  %v17038_v49 = vld [vmem:[#allocation5 + $0x1314] sm:$0xf0]  ;;  %v14335_v26 = vld [vmem:[#allocation5 + $0x1750] sm:$0xf] }
 0x356   :  { %6858 = vmatpush.bf16.msrb.mxu2 %v11748_v4  ;;  %v11604_v4 = vor.u32 %v16489_v44, %v11601_v47  ;;  %v12108_v44 = vor.u32 %v16615_v10, %v12105_v40  ;;  %v17182_v47 = vld [vmem:[#allocation5 + $0x1794] sm:$0xf0]  ;;  %v18540_v38 = vpop.f32.mrf.mxu0  ;;  %v13760_v62 = vor.u32 %v17038_v49, %v13759_v17  ;;  %v16435_v10 = vld [vmem:[#allocation5 + $0x44] sm:$0xf]  ;;  %v13041_v17 = vld [vmem:[#allocation5 + $0xd78] sm:$0xf0] }
 0x357   :  { %6872 = vmatpush.bf16.msrb.mxu3 %v12324_v37  ;;  %v12180_v37 = vor.u32 %v16633_v45, %v12177_v8  ;;  %v16453_v45 = vld [vmem:[#allocation5 + $0xd4] sm:$0xf]  ;;  %v11457_v8 = vld [vmem:[#allocation5 + $0x118] sm:$0xf0]  ;;  %v14336_v40 = vor.u32 %v17182_v47, %v14335_v26  ;;  %v11388_v53 = vor.u32 %v16435_v10, %v11385_v48 }
 0x358   :  { %6831 = vmatpush.bf16.msrb.mxu0 %v13976_v9  ;;  %v18536_v9 = vpop.f32.mrf.mxu2  ;;  %v16993_v49 = vld [vmem:[#allocation5 + $0x11b4] sm:$0xf]  ;;  %v14193_v47 = vld [vmem:[#allocation5 + $0x1678] sm:$0xf0] }
 0x359   :  { %6845 = vmatpush.bf16.msrb.mxu1 %v14552_v0  ;;  %v14408_v0 = vor.u32 %v17200_v3, %v14407_v14  ;;  %v17020_v14 = vld [vmem:[#allocation5 + $0x1284] sm:$0xf0]  ;;  %v17137_v26 = vld [vmem:[#allocation5 + $0x1634] sm:$0xf] }
 0x35a   :  { %6859 = vmatpush.bf16.msrb.mxu2 %v11676_v63  ;;  %v11532_v63 = vor.u32 %v16471_v51, %v11529_v41  ;;  %v14263_v51 = vld [vmem:[#allocation5 + $0x16c0] sm:$0xf]  ;;  %v17164_v41 = vld [vmem:[#allocation5 + $0x1704] sm:$0xf0] }
 0x35b   :  { %6873 = vmatpush.bf16.msrb.mxu3 %v12252_v31  ;;  %v18538_v31 = vpop.f32.mrf.mxu3  ;;  %v14264_v21 = vor.u32 %v17164_v41, %v14263_v51  ;;  %v14121_v51 = vld [vmem:[#allocation5 + $0x15e8] sm:$0xf0] }
 0x35c   :  { %6832 = vmatpush.bf16.msrb.mxu0 %v13904_v11  ;;  %v18542_v11 = vld [vmem:[#allocation7 + $0x8] sm:$0xff]  ;;  %v18546_v3 = vpop.f32.mrf.mxu1 }
 0x35d   :  { %6846 = vmatpush.bf16.msrb.mxu1 %v14480_v30  ;;  %v1054_v30 = vperm.slane %v18542_v11, 4 }
 0x35e   :  { %6860 = vmatpush.bf16.msrb.mxu2 %v11604_v4  ;;  %v1055_v4 = vperm.slane %v18542_v11, 5  ;;  %v6559_v10 = vpop.f32.mrf.mxu0 }
 0x35f   :  { %6874 = vmatpush.bf16.msrb.mxu3 %v12180_v37  ;;  %v11460_v37 = vor.u32 %v16453_v45, %v11457_v8  ;;  %v6446_v32 = vadd.f32 %v18500_v52, %v1054_v30  ;;  %v14769_v8 = vld [vmem:[#allocation5 + $0x1af8] sm:$0xf0]  ;;  %v14196_v52 = vor.u32 %v17137_v26, %v14193_v47  ;;  %v14700_v26 = vor.u32 %v17263_v2, %v14697_v18 }
 0x360   :  { %6833 = vmatpush.bf16.msrb.mxu0 %v13832_v34  ;;  %v16849_v34 = vld [vmem:[#allocation5 + $0xd34] sm:$0xf]  ;;  %v6530_v45 = vadd.f32 %v18526_v25, %v1055_v4  ;;  %v18552_v59 = vpop.f32.mrf.mxu2  ;;  %v13473_v47 = vld [vmem:[#allocation5 + $0x10d8] sm:$0xf0] }
 0x361   :  { %6847 = vmatpush.bf16.msrb.mxu1 %v14408_v0  ;;  %v13688_v0 = vor.u32 %v17020_v14, %v13687_v36  ;;  %v13044_v15 = vor.u32 %v16849_v34, %v13041_v17  ;;  %v12969_v36 = vld [vmem:[#allocation5 + $0xce8] sm:$0xf0]  ;;  %v16975_v14 = vld [vmem:[#allocation5 + $0x1124] sm:$0xf]  ;;  %v6460_v48 = vadd.f32 %v18504_v7, %v6446_v32  ;;  %v6532_v34 = vadd.f32 %v18536_v9, %v1055_v4  ;;  %v16813_v7 = vld [vmem:[#allocation5 + $0xc14] sm:$0xf]  ;;  %v18563_v9 = vpop.permute.xlu2 %7264 }
 0x362   :  { %6861 = vmatpush.bf16.msrb.mxu2 %v11532_v63  ;;  %v13617_v63 = vld [vmem:[#allocation5 + $0x11f8] sm:$0xf0]  ;;  %v6544_v41 = vadd.f32 %v18528_v12, %v6530_v45 }
 0x363   :  { %6875 = vmatpush.bf16.msrb.mxu3 %v12108_v44  ;;  %v17281_v44 = vld [vmem:[#allocation5 + $0x1ab4] sm:$0xf]  ;;  %v13620_v55 = vor.u32 %v16993_v49, %v13617_v63  ;;  %v18554_v20 = vpop.f32.mrf.mxu3  ;;  %v12897_v12 = vld [vmem:[#allocation5 + $0xc58] sm:$0xf0] }
 0x364   :  { %6834 = vmatpush.bf16.msrb.mxu0 %v13760_v62  ;;  %v16831_v62 = vld [vmem:[#allocation5 + $0xca4] sm:$0xf]  ;;  %v14772_v25 = vor.u32 %v17281_v44, %v14769_v8  ;;  %v18560_v49 = vpop.f32.mrf.mxu1  ;;  %v16957_v63 = vld [vmem:[#allocation5 + $0x1094] sm:$0xf]  ;;  %v14625_v4 = vld [vmem:[#allocation5 + $0x19d8] sm:$0xf0] }
 0x365   :  { %6848 = vmatpush.bf16.msrb.mxu1 %v14336_v40  ;;  %v13545_v40 = vld [vmem:[#allocation5 + $0x1168] sm:$0xf0]  ;;  %v12972_v17 = vor.u32 %v16831_v62, %v12969_v36  ;;  %v1056_v44 = vperm.slane %v18542_v11, 6  ;;  %v16795_v8 = vld [vmem:[#allocation5 + $0xb84] sm:$0xf] }
 0x366   :  { %6862 = vmatpush.bf16.msrb.mxu2 %v11460_v37  ;;  %v17119_v37 = vld [vmem:[#allocation5 + $0x15a4] sm:$0xf] }
 0x367   :  { %6876 = vmatpush.bf16.msrb.mxu3 %v12036_v24  ;;  %v6448_v24 = vadd.f32 %v18510_v61, %v1054_v30  ;;  %v14124_v32 = vor.u32 %v17119_v37, %v14121_v51  ;;  %v17101_v61 = vld [vmem:[#allocation5 + $0x1514] sm:$0xf]  ;;  %v14049_v30 = vld [vmem:[#allocation5 + $0x1558] sm:$0xf0]  ;;  %v16939_v62 = vld [vmem:[#allocation5 + $0x1004] sm:$0xf] }
 0x368   :  { %6835 = vmatpush.bf16.msrb.mxu0 %v13688_v0  ;;  %v13548_v0 = vor.u32 %v16975_v14, %v13545_v40  ;;  %v13401_v14 = vld [vmem:[#allocation5 + $0x1048] sm:$0xf0]  ;;  %v6613_v51 = vpop.f32.mrf.mxu0 }
 0x369   :  { %6849 = vmatpush.bf16.msrb.mxu1 %v14264_v21  ;;  %v6462_v45 = vadd.f32 %v18512_v27, %v6448_v24  ;;  %v6546_v21 = vadd.f32 %v18538_v31, %v6532_v34  ;;  %v17083_v27 = vld [vmem:[#allocation5 + $0x1484] sm:$0xf]  ;;  %v14553_v37 = vld [vmem:[#allocation5 + $0x1948] sm:$0xf0]  ;;  %v6614_v24 = vadd.f32 %v6613_v51, %v1056_v44  ;;  %v13404_v34 = vor.u32 %v16939_v62, %v13401_v14 }
 0x36a   :  { %6863 = vmatpush.bf16.msrb.mxu2 %v11388_v53  ;;  %v12900_v53 = vor.u32 %v16813_v7, %v12897_v12  ;;  %v13329_v12 = vld [vmem:[#allocation5 + $0xfb8] sm:$0xf0]  ;;  %v13833_v62 = vld [vmem:[#allocation5 + $0x13a8] sm:$0xf0] }
 0x36b   :  { %6877 = vmatpush.bf16.msrb.mxu3 %v11964_v29  ;;  %6836 = vmatmul.bf16.vlgmr.msrb.gmra.mxu0 %v18110_v35  ;;  %v6558_v29 = vadd.f32 %v18540_v38, %v6544_v41  ;;  %v14052_v38 = vor.u32 %v17101_v61, %v14049_v30  ;;  %v6560_v41 = vadd.f32 %v6559_v10, %v6546_v21  ;;  %v6601_v2 = vpop.f32.mrf.mxu3  ;;  %v14481_v61 = vld [vmem:[#allocation5 + $0x18b8] sm:$0xf0]  ;;  %v14409_v14 = vld [vmem:[#allocation5 + $0x1828] sm:$0xf0] }
 0x36c   :  { %6884 = vmatpush.bf16.msra.mxu0 %v13044_v15  ;;  %v6474_v15 = vadd.f32 %v18506_v50, %v6460_v48  ;;  %6850 = vmatmul.bf16.vlgmr.msrb.gmra.mxu1 %v18112_v39  ;;  %v13476_v50 = vor.u32 %v16957_v63, %v13473_v47  ;;  %v6476_v48 = vadd.f32 %v18514_v42, %v6462_v45  ;;  %v17065_v63 = vld [vmem:[#allocation5 + $0x13f4] sm:$0xf]  ;;  %v13905_v42 = vld [vmem:[#allocation5 + $0x1438] sm:$0xf0] }
 0x36d   :  { %6898 = vmatpush.bf16.msra.mxu1 %v13620_v55  ;;  %6864 = vmatmul.bf16.vlgmr.msrb.gmra.mxu2 %v18098_v57  ;;  %v17245_v55 = vld [vmem:[#allocation5 + $0x1994] sm:$0xf]  ;;  %v6587_v57 = vpop.f32.mrf.mxu2  ;;  %v6572_v40 = vadd.f32 %v18546_v3, %v6558_v29  ;;  %v6627_v3 = vpop.f32.mrf.mxu1  ;;  %v6574_v29 = vadd.f32 %v18560_v49, %v6560_v41  ;;  %v13908_v21 = vor.u32 %v17065_v63, %v13905_v42  ;;  %v12609_v41 = vld [vmem:[#allocation5 + $0xa18] sm:$0xf0] }
 0x36e   :  { %6912 = vmatpush.bf16.msra.mxu2 %v14196_v52  ;;  %6878 = vmatmul.bf16.vlgmr.msrb.gmra.mxu3 %v18101_v6  ;;  %v12825_v52 = vld [vmem:[#allocation5 + $0xbc8] sm:$0xf0]  ;;  %v14628_v36 = vor.u32 %v17245_v55, %v14625_v4  ;;  %v6488_v31 = vadd.f32 %v18508_v60, %v6474_v15  ;;  %v17227_v6 = vld [vmem:[#allocation5 + $0x1904] sm:$0xf]  ;;  %v12753_v60 = vld [vmem:[#allocation5 + $0xb38] sm:$0xf0]  ;;  %v6628_v10 = vadd.f32 %v6627_v3, %v6614_v24  ;;  %v18582_v4 = vpop.permute.xlu2 %7266 }
 0x36f   :  { %6926 = vmatpush.bf16.msra.mxu3 %v14772_v25  ;;  %v13977_v25 = vld [vmem:[#allocation5 + $0x14c8] sm:$0xf0]  ;;  %v12828_v18 = vor.u32 %v16795_v8, %v12825_v52  ;;  %v14556_v7 = vor.u32 %v17227_v6, %v14553_v37  ;;  %v17209_v47 = vld [vmem:[#allocation5 + $0x1874] sm:$0xf]  ;;  %v6490_v15 = vadd.f32 %v18516_v1, %v6476_v48  ;;  %v14337_v3 = vld [vmem:[#allocation5 + $0x1798] sm:$0xf0] }
 0x370   :  { %6885 = vmatpush.bf16.msra.mxu0 %v12972_v17  ;;  %v13980_v17 = vor.u32 %v17083_v27, %v13977_v25  ;;  %v6502_v30 = vadd.f32 %v18518_v46, %v6488_v31  ;;  %v14484_v8 = vor.u32 %v17209_v47, %v14481_v61  ;;  %v13257_v52 = vld [vmem:[#allocation5 + $0xf28] sm:$0xf0]  ;;  %v17047_v46 = vld [vmem:[#allocation5 + $0x1364] sm:$0xf]  ;;  %v7269_v25 = vrot.slane %v18582_v4, 4 }
 0x371   :  { %6899 = vmatpush.bf16.msra.mxu1 %v13548_v0  ;;  %v16777_v0 = vld [vmem:[#allocation5 + $0xaf4] sm:$0xf]  ;;  %v13836_v51 = vor.u32 %v17047_v46, %v13833_v62  ;;  %v16867_v47 = vld [vmem:[#allocation5 + $0xdc4] sm:$0xf]  ;;  %v6966_v61 = vunpack.c.h.b16 %v18338_v58 }
 0x372   :  { %6913 = vmatpush.bf16.msra.mxu2 %v14124_v32  ;;  %v16921_v32 = vld [vmem:[#allocation5 + $0xf74] sm:$0xf]  ;;  %v12756_v55 = vor.u32 %v16777_v0, %v12753_v60  ;;  %v6516_v31 = vadd.f32 %v18521_v16, %v6502_v30  ;;  %v13761_v16 = vld [vmem:[#allocation5 + $0x1318] sm:$0xf0] }
 0x373   :  { %6927 = vmatpush.bf16.msra.mxu3 %v14700_v26  ;;  %v6586_v26 = vadd.f32 %v18552_v59, %v6572_v40  ;;  %v13332_v45 = vor.u32 %v16921_v32, %v13329_v12  ;;  %v6588_v59 = vadd.f32 %v6587_v57, %v6574_v29  ;;  %v6504_v40 = vadd.f32 %v18530_v54, %v6490_v15  ;;  %v6655_v57 = vpop.f32.mrf.mxu3  ;;  %v16741_v48 = vld [vmem:[#allocation5 + $0x9d4] sm:$0xf]  ;;  %v13113_v15 = vld [vmem:[#allocation5 + $0xe08] sm:$0xf0]  ;;  %v17011_v29 = vld [vmem:[#allocation5 + $0x1244] sm:$0xf] }
 0x374   :  { %6886 = vmatpush.bf16.msra.mxu0 %v12900_v53  ;;  %v16759_v53 = vld [vmem:[#allocation5 + $0xa64] sm:$0xf]  ;;  %v17029_v0 = vld [vmem:[#allocation5 + $0x12d4] sm:$0xf]  ;;  %v7268_v54 = vrot.slane %v18563_v9, 4  ;;  %v12612_v12 = vor.u32 %v16741_v48, %v12609_v41  ;;  %v6968_v46 = vpack.c.b16 %v6966_v61, %v6966_v61  ;;  %v7329_v41 = vrot.slane %v18548_v13, 4 }
 0x375   :  { %6900 = vmatpush.bf16.msra.mxu1 %v13476_v50  ;;  %v12681_v50 = vld [vmem:[#allocation5 + $0xaa8] sm:$0xf0]  ;;  %v6641_v1 = vpop.f32.mrf.mxu2  ;;  %v6600_v49 = vadd.f32 %v18554_v20, %v6586_v26  ;;  %v6602_v24 = vadd.f32 %v6601_v2, %v6588_v59  ;;  %v17173_v32 = vld [vmem:[#allocation5 + $0x1754] sm:$0xf]  ;;  %v13764_v42 = vor.u32 %v17029_v0, %v13761_v16 }
 0x376   :  { %6914 = vmatpush.bf16.msra.mxu2 %v14052_v38  ;;  %v16903_v38 = vld [vmem:[#allocation5 + $0xee4] sm:$0xf]  ;;  %v6642_v27 = vadd.f32 %v6641_v1, %v6628_v10  ;;  %v12684_v6 = vor.u32 %v16759_v53, %v12681_v50  ;;  %v7270_v63 = vsel %vm7103_vm0, %v7268_v54, %v7269_v25  ;;  %v12537_v26 = vld [vmem:[#allocation5 + $0x988] sm:$0xf0]  ;;  %v14340_v30 = vor.u32 %v17173_v32, %v14337_v3 }
 0x377   :  { %6928 = vmatpush.bf16.msra.mxu3 %v14628_v36  ;;  %v17191_v36 = vld [vmem:[#allocation5 + $0x17e4] sm:$0xf]  ;;  %v13260_v37 = vor.u32 %v16903_v38, %v13257_v52  ;;  %v18591_v60 = vpack.c.bf16 %v6600_v49, %v6516_v31  ;;  %v6965_v50 = vunpack.c.l.b16 %v18338_v58  ;;  %v18603_v38 = vsel %vm6970_vm1, %v7270_v63, %v18582_v4  ;;  %v18611_v31 = vpop.f32.mrf.mxu1 }
 0x378   :  { %6887 = vmatpush.bf16.msra.mxu0 %v12828_v18  ;;  %v16885_v18 = vld [vmem:[#allocation5 + $0xe54] sm:$0xf]  ;;  %v18588_v20 = vadd.f32 %v6655_v57, %v6642_v27  ;;  %v16723_v10 = vld [vmem:[#allocation5 + $0x944] sm:$0xf]  ;;  %v7278_v58 = vunpack.c.h.b16 %v18603_v38  ;;  %v18608_v27 = vpop.f32.mrf.mxu0  ;;  %v7010_v25 = vunpack.c.l.b16 %v18342_v19  ;;  %v1057_v3 = vperm.slane %v18542_v11, 7 }
 0x379   :  { %6901 = vmatpush.bf16.msra.mxu1 %v13404_v34  ;;  %v14412_v34 = vor.u32 %v17191_v36, %v14409_v14  ;;  %v7097_v53 = vunpack.c.h.b16 %v18591_v60  ;;  %v12540_v59 = vor.u32 %v16723_v10, %v12537_v26  ;;  %v7096_v49 = vunpack.c.l.b16 %v18591_v60 }
 0x37a   :  { %6915 = vmatpush.bf16.msra.mxu2 %v13980_v17  ;;  %v13185_v17 = vld [vmem:[#allocation5 + $0xe98] sm:$0xf0]  ;;  %v6967_v4 = vpack.c.b16 %v6965_v50, %v6965_v50  ;;  %v6960_v63 = vunpack.c.h.b16 %v18175_v5 }
 0x37b   :  { %6929 = vmatpush.bf16.msra.mxu3 %v14556_v7  ;;  %v6518_v7 = vadd.f32 %v18532_v28, %v6504_v40  ;;  %v13188_v2 = vor.u32 %v16885_v18, %v13185_v17  ;;  %v13689_v28 = vld [vmem:[#allocation5 + $0x1288] sm:$0xf0]  ;;  %v7099_v14 = vpack.c.b16 %v7097_v53, %v7097_v53  ;;  %v6975_v40 = vsel %vm6970_vm1, %v6968_v46, 0 }
 0x37c   :  { %6888 = vmatpush.bf16.msra.mxu0 %v12756_v55  ;;  %v7011_v55 = vunpack.c.h.b16 %v18342_v19  ;;  %v13692_v52 = vor.u32 %v17011_v29, %v13689_v28  ;;  %v7098_v57 = vpack.c.b16 %v7096_v49, %v7096_v49  ;;  %v7012_v19 = vpack.c.b16 %v7010_v25, %v7010_v25 }
 0x37d   :  { %6902 = vmatpush.bf16.msra.mxu1 %v13332_v45  ;;  %v18596_v9 = vpack.c.bf16 %v6602_v24, %v6518_v7  ;;  %v17155_v45 = vld [vmem:[#allocation5 + $0x16c4] sm:$0xf]  ;;  %v7108_v48 = vsel %vm7103_vm0, %v7099_v14, 0  ;;  %v7328_v18 = vrot.slane %v18534_v56, 4  ;;  %v18626_v0 = vpop.f32.mrf.mxu2  ;;  %v18629_v56 = vpop.f32.mrf.mxu3  ;;  %v6959_v7 = vunpack.c.l.b16 %v18175_v5 }
 0x37e   :  { %6916 = vmatpush.bf16.msra.mxu2 %v13908_v21  ;;  %v14265_v21 = vld [vmem:[#allocation5 + $0x1708] sm:$0xf0]  ;;  %v7013_v1 = vpack.c.b16 %v7011_v55, %v7011_v55  ;;  %v7105_v24 = vsel %vm7103_vm0, %v7098_v57, 0  ;;  %v18660_v57 = vld [vmem:[#allocation7 + $0x10] sm:$0x3] }
 0x37f   :  { %6930 = vmatpush.bf16.msra.mxu3 %v14484_v8  ;;  %v13116_v8 = vor.u32 %v16867_v47, %v13113_v15  ;;  %v14268_v62 = vor.u32 %v17155_v45, %v14265_v21  ;;  %v7138_v36 = vunpack.c.h.b16 %v18596_v9  ;;  %v7137_v32 = vunpack.c.l.b16 %v18596_v9 }
 0x380   :  { %6889 = vmatpush.bf16.msra.mxu0 %v12684_v6  ;;  %v7019_v6 = vsel %vm6970_vm1, %v7013_v1, 0  ;;  %v6961_v26 = vpack.c.b16 %v6959_v7, %v6959_v7  ;;  %v7004_v45 = vunpack.c.l.b16 %v18179_v43 }
 0x381   :  { %6903 = vmatpush.bf16.msra.mxu1 %v13260_v37  ;;  %v7140_v37 = vpack.c.b16 %v7138_v36, %v7138_v36  ;;  %v7139_v10 = vpack.c.b16 %v7137_v32, %v7137_v32 }
 0x382   :  { %6917 = vmatpush.bf16.msra.mxu2 %v13836_v51  ;;  %v7280_v51 = vpack.c.b16 %v7278_v58, %v7278_v58 }
 0x383   :  { %6931 = vmatpush.bf16.msra.mxu3 %v14412_v34  ;;  %v7148_v34 = vsel %vm7103_vm0, %v7140_v37, 0  ;;  %v7145_v5 = vsel %vm7103_vm0, %v7139_v10, 0  ;;  %v1058_v37 = vperm.slane %v18660_v57, 0 }
 0x384   :  { %6890 = vmatpush.bf16.msra.mxu0 %v12612_v12  ;;  %v7286_v17 = vsel %vm6970_vm1, %v7280_v51, 0 }
 0x385   :  { %6904 = vmatpush.bf16.msra.mxu1 %v13188_v2  ;;  %v7005_v2 = vunpack.c.h.b16 %v18179_v43 }
 0x386   :  { %6918 = vmatpush.bf16.msra.mxu2 %v13764_v42 }
 0x387   :  { %6932 = vmatpush.bf16.msra.mxu3 %v14340_v30  ;;  %v6962_v30 = vpack.c.b16 %v6960_v63, %v6960_v63  ;;  %v7007_v15 = vpack.c.b16 %v7005_v2, %v7005_v2  ;;  %v1059_v2 = vperm.slane %v18660_v57, 1 }
 0x388   :  { %6891 = vmatpush.bf16.msra.mxu0 %v12540_v59 }
 0x389   :  { %6905 = vmatpush.bf16.msra.mxu1 %v13116_v8  ;;  %v6683_v16 = vpop.f32.mrf.mxu1 }
 0x38a   :  { %6919 = vmatpush.bf16.msra.mxu2 %v13692_v52 }
 0x38b   :  { %6933 = vmatpush.bf16.msra.mxu3 %v14268_v62  ;;  %6892 = vmatmul.bf16.vlgmr.msra.gmra.mxu0 %v18104_v22  ;;  %v7330_v22 = vsel %vm7103_vm0, %v7328_v18, %v7329_v41 }
 0x38c   :  { %6984 = vmatpush.bf16.xpose.msrb.mxu0 %v6967_v4  ;;  %6906 = vmatmul.bf16.vlgmr.msra.gmra.mxu1 %v18106_v23  ;;  %v7331_v23 = vsel %vm6970_vm1, %v7330_v22, %v18548_v13 }
 0x38d   :  { %7130 = vmatpush.bf16.msrb.mxu1 %v7108_v48  ;;  %6920 = vmatmul.bf16.vlgmr.msra.gmra.mxu2 %v18110_v35  ;;  %v6669_v35 = vpop.f32.mrf.mxu0  ;;  %v7338_v12 = vunpack.c.h.b16 %v7331_v23  ;;  %v7337_v53 = vunpack.c.l.b16 %v7331_v23 }
 0x38e   :  { %6997 = vmatpush.bf16.xpose.msrb.mxu2 %v6975_v40  ;;  %6934 = vmatmul.bf16.vlgmr.msra.gmra.mxu3 %v18112_v39  ;;  %v6670_v39 = vadd.f32 %v6669_v35, %v18588_v20  ;;  %v7277_v20 = vunpack.c.l.b16 %v18603_v38  ;;  %v7006_v38 = vpack.c.b16 %v7004_v45, %v7004_v45 }
 0x38f   :  { %7041 = vmatpush.bf16.xpose.msrb.mxu3 %v7019_v6  ;;  %v7340_v47 = vpack.c.b16 %v7338_v12, %v7338_v12  ;;  %v7339_v59 = vpack.c.b16 %v7337_v53, %v7337_v53 }
 0x390   :  { %v6684_v54 = vadd.f32 %v6683_v16, %v6670_v39  ;;  %v6697_v42 = vpop.f32.mrf.mxu2  ;;  %v7279_v28 = vpack.c.b16 %v7277_v20, %v7277_v20 }
 0x391   :  { %7308 = vmatpush.bf16.xpose.msra.mxu1 %v7286_v17  ;;  %v6698_v13 = vadd.f32 %v6697_v42, %v1057_v3  ;;  %v6711_v61 = vpop.f32.mrf.mxu3  ;;  %v7346_v55 = vsel %vm6970_vm1, %v7340_v47, 0  ;;  %v18648_v50 = vpop.f32.mrf.mxu1 }
 0x393   :  { %v6712_v29 = vadd.f32 %v6711_v61, %v6698_v13 }
 0x394   :  { %7117 = vmatpush.bf16.msra.mxu0 %v7105_v24 }
 0x395   :  { %v18646_v21 = vpop.f32.mrf.mxu0 }
 0x396   :  { %7028 = vmatpush.bf16.xpose.msra.mxu2 %v7012_v19 }
 0x397   :  { %7170 = vmatpush.bf16.msra.mxu3 %v7148_v34 }
 0x398   :  { %v18650_v8 = vpop.f32.mrf.mxu2 }
 0x399   :  { %v18652_v52 = vpop.f32.mrf.mxu3 }
 0x39b   :  { %6985 = vmatmul.bf16.vlgmr.msrb.gmra.mxu0 %v6961_v26 }
 0x39c   :  { %7295 = vmatpush.bf16.xpose.msrb.mxu0 %v7279_v28 }
 0x39d   :  { %14773 = vmatmul.msk.bf16.vlgmr.msrb.gmra.mxu2 %vm6970_vm1, %v6962_v30 }
 0x39e   :  { %14774 = vmatmul.msk.bf16.vlgmr.msrb.gmra.mxu3 %vm6970_vm1, %v7007_v15  ;;  %7157 = vmatpush.bf16.msrb.mxu2 %v7145_v5 }
 0x39f   :  { %7368 = vmatpush.bf16.xpose.msrb.mxu3 %v7346_v55 }
 0x3a8   :  { %v6725_v46 = vpop.f32.mrf.mxu0 }
 0x3a9   :  { %v6726_v62 = vadd.f32 %v6725_v46, %v6712_v29  ;;  %v6739_v1 = vpop.f32.mrf.mxu1 }
 0x3ab   :  { %v6740_v49 = vadd.f32 %v6739_v1, %v6726_v62 }
 0x3ad   :  { %7029 = vmatmul.bf16.vlgmr.msra.gmra.mxu2 %v7006_v38 }
 0x3ae   :  { %7355 = vmatpush.bf16.xpose.msra.mxu2 %v7339_v59 }
 0x3b0   :  { %v6753_v36 = vpop.f32.mrf.mxu2  ;;  %v18656_v40 = vpop.f32.mrf.mxu0 }
 0x3b1   :  { %v6754_v58 = vadd.f32 %v6753_v36, %v6740_v49  ;;  %v6767_v14 = vpop.f32.mrf.mxu3  ;;  %v18658_v6 = vpop.f32.mrf.mxu1 }
 0x3b3   :  { %v6768_v4 = vadd.f32 %v6767_v14, %v6754_v58 }
 0x3b5   :  { %v18654_v25 = vpack.c.bf16 %v6768_v4, %v6684_v54 }
 0x3b8   :  { %v18663_v51 = vpop.f32.mrf.mxu2 }
 0x3b9   :  { %v18665_v41 = vpop.f32.mrf.mxu3 }
 0x3c8   :  { %v6781_v48 = vpop.f32.mrf.mxu0 }
 0x3c9   :  { %v6782_v19 = vadd.f32 %v6781_v48, %v1058_v37  ;;  %v6795_v18 = vpop.f32.mrf.mxu1 }
 0x3cb   :  { %v6796_v24 = vadd.f32 %v6795_v18, %v6782_v19 }
 0x3d0   :  { %v6809_v34 = vpop.f32.mrf.mxu2  ;;  %v18669_v39 = vpop.f32.mrf.mxu0 }
 0x3d1   :  { %v6810_v17 = vadd.f32 %v6809_v34, %v6796_v24  ;;  %v6823_v22 = vpop.f32.mrf.mxu3  ;;  %v18671_v23 = vpop.f32.mrf.mxu1 }
 0x3d3   :  { %v6824_v35 = vadd.f32 %v6823_v22, %v6810_v17 }
 0x3d8   :  { %v18673_v16 = vpop.f32.mrf.mxu2 }
 0x3d9   :  { %v18675_v54 = vpop.f32.mrf.mxu3 }
 0x3e8   :  { %v6837_v32 = vpop.f32.mrf.mxu0 }
 0x3e9   :  { %v6838_v7 = vadd.f32 %v6837_v32, %v6824_v35  ;;  %v6851_v12 = vpop.f32.mrf.mxu1  ;;  %v6616_v35 = vadd.f32 %v18608_v27, %v1056_v44  ;;  %v6700_v32 = vadd.f32 %v18650_v8, %v1057_v3 }
 0x3eb   :  { %v6852_v63 = vadd.f32 %v6851_v12, %v6838_v7  ;;  %v6630_v7 = vadd.f32 %v18611_v31, %v6616_v35  ;;  %v6714_v12 = vadd.f32 %v18652_v52, %v6700_v32 }
 0x3f0   :  { %v6865_v20 = vpop.f32.mrf.mxu2  ;;  %v18680_v26 = vpop.f32.mrf.mxu0 }
 0x3f1   :  { %v6866_v42 = vadd.f32 %v6865_v20, %v1059_v2  ;;  %v6879_v10 = vpop.f32.mrf.mxu3  ;;  %v18682_v47 = vpop.f32.mrf.mxu1  ;;  %v6728_v20 = vadd.f32 %v18656_v40, %v6714_v12 }
 0x3f3   :  { %v6880_v13 = vadd.f32 %v6879_v10, %v6866_v42  ;;  %v6742_v10 = vadd.f32 %v18658_v6, %v6728_v20 }
 0x3f5   :  { %v6756_v44 = vadd.f32 %v18663_v51, %v6742_v10 }
 0x3f7   :  { %v6770_v27 = vadd.f32 %v18665_v41, %v6756_v44  ;;  %v19146_v41 = vld [vmem:[#allocation25_spill] sm:$0xff]  ;;  %v7254_v44 = vpop.permute.xlu2 %7253 }
 0x3f8   :  { %v18684_v61 = vpop.f32.mrf.mxu2 }
 0x3f9   :  { %v18686_v30 = vpop.f32.mrf.mxu3 }
 0x408   :  { %v6893_v15 = vpop.f32.mrf.mxu0 }
 0x409   :  { %v6894_v29 = vadd.f32 %v6893_v15, %v6880_v13  ;;  %v6907_v28 = vpop.f32.mrf.mxu1  ;;  %v18017_v13 = vmov 8.0  }
 0x40b   :  { %v6908_v5 = vadd.f32 %v6907_v28, %v6894_v29 }
 0x410   :  { %v6921_v55 = vpop.f32.mrf.mxu2  ;;  %v18688_v38 = vpop.f32.mrf.mxu0 }
 0x411   :  { %v6935_v45 = vpop.f32.mrf.mxu3  ;;  %v6922_v53 = vadd.f32 %v6921_v55, %v6908_v5 }
 0x413   :  { %v6936_v59 = vadd.f32 %v6935_v45, %v6922_v53 }
 0x415   :  { %v18690_v46 = vpack.c.bf16 %v6936_v59, %v6852_v63  ;;  %v6644_v63 = vadd.f32 %v18626_v0, %v6630_v7 }
 0x417   :  { %v6658_v42 = vadd.f32 %v18629_v56, %v6644_v63 }
 0x418   :  { %v18692_v62 = vpop.f32.mrf.mxu2  ;;  %v6986_v49 = vpop.f32.mrf.mxu0 }
 0x419   :  { %v18694_v1 = vpop.f32.mrf.mxu3  ;;  %v6672_v11 = vadd.f32 %v18646_v21, %v6658_v42 }
 0x41b   :  { %v6686_v31 = vadd.f32 %v18648_v50, %v6672_v11 }
 0x41d   :  { %v18718_v0 = vpack.c.bf16 %v6770_v27, %v6686_v31  ;;  %v7257_v31 = vrot.slane %v7254_v44, 4 }
 0x420   :  { %v6999_v36 = vpop.f32.mrf.mxu2  ;;  %v6988_v14 = vpop.f32.mrf.mxu0 }
 0x421   :  { %v7043_v58 = vpop.f32.mrf.mxu3  ;;  %v7000_v34 = vadd.f32 %v6999_v36, %v6986_v49 }
 0x423   :  { %v7048_v22 = vsel %vm7047_vm2, %v7000_v34, -inf }
 0x428   :  { %v7001_v4 = vpop.f32.mrf.mxu2 }
 0x429   :  { %v7045_v48 = vpop.f32.mrf.mxu3 }
 0x430   :  { %v7030_v19 = vpop.f32.mrf.mxu2 }
 0x431   :  { %v7044_v18 = vadd.f32 %v7043_v58, %v7030_v19 }
 0x433   :  { %v7051_v24 = vsel %vm7047_vm2, %v7044_v18, -inf }
 0x434   :  { %7052 = vmax.xlane.f32.xlu0 %v7051_v24 }
 0x438   :  { %v7032_v17 = vpop.f32.mrf.mxu2 }
 0x43c   :  { %7049 = vmax.xlane.f32.xlu0 %v7048_v22 }
 0x450   :  { %7315 = vrot.lane.b32.xlu0 %v18179_v43, %s18010_s5 }
 0x458   :  { %7255 = vrot.lane.b32.xlu0 %v18230_v33, %s18010_s5 }
 0x460   :  { %7465 = vrot.lane.b32.xlu0 %v18718_v0, %s18010_s5 }
 0x4a7   :  { %v7053_v43 = vpop.xlane.xlu0 %7052 }
 0x4a8   :  { %v7055_v8 = vsub.f32 %v7044_v18, %v7053_v43 }
 0x4aa   :  { %v7058_v40 = vmul.f32 1.442695, %v7055_v8 }
 0x4af   :  { %v7050_v56 = vpop.xlane.xlu0 %7049 }
 0x4b0   :  { %v7054_v3 = vsub.f32 %v7000_v34, %v7050_v56 }
 0x4b2   :  { %v7056_v52 = vmul.f32 1.442695, %v7054_v3 }
 0x4b4   :  { %17711 = vpow2.f32 %v7056_v52 }
 0x4b5   :  { %17713 = vpow2.f32 %v7058_v40 }
 0x4b6   :  { %17715 = vrcp.f32 %v18017_v13 }
 0x4ba   :  { %v17712_v21 = vpop.eup %17711 }
 0x4bb   :  { %v7060_v6 = vsel %vm7047_vm2, %v17712_v21, 0.0  ;;  %v17714_v51 = vpop.eup %17713 }
 0x4bc   :  { %7061 = vadd.xlane.f32.xlu1 %v7060_v6  ;;  %v7063_v50 = vsel %vm7047_vm2, %v17714_v51, 0.0  ;;  %v17716_v29 = vpop.eup %17715 }
 0x4bd   :  { %v7085_v28 = vmul.f32 8.0, %v17716_v29  ;;  %vm7089_vm3 = vweird.f32 %v17716_v29 }
 0x4bf   :  { %v7086_v55 = vsub.f32 1.0, %v7085_v28 }
 0x4c1   :  { %v7087_v36 = vmul.f32 %v17716_v29, %v7086_v55 }
 0x4c2   :  { %v7316_v14 = vpop.permute.xlu0 %7315 }
 0x4c3   :  { %v7088_v19 = vadd.f32 %v17716_v29, %v7087_v36  ;;  %v7319_v6 = vrot.slane %v7316_v14, 4 }
 0x4c4   :  { %7064 = vadd.xlane.f32.xlu1 %v7063_v50 }
 0x4c5   :  { %v18728_v35 = vsel %vm7089_vm3, %v17716_v29, %v7088_v19 }
 0x4ca   :  { %v7256_v20 = vpop.permute.xlu0 %7255 }
 0x4cb   :  { %v7258_v11 = vrot.slane %v7256_v20, 4 }
 0x4cd   :  { %v7260_v56 = vsel %vm7103_vm0, %v7257_v31, %v7258_v11 }
 0x4ce   :  { %v7262_v40 = vsel %vm6970_vm1, %v7260_v56, %v7256_v20 }
 0x4cf   :  { %v7273_v50 = vunpack.c.h.b16 %v7262_v40 }
 0x4d1   :  { %v7275_v29 = vpack.c.b16 %v7273_v50, %v7273_v50 }
 0x4dd   :  { %7317 = vrot.lane.b32.xlu1 %v19146_v41, %s18010_s5 }
 0x52f   :  { %v7062_v15 = vpop.xlane.xlu1 %7061 }
 0x530   :  { %17717 = vrcp.f32 %v7062_v15 }
 0x536   :  { %v17718_v5 = vpop.eup %17717 }
 0x537   :  { %v7068_v45 = vmul.f32 %v17718_v5, %v17712_v21  ;;  %v7065_v53 = vpop.xlane.xlu1 %7064 }
 0x538   :  { %17719 = vrcp.f32 %v7065_v53 }
 0x539   :  { %v7070_v59 = vsel %vm7047_vm2, %v7068_v45, 0.0 }
 0x53a   :  { %v7071_v49 = vrot.slane %v7070_v59, 4 }
 0x53c   :  { %v7072_v58 = vadd.f32 %v7071_v49, %v7070_v59  ;;  %v18742_v59 = vpop.f32.mrf.mxu1 }
 0x53e   :  { %v17720_v4 = vpop.eup %17719  ;;  %v7073_v48 = vrot.slane %v7072_v58, 2 }
 0x53f   :  { %v7069_v18 = vmul.f32 %v17720_v4, %v17714_v51  ;;  %v7272_v51 = vunpack.c.l.b16 %v7262_v40 }
 0x540   :  { %v7074_v24 = vadd.f32 %v7073_v48, %v7072_v58 }
 0x541   :  { %v7077_v34 = vsel %vm7047_vm2, %v7069_v18, 0.0  ;;  %v7274_v15 = vpack.c.b16 %v7272_v51, %v7272_v51 }
 0x542   :  { %v7075_v17 = vrot.slane %v7074_v24, 1  ;;  %v7078_v22 = vrot.slane %v7077_v34, 4 }
 0x544   :  { %v7076_v32 = vadd.f32 %v7075_v17, %v7074_v24  ;;  %v7079_v7 = vadd.f32 %v7078_v22, %v7077_v34 }
 0x546   :  { %v7091_v12 = vmul.f32 %v18728_v35, %v7076_v32  ;;  %v7080_v63 = vrot.slane %v7079_v7, 2 }
 0x548   :  { %v7093_v42 = vpack.c.bf16 %v7091_v12, %v7091_v12  ;;  %v7081_v10 = vadd.f32 %v7080_v63, %v7079_v7 }
 0x54a   :  { %v7082_v27 = vrot.slane %v7081_v10, 1  ;;  %14775 = vmatmul.msk.bf16.vlgmr.msra.gmra.mxu0 %vm7047_vm2, %v7093_v42  ;;  %14776 = vmatmul.msk.bf16.vlgmr.msrb.gmra.mxu1 %vm7047_vm2, %v7093_v42 }
 0x54c   :  { %v7083_v43 = vadd.f32 %v7082_v27, %v7081_v10 }
 0x54e   :  { %v7092_v3 = vmul.f32 %v18728_v35, %v7083_v43 }
 0x54f   :  { %v7318_v8 = vpop.permute.xlu1 %7317 }
 0x550   :  { %v7094_v52 = vpack.c.bf16 %v7092_v3, %v7092_v3  ;;  %v7320_v21 = vrot.slane %v7318_v8, 4 }
 0x552   :  { %14777 = vmatmul.msk.bf16.vlgmr.msrb.gmra.mxu2 %vm7047_vm2, %v7094_v52  ;;  %14778 = vmatmul.msk.bf16.vlgmr.msra.gmra.mxu3 %vm7047_vm2, %v7094_v52  ;;  %v7321_v13 = vsel %vm7103_vm0, %v7319_v6, %v7320_v21 }
 0x553   :  { %v7322_v28 = vsel %vm6970_vm1, %v7321_v13, %v7318_v8 }
 0x554   :  { %v7332_v5 = vunpack.c.l.b16 %v7322_v28  ;;  %v7333_v55 = vunpack.c.h.b16 %v7322_v28 }
 0x556   :  { %v7334_v45 = vpack.c.b16 %v7332_v5, %v7332_v5  ;;  %v7335_v53 = vpack.c.b16 %v7333_v55, %v7333_v55 }
 0x55a   :  { %7296 = vmatmul.bf16.vlgmr.msrb.gmra.mxu0 %v7274_v15  ;;  %14779 = vmatmul.msk.bf16.vlgmr.msra.gmra.mxu1 %vm6970_vm1, %v7275_v29 }
 0x562   :  { %7356 = vmatmul.bf16.vlgmr.msra.gmra.mxu2 %v7334_v45  ;;  %14780 = vmatmul.msk.bf16.vlgmr.msrb.gmra.mxu3 %vm6970_vm1, %v7335_v53  ;;  %v7466_v53 = vpop.permute.xlu0 %7465 }
 0x5c7   :  { %v7119_v49 = vpop.f32.mrf.mxu0  ;;  %v7132_v36 = vpop.f32.mrf.mxu1 }
 0x5c8   :  { %v7176_v4 = vpack.c.bf16 %v7119_v49, %v7119_v49  ;;  %v7177_v18 = vpack.c.bf16 %v7132_v36, %v7132_v36 }
 0x5ca   :  { %v8125_v63 = vunpack.c.l.b16 %v7176_v4  ;;  %v8126_v20 = vunpack.c.l.b16 %v7177_v18 }
 0x5cf   :  { %v7121_v58 = vpop.f32.mrf.mxu0  ;;  %v7134_v14 = vpop.f32.mrf.mxu1 }
 0x5d0   :  { %v7468_v58 = vrot.slane %v7466_v53, 4 }
 0x5d5   :  { %v7159_v48 = vpop.f32.mrf.mxu2  ;;  %v7172_v19 = vpop.f32.mrf.mxu3 }
 0x5d6   :  { %v7178_v24 = vpack.c.bf16 %v7159_v48, %v7159_v48  ;;  %v7179_v34 = vpack.c.bf16 %v7172_v19, %v7172_v19 }
 0x5d7   :  { %v7297_v17 = vpop.f32.mrf.mxu0  ;;  %v7310_v22 = vpop.f32.mrf.mxu1 }
 0x5d8   :  { %v8127_v32 = vunpack.c.l.b16 %v7178_v24  ;;  %v8128_v7 = vunpack.c.l.b16 %v7179_v34  ;;  %v7311_v12 = vadd.f32 %v7310_v22, %v7297_v17 }
 0x5da   :  { %v8129_v42 = vrot.slane %v8127_v32, 7  ;;  %v8131_v10 = vrot.slane %v8128_v7, 7  ;;  %v7374_v44 = vsel %vm7047_vm2, %v7311_v12, -inf }
 0x5db   :  { %7375 = vmax.xlane.f32.xlu1 %v7374_v44 }
 0x5dc   :  { %v18746_v11 = vsel %vm7595_vm4, %v8129_v42, %v8125_v63  ;;  %v18749_v27 = vsel %vm7595_vm4, %v8131_v10, %v8126_v20 }
 0x5dd   :  { %v7161_v31 = vpop.f32.mrf.mxu2  ;;  %v7174_v43 = vpop.f32.mrf.mxu3 }
 0x5df   :  { %v7299_v56 = vpop.f32.mrf.mxu0  ;;  %v7312_v3 = vpop.f32.mrf.mxu1 }
 0x5e0   :  { %v17405_v3 = vld [vmem:[#allocation8 + $0x394] sm:$0xf] }
 0x5e5   :  { %v7357_v8 = vpop.f32.mrf.mxu2  ;;  %v7370_v52 = vpop.f32.mrf.mxu3 }
 0x5e6   :  { %v7371_v40 = vadd.f32 %v7370_v52, %v7357_v8 }
 0x5e8   :  { %v7377_v21 = vsel %vm7047_vm2, %v7371_v40, -inf }
 0x5e9   :  { %7378 = vmax.xlane.f32.xlu2 %v7377_v21 }
 0x5ed   :  { %v7359_v6 = vpop.f32.mrf.mxu2  ;;  %v7372_v51 = vpop.f32.mrf.mxu3 }
 0x5ee   :  { %v17399_v6 = vld [vmem:[#allocation8 + $0x364] sm:$0xf] }
 0x5f4   :  { %7463 = vrot.lane.b32.xlu1 %v18596_v9, %s18010_s5 }
 0x64e   :  { %v7376_v50 = vpop.xlane.xlu1 %7375 }
 0x64f   :  { %v7380_v13 = vsub.f32 %v7311_v12, %v7376_v50  ;;  %v14933_v50 = vld [vmem:[#allocation8 + $0x378] sm:$0xf0] }
 0x651   :  { %v7382_v15 = vmul.f32 1.442695, %v7380_v13  ;;  %v14936_v13 = vor.u32 %v17399_v6, %v14933_v50  ;;  %v15053_v6 = vld [vmem:[#allocation8 + $0x468] sm:$0xf0] }
 0x653   :  { %17721 = vpow2.f32 %v7382_v15 }
 0x659   :  { %v17722_v29 = vpop.eup %17721 }
 0x65a   :  { %v7386_v28 = vsel %vm7047_vm2, %v17722_v29, 0.0 }
 0x65b   :  { %7387 = vadd.xlane.f32.xlu2 %v7386_v28 }
 0x65c   :  { %v7379_v5 = vpop.xlane.xlu2 %7378 }
 0x65d   :  { %v7381_v55 = vsub.f32 %v7371_v40, %v7379_v5  ;;  %v17393_v5 = vld [vmem:[#allocation8 + $0x334] sm:$0xf] }
 0x65f   :  { %v7384_v45 = vmul.f32 1.442695, %v7381_v55 }
 0x661   :  { %17723 = vpow2.f32 %v7384_v45 }
 0x666   :  { %v7464_v49 = vpop.permute.xlu1 %7463 }
 0x667   :  { %v17724_v36 = vpop.eup %17723  ;;  %v7467_v14 = vrot.slane %v7464_v49, 4 }
 0x668   :  { %v7389_v4 = vsel %vm7047_vm2, %v17724_v36, 0.0 }
 0x669   :  { %v7469_v9 = vsel %vm7103_vm0, %v7467_v14, %v7468_v58  ;;  %7390 = vadd.xlane.f32.xlu0 %v7389_v4 }
 0x66a   :  { %v7470_v48 = vsel %vm6970_vm1, %v7469_v9, %v7466_v53  ;;  %v14909_v53 = vld [vmem:[#allocation8 + $0x348] sm:$0xf0] }
 0x66b   :  { %v7471_v19 = vunpack.c.l.b16 %v7470_v48  ;;  %v7472_v18 = vunpack.c.h.b16 %v7470_v48  ;;  %v14912_v58 = vor.u32 %v17393_v5, %v14909_v53  ;;  %v14955_v48 = vld [vmem:[#allocation8 + $0x390] sm:$0xf]  ;;  %v14837_v53 = vld [vmem:[#allocation8 + $0x2b8] sm:$0xf0] }
 0x66d   :  { %v7473_v24 = vpack.c.b16 %v7471_v19, %v7471_v19  ;;  %v7474_v34 = vpack.c.b16 %v7472_v18, %v7472_v18  ;;  %v17408_v19 = vld [vmem:[#allocation8 + $0x3a4] sm:$0xf0]  ;;  %v17387_v18 = vld [vmem:[#allocation8 + $0x304] sm:$0xf] }
 0x66f   :  { %v7479_v17 = vsel %vm7103_vm0, %v7473_v24, 0  ;;  %v7482_v22 = vsel %vm7103_vm0, %v7474_v34, 0 }
 0x670   :  { %7491 = vmatpush.bf16.msrb.mxu2 %v7479_v17  ;;  %7504 = vmatpush.bf16.msra.mxu3 %v7482_v22  ;;  %v15051_v17 = vld [vmem:[#allocation8 + $0x450] sm:$0xf]  ;;  %v17432_v22 = vld [vmem:[#allocation8 + $0x464] sm:$0xf0] }
 0x673   :  { %7415 = vrot.lane.b32.xlu2 %v18591_v60, %s18010_s5  ;;  %v14957_v60 = vld [vmem:[#allocation8 + $0x3a8] sm:$0xf0] }
 0x674   :  { %v14960_v52 = vor.u32 %v17405_v3, %v14957_v60  ;;  %v15052_v3 = vor.u32 %v17432_v22, %v15051_v17  ;;  %v15027_v60 = vld [vmem:[#allocation8 + $0x420] sm:$0xf] }
 0x675   :  { %v14883_v22 = vld [vmem:[#allocation8 + $0x300] sm:$0xf] }
 0x676   :  { %7991 = vmatpush.bf16.msra.mxu2 %v14960_v52  ;;  %v17381_v52 = vld [vmem:[#allocation8 + $0x2d4] sm:$0xf] }
 0x67a   :  { %7992 = vmatpush.bf16.msra.mxu2 %v14936_v13 }
 0x67d   :  { %7417 = vrot.lane.b32.xlu0 %v18654_v25, %s18010_s5 }
 0x67e   :  { %7993 = vmatpush.bf16.msra.mxu2 %v14912_v58  ;;  %v17396_v58 = vld [vmem:[#allocation8 + $0x344] sm:$0xf0] }
 0x6ce   :  { %v7388_v32 = vpop.xlane.xlu2 %7387 }
 0x6cf   :  { %17725 = vrcp.f32 %v7388_v32  ;;  %v14885_v32 = vld [vmem:[#allocation8 + $0x318] sm:$0xf0] }
 0x6d5   :  { %v17726_v7 = vpop.eup %17725 }
 0x6d6   :  { %v7394_v12 = vmul.f32 %v17726_v7, %v17722_v29  ;;  %v7416_v15 = vpop.permute.xlu2 %7415 }
 0x6d7   :  { %v7419_v49 = vrot.slane %v7416_v15, 4 }
 0x6d8   :  { %v7396_v63 = vsel %vm7047_vm2, %v7394_v12, 0.0 }
 0x6d9   :  { %v7397_v42 = vrot.slane %v7396_v63, 4 }
 0x6db   :  { %v7398_v10 = vadd.f32 %v7397_v42, %v7396_v63  ;;  %v14888_v63 = vor.u32 %v17387_v18, %v14885_v32  ;;  %v14956_v42 = vor.u32 %v17408_v19, %v14955_v48  ;;  %v17369_v19 = vld [vmem:[#allocation8 + $0x274] sm:$0xf]  ;;  %v14813_v18 = vld [vmem:[#allocation8 + $0x288] sm:$0xf0]  ;;  %v17390_v32 = vld [vmem:[#allocation8 + $0x314] sm:$0xf0] }
 0x6dc   :  { %v7391_v20 = vpop.xlane.xlu0 %7390 }
 0x6dd   :  { %17727 = vrcp.f32 %v7391_v20  ;;  %v7399_v43 = vrot.slane %v7398_v10, 2  ;;  %7994 = vmatpush.bf16.msra.mxu2 %v14888_v63  ;;  %v17414_v63 = vld [vmem:[#allocation8 + $0x3d4] sm:$0xf0] }
 0x6df   :  { %v7400_v21 = vadd.f32 %v7399_v43, %v7398_v10  ;;  %v14931_v10 = vld [vmem:[#allocation8 + $0x360] sm:$0xf] }
 0x6e1   :  { %v7401_v28 = vrot.slane %v7400_v21, 1 }
 0x6e3   :  { %v17728_v44 = vpop.eup %17727  ;;  %v7402_v4 = vadd.f32 %v7401_v28, %v7400_v21  ;;  %v17429_v21 = vld [vmem:[#allocation8 + $0x454] sm:$0xf]  ;;  %v17375_v28 = vld [vmem:[#allocation8 + $0x2a4] sm:$0xf] }
 0x6e4   :  { %v7395_v31 = vmul.f32 %v17728_v44, %v17724_v36  ;;  %v17402_v44 = vld [vmem:[#allocation8 + $0x374] sm:$0xf0]  ;;  %v15056_v15 = vor.u32 %v17429_v21, %v15053_v6 }
 0x6e6   :  { %v7403_v56 = vsel %vm7047_vm2, %v7395_v31, 0.0  ;;  %v7410_v31 = vmul.f32 %v7402_v4, %v18728_v35  ;;  %v17420_v4 = vld [vmem:[#allocation8 + $0x404] sm:$0xf0]  ;;  %8008 = vmatpush.bf16.msrb.mxu3 %v15056_v15 }
 0x6e7   :  { %v7404_v8 = vrot.slane %v7403_v56, 4  ;;  %v14939_v15 = vld [vmem:[#allocation8 + $0x368] sm:$0xf] }
 0x6e8   :  { %v7412_v5 = vpack.c.bf16 %v7410_v31, %v7410_v31  ;;  %v17363_v31 = vld [vmem:[#allocation8 + $0x244] sm:$0xf] }
 0x6e9   :  { %v7405_v40 = vadd.f32 %v7404_v8, %v7403_v56  ;;  %v17426_v8 = vld [vmem:[#allocation8 + $0x434] sm:$0xf0] }
 0x6eb   :  { %v7406_v51 = vrot.slane %v7405_v40, 2 }
 0x6ed   :  { %v7407_v29 = vadd.f32 %v7406_v51, %v7405_v40  ;;  %v14861_v40 = vld [vmem:[#allocation8 + $0x2e8] sm:$0xf0] }
 0x6ee   :  { %v14864_v13 = vor.u32 %v17381_v52, %v14861_v40  ;;  %v17384_v52 = vld [vmem:[#allocation8 + $0x2e4] sm:$0xf0] }
 0x6ef   :  { %v7408_v55 = vrot.slane %v7407_v29, 1  ;;  %v7418_v45 = vpop.permute.xlu0 %7417 }
 0x6f0   :  { %v7420_v36 = vrot.slane %v7418_v45, 4  ;;  %7995 = vmatpush.bf16.msra.mxu2 %v14864_v13  ;;  %v17430_v13 = vld [vmem:[#allocation8 + $0x45c] sm:$0xf] }
 0x6f1   :  { %v7409_v14 = vadd.f32 %v7408_v55, %v7407_v29  ;;  %v14907_v29 = vld [vmem:[#allocation8 + $0x330] sm:$0xf]  ;;  %v14932_v55 = vor.u32 %v17402_v44, %v14931_v10 }
 0x6f2   :  { %v7421_v9 = vsel %vm7103_vm0, %v7419_v49, %v7420_v36  ;;  %v17423_v49 = vld [vmem:[#allocation8 + $0x424] sm:$0xf]  ;;  %v15029_v36 = vld [vmem:[#allocation8 + $0x438] sm:$0xf0]  ;;  %v14908_v17 = vor.u32 %v17396_v58, %v14907_v29  ;;  %v17409_v44 = vld [vmem:[#allocation8 + $0x3ac] sm:$0xf0] }
 0x6f3   :  { %v7411_v24 = vmul.f32 %v7409_v14, %v18728_v35  ;;  %v7422_v34 = vsel %vm6970_vm1, %v7421_v9, %v7418_v45  ;;  %v15028_v45 = vor.u32 %v17426_v8, %v15027_v60  ;;  %v15003_v14 = vld [vmem:[#allocation8 + $0x3f0] sm:$0xf]  ;;  %v14840_v9 = vor.u32 %v17375_v28, %v14837_v53  ;;  %v17403_v29 = vld [vmem:[#allocation8 + $0x37c] sm:$0xf0] }
 0x6f4   :  { %v7423_v7 = vunpack.c.l.b16 %v7422_v34  ;;  %v7424_v12 = vunpack.c.h.b16 %v7422_v34  ;;  %v15032_v48 = vor.u32 %v17423_v49, %v15029_v36  ;;  %v15005_v34 = vld [vmem:[#allocation8 + $0x408] sm:$0xf0]  ;;  %v14884_v60 = vor.u32 %v17390_v32, %v14883_v22  ;;  %v14859_v8 = vld [vmem:[#allocation8 + $0x2d0] sm:$0xf]  ;;  %v14835_v49 = vld [vmem:[#allocation8 + $0x2a0] sm:$0xf] }
 0x6f5   :  { %v7413_v20 = vpack.c.bf16 %v7411_v24, %v7411_v24  ;;  %v17417_v24 = vld [vmem:[#allocation8 + $0x3f4] sm:$0xf]  ;;  %7996 = vmatpush.bf16.msra.mxu2 %v14840_v9  ;;  %v14860_v53 = vor.u32 %v17384_v52, %v14859_v8  ;;  %v17378_v36 = vld [vmem:[#allocation8 + $0x2b4] sm:$0xf0]  ;;  %v14940_v58 = vor.u32 %v17403_v29, %v14939_v15  ;;  %v14787_v22 = vld [vmem:[#allocation8 + $0x240] sm:$0xf] }
 0x6f6   :  { %v7425_v43 = vpack.c.b16 %v7423_v7, %v7423_v7  ;;  %v7426_v56 = vpack.c.b16 %v7424_v12, %v7424_v12  ;;  %v15004_v7 = vor.u32 %v17420_v4, %v15003_v14  ;;  %v14979_v12 = vld [vmem:[#allocation8 + $0x3c0] sm:$0xf]  ;;  %8009 = vmatpush.bf16.msrb.mxu3 %v15032_v48  ;;  %v15008_v10 = vor.u32 %v17417_v24, %v15005_v34  ;;  %v14915_v14 = vld [vmem:[#allocation8 + $0x338] sm:$0xf]  ;;  %v17397_v4 = vld [vmem:[#allocation8 + $0x34c] sm:$0xf0] }
 0x6f7   :  { %14783 = vmatmul.msk.bf16.vlgmr.msrb.gmra.mxu2 %vm7047_vm2, %v7413_v20  ;;  %14784 = vmatmul.msk.bf16.vlgmr.msra.gmra.mxu3 %vm7047_vm2, %v7413_v20  ;;  %v14963_v20 = vld [vmem:[#allocation8 + $0x398] sm:$0xf]  ;;  %v14980_v40 = vor.u32 %v17414_v63, %v14979_v12  ;;  %v14836_v9 = vor.u32 %v17378_v36, %v14835_v49  ;;  %v14811_v48 = vld [vmem:[#allocation8 + $0x270] sm:$0xf]  ;;  %v14891_v24 = vld [vmem:[#allocation8 + $0x308] sm:$0xf] }
 0x6f8   :  { %v7431_v51 = vsel %vm7103_vm0, %v7425_v43, 0  ;;  %v7434_v50 = vsel %vm7103_vm0, %v7426_v56, 0  ;;  %v14789_v43 = vld [vmem:[#allocation8 + $0x258] sm:$0xf0]  ;;  %v17411_v56 = vld [vmem:[#allocation8 + $0x3c4] sm:$0xf]  ;;  %v14964_v21 = vor.u32 %v17409_v44, %v14963_v20 }
 0x6f9   :  { %7443 = vmatpush.bf16.msra.mxu0 %v7431_v51  ;;  %7456 = vmatpush.bf16.msrb.mxu1 %v7434_v50  ;;  %v14792_v6 = vor.u32 %v17363_v31, %v14789_v43  ;;  %v15059_v51 = vld [vmem:[#allocation8 + $0x458] sm:$0xf]  ;;  %v17433_v50 = vld [vmem:[#allocation8 + $0x46c] sm:$0xf0]  ;;  %v17391_v34 = vld [vmem:[#allocation8 + $0x31c] sm:$0xf0] }
 0x6fa   :  { %8010 = vmatpush.bf16.msrb.mxu3 %v15008_v10  ;;  %v17366_v32 = vld [vmem:[#allocation8 + $0x254] sm:$0xf0]  ;;  %v17406_v12 = vld [vmem:[#allocation8 + $0x39c] sm:$0xf]  ;;  %v14965_v63 = vld [vmem:[#allocation8 + $0x3b0] sm:$0xf0] }
 0x6fb   :  { %v14788_v20 = vor.u32 %v17366_v32, %v14787_v22  ;;  %v17400_v10 = vld [vmem:[#allocation8 + $0x36c] sm:$0xf]  ;;  %v14941_v44 = vld [vmem:[#allocation8 + $0x380] sm:$0xf0]  ;;  %v17394_v43 = vld [vmem:[#allocation8 + $0x33c] sm:$0xf] }
 0x6fc   :  { %14781 = vmatmul.msk.bf16.vlgmr.msra.gmra.mxu0 %vm7047_vm2, %v7412_v5  ;;  %14782 = vmatmul.msk.bf16.vlgmr.msrb.gmra.mxu1 %vm7047_vm2, %v7412_v5  ;;  %v15061_v5 = vld [vmem:[#allocation8 + $0x470] sm:$0xf0]  ;;  %v14944_v31 = vor.u32 %v17400_v10, %v14941_v44  ;;  %v14893_v8 = vld [vmem:[#allocation8 + $0x320] sm:$0xf0]  ;;  %v17427_v15 = vld [vmem:[#allocation8 + $0x43c] sm:$0xf0] }
 0x6fd   :  { %7965 = vmatpush.bf16.msrb.mxu0 %v14956_v42  ;;  %7982 = vmatpush.bf16.msra.mxu1 %v15052_v3  ;;  %v14816_v42 = vor.u32 %v17369_v19, %v14813_v18  ;;  %v14981_v3 = vld [vmem:[#allocation8 + $0x3d8] sm:$0xf0]  ;;  %v17372_v19 = vld [vmem:[#allocation8 + $0x284] sm:$0xf0]  ;;  %v14916_v18 = vor.u32 %v17397_v4, %v14915_v14  ;;  %v17379_v49 = vld [vmem:[#allocation8 + $0x2bc] sm:$0xf0] }
 0x6fe   :  { %v14984_v28 = vor.u32 %v17411_v56, %v14981_v3  ;;  %v14917_v56 = vld [vmem:[#allocation8 + $0x350] sm:$0xf0]  ;;  %v17376_v36 = vld [vmem:[#allocation8 + $0x2ac] sm:$0xf]  ;;  %v14845_v14 = vld [vmem:[#allocation8 + $0x2c0] sm:$0xf0] }
 0x6ff   :  { %7997 = vmatpush.bf16.msra.mxu2 %v14816_v42  ;;  %v14968_v42 = vor.u32 %v17406_v12, %v14965_v63  ;;  %v14920_v3 = vor.u32 %v17394_v43, %v14917_v56  ;;  %v15011_v4 = vld [vmem:[#allocation8 + $0x3f8] sm:$0xf]  ;;  %v17373_v22 = vld [vmem:[#allocation8 + $0x28c] sm:$0xf0]  ;;  %v17370_v32 = vld [vmem:[#allocation8 + $0x27c] sm:$0xf] }
 0x700   :  { %8011 = vmatpush.bf16.msrb.mxu3 %v14984_v28  ;;  %v14821_v12 = vld [vmem:[#allocation8 + $0x290] sm:$0xf0]  ;;  %v14987_v63 = vld [vmem:[#allocation8 + $0x3c8] sm:$0xf]  ;;  %v17412_v44 = vld [vmem:[#allocation8 + $0x3cc] sm:$0xf] }
 0x701   :  { %7966 = vmatpush.bf16.msrb.mxu0 %v14932_v55  ;;  %7983 = vmatpush.bf16.msra.mxu1 %v15028_v45  ;;  %v15060_v55 = vor.u32 %v17433_v50, %v15059_v51  ;;  %v15064_v45 = vor.u32 %v17430_v13, %v15061_v5  ;;  %v14869_v50 = vld [vmem:[#allocation8 + $0x2f0] sm:$0xf0]  ;;  %v15035_v13 = vld [vmem:[#allocation8 + $0x428] sm:$0xf]  ;;  %v17424_v5 = vld [vmem:[#allocation8 + $0x42c] sm:$0xf] }
 0x702   :  { %v15036_v28 = vor.u32 %v17427_v15, %v15035_v13  ;;  %v14795_v56 = vld [vmem:[#allocation8 + $0x248] sm:$0xf] }
 0x703   :  { %7998 = vmatpush.bf16.msra.mxu2 %v14792_v6  ;;  %v17382_v6 = vld [vmem:[#allocation8 + $0x2dc] sm:$0xf] }
 0x704   :  { %8034 = vmatpush.bf16.msra.mxu3 %v15060_v55  ;;  %v14872_v29 = vor.u32 %v17382_v6, %v14869_v50  ;;  %v15037_v55 = vld [vmem:[#allocation8 + $0x440] sm:$0xf0] }
 0x705   :  { %7967 = vmatpush.bf16.msrb.mxu0 %v14908_v17  ;;  %7984 = vmatpush.bf16.msra.mxu1 %v15004_v7  ;;  %v14812_v17 = vor.u32 %v17372_v19, %v14811_v48  ;;  %v14892_v7 = vor.u32 %v17391_v34, %v14891_v24  ;;  %v14848_v48 = vor.u32 %v17376_v36, %v14845_v14  ;;  %v15013_v24 = vld [vmem:[#allocation8 + $0x410] sm:$0xf0] }
 0x707   :  { %8060 = vmatpush.bf16.msrb.mxu2 %v15064_v45  ;;  %v15040_v45 = vor.u32 %v17424_v5, %v15037_v55 }
 0x708   :  { %8035 = vmatpush.bf16.msra.mxu3 %v15036_v28 }
 0x709   :  { %7968 = vmatpush.bf16.msrb.mxu0 %v14884_v60  ;;  %7985 = vmatpush.bf16.msra.mxu1 %v14980_v40  ;;  %v17388_v60 = vld [vmem:[#allocation8 + $0x30c] sm:$0xf]  ;;  %v14867_v40 = vld [vmem:[#allocation8 + $0x2d8] sm:$0xf] }
 0x70a   :  { %v14896_v52 = vor.u32 %v17388_v60, %v14893_v8  ;;  %v17364_v60 = vld [vmem:[#allocation8 + $0x24c] sm:$0xf] }
 0x70b   :  { %8061 = vmatpush.bf16.msrb.mxu2 %v15040_v45  ;;  %v14971_v45 = vld [vmem:[#allocation8 + $0x3a0] sm:$0xf] }
 0x70d   :  { %8017 = vmatpush.bf16.msrb.mxu1 %v14964_v21  ;;  %7969 = vmatpush.bf16.msrb.mxu0 %v14860_v53  ;;  %v17385_v21 = vld [vmem:[#allocation8 + $0x2ec] sm:$0xf0]  ;;  %v14843_v53 = vld [vmem:[#allocation8 + $0x2a8] sm:$0xf] }
 0x70e   :  { %v14868_v51 = vor.u32 %v17385_v21, %v14867_v40 }
 0x711   :  { %8018 = vmatpush.bf16.msrb.mxu1 %v14940_v58  ;;  %7970 = vmatpush.bf16.msrb.mxu0 %v14836_v9  ;;  %v14844_v58 = vor.u32 %v17379_v49, %v14843_v53  ;;  %v17421_v9 = vld [vmem:[#allocation8 + $0x40c] sm:$0xf0]  ;;  %v17410_v53 = vld [vmem:[#allocation8 + $0x3b4] sm:$0xf0]  ;;  %v17407_v49 = vld [vmem:[#allocation8 + $0x3a4] sm:$0xf] }
 0x712   :  { %v15012_v19 = vor.u32 %v17421_v9, %v15011_v4  ;;  %v14973_v9 = vld [vmem:[#allocation8 + $0x3b8] sm:$0xf0] }
 0x714   :  { %8036 = vmatpush.bf16.msra.mxu3 %v15012_v19  ;;  %v17434_v19 = vld [vmem:[#allocation8 + $0x474] sm:$0xf0] }
 0x715   :  { %8019 = vmatpush.bf16.msrb.mxu1 %v14916_v18  ;;  %7971 = vmatpush.bf16.msrb.mxu0 %v14812_v17  ;;  %v17418_v18 = vld [vmem:[#allocation8 + $0x3fc] sm:$0xf]  ;;  %v14819_v17 = vld [vmem:[#allocation8 + $0x278] sm:$0xf] }
 0x716   :  { %v15016_v34 = vor.u32 %v17418_v18, %v15013_v24  ;;  %v17431_v18 = vld [vmem:[#allocation8 + $0x464] sm:$0xf]  ;;  %v15069_v24 = vld [vmem:[#allocation8 + $0x478] sm:$0xf0] }
 0x718   :  { %8062 = vmatpush.bf16.msrb.mxu2 %v15016_v34 }
 0x719   :  { %8020 = vmatpush.bf16.msrb.mxu1 %v14892_v7  ;;  %7972 = vmatpush.bf16.msrb.mxu0 %v14788_v20  ;;  %v14820_v7 = vor.u32 %v17373_v22, %v14819_v17  ;;  %v17415_v20 = vld [vmem:[#allocation8 + $0x3dc] sm:$0xf0] }
 0x71a   :  { %v14988_v10 = vor.u32 %v17415_v20, %v14987_v63 }
 0x71c   :  { %8037 = vmatpush.bf16.msra.mxu3 %v14988_v10  ;;  %v14976_v10 = vor.u32 %v17407_v49, %v14973_v9  ;;  %v15021_v49 = vld [vmem:[#allocation8 + $0x418] sm:$0xf0] }
 0x71d   :  { %8043 = vmatpush.bf16.msra.mxu0 %v14968_v42  ;;  %8021 = vmatpush.bf16.msrb.mxu1 %v14868_v51  ;;  %v14824_v42 = vor.u32 %v17370_v32, %v14821_v12 }
 0x721   :  { %8044 = vmatpush.bf16.msra.mxu0 %v14944_v31  ;;  %8022 = vmatpush.bf16.msrb.mxu1 %v14844_v58  ;;  %v14989_v31 = vld [vmem:[#allocation8 + $0x3e0] sm:$0xf0] }
 0x722   :  { %v14992_v43 = vor.u32 %v17412_v44, %v14989_v31  ;;  %v14947_v44 = vld [vmem:[#allocation8 + $0x370] sm:$0xf]  ;;  %v17404_v31 = vld [vmem:[#allocation8 + $0x384] sm:$0xf0] }
 0x724   :  { %8063 = vmatpush.bf16.msrb.mxu2 %v14992_v43 }
 0x725   :  { %8045 = vmatpush.bf16.msra.mxu0 %v14920_v3  ;;  %8023 = vmatpush.bf16.msrb.mxu1 %v14820_v7  ;;  %v17367_v3 = vld [vmem:[#allocation8 + $0x25c] sm:$0xf0] }
 0x726   :  { %v14796_v8 = vor.u32 %v17367_v3, %v14795_v56  ;;  %v15072_v56 = vor.u32 %v17431_v18, %v15069_v24  ;;  %v17401_v3 = vld [vmem:[#allocation8 + $0x374] sm:$0xf]  ;;  %v14901_v18 = vld [vmem:[#allocation8 + $0x328] sm:$0xf0]  ;;  %v14995_v24 = vld [vmem:[#allocation8 + $0x3d0] sm:$0xf] }
 0x729   :  { %8046 = vmatpush.bf16.msra.mxu0 %v14896_v52  ;;  %v14797_v52 = vld [vmem:[#allocation8 + $0x260] sm:$0xf0]  ;;  %8024 = vmatpush.bf16.msrb.mxu1 %v14796_v8  ;;  %v15043_v8 = vld [vmem:[#allocation8 + $0x430] sm:$0xf] }
 0x72a   :  { %v14800_v40 = vor.u32 %v17364_v60, %v14797_v52  ;;  %v14949_v60 = vld [vmem:[#allocation8 + $0x388] sm:$0xf0]  ;;  %v17428_v52 = vld [vmem:[#allocation8 + $0x444] sm:$0xf0] }
 0x72d   :  { %8047 = vmatpush.bf16.msra.mxu0 %v14872_v29 }
 0x731   :  { %8048 = vmatpush.bf16.msra.mxu0 %v14848_v48  ;;  %v15067_v48 = vld [vmem:[#allocation8 + $0x460] sm:$0xf] }
 0x732   :  { %v15068_v43 = vor.u32 %v17434_v19, %v15067_v48  ;;  %v17389_v19 = vld [vmem:[#allocation8 + $0x314] sm:$0xf] }
 0x735   :  { %8049 = vmatpush.bf16.msra.mxu0 %v14824_v42  ;;  %v14972_v42 = vor.u32 %v17410_v53, %v14971_v45  ;;  %v17422_v45 = vld [vmem:[#allocation8 + $0x414] sm:$0xf0]  ;;  %v17419_v53 = vld [vmem:[#allocation8 + $0x404] sm:$0xf] }
 0x736   :  { %v15024_v48 = vor.u32 %v17419_v53, %v15021_v49  ;;  %v14827_v49 = vld [vmem:[#allocation8 + $0x280] sm:$0xf] }
 0x739   :  { %8050 = vmatpush.bf16.msra.mxu0 %v14800_v40  ;;  %v17425_v40 = vld [vmem:[#allocation8 + $0x434] sm:$0xf] }
 0x779   :  { %v7445_v21 = vpop.f32.mrf.mxu0  ;;  %v7458_v6 = vpop.f32.mrf.mxu1 }
 0x77a   :  { %v7493_v51 = vpop.f32.mrf.mxu2  ;;  %v7506_v50 = vpop.f32.mrf.mxu3  ;;  %v7510_v13 = vpack.c.bf16 %v7445_v21, %v7445_v21  ;;  %v7511_v15 = vpack.c.bf16 %v7458_v6, %v7458_v6  ;;  %v15045_v21 = vld [vmem:[#allocation8 + $0x448] sm:$0xf0]  ;;  %v14948_v6 = vor.u32 %v17404_v31, %v14947_v44  ;;  %v17383_v31 = vld [vmem:[#allocation8 + $0x2e4] sm:$0xf] }
 0x77b   :  { %v7512_v29 = vpack.c.bf16 %v7493_v51, %v7493_v51  ;;  %v7513_v28 = vpack.c.bf16 %v7506_v50, %v7506_v50  ;;  %v14952_v51 = vor.u32 %v17401_v3, %v14949_v60  ;;  %v14923_v50 = vld [vmem:[#allocation8 + $0x340] sm:$0xf]  ;;  %v17336_v3 = vld [vmem:[#allocation8 + $0x164] sm:$0xf0]  ;;  %v17333_v60 = vld [vmem:[#allocation8 + $0x154] sm:$0xf] }
 0x77c   :  { %v7590_v36 = vunpack.c.l.b16 %v7510_v13  ;;  %v7591_v58 = vunpack.c.l.b16 %v7511_v15  ;;  %v17398_v13 = vld [vmem:[#allocation8 + $0x354] sm:$0xf0]  ;;  %v15044_v15 = vor.u32 %v17428_v52, %v15043_v8  ;;  %v15251_v8 = vld [vmem:[#allocation8 + $0x168] sm:$0xf0] }
 0x77d   :  { %v7592_v5 = vunpack.c.l.b16 %v7512_v29  ;;  %v7593_v55 = vunpack.c.l.b16 %v7513_v28  ;;  %v15048_v29 = vor.u32 %v17425_v40, %v15045_v21  ;;  %v17395_v28 = vld [vmem:[#allocation8 + $0x344] sm:$0xf]  ;;  %v14851_v21 = vld [vmem:[#allocation8 + $0x2b0] sm:$0xf] }
 0x77f   :  { %v7594_v14 = vrot.slane %v7592_v5, 7  ;;  %v7597_v4 = vrot.slane %v7593_v55, 7  ;;  %v14925_v5 = vld [vmem:[#allocation8 + $0x358] sm:$0xf0]  ;;  %v15019_v55 = vld [vmem:[#allocation8 + $0x400] sm:$0xf] }
 0x780   :  { %v15020_v9 = vor.u32 %v17422_v45, %v15019_v55  ;;  %v15227_v55 = vld [vmem:[#allocation8 + $0x138] sm:$0xf0] }
 0x781   :  { %v7596_v34 = vsel %vm7595_vm4, %v7594_v14, %v7590_v36  ;;  %v7598_v17 = vsel %vm7595_vm4, %v7597_v4, %v7591_v58  ;;  %v7447_v22 = vpop.f32.mrf.mxu0  ;;  %v7460_v32 = vpop.f32.mrf.mxu1  ;;  %v14924_v36 = vor.u32 %v17398_v13, %v14923_v50  ;;  %v14928_v58 = vor.u32 %v17395_v28, %v14925_v5  ;;  %v14899_v14 = vld [vmem:[#allocation8 + $0x310] sm:$0xf]  ;;  %v17392_v4 = vld [vmem:[#allocation8 + $0x324] sm:$0xf0]  ;;  %v17377_v13 = vld [vmem:[#allocation8 + $0x2b4] sm:$0xf] }
 0x782   :  { %v18778_v7 = vpack.c.b16 %v7596_v34, %v7596_v34  ;;  %v18780_v12 = vpack.c.b16 %v7598_v17, %v7598_v17  ;;  %v7495_v63 = vpop.f32.mrf.mxu2  ;;  %v7508_v20 = vpop.f32.mrf.mxu3  ;;  %v17416_v34 = vld [vmem:[#allocation8 + $0x3e4] sm:$0xf0]  ;;  %v17413_v17 = vld [vmem:[#allocation8 + $0x3d4] sm:$0xf]  ;;  %v14997_v22 = vld [vmem:[#allocation8 + $0x3e8] sm:$0xf0]  ;;  %v14900_v32 = vor.u32 %v17392_v4, %v14899_v14  ;;  %v15254_v50 = vor.u32 %v17333_v60, %v15251_v8 }
 0x783   :  { %v14904_v63 = vor.u32 %v17389_v19, %v14901_v18  ;;  %v14875_v20 = vld [vmem:[#allocation8 + $0x2e0] sm:$0xf]  ;;  %v15000_v44 = vor.u32 %v17413_v17, %v14997_v22  ;;  %v17330_v28 = vld [vmem:[#allocation8 + $0x134] sm:$0xf0]  ;;  %v17327_v5 = vld [vmem:[#allocation8 + $0x124] sm:$0xf] }
 0x784   :  { %7973 = vmatmul.bf16.vlgmr.msrb.gmra.mxu0 %v18778_v7  ;;  %15073 = vmatmul.msk.bf16.vlgmr.msra.gmra.mxu1 %vm6970_vm1, %v18780_v12  ;;  %v15230_v14 = vor.u32 %v17327_v5, %v15227_v55  ;;  %v17371_v4 = vld [vmem:[#allocation8 + $0x284] sm:$0xf]  ;;  %v17324_v19 = vld [vmem:[#allocation8 + $0x104] sm:$0xf0]  ;;  %v17321_v18 = vld [vmem:[#allocation8 + $0xf4] sm:$0xf] }
 0x785   :  { %7999 = vmatmul.bf16.vlgmr.msra.gmra.mxu2 %v18778_v7  ;;  %15074 = vmatmul.msk.bf16.vlgmr.msrb.gmra.mxu3 %vm6970_vm1, %v18780_v12  ;;  %v14803_v22 = vld [vmem:[#allocation8 + $0x250] sm:$0xf]  ;;  %v17360_v60 = vld [vmem:[#allocation8 + $0x224] sm:$0xf0]  ;;  %v17357_v8 = vld [vmem:[#allocation8 + $0x214] sm:$0xf] }
 0x786   :  { %8069 = vmatpush.bf16.msrb.mxu3 %v14972_v42  ;;  %8095 = vmatpush.bf16.msra.mxu2 %v14976_v10  ;;  %v17386_v42 = vld [vmem:[#allocation8 + $0x2f4] sm:$0xf0]  ;;  %v14996_v10 = vor.u32 %v17416_v34, %v14995_v24  ;;  %v15203_v24 = vld [vmem:[#allocation8 + $0x108] sm:$0xf0]  ;;  %v15321_v55 = vld [vmem:[#allocation8 + $0x1e0] sm:$0xf] }
 0x787   :  { %8086 = vmatpush.bf16.msra.mxu1 %v15068_v43  ;;  %8112 = vmatpush.bf16.msrb.mxu0 %v15072_v56  ;;  %v14877_v43 = vld [vmem:[#allocation8 + $0x2f8] sm:$0xf0]  ;;  %v15249_v56 = vld [vmem:[#allocation8 + $0x150] sm:$0xf]  ;;  %v14876_v52 = vor.u32 %v17386_v42, %v14875_v20  ;;  %v15206_v42 = vor.u32 %v17321_v18, %v15203_v24  ;;  %v15155_v5 = vld [vmem:[#allocation8 + $0xa8] sm:$0xf0] }
 0x788   :  { %v14880_v40 = vor.u32 %v17383_v31, %v14877_v43  ;;  %v17318_v31 = vld [vmem:[#allocation8 + $0xd4] sm:$0xf0]  ;;  %v17315_v43 = vld [vmem:[#allocation8 + $0xc4] sm:$0xf]  ;;  %v15131_v18 = vld [vmem:[#allocation8 + $0x78] sm:$0xf0] }
 0x789   :  { %v15297_v24 = vld [vmem:[#allocation8 + $0x1b0] sm:$0xf] }
 0x78a   :  { %8070 = vmatpush.bf16.msrb.mxu3 %v14948_v6  ;;  %8096 = vmatpush.bf16.msra.mxu2 %v14952_v51  ;;  %v17380_v6 = vld [vmem:[#allocation8 + $0x2c4] sm:$0xf0]  ;;  %v15250_v51 = vor.u32 %v17336_v3, %v15249_v56  ;;  %v15179_v56 = vld [vmem:[#allocation8 + $0xd8] sm:$0xf0]  ;;  %v15345_v3 = vld [vmem:[#allocation8 + $0x210] sm:$0xf] }
 0x78b   :  { %8087 = vmatpush.bf16.msra.mxu1 %v15044_v15  ;;  %8113 = vmatpush.bf16.msrb.mxu0 %v15048_v29  ;;  %v14853_v15 = vld [vmem:[#allocation8 + $0x2c8] sm:$0xf0]  ;;  %v15225_v29 = vld [vmem:[#allocation8 + $0x120] sm:$0xf]  ;;  %v14852_v45 = vor.u32 %v17380_v6, %v14851_v21 }
 0x78c   :  { %v14856_v53 = vor.u32 %v17377_v13, %v14853_v15  ;;  %v17312_v13 = vld [vmem:[#allocation8 + $0xa4] sm:$0xf0]  ;;  %v15346_v15 = vor.u32 %v17360_v60, %v15345_v3  ;;  %v17342_v3 = vld [vmem:[#allocation8 + $0x194] sm:$0xf0]  ;;  %v17339_v60 = vld [vmem:[#allocation8 + $0x184] sm:$0xf] }
 0x78e   :  { %8071 = vmatpush.bf16.msrb.mxu3 %v14924_v36  ;;  %8097 = vmatpush.bf16.msra.mxu2 %v14928_v58  ;;  %v17374_v36 = vld [vmem:[#allocation8 + $0x294] sm:$0xf0]  ;;  %v15226_v58 = vor.u32 %v17330_v28, %v15225_v29  ;;  %v17309_v28 = vld [vmem:[#allocation8 + $0x94] sm:$0xf] }
 0x78f   :  { %8088 = vmatpush.bf16.msra.mxu1 %v15020_v9  ;;  %8114 = vmatpush.bf16.msrb.mxu0 %v15024_v48  ;;  %v14829_v9 = vld [vmem:[#allocation8 + $0x298] sm:$0xf0]  ;;  %v15201_v48 = vld [vmem:[#allocation8 + $0xf0] sm:$0xf]  ;;  %v14828_v34 = vor.u32 %v17374_v36, %v14827_v49 }
 0x790   :  { %v14832_v17 = vor.u32 %v17371_v4, %v14829_v9  ;;  %v15202_v20 = vor.u32 %v17324_v19, %v15201_v48  ;;  %v15323_v49 = vld [vmem:[#allocation8 + $0x1f8] sm:$0xf0]  ;;  %v17306_v4 = vld [vmem:[#allocation8 + $0x74] sm:$0xf0]  ;;  %v17303_v19 = vld [vmem:[#allocation8 + $0x64] sm:$0xf] }
 0x792   :  { %8072 = vmatpush.bf16.msrb.mxu3 %v14900_v32  ;;  %8098 = vmatpush.bf16.msra.mxu2 %v14904_v63  ;;  %v17368_v32 = vld [vmem:[#allocation8 + $0x264] sm:$0xf0]  ;;  %v17365_v63 = vld [vmem:[#allocation8 + $0x254] sm:$0xf] }
 0x793   :  { %8089 = vmatpush.bf16.msra.mxu1 %v14996_v10  ;;  %8115 = vmatpush.bf16.msrb.mxu0 %v15000_v44  ;;  %v14805_v10 = vld [vmem:[#allocation8 + $0x268] sm:$0xf0]  ;;  %v15177_v44 = vld [vmem:[#allocation8 + $0xc0] sm:$0xf] }
 0x794   :  { %8025 = vmatmul.bf16.vlgmr.msrb.gmra.mxu1 %v18778_v7  ;;  %8051 = vmatmul.bf16.vlgmr.msra.gmra.mxu0 %v18778_v7  ;;  %v14808_v21 = vor.u32 %v17365_v63, %v14805_v10  ;;  %v15178_v6 = vor.u32 %v17318_v31, %v15177_v44  ;;  %v15134_v63 = vor.u32 %v17303_v19, %v15131_v18  ;;  %v17297_v10 = vld [vmem:[#allocation8 + $0x34] sm:$0xf] }
 0x795   :  { %15075 = vmatmul.msk.bf16.vlgmr.msra.gmra.mxu3 %vm6970_vm1, %v18780_v12  ;;  %15076 = vmatmul.msk.bf16.vlgmr.msrb.gmra.mxu2 %vm6970_vm1, %v18780_v12 }
 0x796   :  { %8073 = vmatpush.bf16.msrb.mxu3 %v14876_v52  ;;  %8099 = vmatpush.bf16.msra.mxu2 %v14880_v40  ;;  %v15347_v52 = vld [vmem:[#allocation8 + $0x228] sm:$0xf0]  ;;  %v14804_v40 = vor.u32 %v17368_v32, %v14803_v22 }
 0x797   :  { %8499 = vmatpush.bf16.msrb.mxu1 %v15250_v51  ;;  %8525 = vmatpush.bf16.msra.mxu0 %v15254_v50  ;;  %v15182_v51 = vor.u32 %v17315_v43, %v15179_v56  ;;  %v15153_v50 = vld [vmem:[#allocation8 + $0x90] sm:$0xf]  ;;  %v15350_v29 = vor.u32 %v17357_v8, %v15347_v52  ;;  %v15299_v22 = vld [vmem:[#allocation8 + $0x1c8] sm:$0xf0]  ;;  %v15273_v56 = vld [vmem:[#allocation8 + $0x180] sm:$0xf] }
 0x798   :  { %v15154_v36 = vor.u32 %v17312_v13, %v15153_v50  ;;  %v15107_v43 = vld [vmem:[#allocation8 + $0x48] sm:$0xf0]  ;;  %v15275_v8 = vld [vmem:[#allocation8 + $0x198] sm:$0xf0]  ;;  %v17337_v52 = vld [vmem:[#allocation8 + $0x16c] sm:$0xf0] }
 0x799   :  { %v17294_v50 = vld [vmem:[#allocation8 + $0x14] sm:$0xf0]  ;;  %v17291_v13 = vld [vmem:[#allocation8 + $0x4] sm:$0xf] }
 0x79a   :  { %8074 = vmatpush.bf16.msrb.mxu3 %v14852_v45  ;;  %8100 = vmatpush.bf16.msra.mxu2 %v14856_v53  ;;  %v17354_v45 = vld [vmem:[#allocation8 + $0x1f4] sm:$0xf0]  ;;  %v17351_v53 = vld [vmem:[#allocation8 + $0x1e4] sm:$0xf] }
 0x79b   :  { %8500 = vmatpush.bf16.msrb.mxu1 %v15226_v58  ;;  %8526 = vmatpush.bf16.msra.mxu0 %v15230_v14  ;;  %v15158_v58 = vor.u32 %v17309_v28, %v15155_v5  ;;  %v15129_v14 = vld [vmem:[#allocation8 + $0x60] sm:$0xf]  ;;  %v15322_v9 = vor.u32 %v17354_v45, %v15321_v55  ;;  %v15326_v48 = vor.u32 %v17351_v53, %v15323_v49  ;;  %v15083_v28 = vld [vmem:[#allocation8 + $0x18] sm:$0xf0]  ;;  %v15353_v5 = vld [vmem:[#allocation8 + $0x218] sm:$0xf] }
 0x79c   :  { %v15130_v32 = vor.u32 %v17306_v4, %v15129_v14  ;;  %v17361_v55 = vld [vmem:[#allocation8 + $0x22c] sm:$0xf0]  ;;  %v17358_v49 = vld [vmem:[#allocation8 + $0x21c] sm:$0xf]  ;;  %v17331_v14 = vld [vmem:[#allocation8 + $0x13c] sm:$0xf0]  ;;  %v15086_v19 = vor.u32 %v17291_v13, %v15083_v28 }
 0x79d   :  { %v17328_v4 = vld [vmem:[#allocation8 + $0x12c] sm:$0xf]  ;;  %v15354_v18 = vor.u32 %v17361_v55, %v15353_v5  ;;  %v15307_v28 = vld [vmem:[#allocation8 + $0x1d0] sm:$0xf0]  ;;  %v15187_v55 = vld [vmem:[#allocation8 + $0xe0] sm:$0xf0] }
 0x79e   :  { %8075 = vmatpush.bf16.msrb.mxu3 %v14828_v34  ;;  %8101 = vmatpush.bf16.msra.mxu2 %v14832_v17  ;;  %v17348_v34 = vld [vmem:[#allocation8 + $0x1c4] sm:$0xf0]  ;;  %v17345_v17 = vld [vmem:[#allocation8 + $0x1b4] sm:$0xf]  ;;  %v17316_v5 = vld [vmem:[#allocation8 + $0xcc] sm:$0xf] }
 0x79f   :  { %8501 = vmatpush.bf16.msrb.mxu1 %v15202_v20  ;;  %8527 = vmatpush.bf16.msra.mxu0 %v15206_v42  ;;  %v15105_v20 = vld [vmem:[#allocation8 + $0x30] sm:$0xf]  ;;  %v17300_v42 = vld [vmem:[#allocation8 + $0x44] sm:$0xf0]  ;;  %v15298_v44 = vor.u32 %v17348_v34, %v15297_v24  ;;  %v15302_v31 = vor.u32 %v17345_v17, %v15299_v22  ;;  %v17355_v17 = vld [vmem:[#allocation8 + $0x1fc] sm:$0xf0] }
 0x7a0   :  { %v15329_v34 = vld [vmem:[#allocation8 + $0x1e8] sm:$0xf] }
 0x7a2   :  { %8076 = vmatpush.bf16.msrb.mxu3 %v14804_v40  ;;  %8102 = vmatpush.bf16.msra.mxu2 %v14808_v21  ;;  %v17334_v40 = vld [vmem:[#allocation8 + $0x15c] sm:$0xf]  ;;  %v15106_v21 = vor.u32 %v17300_v42, %v15105_v20  ;;  %v15331_v20 = vld [vmem:[#allocation8 + $0x200] sm:$0xf0]  ;;  %v15209_v42 = vld [vmem:[#allocation8 + $0xf8] sm:$0xf] }
 0x7a3   :  { %8502 = vmatpush.bf16.msrb.mxu1 %v15178_v6  ;;  %8528 = vmatpush.bf16.msra.mxu0 %v15182_v51  ;;  %v15110_v6 = vor.u32 %v17297_v10, %v15107_v43  ;;  %v15081_v51 = vld [vmem:[#allocation8] sm:$0xf]  ;;  %v17325_v10 = vld [vmem:[#allocation8 + $0x10c] sm:$0xf0]  ;;  %v19147_v43 = vld [vmem:[#allocation39_spill] sm:$0xff] }
 0x7a4   :  { %15077 = vmatmul.msk.bf16.vlgmr.msra.gmra.mxu1 %vm6970_vm1, %v18780_v12  ;;  %15078 = vmatmul.msk.bf16.vlgmr.msrb.gmra.mxu0 %vm6970_vm1, %v18780_v12  ;;  %v15259_v12 = vld [vmem:[#allocation8 + $0x170] sm:$0xf0]  ;;  %v15210_v13 = vor.u32 %v17325_v10, %v15209_v42  ;;  %v19155_v10 = vld [vmem:[#allocation51_spill] sm:$0xff] }
 0x7a5   :  { %8077 = vmatmul.bf16.vlgmr.msrb.gmra.mxu3 %v18778_v7  ;;  %8103 = vmatmul.bf16.vlgmr.msra.gmra.mxu2 %v18778_v7  ;;  %v15257_v7 = vld [vmem:[#allocation8 + $0x158] sm:$0xf]  ;;  %v15262_v53 = vor.u32 %v17334_v40, %v15259_v12  ;;  %v18808_v40 = vpack.c.b16 %v18746_v11, %v18746_v11  ;;  %v18812_v12 = vpack.c.b16 %v18749_v27, %v18749_v27  ;;  %v15185_v11 = vld [vmem:[#allocation8 + $0xc8] sm:$0xf]  ;;  %v17319_v27 = vld [vmem:[#allocation8 + $0xdc] sm:$0xf0] }
 0x7a6   :  { %8516 = vmatpush.bf16.msra.mxu3 %v15346_v15  ;;  %8542 = vmatpush.bf16.msrb.mxu2 %v15350_v29  ;;  %v15274_v15 = vor.u32 %v17342_v3, %v15273_v56  ;;  %v15278_v29 = vor.u32 %v17339_v60, %v15275_v8  ;;  %v15258_v45 = vor.u32 %v17337_v52, %v15257_v7  ;;  %v19148_v56 = vperm.slane %v19147_v43, 2  ;;  %v19149_v3 = vld [vmem:[#allocation41_spill] sm:$0xff]  ;;  %v19151_v7 = vld [vmem:[#allocation47_spill] sm:$0xff] }
 0x7a7   :  { %8503 = vmatpush.bf16.msrb.mxu1 %v15154_v36  ;;  %8529 = vmatpush.bf16.msra.mxu0 %v15158_v58  ;;  %v15355_v36 = vld [vmem:[#allocation8 + $0x230] sm:$0xf0]  ;;  %v15233_v58 = vld [vmem:[#allocation8 + $0x128] sm:$0xf]  ;;  %v19150_v8 = vperm.slane %v19147_v43, 3 }
 0x7a8   :  { %v15358_v24 = vor.u32 %v17358_v49, %v15355_v36  ;;  %v15234_v22 = vor.u32 %v17331_v14, %v15233_v58  ;;  %v6280_v60 = vadd.f32 %v19149_v3, %v19148_v56  ;;  %v19153_v49 = vld [vmem:[#allocation48_spill] sm:$0xff]  ;;  %v6784_v58 = vadd.f32 %v18669_v39, %v1058_v37  ;;  %v15163_v37 = vld [vmem:[#allocation8 + $0xb0] sm:$0xf0]  ;;  %v15265_v39 = vld [vmem:[#allocation8 + $0x160] sm:$0xf] }
 0x7a9   :  { %v6364_v52 = vadd.f32 %v19151_v7, %v19150_v8  ;;  %v17335_v43 = vld [vmem:[#allocation8 + $0x164] sm:$0xf]  ;;  %v15267_v56 = vld [vmem:[#allocation8 + $0x178] sm:$0xf0]  ;;  %v17307_v7 = vld [vmem:[#allocation8 + $0x7c] sm:$0xf0] }
 0x7aa   :  { %8517 = vmatpush.bf16.msra.mxu3 %v15322_v9  ;;  %8543 = vmatpush.bf16.msrb.mxu2 %v15326_v48  ;;  %v15235_v9 = vld [vmem:[#allocation8 + $0x140] sm:$0xf0]  ;;  %v15082_v48 = vor.u32 %v17294_v50, %v15081_v51  ;;  %v15305_v51 = vld [vmem:[#allocation8 + $0x1b8] sm:$0xf]  ;;  %v17349_v50 = vld [vmem:[#allocation8 + $0x1cc] sm:$0xf0]  ;;  %v6798_v3 = vadd.f32 %v18671_v23, %v6784_v58 }
 0x7ab   :  { %8504 = vmatpush.bf16.msrb.mxu1 %v15130_v32  ;;  %8530 = vmatpush.bf16.msra.mxu0 %v15134_v63  ;;  %v15238_v32 = vor.u32 %v17328_v4, %v15235_v9  ;;  %v17352_v63 = vld [vmem:[#allocation8 + $0x1ec] sm:$0xf]  ;;  %v6378_v36 = vadd.f32 %v19153_v49, %v6364_v52  ;;  %v15306_v14 = vor.u32 %v17349_v50, %v15305_v51  ;;  %v15281_v9 = vld [vmem:[#allocation8 + $0x188] sm:$0xf]  ;;  %v15139_v50 = vld [vmem:[#allocation8 + $0x80] sm:$0xf0] }
 0x7ac   :  { %v17304_v51 = vld [vmem:[#allocation8 + $0x6c] sm:$0xf]  ;;  %v15113_v58 = vld [vmem:[#allocation8 + $0x38] sm:$0xf] }
 0x7ad   :  { %v19157_v23 = vld [vmem:[#allocation52_spill] sm:$0xff] }
 0x7ae   :  { %8518 = vmatpush.bf16.msra.mxu3 %v15298_v44  ;;  %8544 = vmatpush.bf16.msrb.mxu2 %v15302_v31  ;;  %v17322_v44 = vld [vmem:[#allocation8 + $0xfc] sm:$0xf]  ;;  %v15211_v31 = vld [vmem:[#allocation8 + $0x110] sm:$0xf0] }
 0x7af   :  { %8505 = vmatpush.bf16.msrb.mxu1 %v15106_v21  ;;  %8531 = vmatpush.bf16.msra.mxu0 %v15110_v6  ;;  %v15330_v21 = vor.u32 %v17355_v17, %v15329_v34  ;;  %v15334_v6 = vor.u32 %v17352_v63, %v15331_v20  ;;  %v15283_v34 = vld [vmem:[#allocation8 + $0x1a0] sm:$0xf0]  ;;  %v15161_v17 = vld [vmem:[#allocation8 + $0x98] sm:$0xf]  ;;  %v17310_v63 = vld [vmem:[#allocation8 + $0x9c] sm:$0xf] }
 0x7b0   :  { %v19154_v20 = vld [vmem:[#allocation43_spill] sm:$0xff] }
 0x7b2   :  { %8519 = vmatpush.bf16.msra.mxu3 %v15274_v15  ;;  %8545 = vmatpush.bf16.msrb.mxu2 %v15278_v29  ;;  %v15214_v15 = vor.u32 %v17322_v44, %v15211_v31  ;;  %v17346_v29 = vld [vmem:[#allocation8 + $0x1bc] sm:$0xf]  ;;  %v6392_v44 = vadd.f32 %v19155_v10, %v6378_v36  ;;  %v17338_v31 = vld [vmem:[#allocation8 + $0x174] sm:$0xf0]  ;;  %v15142_v36 = vor.u32 %v17304_v51, %v15139_v50  ;;  %v17295_v10 = vld [vmem:[#allocation8 + $0x1c] sm:$0xf0] }
 0x7b3   :  { %8506 = vmatpush.bf16.msrb.mxu1 %v15082_v48  ;;  %8532 = vmatpush.bf16.msra.mxu0 %v15086_v19  ;;  %v15310_v4 = vor.u32 %v17346_v29, %v15307_v28  ;;  %v17343_v48 = vld [vmem:[#allocation8 + $0x19c] sm:$0xf0]  ;;  %v17340_v19 = vld [vmem:[#allocation8 + $0x18c] sm:$0xf] }
 0x7b4   :  { %v15286_v8 = vor.u32 %v17340_v19, %v15283_v34  ;;  %v6406_v28 = vadd.f32 %v19157_v23, %v6392_v44  ;;  %v15115_v19 = vld [vmem:[#allocation8 + $0x50] sm:$0xf0]  ;;  %v17323_v34 = vld [vmem:[#allocation8 + $0x104] sm:$0xf]  ;;  %v17292_v44 = vld [vmem:[#allocation8 + $0xc] sm:$0xf] }
 0x7b5   :  { %15367 = vmatmul.msk.bf16.vlgmr.msra.gmra.mxu3 %vm6970_vm1, %v18812_v12  ;;  %15368 = vmatmul.msk.bf16.vlgmr.msrb.gmra.mxu2 %vm6970_vm1, %v18812_v12  ;;  %v19166_v51 = vld [vmem:[#allocation32_spill] sm:$0xff]  ;;  %v15363_v23 = vld [vmem:[#allocation8 + $0x238] sm:$0xf0] }
 0x7b6   :  { %8551 = vmatpush.bf16.msrb.mxu3 %v15258_v45  ;;  %8577 = vmatpush.bf16.msra.mxu2 %v15262_v53  ;;  %v19152_v45 = vld [vmem:[#allocation42_spill] sm:$0xff] }
 0x7b7   :  { %8568 = vmatpush.bf16.msra.mxu1 %v15354_v18  ;;  %8594 = vmatpush.bf16.msrb.mxu0 %v15358_v24  ;;  %v6294_v53 = vadd.f32 %v19152_v45, %v6280_v60  ;;  %v15186_v18 = vor.u32 %v17319_v27, %v15185_v11  ;;  %v15190_v24 = vor.u32 %v17316_v5, %v15187_v55  ;;  %v17332_v11 = vld [vmem:[#allocation8 + $0x144] sm:$0xf0]  ;;  %v17329_v27 = vld [vmem:[#allocation8 + $0x134] sm:$0xf]  ;;  %v15243_v5 = vld [vmem:[#allocation8 + $0x148] sm:$0xf0] }
 0x7b8   :  { %8507 = vmatmul.bf16.vlgmr.msrb.gmra.mxu1 %v18808_v40  ;;  %8533 = vmatmul.bf16.vlgmr.msra.gmra.mxu0 %v18808_v40  ;;  %v15282_v60 = vor.u32 %v17343_v48, %v15281_v9  ;;  %v6812_v55 = vadd.f32 %v18673_v16, %v6798_v3  ;;  %v15246_v9 = vor.u32 %v17329_v27, %v15243_v5  ;;  %v17298_v48 = vld [vmem:[#allocation8 + $0x3c] sm:$0xf]  ;;  %v19159_v16 = vld [vmem:[#allocation45_spill] sm:$0xff]  ;;  %v15091_v3 = vld [vmem:[#allocation8 + $0x20] sm:$0xf0] }
 0x7b9   :  { %v6308_v42 = vadd.f32 %v19154_v20, %v6294_v53  ;;  %v19158_v53 = vld [vmem:[#allocation53_spill] sm:$0xff]  ;;  %v15118_v20 = vor.u32 %v17298_v48, %v15115_v19  ;;  %v15094_v27 = vor.u32 %v17292_v44, %v15091_v3  ;;  %v17356_v19 = vld [vmem:[#allocation8 + $0x204] sm:$0xf0]  ;;  %v15147_v44 = vld [vmem:[#allocation8 + $0x88] sm:$0xf0] }
 0x7ba   :  { %8552 = vmatpush.bf16.msrb.mxu3 %v15234_v22  ;;  %8578 = vmatpush.bf16.msra.mxu2 %v15238_v32  ;;  %v17313_v22 = vld [vmem:[#allocation8 + $0xac] sm:$0xf0]  ;;  %v6868_v32 = vadd.f32 %v18684_v61, %v1059_v2  ;;  %v15166_v2 = vor.u32 %v17310_v63, %v15163_v37  ;;  %v15137_v61 = vld [vmem:[#allocation8 + $0x68] sm:$0xf]  ;;  %v19160_v63 = vld [vmem:[#allocation54_spill] sm:$0xff] }
 0x7bb   :  { %8569 = vmatpush.bf16.msra.mxu1 %v15330_v21  ;;  %8595 = vmatpush.bf16.msrb.mxu0 %v15334_v6  ;;  %v15162_v57 = vor.u32 %v17313_v22, %v15161_v17  ;;  %v15266_v21 = vor.u32 %v17338_v31, %v15265_v39  ;;  %v15270_v6 = vor.u32 %v17335_v43, %v15267_v56  ;;  %v15219_v17 = vld [vmem:[#allocation8 + $0x118] sm:$0xf0]  ;;  %v17350_v3 = vld [vmem:[#allocation8 + $0x1d4] sm:$0xf0] }
 0x7bc   :  { %v6882_v52 = vadd.f32 %v18686_v30, %v6868_v32  ;;  %v6420_v30 = vadd.f32 %v19158_v53, %v6406_v28  ;;  %v15138_v49 = vor.u32 %v17307_v7, %v15137_v61  ;;  %v6826_v22 = vadd.f32 %v18675_v54, %v6812_v55  ;;  %v17320_v54 = vld [vmem:[#allocation8 + $0xe4] sm:$0xf0]  ;;  %v15361_v61 = vld [vmem:[#allocation8 + $0x220] sm:$0xf]  ;;  %v19162_v7 = vld [vmem:[#allocation24_spill] sm:$0xff] }
 0x7bd   :  { %v15222_v56 = vor.u32 %v17323_v34, %v15219_v17  ;;  %v15169_v53 = vld [vmem:[#allocation8 + $0xa0] sm:$0xf] }
 0x7be   :  { %8553 = vmatpush.bf16.msrb.mxu3 %v15210_v13  ;;  %8579 = vmatpush.bf16.msra.mxu2 %v15214_v15  ;;  %v15241_v13 = vld [vmem:[#allocation8 + $0x130] sm:$0xf]  ;;  %v6896_v45 = vadd.f32 %v18688_v38, %v6882_v52  ;;  %v17326_v38 = vld [vmem:[#allocation8 + $0x114] sm:$0xf0]  ;;  %v6434_v37 = vadd.f32 %v19160_v63, %v6420_v30  ;;  %v19164_v52 = vld [vmem:[#allocation26_spill] sm:$0xff] }
 0x7bf   :  { %8570 = vmatpush.bf16.msra.mxu1 %v15306_v14  ;;  %8596 = vmatpush.bf16.msrb.mxu0 %v15310_v4  ;;  %v19156_v15 = vld [vmem:[#allocation44_spill] sm:$0xff]  ;;  %v15242_v4 = vor.u32 %v17332_v11, %v15241_v13  ;;  %v6840_v13 = vadd.f32 %v18680_v26, %v6826_v22  ;;  %v17314_v30 = vld [vmem:[#allocation8 + $0xb4] sm:$0xf0]  ;;  %v17311_v26 = vld [vmem:[#allocation8 + $0xa4] sm:$0xf]  ;;  %v8797_v22 = vrot.slane %v18690_v46, 4 }
 0x7c0   :  { %v6322_v29 = vadd.f32 %v19156_v15, %v6308_v42  ;;  %v17301_v14 = vld [vmem:[#allocation8 + $0x4c] sm:$0xf0]  ;;  %v6910_v32 = vadd.f32 %v18742_v59, %v6896_v45  ;;  %v15089_v42 = vld [vmem:[#allocation8 + $0x8] sm:$0xf]  ;;  %v17362_v15 = vld [vmem:[#allocation8 + $0x234] sm:$0xf0]  ;;  %v15170_v63 = vor.u32 %v17314_v30, %v15169_v53 }
 0x7c1   :  { %v15114_v39 = vor.u32 %v17301_v14, %v15113_v58  ;;  %v15090_v11 = vor.u32 %v17295_v10, %v15089_v42  ;;  %v15171_v58 = vld [vmem:[#allocation8 + $0xb8] sm:$0xf0]  ;;  %v15337_v14 = vld [vmem:[#allocation8 + $0x1f0] sm:$0xf]  ;;  %v6854_v48 = vadd.f32 %v18682_v47, %v6840_v13  ;;  %v17305_v10 = vld [vmem:[#allocation8 + $0x74] sm:$0xf] }
 0x7c2   :  { %8554 = vmatpush.bf16.msrb.mxu3 %v15186_v18  ;;  %8580 = vmatpush.bf16.msra.mxu2 %v15190_v24  ;;  %v15217_v18 = vld [vmem:[#allocation8 + $0x100] sm:$0xf]  ;;  %v6336_v24 = vadd.f32 %v19159_v16, %v6322_v29  ;;  %v6924_v31 = vadd.f32 %v18692_v62, %v6910_v32  ;;  %v19163_v62 = vperm.slane %v19162_v7, 4  ;;  %v17359_v29 = vld [vmem:[#allocation8 + $0x224] sm:$0xf]  ;;  %v19174_v53 = vld [vmem:[#allocation36_spill] sm:$0xff] }
 0x7c3   :  { %8571 = vmatpush.bf16.msra.mxu1 %v15282_v60  ;;  %8597 = vmatpush.bf16.msrb.mxu0 %v15286_v8  ;;  %v15218_v43 = vor.u32 %v17326_v38, %v15217_v18  ;;  %v15193_v60 = vld [vmem:[#allocation8 + $0xd0] sm:$0xf]  ;;  %v19161_v8 = vld [vmem:[#allocation46_spill] sm:$0xff]  ;;  %v17353_v18 = vld [vmem:[#allocation8 + $0x1f4] sm:$0xf] }
 0x7c4   :  { %v6350_v59 = vadd.f32 %v19161_v8, %v6336_v24  ;;  %v6938_v5 = vadd.f32 %v18694_v1, %v6924_v31  ;;  %v15194_v55 = vor.u32 %v17320_v54, %v15193_v60  ;;  %v15339_v16 = vld [vmem:[#allocation8 + $0x208] sm:$0xf0]  ;;  %v19168_v24 = vld [vmem:[#allocation33_spill] sm:$0xff]  ;;  %v15145_v47 = vld [vmem:[#allocation8 + $0x70] sm:$0xf] }
 0x7c5   :  { %v19169_v38 = vld [vmem:[#allocation40_spill] sm:$0xff]  ;;  %v15342_v42 = vor.u32 %v17353_v18, %v15339_v16  ;;  %v15313_v31 = vld [vmem:[#allocation8 + $0x1c0] sm:$0xf]  ;;  %v17347_v60 = vld [vmem:[#allocation8 + $0x1c4] sm:$0xf] }
 0x7c6   :  { %8555 = vmatpush.bf16.msrb.mxu3 %v15162_v57  ;;  %8581 = vmatpush.bf16.msra.mxu2 %v15166_v2  ;;  %v17317_v57 = vld [vmem:[#allocation8 + $0xd4] sm:$0xf]  ;;  %v15195_v2 = vld [vmem:[#allocation8 + $0xe8] sm:$0xf0]  ;;  %v18854_v28 = vpack.c.bf16 %v6434_v37, %v6350_v59  ;;  %v8710_v34 = vrot.slane %v19169_v38, 4  ;;  %v18863_v32 = vpack.c.bf16 %v6938_v5, %v6854_v48  ;;  %v15174_v37 = vor.u32 %v17311_v26, %v15171_v58  ;;  %v19171_v8 = vld [vmem:[#allocation35_spill] sm:$0xff] }
 0x7c7   :  { %8603 = vmatpush.bf16.msrb.mxu1 %v15266_v21  ;;  %8629 = vmatpush.bf16.msra.mxu0 %v15270_v6  ;;  %v5776_v21 = vadd.f32 %v19164_v52, %v19163_v62  ;;  %v19165_v6 = vperm.slane %v19162_v7, 5  ;;  %v15198_v45 = vor.u32 %v17317_v57, %v15195_v2  ;;  %v15315_v54 = vld [vmem:[#allocation8 + $0x1d8] sm:$0xf0]  ;;  %v8796_v57 = vrot.slane %v18654_v25, 4  ;;  %v17299_v13 = vld [vmem:[#allocation8 + $0x44] sm:$0xf] }
 0x7c8   :  { %15369 = vmatmul.msk.bf16.vlgmr.msra.gmra.mxu1 %vm6970_vm1, %v18812_v12  ;;  %15370 = vmatmul.msk.bf16.vlgmr.msrb.gmra.mxu0 %vm6970_vm1, %v18812_v12  ;;  %v8711_v17 = vrot.slane %v18854_v28, 4  ;;  %v8839_v7 = vrot.slane %v18718_v0, 4  ;;  %v15150_v52 = vor.u32 %v17305_v10, %v15147_v44  ;;  %v17341_v5 = vld [vmem:[#allocation8 + $0x194] sm:$0xf]  ;;  %v15291_v0 = vld [vmem:[#allocation8 + $0x1a8] sm:$0xf0] }
 0x7c9   :  { %v5860_v50 = vadd.f32 %v19166_v51, %v19165_v6  ;;  %v17302_v6 = vld [vmem:[#allocation8 + $0x54] sm:$0xf0]  ;;  %v15314_v51 = vor.u32 %v17350_v3, %v15313_v31  ;;  %v8798_v25 = vsel %vm7103_vm0, %v8796_v57, %v8797_v22  ;;  %v15294_v16 = vor.u32 %v17341_v5, %v15291_v0  ;;  %v15099_v38 = vld [vmem:[#allocation8 + $0x28] sm:$0xf0]  ;;  %v19177_v31 = vld [vmem:[#allocation38_spill] sm:$0xff] }
 0x7ca   :  { %8556 = vmatpush.bf16.msrb.mxu3 %v15138_v49  ;;  %8582 = vmatpush.bf16.msra.mxu2 %v15142_v36  ;;  %v15362_v49 = vor.u32 %v17362_v15, %v15361_v61  ;;  %v15366_v36 = vor.u32 %v17359_v29, %v15363_v23  ;;  %v8712_v2 = vsel %vm7103_vm0, %v8710_v34, %v8711_v17  ;;  %v8840_v61 = vrot.slane %v18863_v32, 4  ;;  %v15123_v15 = vld [vmem:[#allocation8 + $0x58] sm:$0xf0]  ;;  %v15289_v29 = vld [vmem:[#allocation8 + $0x190] sm:$0xf]  ;;  %v19172_v23 = vld [vmem:[#allocation29_spill] sm:$0xff] }
 0x7cb   :  { %8604 = vmatpush.bf16.msrb.mxu1 %v15242_v4  ;;  %8630 = vmatpush.bf16.msra.mxu0 %v15246_v9  ;;  %v19167_v4 = vld [vmem:[#allocation27_spill] sm:$0xff]  ;;  %v5874_v1 = vadd.f32 %v19168_v24, %v5860_v50  ;;  %v15318_v50 = vor.u32 %v17347_v60, %v15315_v54  ;;  %v15126_v58 = vor.u32 %v17299_v13, %v15123_v15  ;;  %v19175_v48 = vld [vmem:[#allocation37_spill] sm:$0xff]  ;;  %v19176_v34 = vld [vmem:[#allocation30_spill] sm:$0xff]  ;;  %v8800_v44 = vunpack.c.h.b16 %v8798_v25 }
 0x7cc   :  { %v5790_v9 = vadd.f32 %v19167_v4, %v5776_v21  ;;  %v15121_v21 = vld [vmem:[#allocation8 + $0x40] sm:$0xf]  ;;  %v8799_v4 = vunpack.c.l.b16 %v8798_v25  ;;  %v17296_v24 = vld [vmem:[#allocation8 + $0x24] sm:$0xf0] }
 0x7cd   :  { %v5888_v59 = vadd.f32 %v19171_v8, %v5874_v1  ;;  %v15122_v26 = vor.u32 %v17302_v6, %v15121_v21  ;;  %v17293_v1 = vld [vmem:[#allocation8 + $0x14] sm:$0xf]  ;;  %v8802_v57 = vpack.c.b16 %v8800_v44, %v8800_v44 }
 0x7ce   :  { %8557 = vmatpush.bf16.msrb.mxu3 %v15114_v39  ;;  %8583 = vmatpush.bf16.msra.mxu2 %v15118_v20  ;;  %v17308_v39 = vld [vmem:[#allocation8 + $0x84] sm:$0xf0]  ;;  %v15338_v20 = vor.u32 %v17356_v19, %v15337_v14  ;;  %v15097_v14 = vld [vmem:[#allocation8 + $0x10] sm:$0xf]  ;;  %v8801_v10 = vpack.c.b16 %v8799_v4, %v8799_v4 }
 0x7cf   :  { %8605 = vmatpush.bf16.msrb.mxu1 %v15218_v43  ;;  %8631 = vmatpush.bf16.msra.mxu0 %v15222_v56  ;;  %v19170_v43 = vld [vmem:[#allocation28_spill] sm:$0xff]  ;;  %v15146_v62 = vor.u32 %v17308_v39, %v15145_v47  ;;  %v5902_v30 = vadd.f32 %v19174_v53, %v5888_v59  ;;  %v8719_v47 = vunpack.c.h.b16 %v8712_v2 }
 0x7d0   :  { %v5804_v56 = vadd.f32 %v19170_v43, %v5790_v9  ;;  %v8841_v9 = vsel %vm7103_vm0, %v8839_v7, %v8840_v61  ;;  %v8807_v59 = vsel %vm7103_vm0, %v8801_v10, 0 }
 0x7d1   :  { %v5916_v19 = vadd.f32 %v19175_v48, %v5902_v30  ;;  %v8842_v39 = vunpack.c.l.b16 %v8841_v9  ;;  %v8721_v60 = vpack.c.b16 %v8719_v47, %v8719_v47  ;;  %v8843_v13 = vunpack.c.h.b16 %v8841_v9 }
 0x7d2   :  { %8558 = vmatpush.bf16.msrb.mxu3 %v15090_v11  ;;  %8584 = vmatpush.bf16.msra.mxu2 %v15094_v27  ;;  %v5818_v11 = vadd.f32 %v19172_v23, %v5804_v56  ;;  %v17344_v27 = vld [vmem:[#allocation8 + $0x1a4] sm:$0xf0] }
 0x7d3   :  { %8606 = vmatpush.bf16.msrb.mxu1 %v15194_v55  ;;  %8632 = vmatpush.bf16.msra.mxu0 %v15198_v45  ;;  %v19173_v55 = vld [vmem:[#allocation50_spill] sm:$0xff]  ;;  %v15290_v18 = vor.u32 %v17344_v27, %v15289_v29  ;;  %v5930_v43 = vadd.f32 %v19177_v31, %v5916_v19  ;;  %v19178_v56 = vld [vmem:[#allocation31_spill] sm:$0xff]  ;;  %v8844_v54 = vpack.c.b16 %v8842_v39, %v8842_v39  ;;  %v8727_v61 = vsel %vm6970_vm1, %v8721_v60, 0 }
 0x7d4   :  { %v8668_v45 = vunpack.c.l.b16 %v19173_v55  ;;  %v5832_v17 = vadd.f32 %v19176_v34, %v5818_v11  ;;  %v8845_v23 = vpack.c.b16 %v8843_v13, %v8843_v13 }
 0x7d5   :  { %8559 = vmatmul.bf16.vlgmr.msrb.gmra.mxu3 %v18808_v40  ;;  %8585 = vmatmul.bf16.vlgmr.msra.gmra.mxu2 %v18808_v40  ;;  %v8850_v7 = vsel %vm7103_vm0, %v8844_v54, 0 }
 0x7d6   :  { %8620 = vmatpush.bf16.msra.mxu3 %v15362_v49  ;;  %8646 = vmatpush.bf16.msrb.mxu2 %v15366_v36  ;;  %v8718_v49 = vunpack.c.l.b16 %v8712_v2  ;;  %v8669_v36 = vunpack.c.h.b16 %v19173_v55  ;;  %v8670_v22 = vpack.c.b16 %v8668_v45, %v8668_v45  ;;  %v5846_v3 = vadd.f32 %v19178_v56, %v5832_v17 }
 0x7d7   :  { %8607 = vmatpush.bf16.msrb.mxu1 %v15170_v63  ;;  %8633 = vmatpush.bf16.msra.mxu0 %v15174_v37  ;;  %v8853_v0 = vsel %vm7103_vm0, %v8845_v23, 0 }
 0x7d8   :  { %v8720_v63 = vpack.c.b16 %v8718_v49, %v8718_v49  ;;  %v8671_v37 = vpack.c.b16 %v8669_v36, %v8669_v36  ;;  %v18885_v2 = vpack.c.bf16 %v5930_v43, %v5846_v3 }
 0x7da   :  { %8621 = vmatpush.bf16.msra.mxu3 %v15338_v20  ;;  %8647 = vmatpush.bf16.msrb.mxu2 %v15342_v42  ;;  %v15098_v20 = vor.u32 %v17296_v24, %v15097_v14  ;;  %v15102_v42 = vor.u32 %v17293_v1, %v15099_v38  ;;  %v8677_v8 = vsel %vm6970_vm1, %v8671_v37, 0  ;;  %v8707_v6 = vrot.slane %v18885_v2, 4 }
 0x7db   :  { %8608 = vmatpush.bf16.msrb.mxu1 %v15146_v62  ;;  %8634 = vmatpush.bf16.msra.mxu0 %v15150_v52  ;;  %v8810_v62 = vsel %vm7103_vm0, %v8802_v57, 0  ;;  %v19179_v52 = vld [vmem:[#allocation34_spill] sm:$0xff] }
 0x7dc   :  { %v8657_v21 = vrot.slane %v19179_v52, 4 }
 0x7de   :  { %8622 = vmatpush.bf16.msra.mxu3 %v15314_v51  ;;  %8648 = vmatpush.bf16.msrb.mxu2 %v15318_v50  ;;  %v8656_v51 = vrot.slane %v18230_v33, 4 }
 0x7df   :  { %8609 = vmatpush.bf16.msrb.mxu1 %v15122_v26  ;;  %8635 = vmatpush.bf16.msra.mxu0 %v15126_v58 }
 0x7e0   :  { %v8658_v50 = vsel %vm7103_vm0, %v8656_v51, %v8657_v21 }
 0x7e1   :  { %v8663_v15 = vunpack.c.l.b16 %v8658_v50  ;;  %v8664_v25 = vunpack.c.h.b16 %v8658_v50 }
 0x7e2   :  { %8623 = vmatpush.bf16.msra.mxu3 %v15290_v18  ;;  %8649 = vmatpush.bf16.msrb.mxu2 %v15294_v16 }
 0x7e3   :  { %8610 = vmatpush.bf16.msrb.mxu1 %v15098_v20  ;;  %8636 = vmatpush.bf16.msra.mxu0 %v15102_v42  ;;  %v8665_v11 = vpack.c.b16 %v8663_v15, %v8663_v15  ;;  %v8666_v5 = vpack.c.b16 %v8664_v25, %v8664_v25 }
 0x7e5   :  { %15371 = vmatmul.msk.bf16.vlgmr.msra.gmra.mxu3 %vm6970_vm1, %v18812_v12  ;;  %15372 = vmatmul.msk.bf16.vlgmr.msrb.gmra.mxu2 %vm6970_vm1, %v18812_v12  ;;  %v8706_v12 = vrot.slane %v19146_v41, 4 }
 0x7e6   :  { %8686 = vmatpush.bf16.xpose.msrb.mxu3 %v8670_v22  ;;  %8736 = vmatpush.bf16.xpose.msra.mxu2 %v8720_v63 }
 0x7e7   :  { %8699 = vmatpush.bf16.xpose.msra.mxu1 %v8677_v8  ;;  %8819 = vmatpush.bf16.msrb.mxu0 %v8807_v59 }
 0x7e8   :  { %8611 = vmatmul.bf16.vlgmr.msrb.gmra.mxu1 %v18808_v40  ;;  %8637 = vmatmul.bf16.vlgmr.msra.gmra.mxu0 %v18808_v40  ;;  %v8708_v40 = vsel %vm7103_vm0, %v8706_v12, %v8707_v6 }
 0x7e9   :  { %v8713_v29 = vunpack.c.l.b16 %v8708_v40  ;;  %v8714_v33 = vunpack.c.h.b16 %v8708_v40 }
 0x7eb   :  { %v8715_v27 = vpack.c.b16 %v8713_v29, %v8713_v29  ;;  %v8716_v41 = vpack.c.b16 %v8714_v33, %v8714_v33 }
 0x7ee   :  { %8749 = vmatpush.bf16.xpose.msra.mxu3 %v8727_v61  ;;  %8862 = vmatpush.bf16.msrb.mxu2 %v8850_v7 }
 0x7ef   :  { %8832 = vmatpush.bf16.msrb.mxu1 %v8810_v62 }
 0x7f5   :  { %8687 = vmatmul.bf16.vlgmr.msrb.gmra.mxu3 %v8665_v11  ;;  %8737 = vmatmul.bf16.vlgmr.msra.gmra.mxu2 %v8715_v27 }
 0x7f6   :  { %8875 = vmatpush.bf16.msrb.mxu3 %v8853_v0 }
 0x7f8   :  { %15373 = vmatmul.msk.bf16.vlgmr.msra.gmra.mxu1 %vm6970_vm1, %v8666_v5 }
 0x801   :  { %v7974_v55 = vpop.f32.mrf.mxu0  ;;  %v7987_v45 = vpop.f32.mrf.mxu1 }
 0x802   :  { %v7988_v53 = vadd.f32 %v7987_v45, %v7974_v55 }
 0x805   :  { %15374 = vmatmul.msk.bf16.vlgmr.msra.gmra.mxu3 %vm6970_vm1, %v8716_v41 }
 0x808   :  { %v8000_v30 = vpop.f32.mrf.mxu2  ;;  %v8013_v49 = vpop.f32.mrf.mxu3 }
 0x809   :  { %v8014_v36 = vadd.f32 %v8013_v49, %v8000_v30  ;;  %v7976_v26 = vpop.f32.mrf.mxu0  ;;  %v7989_v58 = vpop.f32.mrf.mxu1 }
 0x810   :  { %v8002_v14 = vpop.f32.mrf.mxu2  ;;  %v8015_v4 = vpop.f32.mrf.mxu3 }
 0x811   :  { %v8026_v9 = vpop.f32.mrf.mxu1  ;;  %v8052_v48 = vpop.f32.mrf.mxu0 }
 0x818   :  { %v8039_v19 = vpop.f32.mrf.mxu3  ;;  %v8065_v18 = vpop.f32.mrf.mxu2 }
 0x819   :  { %v8040_v16 = vadd.f32 %v8039_v19, %v8026_v9  ;;  %v8066_v24 = vadd.f32 %v8065_v18, %v8052_v48  ;;  %v8028_v1 = vpop.f32.mrf.mxu1  ;;  %v8054_v38 = vpop.f32.mrf.mxu0 }
 0x820   :  { %v8041_v34 = vpop.f32.mrf.mxu3  ;;  %v8067_v17 = vpop.f32.mrf.mxu2 }
 0x821   :  { %v8091_v22 = vpop.f32.mrf.mxu1  ;;  %v8117_v63 = vpop.f32.mrf.mxu0  ;;  %v19180_v17 = vld [vmem:[#allocation49_spill] sm:$0xff] }
 0x828   :  { %v8078_v37 = vpop.f32.mrf.mxu3  ;;  %v8104_v39 = vpop.f32.mrf.mxu2 }
 0x829   :  { %v8092_v47 = vadd.f32 %v8091_v22, %v8078_v37  ;;  %v8118_v20 = vadd.f32 %v8117_v63, %v8104_v39  ;;  %v8093_v42 = vpop.f32.mrf.mxu1  ;;  %v8119_v10 = vpop.f32.mrf.mxu0  ;;  %v9507_v22 = vunpack.c.l.b16 %v19180_v17 }
 0x82b   :  { %v9509_v37 = vpack.c.b16 %v9507_v22, %v9507_v22  ;;  %v17468_v22 = vld [vmem:[#allocation8 + $0x584] sm:$0xf0] }
 0x830   :  { %v8080_v44 = vpop.f32.mrf.mxu3  ;;  %v8106_v31 = vpop.f32.mrf.mxu2 }
 0x835   :  { %v8508_v43 = vpop.f32.mrf.mxu1  ;;  %v8534_v3 = vpop.f32.mrf.mxu0 }
 0x836   :  { %v8509_v56 = vadd.f32 %v8508_v43, %v7988_v53  ;;  %v8535_v60 = vadd.f32 %v8534_v3, %v8014_v36 }
 0x838   :  { %v8521_v54 = vpop.f32.mrf.mxu3  ;;  %v8547_v59 = vpop.f32.mrf.mxu2 }
 0x839   :  { %v18905_v8 = vadd.f32 %v8521_v54, %v8509_v56  ;;  %v18907_v57 = vadd.f32 %v8547_v59, %v8535_v60 }
 0x83d   :  { %v8510_v61 = vpop.f32.mrf.mxu1  ;;  %v8536_v7 = vpop.f32.mrf.mxu0 }
 0x83e   :  { %v9497_v7 = vunpack.c.l.b16 %v19179_v52 }
 0x840   :  { %v8523_v62 = vpop.f32.mrf.mxu3  ;;  %v8549_v21 = vpop.f32.mrf.mxu2 }
 0x841   :  { %v9499_v62 = vpack.c.b16 %v9497_v7, %v9497_v7  ;;  %v9560_v21 = vunpack.c.h.b16 %v18854_v28 }
 0x845   :  { %v8573_v6 = vpop.f32.mrf.mxu1  ;;  %v8599_v51 = vpop.f32.mrf.mxu0 }
 0x84d   :  { %v8575_v12 = vpop.f32.mrf.mxu1  ;;  %v8601_v50 = vpop.f32.mrf.mxu0 }
 0x84e   :  { %v9498_v50 = vunpack.c.h.b16 %v19179_v52 }
 0x858   :  { %v8560_v40 = vpop.f32.mrf.mxu3  ;;  %v8586_v13 = vpop.f32.mrf.mxu2 }
 0x859   :  { %v8561_v15 = vadd.f32 %v8560_v40, %v8040_v16  ;;  %v8587_v29 = vadd.f32 %v8586_v13, %v8066_v24  ;;  %v9500_v40 = vpack.c.b16 %v9498_v50, %v9498_v50  ;;  %v9549_v13 = vunpack.c.l.b16 %v18885_v2 }
 0x85b   :  { %v18909_v25 = vadd.f32 %v8573_v6, %v8561_v15  ;;  %v18911_v23 = vadd.f32 %v8599_v51, %v8587_v29  ;;  %v9508_v6 = vunpack.c.h.b16 %v19180_v17  ;;  %v9562_v51 = vpack.c.b16 %v9560_v21, %v9560_v21  ;;  %v15501_v17 = vld [vmem:[#allocation8 + $0x570] sm:$0xf] }
 0x85c   :  { %v9551_v15 = vpack.c.b16 %v9549_v13, %v9549_v13  ;;  %v15453_v21 = vld [vmem:[#allocation8 + $0x510] sm:$0xf]  ;;  %v17450_v13 = vld [vmem:[#allocation8 + $0x4f4] sm:$0xf0] }
 0x85d   :  { %v9510_v12 = vpack.c.b16 %v9508_v6, %v9508_v6  ;;  %v17456_v6 = vld [vmem:[#allocation8 + $0x524] sm:$0xf0] }
 0x860   :  { %v8562_v11 = vpop.f32.mrf.mxu3  ;;  %v8588_v27 = vpop.f32.mrf.mxu2 }
 0x865   :  { %v8612_v5 = vpop.f32.mrf.mxu1  ;;  %v8638_v0 = vpop.f32.mrf.mxu0 }
 0x866   :  { %v8613_v33 = vadd.f32 %v8612_v5, %v8092_v47  ;;  %v8639_v41 = vadd.f32 %v8638_v0, %v8118_v20  ;;  %v9559_v47 = vunpack.c.l.b16 %v18854_v28  ;;  %v9550_v20 = vunpack.c.h.b16 %v18885_v2 }
 0x868   :  { %v8625_v55 = vpop.f32.mrf.mxu3  ;;  %v8651_v45 = vpop.f32.mrf.mxu2  ;;  %v9561_v39 = vpack.c.b16 %v9559_v47, %v9559_v47  ;;  %v9552_v42 = vpack.c.b16 %v9550_v20, %v9550_v20  ;;  %v15621_v20 = vld [vmem:[#allocation8 + $0x660] sm:$0xf] }
 0x869   :  { %v18913_v53 = vadd.f32 %v8625_v55, %v8613_v33  ;;  %v18915_v30 = vadd.f32 %v8651_v45, %v8639_v41  ;;  %v15549_v45 = vld [vmem:[#allocation8 + $0x5d0] sm:$0xf] }
 0x86d   :  { %v8614_v49 = vpop.f32.mrf.mxu1  ;;  %v8640_v36 = vpop.f32.mrf.mxu0 }
 0x86e   :  { %v17480_v49 = vld [vmem:[#allocation8 + $0x5e4] sm:$0xf0] }
 0x86f   :  { %v15550_v2 = vor.u32 %v17480_v49, %v15549_v45  ;;  %v15381_v49 = vld [vmem:[#allocation8 + $0x480] sm:$0xf] }
 0x870   :  { %v8627_v26 = vpop.f32.mrf.mxu3  ;;  %v8653_v58 = vpop.f32.mrf.mxu2 }
 0x871   :  { %v15525_v26 = vld [vmem:[#allocation8 + $0x5a0] sm:$0xf]  ;;  %v17474_v58 = vld [vmem:[#allocation8 + $0x5b4] sm:$0xf0]  ;;  %9335 = vmatpush.bf16.msra.mxu0 %v15550_v2 }
 0x872   :  { %v15573_v2 = vld [vmem:[#allocation8 + $0x600] sm:$0xf] }
 0x875   :  { %v8701_v14 = vpop.f32.mrf.mxu1 }
 0x878   :  { %v8688_v4 = vpop.f32.mrf.mxu3  ;;  %v8738_v9 = vpop.f32.mrf.mxu2 }
 0x879   :  { %v8702_v48 = vadd.f32 %v8701_v14, %v8688_v4  ;;  %v17477_v14 = vld [vmem:[#allocation8 + $0x5d4] sm:$0xf] }
 0x87b   :  { %v8755_v18 = vsel %vm7047_vm2, %v8702_v48, -inf }
 0x87c   :  { %8756 = vmax.xlane.f32.xlu2 %v8755_v18  ;;  %v15526_v18 = vor.u32 %v17474_v58, %v15525_v26  ;;  %v17486_v58 = vld [vmem:[#allocation8 + $0x614] sm:$0xf0] }
 0x87d   :  { %v8703_v19 = vpop.f32.mrf.mxu1 }
 0x87e   :  { %9336 = vmatpush.bf16.msra.mxu0 %v15526_v18  ;;  %v17481_v18 = vld [vmem:[#allocation8 + $0x5ec] sm:$0xf0] }
 0x880   :  { %v8690_v16 = vpop.f32.mrf.mxu3  ;;  %v8740_v24 = vpop.f32.mrf.mxu2 }
 0x881   :  { %v15645_v24 = vld [vmem:[#allocation8 + $0x690] sm:$0xf] }
 0x888   :  { %v8751_v1 = vpop.f32.mrf.mxu3 }
 0x889   :  { %v8752_v38 = vadd.f32 %v8751_v1, %v8738_v9  ;;  %v17504_v1 = vld [vmem:[#allocation8 + $0x6a4] sm:$0xf0] }
 0x88b   :  { %v8758_v34 = vsel %vm7047_vm2, %v8752_v38, -inf }
 0x88c   :  { %8759 = vmax.xlane.f32.xlu1 %v8758_v34 }
 0x890   :  { %v8753_v63 = vpop.f32.mrf.mxu3 }
 0x891   :  { %v15646_v63 = vor.u32 %v17504_v1, %v15645_v24  ;;  %v15559_v1 = vld [vmem:[#allocation8 + $0x5f0] sm:$0xf0] }
 0x893   :  { %9352 = vmatpush.bf16.msra.mxu1 %v15646_v63  ;;  %v17495_v63 = vld [vmem:[#allocation8 + $0x664] sm:$0xf] }
 0x894   :  { %9511 = vrot.lane.b32.xlu2 %v9509_v37, %s18010_s5  ;;  %v15527_v37 = vld [vmem:[#allocation8 + $0x5b8] sm:$0xf0] }
 0x89c   :  { %9563 = vrot.lane.b32.xlu2 %v9561_v39, %s18010_s5 }
 0x8a4   :  { %9555 = vrot.lane.b32.xlu2 %v9552_v42, %s18010_s5  ;;  %v17498_v42 = vld [vmem:[#allocation8 + $0x674] sm:$0xf0] }
 0x8ef   :  { %v8757_v10 = vpop.xlane.xlu2 %8756 }
 0x8f0   :  { %v8761_v44 = vsub.f32 %v8702_v48, %v8757_v10  ;;  %v15551_v48 = vld [vmem:[#allocation8 + $0x5e8] sm:$0xf0] }
 0x8f1   :  { %v15554_v16 = vor.u32 %v17477_v14, %v15551_v48  ;;  %v17501_v14 = vld [vmem:[#allocation8 + $0x694] sm:$0xf] }
 0x8f2   :  { %v8763_v31 = vmul.f32 1.442695, %v8761_v44  ;;  %v17465_v44 = vld [vmem:[#allocation8 + $0x574] sm:$0xf] }
 0x8f3   :  { %9361 = vmatpush.bf16.msra.mxu2 %v15554_v16  ;;  %v17478_v16 = vld [vmem:[#allocation8 + $0x5dc] sm:$0xf] }
 0x8f4   :  { %17729 = vpow2.f32 %v8763_v31  ;;  %v15503_v31 = vld [vmem:[#allocation8 + $0x588] sm:$0xf0] }
 0x8fa   :  { %v17730_v43 = vpop.eup %17729 }
 0x8fb   :  { %v8767_v56 = vsel %vm7047_vm2, %v17730_v43, 0.0 }
 0x8fc   :  { %8768 = vadd.xlane.f32.xlu1 %v8767_v56  ;;  %v15622_v56 = vor.u32 %v17498_v42, %v15621_v20  ;;  %v17475_v20 = vld [vmem:[#allocation8 + $0x5bc] sm:$0xf0]  ;;  %v17472_v42 = vld [vmem:[#allocation8 + $0x5ac] sm:$0xf] }
 0x8fe   :  { %9353 = vmatpush.bf16.msra.mxu1 %v15622_v56  ;;  %v15431_v56 = vld [vmem:[#allocation8 + $0x4f8] sm:$0xf0] }
 0x8ff   :  { %v8760_v3 = vpop.xlane.xlu1 %8759 }
 0x900   :  { %v8762_v60 = vsub.f32 %v8752_v38, %v8760_v3  ;;  %v17471_v38 = vld [vmem:[#allocation8 + $0x5a4] sm:$0xf] }
 0x901   :  { %v15530_v39 = vor.u32 %v17471_v38, %v15527_v37  ;;  %v17453_v38 = vld [vmem:[#allocation8 + $0x514] sm:$0xf]  ;;  %v15623_v37 = vld [vmem:[#allocation8 + $0x678] sm:$0xf0] }
 0x902   :  { %v8765_v54 = vmul.f32 1.442695, %v8762_v60  ;;  %v15477_v60 = vld [vmem:[#allocation8 + $0x540] sm:$0xf] }
 0x903   :  { %9362 = vmatpush.bf16.msra.mxu2 %v15530_v39  ;;  %v15626_v39 = vor.u32 %v17495_v63, %v15623_v37  ;;  %v17451_v63 = vld [vmem:[#allocation8 + $0x4fc] sm:$0xf0]  ;;  %v17448_v37 = vld [vmem:[#allocation8 + $0x4ec] sm:$0xf] }
 0x904   :  { %17731 = vpow2.f32 %v8765_v54  ;;  %v17462_v54 = vld [vmem:[#allocation8 + $0x554] sm:$0xf0] }
 0x905   :  { %v15478_v7 = vor.u32 %v17462_v54, %v15477_v60  ;;  %v15599_v54 = vld [vmem:[#allocation8 + $0x648] sm:$0xf0] }
 0x90a   :  { %v17732_v59 = vpop.eup %17731 }
 0x90b   :  { %v8770_v61 = vsel %vm7047_vm2, %v17732_v59, 0.0 }
 0x90c   :  { %8771 = vadd.xlane.f32.xlu0 %v8770_v61 }
 0x915   :  { %9501 = vrot.lane.b32.xlu1 %v9499_v62, %s18010_s5 }
 0x91d   :  { %9565 = vrot.lane.b32.xlu1 %v9562_v51, %s18010_s5 }
 0x920   :  { %9513 = vrot.lane.b32.xlu0 %v9510_v12, %s18010_s5  ;;  %v15454_v12 = vor.u32 %v17456_v6, %v15453_v21  ;;  %v15511_v21 = vld [vmem:[#allocation8 + $0x590] sm:$0xf0] }
 0x921   :  { %v17441_v6 = vld [vmem:[#allocation8 + $0x4b4] sm:$0xf] }
 0x928   :  { %9503 = vrot.lane.b32.xlu0 %v9500_v40, %s18010_s5  ;;  %v15429_v40 = vld [vmem:[#allocation8 + $0x4e0] sm:$0xf] }
 0x930   :  { %9553 = vrot.lane.b32.xlu0 %v9551_v15, %s18010_s5 }
 0x96f   :  { %v8769_v29 = vpop.xlane.xlu1 %8768 }
 0x970   :  { %17733 = vrcp.f32 %v8769_v29  ;;  %v15430_v29 = vor.u32 %v17450_v13, %v15429_v40  ;;  %v17483_v40 = vld [vmem:[#allocation8 + $0x604] sm:$0xf]  ;;  %v15575_v13 = vld [vmem:[#allocation8 + $0x618] sm:$0xf0] }
 0x976   :  { %v17734_v28 = vpop.eup %17733 }
 0x977   :  { %v8775_v11 = vmul.f32 %v17734_v28, %v17730_v43  ;;  %v15502_v43 = vor.u32 %v17468_v22, %v15501_v17  ;;  %v15562_v17 = vor.u32 %v17478_v16, %v15559_v1  ;;  %v17499_v16 = vld [vmem:[#allocation8 + $0x67c] sm:$0xf0] }
 0x979   :  { %v8777_v27 = vsel %vm7047_vm2, %v8775_v11, 0.0  ;;  %9337 = vmatpush.bf16.msra.mxu0 %v15502_v43  ;;  %v15405_v11 = vld [vmem:[#allocation8 + $0x4b0] sm:$0xf]  ;;  %v17447_v43 = vld [vmem:[#allocation8 + $0x4e4] sm:$0xf] }
 0x97a   :  { %v8778_v5 = vrot.slane %v8777_v27, 4  ;;  %v15434_v60 = vor.u32 %v17447_v43, %v15431_v56  ;;  %v15607_v43 = vld [vmem:[#allocation8 + $0x650] sm:$0xf0] }
 0x97c   :  { %v8779_v0 = vadd.f32 %v8778_v5, %v8777_v27  ;;  %v17444_v27 = vld [vmem:[#allocation8 + $0x4c4] sm:$0xf0]  ;;  %v15597_v5 = vld [vmem:[#allocation8 + $0x630] sm:$0xf] }
 0x97d   :  { %9338 = vmatpush.bf16.msra.mxu0 %v15478_v7 }
 0x97e   :  { %v8780_v33 = vrot.slane %v8779_v0, 2 }
 0x97f   :  { %v8772_v41 = vpop.xlane.xlu0 %8771 }
 0x980   :  { %v8781_v55 = vadd.f32 %v8780_v33, %v8779_v0  ;;  %17735 = vrcp.f32 %v8772_v41  ;;  %v15406_v0 = vor.u32 %v17444_v27, %v15405_v11  ;;  %v17492_v33 = vld [vmem:[#allocation8 + $0x644] sm:$0xf0]  ;;  %v17460_v11 = vld [vmem:[#allocation8 + $0x54c] sm:$0xf]  ;;  %v15578_v27 = vor.u32 %v17483_v40, %v15575_v13 }
 0x981   :  { %9339 = vmatpush.bf16.msra.mxu0 %v15454_v12  ;;  %v15598_v41 = vor.u32 %v17492_v33, %v15597_v5  ;;  %v15487_v5 = vld [vmem:[#allocation8 + $0x560] sm:$0xf0]  ;;  %v15383_v33 = vld [vmem:[#allocation8 + $0x498] sm:$0xf0] }
 0x982   :  { %v8782_v52 = vrot.slane %v8781_v55, 1 }
 0x983   :  { %9354 = vmatpush.bf16.msra.mxu1 %v15598_v41  ;;  %v15653_v41 = vld [vmem:[#allocation8 + $0x698] sm:$0xf] }
 0x984   :  { %v8783_v36 = vadd.f32 %v8782_v52, %v8781_v55  ;;  %v17459_v55 = vld [vmem:[#allocation8 + $0x544] sm:$0xf]  ;;  %v15479_v52 = vld [vmem:[#allocation8 + $0x558] sm:$0xf0] }
 0x985   :  { %9340 = vmatpush.bf16.msra.mxu0 %v15430_v29  ;;  %v15482_v45 = vor.u32 %v17459_v55, %v15479_v52  ;;  %v15485_v29 = vld [vmem:[#allocation8 + $0x548] sm:$0xf]  ;;  %v17505_v55 = vld [vmem:[#allocation8 + $0x6ac] sm:$0xf0]  ;;  %v17502_v52 = vld [vmem:[#allocation8 + $0x69c] sm:$0xf] }
 0x986   :  { %v17736_v4 = vpop.eup %17735  ;;  %v8791_v9 = vmul.f32 %v8783_v36, %v18728_v35  ;;  %v17438_v36 = vld [vmem:[#allocation8 + $0x494] sm:$0xf0] }
 0x987   :  { %v8776_v19 = vmul.f32 %v17736_v4, %v17732_v59  ;;  %v15506_v59 = vor.u32 %v17465_v44, %v15503_v31  ;;  %v15382_v26 = vor.u32 %v17438_v36, %v15381_v49  ;;  %v15647_v4 = vld [vmem:[#allocation8 + $0x6a8] sm:$0xf0]  ;;  %v15490_v49 = vor.u32 %v17460_v11, %v15487_v5 }
 0x988   :  { %v8793_v34 = vpack.c.bf16 %v8791_v9, %v8791_v9  ;;  %v15574_v9 = vor.u32 %v17486_v58, %v15573_v2  ;;  %v15650_v48 = vor.u32 %v17501_v14, %v15647_v4  ;;  %v15654_v36 = vor.u32 %v17505_v55, %v15653_v41  ;;  %v15655_v2 = vld [vmem:[#allocation8 + $0x6b0] sm:$0xf0]  ;;  %v15461_v14 = vld [vmem:[#allocation8 + $0x518] sm:$0xf]  ;;  %v17457_v4 = vld [vmem:[#allocation8 + $0x52c] sm:$0xf0] }
 0x989   :  { %v8784_v47 = vsel %vm7047_vm2, %v8776_v19, 0.0  ;;  %9363 = vmatpush.bf16.msra.mxu2 %v15506_v59  ;;  %9341 = vmatpush.bf16.msra.mxu0 %v15406_v0  ;;  %v15557_v19 = vld [vmem:[#allocation8 + $0x5d8] sm:$0xf]  ;;  %v17435_v0 = vld [vmem:[#allocation8 + $0x484] sm:$0xf]  ;;  %v15658_v58 = vor.u32 %v17502_v52, %v15655_v2 }
 0x98a   :  { %v8785_v10 = vrot.slane %v8784_v47, 4  ;;  %15375 = vmatmul.msk.bf16.vlgmr.msrb.gmra.mxu0 %vm7047_vm2, %v8793_v34  ;;  %15376 = vmatmul.msk.bf16.vlgmr.msrb.gmra.mxu1 %vm7047_vm2, %v8793_v34  ;;  %v15558_v24 = vor.u32 %v17481_v18, %v15557_v19  ;;  %v15455_v34 = vld [vmem:[#allocation8 + $0x528] sm:$0xf0]  ;;  %v15509_v59 = vld [vmem:[#allocation8 + $0x578] sm:$0xf] }
 0x98b   :  { %9378 = vmatpush.bf16.msra.mxu3 %v15650_v48  ;;  %v15458_v22 = vor.u32 %v17453_v38, %v15455_v34  ;;  %9355 = vmatpush.bf16.msra.mxu1 %v15574_v9  ;;  %v17454_v9 = vld [vmem:[#allocation8 + $0x51c] sm:$0xf]  ;;  %v15462_v48 = vor.u32 %v17457_v4, %v15461_v14  ;;  %v15463_v19 = vld [vmem:[#allocation8 + $0x530] sm:$0xf0]  ;;  %v15629_v18 = vld [vmem:[#allocation8 + $0x668] sm:$0xf] }
 0x98c   :  { %v8786_v3 = vadd.f32 %v8785_v10, %v8784_v47  ;;  %v15533_v47 = vld [vmem:[#allocation8 + $0x5a8] sm:$0xf]  ;;  %v15535_v10 = vld [vmem:[#allocation8 + $0x5c0] sm:$0xf0]  ;;  %v15630_v1 = vor.u32 %v17499_v16, %v15629_v18  ;;  %v17496_v38 = vld [vmem:[#allocation8 + $0x66c] sm:$0xf] }
 0x98d   :  { %9364 = vmatpush.bf16.msra.mxu2 %v15482_v45  ;;  %9342 = vmatpush.bf16.msra.mxu0 %v15382_v26  ;;  %v15534_v44 = vor.u32 %v17475_v20, %v15533_v47  ;;  %v15538_v31 = vor.u32 %v17472_v42, %v15535_v10  ;;  %v15386_v26 = vor.u32 %v17435_v0, %v15383_v33  ;;  %v15631_v34 = vld [vmem:[#allocation8 + $0x680] sm:$0xf0]  ;;  %v15605_v20 = vld [vmem:[#allocation8 + $0x638] sm:$0xf]  ;;  %v17493_v42 = vld [vmem:[#allocation8 + $0x64c] sm:$0xf0] }
 0x98e   :  { %v8787_v61 = vrot.slane %v8786_v3, 2  ;;  %v17482_v14 = vld [vmem:[#allocation8 + $0x5f4] sm:$0xf0]  ;;  %v17479_v4 = vld [vmem:[#allocation8 + $0x5e4] sm:$0xf] }
 0x98f   :  { %9387 = vmatpush.bf16.msrb.mxu1 %v15558_v24  ;;  %9379 = vmatpush.bf16.msra.mxu3 %v15626_v39  ;;  %v15466_v24 = vor.u32 %v17454_v9, %v15463_v19  ;;  %v15439_v39 = vld [vmem:[#allocation8 + $0x500] sm:$0xf0]  ;;  %v15567_v16 = vld [vmem:[#allocation8 + $0x5f8] sm:$0xf0] }
 0x990   :  { %v8788_v62 = vadd.f32 %v8787_v61, %v8786_v3  ;;  %v17489_v3 = vld [vmem:[#allocation8 + $0x634] sm:$0xf]  ;;  %v17469_v61 = vld [vmem:[#allocation8 + $0x58c] sm:$0xf0]  ;;  %v15442_v10 = vor.u32 %v17448_v37, %v15439_v39 }
 0x991   :  { %9413 = vmatpush.bf16.msrb.mxu0 %v15562_v17  ;;  %9365 = vmatpush.bf16.msra.mxu2 %v15458_v22  ;;  %v15602_v7 = vor.u32 %v17489_v3, %v15599_v54  ;;  %v15634_v17 = vor.u32 %v17496_v38, %v15631_v34  ;;  %v15437_v22 = vld [vmem:[#allocation8 + $0x4e8] sm:$0xf]  ;;  %v15413_v3 = vld [vmem:[#allocation8 + $0x4b8] sm:$0xf]  ;;  %v17442_v54 = vld [vmem:[#allocation8 + $0x4bc] sm:$0xf] }
 0x992   :  { %v8789_v51 = vrot.slane %v8788_v62, 1  ;;  %v15438_v47 = vor.u32 %v17451_v63, %v15437_v22  ;;  %v17503_v38 = vld [vmem:[#allocation8 + $0x6a4] sm:$0xf]  ;;  %v15663_v34 = vld [vmem:[#allocation8 + $0x6b8] sm:$0xf0] }
 0x993   :  { %9388 = vmatpush.bf16.msrb.mxu1 %v15534_v44  ;;  %9380 = vmatpush.bf16.msra.mxu3 %v15602_v7  ;;  %v15606_v44 = vor.u32 %v17493_v42, %v15605_v20  ;;  %v15581_v7 = vld [vmem:[#allocation8 + $0x608] sm:$0xf]  ;;  %v15570_v42 = vor.u32 %v17479_v4, %v15567_v16  ;;  %v17455_v16 = vld [vmem:[#allocation8 + $0x524] sm:$0xf] }
 0x994   :  { %v8790_v50 = vadd.f32 %v8789_v51, %v8788_v62  ;;  %v17466_v62 = vld [vmem:[#allocation8 + $0x57c] sm:$0xf]  ;;  %v15510_v51 = vor.u32 %v17469_v61, %v15509_v59  ;;  %v15415_v61 = vld [vmem:[#allocation8 + $0x4d0] sm:$0xf0] }
 0x995   :  { %9414 = vmatpush.bf16.msrb.mxu0 %v15538_v31  ;;  %v15514_v12 = vor.u32 %v17466_v62, %v15511_v21  ;;  %9366 = vmatpush.bf16.msra.mxu2 %v15434_v60  ;;  %v17490_v31 = vld [vmem:[#allocation8 + $0x63c] sm:$0xf]  ;;  %v17445_v60 = vld [vmem:[#allocation8 + $0x4cc] sm:$0xf0]  ;;  %v17487_v62 = vld [vmem:[#allocation8 + $0x61c] sm:$0xf0]  ;;  %v15418_v21 = vor.u32 %v17442_v54, %v15415_v61 }
 0x996   :  { %v8792_v15 = vmul.f32 %v8790_v50, %v18728_v35  ;;  %v15407_v50 = vld [vmem:[#allocation8 + $0x4c8] sm:$0xf0]  ;;  %v15610_v56 = vor.u32 %v17490_v31, %v15607_v43  ;;  %v15414_v59 = vor.u32 %v17445_v60, %v15413_v3  ;;  %v15666_v43 = vor.u32 %v17503_v38, %v15663_v34  ;;  %v15637_v60 = vld [vmem:[#allocation8 + $0x670] sm:$0xf]  ;;  %v17500_v54 = vld [vmem:[#allocation8 + $0x684] sm:$0xf0] }
 0x997   :  { %9389 = vmatpush.bf16.msrb.mxu1 %v15510_v51  ;;  %9381 = vmatpush.bf16.msra.mxu3 %v15578_v27  ;;  %v17484_v51 = vld [vmem:[#allocation8 + $0x60c] sm:$0xf]  ;;  %v15391_v27 = vld [vmem:[#allocation8 + $0x4a0] sm:$0xf0] }
 0x998   :  { %v8794_v28 = vpack.c.bf16 %v8792_v15, %v8792_v15  ;;  %v15410_v15 = vor.u32 %v17441_v6, %v15407_v50  ;;  %v15582_v6 = vor.u32 %v17487_v62, %v15581_v7  ;;  %v15543_v3 = vld [vmem:[#allocation8 + $0x5c8] sm:$0xf0] }
 0x999   :  { %9415 = vmatpush.bf16.msrb.mxu0 %v15514_v12  ;;  %v15583_v12 = vld [vmem:[#allocation8 + $0x620] sm:$0xf0]  ;;  %v15639_v61 = vld [vmem:[#allocation8 + $0x688] sm:$0xf0] }
 0x99a   :  { %15377 = vmatmul.msk.bf16.vlgmr.msrb.gmra.mxu2 %vm7047_vm2, %v8794_v28  ;;  %15378 = vmatmul.msk.bf16.vlgmr.msrb.gmra.mxu3 %vm7047_vm2, %v8794_v28  ;;  %v17463_v28 = vld [vmem:[#allocation8 + $0x55c] sm:$0xf0]  ;;  %v15586_v13 = vor.u32 %v17484_v51, %v15583_v12  ;;  %v15638_v51 = vor.u32 %v17500_v54, %v15637_v60  ;;  %v17443_v60 = vld [vmem:[#allocation8 + $0x4c4] sm:$0xf]  ;;  %v15423_v54 = vld [vmem:[#allocation8 + $0x4d8] sm:$0xf0] }
 0x99b   :  { %v15486_v45 = vor.u32 %v17463_v28, %v15485_v29  ;;  %9367 = vmatpush.bf16.msra.mxu2 %v15410_v15  ;;  %9404 = vmatpush.bf16.msrb.mxu3 %v15654_v36  ;;  %v15389_v15 = vld [vmem:[#allocation8 + $0x488] sm:$0xf]  ;;  %v17439_v29 = vld [vmem:[#allocation8 + $0x49c] sm:$0xf0]  ;;  %v17436_v28 = vld [vmem:[#allocation8 + $0x48c] sm:$0xf] }
 0x99c   :  { %v15390_v11 = vor.u32 %v17439_v29, %v15389_v15  ;;  %v15394_v5 = vor.u32 %v17436_v28, %v15391_v27  ;;  %v17494_v15 = vld [vmem:[#allocation8 + $0x654] sm:$0xf0]  ;;  %v17491_v29 = vld [vmem:[#allocation8 + $0x644] sm:$0xf]  ;;  %v15615_v28 = vld [vmem:[#allocation8 + $0x658] sm:$0xf0] }
 0x99d   :  { %9390 = vmatpush.bf16.msrb.mxu1 %v15486_v45  ;;  %9416 = vmatpush.bf16.msrb.mxu0 %v15490_v49 }
 0x99f   :  { %9368 = vmatpush.bf16.msra.mxu2 %v15386_v26  ;;  %9405 = vmatpush.bf16.msrb.mxu3 %v15630_v1  ;;  %v17506_v1 = vld [vmem:[#allocation8 + $0x6b4] sm:$0xf0] }
 0x9a1   :  { %9391 = vmatpush.bf16.msrb.mxu1 %v15462_v48  ;;  %9417 = vmatpush.bf16.msrb.mxu0 %v15466_v24  ;;  %v15661_v24 = vld [vmem:[#allocation8 + $0x6a0] sm:$0xf] }
 0x9a2   :  { %v15662_v31 = vor.u32 %v17506_v1, %v15661_v24  ;;  %v15471_v24 = vld [vmem:[#allocation8 + $0x538] sm:$0xf0]  ;;  %v9514_v1 = vpop.permute.xlu0 %9513 }
 0x9a3   :  { %9430 = vmatpush.bf16.msrb.mxu2 %v15658_v58  ;;  %9406 = vmatpush.bf16.msrb.mxu3 %v15606_v44  ;;  %v15565_v58 = vld [vmem:[#allocation8 + $0x5e0] sm:$0xf]  ;;  %v17476_v44 = vld [vmem:[#allocation8 + $0x5c4] sm:$0xf0] }
 0x9a4   :  { %v15566_v20 = vor.u32 %v17482_v14, %v15565_v58  ;;  %v15591_v58 = vld [vmem:[#allocation8 + $0x628] sm:$0xf0] }
 0x9a5   :  { %9392 = vmatpush.bf16.msrb.mxu1 %v15438_v47  ;;  %9418 = vmatpush.bf16.msrb.mxu0 %v15442_v10  ;;  %v15541_v10 = vld [vmem:[#allocation8 + $0x5b0] sm:$0xf] }
 0x9a6   :  { %v15542_v7 = vor.u32 %v17476_v44, %v15541_v10 }
 0x9a7   :  { %9431 = vmatpush.bf16.msrb.mxu2 %v15634_v17  ;;  %9407 = vmatpush.bf16.msrb.mxu3 %v15582_v6  ;;  %v17470_v6 = vld [vmem:[#allocation8 + $0x594] sm:$0xf0] }
 0x9a9   :  { %9393 = vmatpush.bf16.msrb.mxu1 %v15414_v59  ;;  %9419 = vmatpush.bf16.msrb.mxu0 %v15418_v21  ;;  %v17497_v59 = vld [vmem:[#allocation8 + $0x674] sm:$0xf]  ;;  %v15517_v21 = vld [vmem:[#allocation8 + $0x580] sm:$0xf] }
 0x9aa   :  { %v15642_v12 = vor.u32 %v17497_v59, %v15639_v61  ;;  %v15518_v27 = vor.u32 %v17470_v6, %v15517_v21  ;;  %v15426_v61 = vor.u32 %v17443_v60, %v15423_v54  ;;  %v17437_v21 = vld [vmem:[#allocation8 + $0x494] sm:$0xf]  ;;  %v15399_v6 = vld [vmem:[#allocation8 + $0x4a8] sm:$0xf0] }
 0x9ab   :  { %9432 = vmatpush.bf16.msrb.mxu2 %v15610_v56  ;;  %v17473_v56 = vld [vmem:[#allocation8 + $0x5b4] sm:$0xf] }
 0x9ac   :  { %v15546_v62 = vor.u32 %v17473_v56, %v15543_v3  ;;  %v15421_v56 = vld [vmem:[#allocation8 + $0x4c0] sm:$0xf]  ;;  %v17446_v3 = vld [vmem:[#allocation8 + $0x4d4] sm:$0xf0] }
 0x9ad   :  { %9394 = vmatpush.bf16.msrb.mxu1 %v15390_v11  ;;  %9420 = vmatpush.bf16.msrb.mxu0 %v15394_v5  ;;  %v18957_v11 = vpop.permute.xlu1 %9501  ;;  %v15422_v59 = vor.u32 %v17446_v3, %v15421_v56 }
 0x9af   :  { %9433 = vmatpush.bf16.msrb.mxu2 %v15586_v13  ;;  %v15613_v13 = vld [vmem:[#allocation8 + $0x640] sm:$0xf] }
 0x9b5   :  { %v9566_v34 = vpop.permute.xlu1 %9565 }
 0xa07   :  { %v8821_v50 = vpop.f32.mrf.mxu0  ;;  %v8834_v40 = vpop.f32.mrf.mxu1 }
 0xa08   :  { %v8881_v52 = vpack.c.bf16 %v8821_v50, %v8821_v50  ;;  %v8882_v45 = vpack.c.bf16 %v8834_v40, %v8834_v40  ;;  %v17467_v50 = vld [vmem:[#allocation8 + $0x584] sm:$0xf]  ;;  %v15519_v40 = vld [vmem:[#allocation8 + $0x598] sm:$0xf0] }
 0xa09   :  { %v15522_v5 = vor.u32 %v17467_v50, %v15519_v40  ;;  %v9521_v50 = vsel %vm6970_vm1, %v9514_v1, 0  ;;  %v9573_v40 = vsel %vm6970_vm1, %v9566_v34, 0 }
 0xa0a   :  { %v8961_v9 = vunpack.c.l.b16 %v8881_v52  ;;  %v8962_v48 = vunpack.c.l.b16 %v8882_v45  ;;  %v15618_v52 = vor.u32 %v17491_v29, %v15615_v28  ;;  %v17461_v45 = vld [vmem:[#allocation8 + $0x554] sm:$0xf] }
 0xa0f   :  { %v8823_v0 = vpop.f32.mrf.mxu0  ;;  %v8836_v33 = vpop.f32.mrf.mxu1 }
 0xa10   :  { %v15493_v0 = vld [vmem:[#allocation8 + $0x550] sm:$0xf]  ;;  %v17464_v33 = vld [vmem:[#allocation8 + $0x564] sm:$0xf0] }
 0xa11   :  { %v15494_v14 = vor.u32 %v17464_v33, %v15493_v0 }
 0xa1d   :  { %v8864_v41 = vpop.f32.mrf.mxu2  ;;  %v8877_v55 = vpop.f32.mrf.mxu3 }
 0xa1e   :  { %v8883_v49 = vpack.c.bf16 %v8864_v41, %v8864_v41  ;;  %v8884_v36 = vpack.c.bf16 %v8877_v55, %v8877_v55  ;;  %v9512_v41 = vpop.permute.xlu2 %9511  ;;  %v15614_v55 = vor.u32 %v17494_v15, %v15613_v13  ;;  %v9504_v13 = vpop.permute.xlu0 %9503 }
 0xa1f   :  { %v9515_v10 = vsel %vm6970_vm1, %v9512_v41, %v9514_v1  ;;  %v9505_v28 = vsel %vm6970_vm1, %v18957_v11, %v9504_v13 }
 0xa20   :  { %v8963_v2 = vunpack.c.l.b16 %v8883_v49  ;;  %v8964_v26 = vunpack.c.l.b16 %v8884_v36  ;;  %v15495_v49 = vld [vmem:[#allocation8 + $0x568] sm:$0xf0]  ;;  %v15589_v36 = vld [vmem:[#allocation8 + $0x610] sm:$0xf] }
 0xa21   :  { %v15498_v4 = vor.u32 %v17461_v45, %v15495_v49 }
 0xa22   :  { %v8965_v19 = vrot.slane %v8963_v2, 7  ;;  %v8967_v18 = vrot.slane %v8964_v26, 7  ;;  %v17488_v2 = vld [vmem:[#allocation8 + $0x624] sm:$0xf0]  ;;  %v17485_v26 = vld [vmem:[#allocation8 + $0x614] sm:$0xf] }
 0xa24   :  { %v8966_v17 = vsel %vm7595_vm4, %v8965_v19, %v8961_v9  ;;  %v8968_v22 = vsel %vm7595_vm4, %v8967_v18, %v8962_v48  ;;  %v15590_v9 = vor.u32 %v17488_v2, %v15589_v36  ;;  %v15594_v48 = vor.u32 %v17485_v26, %v15591_v58  ;;  %v15469_v19 = vld [vmem:[#allocation8 + $0x520] sm:$0xf]  ;;  %v17458_v18 = vld [vmem:[#allocation8 + $0x534] sm:$0xf0] }
 0xa25   :  { %v18947_v63 = vpack.c.b16 %v8966_v17, %v8966_v17  ;;  %v18949_v37 = vpack.c.b16 %v8968_v22, %v8968_v22  ;;  %v8866_v47 = vpop.f32.mrf.mxu2  ;;  %v8879_v39 = vpop.f32.mrf.mxu3  ;;  %v15470_v38 = vor.u32 %v17458_v18, %v15469_v19  ;;  %v15474_v17 = vor.u32 %v17455_v16, %v15471_v24  ;;  %v15445_v22 = vld [vmem:[#allocation8 + $0x4f0] sm:$0xf] }
 0xa26   :  { %v17452_v47 = vld [vmem:[#allocation8 + $0x504] sm:$0xf0]  ;;  %v17449_v39 = vld [vmem:[#allocation8 + $0x4f4] sm:$0xf]  ;;  %v9554_v15 = vpop.permute.xlu0 %9553 }
 0xa27   :  { %9343 = vmatmul.bf16.vlgmr.msra.gmra.mxu0 %v18947_v63  ;;  %15667 = vmatmul.msk.bf16.vlgmr.msra.gmra.mxu1 %vm6970_vm1, %v18949_v37 }
 0xa28   :  { %9369 = vmatmul.bf16.vlgmr.msra.gmra.mxu2 %v18947_v63  ;;  %15668 = vmatmul.msk.bf16.vlgmr.msra.gmra.mxu3 %vm6970_vm1, %v18949_v37 }
 0xa29   :  { %9439 = vmatpush.bf16.msra.mxu3 %v15566_v20  ;;  %9465 = vmatpush.bf16.msra.mxu2 %v15570_v42  ;;  %v15447_v20 = vld [vmem:[#allocation8 + $0x508] sm:$0xf0]  ;;  %v9564_v42 = vpop.permute.xlu2 %9563 }
 0xa2a   :  { %9456 = vmatpush.bf16.msra.mxu1 %v15662_v31  ;;  %9482 = vmatpush.bf16.msra.mxu0 %v15666_v43  ;;  %v9567_v44 = vsel %vm6970_vm1, %v9564_v42, %v9566_v34  ;;  %v15446_v31 = vor.u32 %v17452_v47, %v15445_v22  ;;  %v15450_v43 = vor.u32 %v17449_v39, %v15447_v20 }
 0xa2d   :  { %9440 = vmatpush.bf16.msra.mxu3 %v15542_v7  ;;  %9466 = vmatpush.bf16.msra.mxu2 %v15546_v62  ;;  %v15397_v7 = vld [vmem:[#allocation8 + $0x490] sm:$0xf]  ;;  %v17440_v62 = vld [vmem:[#allocation8 + $0x4a4] sm:$0xf0] }
 0xa2e   :  { %9457 = vmatpush.bf16.msra.mxu1 %v15638_v51  ;;  %9483 = vmatpush.bf16.msra.mxu0 %v15642_v12  ;;  %v15398_v51 = vor.u32 %v17440_v62, %v15397_v7  ;;  %v15402_v12 = vor.u32 %v17437_v21, %v15399_v6  ;;  %v9685_v21 = vunpack.c.l.b16 %v18863_v32 }
 0xa30   :  { %v9687_v6 = vpack.c.b16 %v9685_v21, %v9685_v21 }
 0xa31   :  { %9441 = vmatpush.bf16.msra.mxu3 %v15518_v27  ;;  %9467 = vmatpush.bf16.msra.mxu2 %v15522_v5  ;;  %v9556_v29 = vpop.permute.xlu2 %9555 }
 0xa32   :  { %9458 = vmatpush.bf16.msra.mxu1 %v15614_v55  ;;  %9484 = vmatpush.bf16.msra.mxu0 %v15618_v52  ;;  %v9557_v27 = vsel %vm6970_vm1, %v9554_v15, %v9556_v29 }
 0xa35   :  { %9442 = vmatpush.bf16.msra.mxu3 %v15494_v14  ;;  %9468 = vmatpush.bf16.msra.mxu2 %v15498_v4 }
 0xa36   :  { %9459 = vmatpush.bf16.msra.mxu1 %v15590_v9  ;;  %9485 = vmatpush.bf16.msra.mxu0 %v15594_v48 }
 0xa37   :  { %9395 = vmatmul.bf16.vlgmr.msrb.gmra.mxu1 %v18947_v63  ;;  %9421 = vmatmul.bf16.vlgmr.msrb.gmra.mxu0 %v18947_v63 }
 0xa38   :  { %15669 = vmatmul.msk.bf16.vlgmr.msrb.gmra.mxu3 %vm6970_vm1, %v18949_v37  ;;  %15670 = vmatmul.msk.bf16.vlgmr.msrb.gmra.mxu2 %vm6970_vm1, %v18949_v37 }
 0xa39   :  { %9443 = vmatpush.bf16.msra.mxu3 %v15470_v38  ;;  %9469 = vmatpush.bf16.msra.mxu2 %v15474_v17 }
 0xa3a   :  { %9530 = vmatpush.bf16.xpose.msrb.mxu1 %v9515_v10  ;;  %9582 = vmatpush.bf16.xpose.msrb.mxu0 %v9567_v44 }
 0xa3d   :  { %9444 = vmatpush.bf16.msra.mxu3 %v15446_v31  ;;  %9470 = vmatpush.bf16.msra.mxu2 %v15450_v43 }
 0xa41   :  { %9445 = vmatpush.bf16.msra.mxu3 %v15422_v59  ;;  %9471 = vmatpush.bf16.msra.mxu2 %v15426_v61 }
 0xa45   :  { %9446 = vmatpush.bf16.msra.mxu3 %v15398_v51  ;;  %9472 = vmatpush.bf16.msra.mxu2 %v15402_v12 }
 0xa47   :  { %15671 = vmatmul.msk.bf16.vlgmr.msra.gmra.mxu1 %vm6970_vm1, %v18949_v37  ;;  %15672 = vmatmul.msk.bf16.vlgmr.msra.gmra.mxu0 %vm6970_vm1, %v18949_v37 }
 0xa48   :  { %9447 = vmatmul.bf16.vlgmr.msra.gmra.mxu3 %v18947_v63  ;;  %9595 = vmatpush.bf16.xpose.msra.mxu1 %v9573_v40 }
 0xa49   :  { %9543 = vmatpush.bf16.xpose.msrb.mxu3 %v9521_v50  ;;  %9473 = vmatmul.bf16.vlgmr.msra.gmra.mxu2 %v18947_v63 }
 0xa57   :  { %9531 = vmatmul.bf16.vlgmr.msrb.gmra.mxu1 %v9505_v28  ;;  %9583 = vmatmul.bf16.vlgmr.msrb.gmra.mxu0 %v9557_v27 }
 0xa58   :  { %15673 = vmatmul.msk.bf16.vlgmr.msrb.gmra.mxu3 %vm6970_vm1, %v9504_v13 }
 0xa67   :  { %15674 = vmatmul.msk.bf16.vlgmr.msra.gmra.mxu1 %vm6970_vm1, %v9556_v29 }
 0xaa4   :  { %v9344_v37 = vpop.f32.mrf.mxu0  ;;  %v9357_v5 = vpop.f32.mrf.mxu1 }
 0xaa5   :  { %v9358_v0 = vadd.f32 %v9357_v5, %v9344_v37 }
 0xaa7   :  { %v18981_v33 = vadd.f32 %v9358_v0, %v18905_v8 }
 0xaab   :  { %v9370_v63 = vpop.f32.mrf.mxu2  ;;  %v9383_v41 = vpop.f32.mrf.mxu3 }
 0xaac   :  { %v9384_v55 = vadd.f32 %v9383_v41, %v9370_v63  ;;  %v9346_v52 = vpop.f32.mrf.mxu0  ;;  %v9359_v45 = vpop.f32.mrf.mxu1  ;;  %v9686_v63 = vunpack.c.h.b16 %v18863_v32 }
 0xaae   :  { %v18984_v11 = vadd.f32 %v9384_v55, %v18907_v57  ;;  %v9688_v41 = vpack.c.b16 %v9686_v63, %v9686_v63  ;;  %v9641_v55 = vunpack.c.l.b16 %v18690_v46 }
 0xab0   :  { %v9643_v52 = vpack.c.b16 %v9641_v55, %v9641_v55  ;;  %v17561_v55 = vld [vmem:[#allocation8 + $0x874] sm:$0xf] }
 0xab3   :  { %v9372_v49 = vpop.f32.mrf.mxu2  ;;  %v9385_v36 = vpop.f32.mrf.mxu3 }
 0xab4   :  { %v9396_v2 = vpop.f32.mrf.mxu1  ;;  %v9422_v26 = vpop.f32.mrf.mxu0  ;;  %v17549_v36 = vld [vmem:[#allocation8 + $0x814] sm:$0xf] }
 0xabb   :  { %v9409_v58 = vpop.f32.mrf.mxu3  ;;  %v9435_v14 = vpop.f32.mrf.mxu2 }
 0xabc   :  { %v9410_v4 = vadd.f32 %v9409_v58, %v9396_v2  ;;  %v9436_v9 = vadd.f32 %v9435_v14, %v9422_v26  ;;  %v9398_v48 = vpop.f32.mrf.mxu1  ;;  %v9424_v19 = vpop.f32.mrf.mxu0  ;;  %v15851_v14 = vld [vmem:[#allocation8 + $0x828] sm:$0xf0] }
 0xabd   :  { %v15854_v48 = vor.u32 %v17549_v36, %v15851_v14  ;;  %v17543_v19 = vld [vmem:[#allocation8 + $0x7e4] sm:$0xf] }
 0xabe   :  { %v18987_v8 = vadd.f32 %v9410_v4, %v18909_v25  ;;  %v18990_v18 = vadd.f32 %v9436_v9, %v18911_v23 }
 0xac3   :  { %v9411_v16 = vpop.f32.mrf.mxu3  ;;  %v9437_v24 = vpop.f32.mrf.mxu2 }
 0xac4   :  { %v9461_v57 = vpop.f32.mrf.mxu1  ;;  %v9487_v1 = vpop.f32.mrf.mxu0  ;;  %v15827_v16 = vld [vmem:[#allocation8 + $0x7f8] sm:$0xf0] }
 0xacb   :  { %v9448_v38 = vpop.f32.mrf.mxu3 }
 0xacc   :  { %v9462_v34 = vadd.f32 %v9461_v57, %v9448_v38  ;;  %v9474_v17 = vpop.f32.mrf.mxu2  ;;  %v9463_v22 = vpop.f32.mrf.mxu1 }
 0xacd   :  { %v9488_v47 = vadd.f32 %v9487_v1, %v9474_v17  ;;  %v9489_v39 = vpop.f32.mrf.mxu0  ;;  %v15830_v1 = vor.u32 %v17543_v19, %v15827_v16  ;;  %v17576_v17 = vld [vmem:[#allocation8 + $0x8e4] sm:$0xf0]  ;;  %v17537_v22 = vld [vmem:[#allocation8 + $0x7b4] sm:$0xf] }
 0xace   :  { %v18993_v20 = vadd.f32 %v9462_v34, %v18913_v53  ;;  %v15945_v34 = vld [vmem:[#allocation8 + $0x8d0] sm:$0xf]  ;;  %v15803_v39 = vld [vmem:[#allocation8 + $0x7c8] sm:$0xf0]  ;;  %v17552_v19 = vld [vmem:[#allocation8 + $0x824] sm:$0xf0] }
 0xacf   :  { %v18996_v42 = vadd.f32 %v9488_v47, %v18915_v30  ;;  %v9642_v30 = vunpack.c.h.b16 %v18690_v46  ;;  %v15946_v47 = vor.u32 %v17576_v17, %v15945_v34  ;;  %v17546_v34 = vld [vmem:[#allocation8 + $0x7f4] sm:$0xf0] }
 0xad1   :  { %v9644_v62 = vpack.c.b16 %v9642_v30, %v9642_v30 }
 0xad3   :  { %v9450_v25 = vpop.f32.mrf.mxu3 }
 0xad4   :  { %v9476_v10 = vpop.f32.mrf.mxu2  ;;  %v9532_v23 = vpop.f32.mrf.mxu1 }
 0xad5   :  { %v9584_v44 = vpop.f32.mrf.mxu0 }
 0xadb   :  { %v9545_v31 = vpop.f32.mrf.mxu3 }
 0xadc   :  { %v9546_v43 = vadd.f32 %v9545_v31, %v9532_v23  ;;  %v9534_v56 = vpop.f32.mrf.mxu1  ;;  %v15806_v23 = vor.u32 %v17537_v22, %v15803_v39  ;;  %v17540_v39 = vld [vmem:[#allocation8 + $0x7c4] sm:$0xf0] }
 0xadd   :  { %v9586_v3 = vpop.f32.mrf.mxu0  ;;  %v15947_v56 = vld [vmem:[#allocation8 + $0x8e8] sm:$0xf0] }
 0xade   :  { %v9601_v60 = vsel %vm7047_vm2, %v9546_v43, -inf  ;;  %v15921_v3 = vld [vmem:[#allocation8 + $0x8a0] sm:$0xf] }
 0xadf   :  { %9602 = vmax.xlane.f32.xlu1 %v9601_v60 }
 0xae3   :  { %v9547_v54 = vpop.f32.mrf.mxu3 }
 0xae4   :  { %v9597_v59 = vpop.f32.mrf.mxu1  ;;  %v17570_v54 = vld [vmem:[#allocation8 + $0x8b4] sm:$0xf0] }
 0xae5   :  { %v9598_v61 = vadd.f32 %v9597_v59, %v9584_v44  ;;  %v17531_v59 = vld [vmem:[#allocation8 + $0x784] sm:$0xf]  ;;  %v15922_v30 = vor.u32 %v17570_v54, %v15921_v3  ;;  %v15731_v54 = vld [vmem:[#allocation8 + $0x738] sm:$0xf0] }
 0xae7   :  { %v9604_v53 = vsel %vm7047_vm2, %v9598_v61, -inf }
 0xae8   :  { %9605 = vmax.xlane.f32.xlu0 %v9604_v53 }
 0xaec   :  { %v9599_v7 = vpop.f32.mrf.mxu1 }
 0xafc   :  { %9647 = vrot.lane.b32.xlu0 %v9644_v62, %s18010_s5 }
 0xb04   :  { %9689 = vrot.lane.b32.xlu0 %v9687_v6, %s18010_s5 }
 0xb52   :  { %v9603_v51 = vpop.xlane.xlu1 %9602 }
 0xb53   :  { %v9607_v12 = vsub.f32 %v9546_v43, %v9603_v51  ;;  %v17573_v43 = vld [vmem:[#allocation8 + $0x8d4] sm:$0xf]  ;;  %v17567_v51 = vld [vmem:[#allocation8 + $0x8a4] sm:$0xf] }
 0xb54   :  { %v15950_v60 = vor.u32 %v17573_v43, %v15947_v56  ;;  %v15729_v43 = vld [vmem:[#allocation8 + $0x720] sm:$0xf]  ;;  %v17522_v56 = vld [vmem:[#allocation8 + $0x734] sm:$0xf0] }
 0xb55   :  { %v9609_v50 = vmul.f32 1.442695, %v9607_v12  ;;  %v15923_v12 = vld [vmem:[#allocation8 + $0x8b8] sm:$0xf0]  ;;  %v15730_v3 = vor.u32 %v17522_v56, %v15729_v43 }
 0xb57   :  { %17737 = vpow2.f32 %v9609_v50  ;;  %v15897_v50 = vld [vmem:[#allocation8 + $0x870] sm:$0xf] }
 0xb5b   :  { %v9606_v40 = vpop.xlane.xlu0 %9605 }
 0xb5c   :  { %v9608_v13 = vsub.f32 %v9598_v61, %v9606_v40  ;;  %v15779_v61 = vld [vmem:[#allocation8 + $0x798] sm:$0xf0] }
 0xb5d   :  { %v17738_v15 = vpop.eup %17737  ;;  %v15782_v21 = vor.u32 %v17531_v59, %v15779_v61  ;;  %v15705_v61 = vld [vmem:[#allocation8 + $0x6f0] sm:$0xf] }
 0xb5e   :  { %v9611_v29 = vmul.f32 1.442695, %v9608_v13  ;;  %v9613_v28 = vsel %vm7047_vm2, %v17738_v15, 0.0  ;;  %v15926_v13 = vor.u32 %v17567_v51, %v15923_v12 }
 0xb5f   :  { %9614 = vadd.xlane.f32.xlu2 %v9613_v28  ;;  %v15755_v28 = vld [vmem:[#allocation8 + $0x768] sm:$0xf0] }
 0xb60   :  { %17739 = vpow2.f32 %v9611_v29  ;;  %v17525_v29 = vld [vmem:[#allocation8 + $0x754] sm:$0xf] }
 0xb61   :  { %v15758_v63 = vor.u32 %v17525_v29, %v15755_v28  ;;  %v15707_v29 = vld [vmem:[#allocation8 + $0x708] sm:$0xf0] }
 0xb66   :  { %v17740_v27 = vpop.eup %17739 }
 0xb67   :  { %v9616_v37 = vsel %vm7047_vm2, %v17740_v27, 0.0 }
 0xb68   :  { %9617 = vadd.xlane.f32.xlu1 %v9616_v37 }
 0xb6e   :  { %v19006_v5 = vpop.permute.xlu0 %9647 }
 0xb6f   :  { %v9657_v0 = vsel %vm7103_vm0, %v19006_v5, 0 }
 0xb70   :  { %9679 = vmatpush.bf16.msra.mxu3 %v9657_v0 }
 0xb74   :  { %10200 = vmatpush.bf16.msrb.mxu3 %v15946_v47  ;;  %v15801_v47 = vld [vmem:[#allocation8 + $0x7b0] sm:$0xf] }
 0xb76   :  { %v9690_v2 = vpop.permute.xlu0 %9689 }
 0xb77   :  { %9691 = vrot.lane.b32.xlu2 %v9688_v41, %s18010_s5 }
 0xb78   :  { %10201 = vmatpush.bf16.msrb.mxu3 %v15922_v30 }
 0xb81   :  { %9645 = vrot.lane.b32.xlu1 %v9643_v52, %s18010_s5  ;;  %v15899_v52 = vld [vmem:[#allocation8 + $0x888] sm:$0xf0] }
 0xb82   :  { %v15902_v36 = vor.u32 %v17561_v55, %v15899_v52  ;;  %v17550_v55 = vld [vmem:[#allocation8 + $0x81c] sm:$0xf] }
 0xbd2   :  { %v9615_v45 = vpop.xlane.xlu2 %9614 }
 0xbd3   :  { %17741 = vrcp.f32 %v9615_v45  ;;  %v15873_v45 = vld [vmem:[#allocation8 + $0x840] sm:$0xf] }
 0xbd9   :  { %v17742_v49 = vpop.eup %17741 }
 0xbda   :  { %v9621_v26 = vmul.f32 %v17742_v49, %v17738_v15  ;;  %v9692_v58 = vpop.permute.xlu2 %9691  ;;  %v17564_v15 = vld [vmem:[#allocation8 + $0x884] sm:$0xf0] }
 0xbdb   :  { %v9693_v4 = vsel %vm6970_vm1, %v9690_v2, %v9692_v58  ;;  %v9701_v32 = vsel %vm7103_vm0, %v9692_v58, 0  ;;  %v9618_v9 = vpop.xlane.xlu1 %9617  ;;  %v15898_v37 = vor.u32 %v17564_v15, %v15897_v50  ;;  %v17558_v2 = vld [vmem:[#allocation8 + $0x854] sm:$0xf0]  ;;  %v17553_v58 = vld [vmem:[#allocation8 + $0x82c] sm:$0xf0] }
 0xbdc   :  { %v9623_v46 = vsel %vm7047_vm2, %v9621_v26, 0.0  ;;  %v9698_v24 = vsel %vm7103_vm0, %v9693_v4, 0  ;;  %9723 = vmatpush.bf16.msrb.mxu1 %v9701_v32  ;;  %17743 = vrcp.f32 %v9618_v9  ;;  %v15857_v26 = vld [vmem:[#allocation8 + $0x818] sm:$0xf]  ;;  %v15874_v14 = vor.u32 %v17558_v2, %v15873_v45  ;;  %v15833_v50 = vld [vmem:[#allocation8 + $0x7e8] sm:$0xf] }
 0xbdd   :  { %v9624_v57 = vrot.slane %v9623_v46, 4  ;;  %9710 = vmatpush.bf16.msra.mxu0 %v9698_v24  ;;  %10202 = vmatpush.bf16.msrb.mxu3 %v15898_v37  ;;  %v15858_v4 = vor.u32 %v17553_v58, %v15857_v26  ;;  %v17513_v15 = vld [vmem:[#allocation8 + $0x6f4] sm:$0xf]  ;;  %v17510_v37 = vld [vmem:[#allocation8 + $0x6d4] sm:$0xf0] }
 0xbde   :  { %v15710_v28 = vor.u32 %v17513_v15, %v15707_v29  ;;  %v15859_v45 = vld [vmem:[#allocation8 + $0x830] sm:$0xf0]  ;;  %v17507_v58 = vld [vmem:[#allocation8 + $0x6c4] sm:$0xf]  ;;  %v17517_v15 = vld [vmem:[#allocation8 + $0x70c] sm:$0xf0] }
 0xbdf   :  { %v9625_v38 = vadd.f32 %v9624_v57, %v9623_v46  ;;  %v15862_v2 = vor.u32 %v17550_v55, %v15859_v45  ;;  %v17514_v55 = vld [vmem:[#allocation8 + $0x6fc] sm:$0xf] }
 0xbe0   :  { %10226 = vmatpush.bf16.msra.mxu1 %v15950_v60  ;;  %v17519_v60 = vld [vmem:[#allocation8 + $0x724] sm:$0xf] }
 0xbe1   :  { %10209 = vmatpush.bf16.msrb.mxu0 %v15854_v48  ;;  %v9626_v25 = vrot.slane %v9625_v38, 2  ;;  %10203 = vmatpush.bf16.msrb.mxu3 %v15874_v14  ;;  %v15849_v48 = vld [vmem:[#allocation8 + $0x810] sm:$0xf]  ;;  %v15734_v59 = vor.u32 %v17519_v60, %v15731_v54  ;;  %v15683_v14 = vld [vmem:[#allocation8 + $0x6d8] sm:$0xf0] }
 0xbe2   :  { %v17744_v10 = vpop.eup %17743  ;;  %v15850_v24 = vor.u32 %v17552_v19, %v15849_v48  ;;  %v15905_v19 = vld [vmem:[#allocation8 + $0x878] sm:$0xf]  ;;  %v15907_v60 = vld [vmem:[#allocation8 + $0x890] sm:$0xf0] }
 0xbe3   :  { %v9627_v44 = vadd.f32 %v9626_v25, %v9625_v38  ;;  %v9622_v31 = vmul.f32 %v17744_v10, %v17740_v27  ;;  %v15825_v38 = vld [vmem:[#allocation8 + $0x7e0] sm:$0xf]  ;;  %v17534_v10 = vld [vmem:[#allocation8 + $0x794] sm:$0xf0] }
 0xbe4   :  { %10227 = vmatpush.bf16.msra.mxu1 %v15926_v13  ;;  %v15826_v22 = vor.u32 %v17546_v34, %v15825_v38  ;;  %v15777_v25 = vld [vmem:[#allocation8 + $0x780] sm:$0xf] }
 0xbe5   :  { %10210 = vmatpush.bf16.msrb.mxu0 %v15830_v1  ;;  %v9628_v53 = vrot.slane %v9627_v44, 1  ;;  %v9630_v7 = vsel %vm7047_vm2, %v9622_v31, 0.0  ;;  %v17535_v38 = vld [vmem:[#allocation8 + $0x79c] sm:$0xf0] }
 0xbe6   :  { %v9631_v62 = vrot.slane %v9630_v7, 4 }
 0xbe7   :  { %v9629_v6 = vadd.f32 %v9628_v53, %v9627_v44  ;;  %v17528_v44 = vld [vmem:[#allocation8 + $0x764] sm:$0xf0] }
 0xbe8   :  { %v9632_v40 = vadd.f32 %v9631_v62, %v9630_v7  ;;  %10228 = vmatpush.bf16.msra.mxu1 %v15902_v36  ;;  %v17516_v53 = vld [vmem:[#allocation8 + $0x704] sm:$0xf0]  ;;  %v17555_v7 = vld [vmem:[#allocation8 + $0x844] sm:$0xf]  ;;  %v15875_v62 = vld [vmem:[#allocation8 + $0x858] sm:$0xf0] }
 0xbe9   :  { %10211 = vmatpush.bf16.msrb.mxu0 %v15806_v23  ;;  %v9637_v27 = vmul.f32 %v9629_v6, %v18728_v35  ;;  %v15753_v23 = vld [vmem:[#allocation8 + $0x750] sm:$0xf]  ;;  %v15706_v30 = vor.u32 %v17516_v53, %v15705_v61  ;;  %v15878_v51 = vor.u32 %v17555_v7, %v15875_v62  ;;  %v15787_v61 = vld [vmem:[#allocation8 + $0x7a0] sm:$0xf0]  ;;  %v15737_v7 = vld [vmem:[#allocation8 + $0x728] sm:$0xf] }
 0xbea   :  { %v9633_v0 = vrot.slane %v9632_v40, 2  ;;  %v15754_v31 = vor.u32 %v17528_v44, %v15753_v23  ;;  %v17577_v6 = vld [vmem:[#allocation8 + $0x8ec] sm:$0xf0]  ;;  %v15811_v23 = vld [vmem:[#allocation8 + $0x7d0] sm:$0xf0] }
 0xbeb   :  { %v9639_v41 = vpack.c.bf16 %v9637_v27, %v9637_v27  ;;  %v15681_v27 = vld [vmem:[#allocation8 + $0x6c0] sm:$0xf]  ;;  %v17541_v36 = vld [vmem:[#allocation8 + $0x7cc] sm:$0xf0]  ;;  %v15761_v44 = vld [vmem:[#allocation8 + $0x758] sm:$0xf] }
 0xbec   :  { %v9634_v49 = vadd.f32 %v9633_v0, %v9632_v40  ;;  %v17547_v40 = vld [vmem:[#allocation8 + $0x7fc] sm:$0xf0]  ;;  %10229 = vmatpush.bf16.msra.mxu1 %v15878_v51  ;;  %v15682_v0 = vor.u32 %v17510_v37, %v15681_v27  ;;  %v17526_v51 = vld [vmem:[#allocation8 + $0x75c] sm:$0xf]  ;;  %v15739_v27 = vld [vmem:[#allocation8 + $0x740] sm:$0xf0] }
 0xbed   :  { %10212 = vmatpush.bf16.msrb.mxu0 %v15782_v21  ;;  %15676 = vmatmul.msk.bf16.vlgmr.msra.gmra.mxu3 %vm7047_vm2, %v9639_v41  ;;  %v15953_v21 = vld [vmem:[#allocation8 + $0x8d8] sm:$0xf]  ;;  %v15834_v13 = vor.u32 %v17547_v40, %v15833_v50  ;;  %v15763_v50 = vld [vmem:[#allocation8 + $0x770] sm:$0xf0] }
 0xbee   :  { %v9635_v32 = vrot.slane %v9634_v49, 1  ;;  %10235 = vmatpush.bf16.msra.mxu3 %v15858_v4  ;;  %v15954_v12 = vor.u32 %v17577_v6, %v15953_v21  ;;  %v15686_v4 = vor.u32 %v17507_v58, %v15683_v14  ;;  %v17556_v21 = vld [vmem:[#allocation8 + $0x84c] sm:$0xf]  ;;  %v15883_v6 = vld [vmem:[#allocation8 + $0x860] sm:$0xf0]  ;;  %v15766_v40 = vor.u32 %v17526_v51, %v15763_v50 }
 0xbef   :  { %v17545_v50 = vld [vmem:[#allocation8 + $0x7f4] sm:$0xf] }
 0xbf0   :  { %v9636_v9 = vadd.f32 %v9635_v32, %v9634_v49  ;;  %v15809_v49 = vld [vmem:[#allocation8 + $0x7b8] sm:$0xf]  ;;  %v17574_v32 = vld [vmem:[#allocation8 + $0x8dc] sm:$0xf] }
 0xbf1   :  { %10213 = vmatpush.bf16.msrb.mxu0 %v15758_v63  ;;  %v15929_v63 = vld [vmem:[#allocation8 + $0x8a8] sm:$0xf]  ;;  %v15810_v26 = vor.u32 %v17541_v36, %v15809_v49  ;;  %v17508_v49 = vld [vmem:[#allocation8 + $0x6cc] sm:$0xf] }
 0xbf2   :  { %v9638_v16 = vmul.f32 %v9636_v9, %v18728_v35  ;;  %v15802_v35 = vor.u32 %v17540_v39, %v15801_v47  ;;  %10236 = vmatpush.bf16.msra.mxu3 %v15834_v13  ;;  %v15955_v9 = vld [vmem:[#allocation8 + $0x8f0] sm:$0xf0]  ;;  %v15931_v47 = vld [vmem:[#allocation8 + $0x8c0] sm:$0xf0]  ;;  %v15713_v13 = vld [vmem:[#allocation8 + $0x6f8] sm:$0xf] }
 0xbf3   :  { %v9646_v46 = vpop.permute.xlu1 %9645  ;;  %v15958_v48 = vor.u32 %v17574_v32, %v15955_v9  ;;  %v15714_v29 = vor.u32 %v17517_v15, %v15713_v13  ;;  %v15843_v15 = vld [vmem:[#allocation8 + $0x808] sm:$0xf0] }
 0xbf4   :  { %v9640_v57 = vpack.c.bf16 %v9638_v16, %v9638_v16  ;;  %v9649_v1 = vsel %vm6970_vm1, %v9646_v46, %v19006_v5  ;;  %v15778_v5 = vor.u32 %v17534_v10, %v15777_v25  ;;  %v17565_v16 = vld [vmem:[#allocation8 + $0x88c] sm:$0xf0]  ;;  %v17544_v46 = vld [vmem:[#allocation8 + $0x7ec] sm:$0xf]  ;;  %v17559_v25 = vld [vmem:[#allocation8 + $0x85c] sm:$0xf0] }
 0xbf5   :  { %v9654_v17 = vsel %vm7103_vm0, %v9649_v1, 0  ;;  %10214 = vmatpush.bf16.msrb.mxu0 %v15734_v59  ;;  %v15785_v1 = vld [vmem:[#allocation8 + $0x788] sm:$0xf]  ;;  %v17538_v10 = vld [vmem:[#allocation8 + $0x7bc] sm:$0xf] }
 0xbf6   :  { %9666 = vmatpush.bf16.msrb.mxu2 %v9654_v17  ;;  %15677 = vmatmul.msk.bf16.vlgmr.msra.gmra.mxu0 %vm7047_vm2, %v9640_v57  ;;  %v15786_v17 = vor.u32 %v17535_v38, %v15785_v1  ;;  %v15814_v43 = vor.u32 %v17538_v10, %v15811_v23  ;;  %v17532_v59 = vld [vmem:[#allocation8 + $0x78c] sm:$0xf]  ;;  %v17548_v23 = vld [vmem:[#allocation8 + $0x804] sm:$0xf0] }
 0xbf7   :  { %15678 = vmatmul.msk.bf16.vlgmr.msrb.gmra.mxu1 %vm7047_vm2, %v9640_v57  ;;  %10237 = vmatpush.bf16.msra.mxu3 %v15810_v26  ;;  %v15835_v57 = vld [vmem:[#allocation8 + $0x800] sm:$0xf0]  ;;  %v15790_v53 = vor.u32 %v17532_v59, %v15787_v61 }
 0xbf8   :  { %10252 = vmatpush.bf16.msrb.mxu1 %v15954_v12  ;;  %v15838_v34 = vor.u32 %v17544_v46, %v15835_v57  ;;  %v15886_v12 = vor.u32 %v17556_v21, %v15883_v6  ;;  %v17554_v46 = vld [vmem:[#allocation8 + $0x834] sm:$0xf0]  ;;  %v15913_v21 = vld [vmem:[#allocation8 + $0x880] sm:$0xf] }
 0xbf9   :  { %15675 = vmatmul.msk.bf16.vlgmr.msrb.gmra.mxu2 %vm7047_vm2, %v9639_v41  ;;  %v17571_v41 = vld [vmem:[#allocation8 + $0x8bc] sm:$0xf0]  ;;  %10215 = vmatpush.bf16.msrb.mxu0 %v15710_v28  ;;  %v17520_v28 = vld [vmem:[#allocation8 + $0x72c] sm:$0xf]  ;;  %v17578_v57 = vld [vmem:[#allocation8 + $0x8f4] sm:$0xf0] }
 0xbfa   :  { %10183 = vmatpush.bf16.msra.mxu2 %v15850_v24  ;;  %v15930_v52 = vor.u32 %v17571_v41, %v15929_v63  ;;  %v15906_v24 = vor.u32 %v17565_v16, %v15905_v19  ;;  %v15742_v37 = vor.u32 %v17520_v28, %v15739_v27  ;;  %v17511_v63 = vld [vmem:[#allocation8 + $0x6dc] sm:$0xf0]  ;;  %v17566_v6 = vld [vmem:[#allocation8 + $0x894] sm:$0xf0]  ;;  %v15939_v28 = vld [vmem:[#allocation8 + $0x8c8] sm:$0xf0] }
 0xbfb   :  { %10238 = vmatpush.bf16.msra.mxu3 %v15786_v17  ;;  %v15865_v19 = vld [vmem:[#allocation8 + $0x820] sm:$0xf] }
 0xbfc   :  { %10253 = vmatpush.bf16.msrb.mxu1 %v15930_v52  ;;  %v15715_v52 = vld [vmem:[#allocation8 + $0x710] sm:$0xf0] }
 0xbfd   :  { %10216 = vmatpush.bf16.msrb.mxu0 %v15686_v4  ;;  %v15718_v45 = vor.u32 %v17514_v55, %v15715_v52  ;;  %v15889_v55 = vld [vmem:[#allocation8 + $0x850] sm:$0xf]  ;;  %v17560_v52 = vld [vmem:[#allocation8 + $0x864] sm:$0xf0] }
 0xbfe   :  { %10184 = vmatpush.bf16.msra.mxu2 %v15826_v22  ;;  %v17568_v22 = vld [vmem:[#allocation8 + $0x8ac] sm:$0xf] }
 0xbff   :  { %v15934_v39 = vor.u32 %v17568_v22, %v15931_v47  ;;  %v15866_v47 = vor.u32 %v17554_v46, %v15865_v19  ;;  %v17594_v19 = vld [vmem:[#allocation11 + $0x74] sm:$0xf0]  ;;  %v17533_v46 = vld [vmem:[#allocation8 + $0x794] sm:$0xf] }
 0xc00   :  { %10254 = vmatpush.bf16.msrb.mxu1 %v15906_v24  ;;  %v15961_v24 = vld [vmem:[#allocation8 + $0x8e0] sm:$0xf] }
 0xc01   :  { %10278 = vmatpush.bf16.msra.mxu0 %v15958_v48 }
 0xc02   :  { %10185 = vmatpush.bf16.msra.mxu2 %v15802_v35  ;;  %v15881_v35 = vld [vmem:[#allocation8 + $0x848] sm:$0xf] }
 0xc05   :  { %10279 = vmatpush.bf16.msra.mxu0 %v15934_v39  ;;  %v15841_v39 = vld [vmem:[#allocation8 + $0x7f0] sm:$0xf] }
 0xc06   :  { %10186 = vmatpush.bf16.msra.mxu2 %v15778_v5  ;;  %v15882_v5 = vor.u32 %v17559_v25, %v15881_v35  ;;  %v15962_v35 = vor.u32 %v17578_v57, %v15961_v24  ;;  %v15795_v57 = vld [vmem:[#allocation8 + $0x7a8] sm:$0xf0] }
 0xc08   :  { %10255 = vmatpush.bf16.msrb.mxu1 %v15882_v5 }
 0xc0a   :  { %10187 = vmatpush.bf16.msra.mxu2 %v15754_v31  ;;  %v17529_v31 = vld [vmem:[#allocation8 + $0x76c] sm:$0xf0] }
 0xc0b   :  { %v15762_v56 = vor.u32 %v17529_v31, %v15761_v44  ;;  %v15937_v44 = vld [vmem:[#allocation8 + $0x8b0] sm:$0xf]  ;;  %v17572_v31 = vld [vmem:[#allocation8 + $0x8c4] sm:$0xf0] }
 0xc0d   :  { %10239 = vmatpush.bf16.msra.mxu3 %v15762_v56  ;;  %v17551_v56 = vld [vmem:[#allocation8 + $0x824] sm:$0xf] }
 0xc0e   :  { %10188 = vmatpush.bf16.msra.mxu2 %v15730_v3  ;;  %v17562_v3 = vld [vmem:[#allocation8 + $0x87c] sm:$0xf] }
 0xc0f   :  { %v15910_v54 = vor.u32 %v17562_v3, %v15907_v60  ;;  %v15867_v3 = vld [vmem:[#allocation8 + $0x838] sm:$0xf0]  ;;  %v17575_v60 = vld [vmem:[#allocation8 + $0x8e4] sm:$0xf] }
 0xc11   :  { %10280 = vmatpush.bf16.msra.mxu0 %v15910_v54  ;;  %v15963_v54 = vld [vmem:[#allocation8 + $0x8f8] sm:$0xf0] }
 0xc12   :  { %10189 = vmatpush.bf16.msra.mxu2 %v15706_v30  ;;  %v17523_v30 = vld [vmem:[#allocation8 + $0x73c] sm:$0xf0] }
 0xc13   :  { %v15738_v62 = vor.u32 %v17523_v30, %v15737_v7  ;;  %v15817_v7 = vld [vmem:[#allocation8 + $0x7c0] sm:$0xf]  ;;  %v15938_v30 = vor.u32 %v17572_v31, %v15937_v44  ;;  %v15771_v44 = vld [vmem:[#allocation8 + $0x778] sm:$0xf0]  ;;  %v16159_v31 = vld [vmem:[#allocation11 + $0x170] sm:$0xf] }
 0xc15   :  { %10240 = vmatpush.bf16.msra.mxu3 %v15738_v62  ;;  %10281 = vmatpush.bf16.msra.mxu0 %v15886_v12  ;;  %v17542_v62 = vld [vmem:[#allocation8 + $0x7d4] sm:$0xf0]  ;;  %v15870_v12 = vor.u32 %v17551_v56, %v15867_v3  ;;  %v15721_v3 = vld [vmem:[#allocation8 + $0x700] sm:$0xf] }
 0xc16   :  { %10190 = vmatpush.bf16.msra.mxu2 %v15682_v0  ;;  %v15689_v0 = vld [vmem:[#allocation8 + $0x6c8] sm:$0xf]  ;;  %v15818_v27 = vor.u32 %v17542_v62, %v15817_v7  ;;  %v17521_v7 = vld [vmem:[#allocation8 + $0x734] sm:$0xf]  ;;  %v15747_v62 = vld [vmem:[#allocation8 + $0x748] sm:$0xf0] }
 0xc17   :  { %v15690_v41 = vor.u32 %v17511_v63, %v15689_v0  ;;  %v15914_v0 = vor.u32 %v17566_v6, %v15913_v21  ;;  %v16151_v21 = vld [vmem:[#allocation11 + $0x160] sm:$0xf]  ;;  %v17624_v6 = vld [vmem:[#allocation11 + $0x164] sm:$0xf0] }
 0xc19   :  { %10241 = vmatpush.bf16.msra.mxu3 %v15714_v29  ;;  %v17569_v29 = vld [vmem:[#allocation8 + $0x8b4] sm:$0xf] }
 0xc1a   :  { %10261 = vmatpush.bf16.msrb.mxu2 %v15862_v2  ;;  %v15691_v2 = vld [vmem:[#allocation8 + $0x6e0] sm:$0xf0] }
 0xc1b   :  { %v15694_v26 = vor.u32 %v17508_v49, %v15691_v2  ;;  %v17539_v49 = vld [vmem:[#allocation8 + $0x7c4] sm:$0xf]  ;;  %v15819_v2 = vld [vmem:[#allocation8 + $0x7d8] sm:$0xf0] }
 0xc1d   :  { %10242 = vmatpush.bf16.msra.mxu3 %v15690_v41  ;;  %v17536_v41 = vld [vmem:[#allocation8 + $0x7a4] sm:$0xf0] }
 0xc1e   :  { %10262 = vmatpush.bf16.msrb.mxu2 %v15838_v34 }
 0xc22   :  { %10263 = vmatpush.bf16.msrb.mxu2 %v15814_v43 }
 0xc26   :  { %10264 = vmatpush.bf16.msrb.mxu2 %v15790_v53  ;;  %v15842_v53 = vor.u32 %v17548_v23, %v15841_v39  ;;  %v16023_v39 = vld [vmem:[#allocation11 + $0x60] sm:$0xf] }
 0xc2a   :  { %10265 = vmatpush.bf16.msrb.mxu2 %v15766_v40  ;;  %v15966_v40 = vor.u32 %v17575_v60, %v15963_v54  ;;  %v17518_v54 = vld [vmem:[#allocation8 + $0x714] sm:$0xf0] }
 0xc2e   :  { %10266 = vmatpush.bf16.msrb.mxu2 %v15742_v37  ;;  %v15793_v37 = vld [vmem:[#allocation8 + $0x790] sm:$0xf] }
 0xc32   :  { %10267 = vmatpush.bf16.msrb.mxu2 %v15718_v45  ;;  %v15846_v45 = vor.u32 %v17545_v50, %v15843_v15  ;;  %v16007_v15 = vld [vmem:[#allocation11 + $0x40] sm:$0xf] }
 0xc36   :  { %10268 = vmatpush.bf16.msrb.mxu2 %v15694_v26  ;;  %v17563_v26 = vld [vmem:[#allocation8 + $0x884] sm:$0xf] }
 0xc70   :  { %v9681_v36 = vpop.f32.mrf.mxu3 }
 0xc71   :  { %v9730_v4 = vpack.c.bf16 %v9681_v36, %v9681_v36  ;;  %v15942_v36 = vor.u32 %v17569_v29, %v15939_v28  ;;  %v17588_v29 = vld [vmem:[#allocation11 + $0x44] sm:$0xf0]  ;;  %v15750_v28 = vor.u32 %v17521_v7, %v15747_v62  ;;  %v17638_v62 = vld [vmem:[#allocation11 + $0x1d4] sm:$0xf0] }
 0xc72   :  { %v17616_v7 = vld [vmem:[#allocation11 + $0x124] sm:$0xf0] }
 0xc73   :  { %v9712_v58 = vpop.f32.mrf.mxu0  ;;  %v9810_v1 = vunpack.c.l.b16 %v9730_v4  ;;  %v15769_v4 = vld [vmem:[#allocation8 + $0x760] sm:$0xf] }
 0xc74   :  { %v9725_v14 = vpop.f32.mrf.mxu1  ;;  %v9731_v9 = vpack.c.bf16 %v9712_v58, %v9712_v58  ;;  %v15915_v58 = vld [vmem:[#allocation8 + $0x898] sm:$0xf0] }
 0xc75   :  { %v9732_v32 = vpack.c.bf16 %v9725_v14, %v9725_v14  ;;  %v15794_v14 = vor.u32 %v17536_v41, %v15793_v37  ;;  %v15918_v24 = vor.u32 %v17563_v26, %v15915_v58  ;;  %v16152_v37 = vor.u32 %v17624_v6, %v16151_v21  ;;  %v15723_v41 = vld [vmem:[#allocation8 + $0x718] sm:$0xf0] }
 0xc76   :  { %v9811_v34 = vunpack.c.l.b16 %v9731_v9  ;;  %v17530_v9 = vld [vmem:[#allocation8 + $0x774] sm:$0xf0]  ;;  %v17586_v26 = vld [vmem:[#allocation11 + $0x34] sm:$0xf0] }
 0xc77   :  { %v9812_v48 = vunpack.c.l.b16 %v9732_v32  ;;  %v15890_v32 = vor.u32 %v17560_v52, %v15889_v55  ;;  %v16143_v55 = vld [vmem:[#allocation11 + $0x150] sm:$0xf]  ;;  %v17622_v52 = vld [vmem:[#allocation11 + $0x154] sm:$0xf0] }
 0xc78   :  { %v9683_v16 = vpop.f32.mrf.mxu3  ;;  %v9813_v59 = vrot.slane %v9811_v34, 7  ;;  %v15770_v34 = vor.u32 %v17530_v9, %v15769_v4  ;;  %v16144_v4 = vor.u32 %v17622_v52, %v16143_v55  ;;  %v17608_v9 = vld [vmem:[#allocation11 + $0xe4] sm:$0xf0]  ;;  %v16055_v55 = vld [vmem:[#allocation11 + $0xa0] sm:$0xf] }
 0xc79   :  { %v9815_v38 = vrot.slane %v9812_v48, 7  ;;  %v16031_v48 = vld [vmem:[#allocation11 + $0x70] sm:$0xf]  ;;  %v15822_v16 = vor.u32 %v17539_v49, %v15819_v2  ;;  %v16008_v49 = vor.u32 %v17588_v29, %v16007_v15  ;;  %v17614_v29 = vld [vmem:[#allocation11 + $0x114] sm:$0xf0] }
 0xc7a   :  { %v15999_v2 = vld [vmem:[#allocation11 + $0x30] sm:$0xf]  ;;  %v17600_v52 = vld [vmem:[#allocation11 + $0xa4] sm:$0xf0] }
 0xc7b   :  { %v9816_v17 = vsel %vm7595_vm4, %v9815_v38, %v9810_v1  ;;  %v9714_v22 = vpop.f32.mrf.mxu0  ;;  %v17557_v1 = vld [vmem:[#allocation8 + $0x854] sm:$0xf]  ;;  %v15891_v38 = vld [vmem:[#allocation8 + $0x868] sm:$0xf0] }
 0xc7c   :  { %v19029_v25 = vpack.c.b16 %v9816_v17, %v9816_v17  ;;  %v9727_v10 = vpop.f32.mrf.mxu1  ;;  %v9668_v5 = vpop.f32.mrf.mxu2  ;;  %v15745_v17 = vld [vmem:[#allocation8 + $0x730] sm:$0xf]  ;;  %v16032_v22 = vor.u32 %v17594_v19, %v16031_v48  ;;  %v15894_v23 = vor.u32 %v17557_v1, %v15891_v38  ;;  %v15699_v48 = vld [vmem:[#allocation8 + $0x6e8] sm:$0xf0]  ;;  %v16135_v19 = vld [vmem:[#allocation11 + $0x140] sm:$0xf] }
 0xc7d   :  { %v9729_v43 = vpack.c.bf16 %v9668_v5, %v9668_v5  ;;  %v15798_v10 = vor.u32 %v17533_v46, %v15795_v57  ;;  %v17527_v5 = vld [vmem:[#allocation8 + $0x764] sm:$0xf]  ;;  %v16223_v46 = vld [vmem:[#allocation11 + $0x1f0] sm:$0xf]  ;;  %v16000_v57 = vor.u32 %v17586_v26, %v15999_v2  ;;  %v17580_v26 = vld [vmem:[#allocation11 + $0x4] sm:$0xf0] }
 0xc7e   :  { %15967 = vmatmul.msk.bf16.vlgmr.msrb.gmra.mxu3 %vm6970_vm1, %v19029_v25  ;;  %15968 = vmatmul.msk.bf16.vlgmr.msra.gmra.mxu1 %vm6970_vm1, %v19029_v25  ;;  %v15991_v38 = vld [vmem:[#allocation11 + $0x20] sm:$0xf]  ;;  %v16111_v15 = vld [vmem:[#allocation11 + $0x110] sm:$0xf] }
 0xc7f   :  { %v9809_v61 = vunpack.c.l.b16 %v9729_v43  ;;  %10287 = vmatpush.bf16.msra.mxu1 %v15866_v47  ;;  %10304 = vmatpush.bf16.msrb.mxu3 %v15962_v35  ;;  %v17524_v47 = vld [vmem:[#allocation8 + $0x744] sm:$0xf0]  ;;  %v17592_v35 = vld [vmem:[#allocation11 + $0x64] sm:$0xf0]  ;;  %v17626_v43 = vld [vmem:[#allocation11 + $0x174] sm:$0xf0] }
 0xc80   :  { %v15746_v56 = vor.u32 %v17524_v47, %v15745_v17  ;;  %v16024_v60 = vor.u32 %v17592_v35, %v16023_v39  ;;  %v16079_v47 = vld [vmem:[#allocation11 + $0xd0] sm:$0xf]  ;;  %v17606_v35 = vld [vmem:[#allocation11 + $0xd4] sm:$0xf0]  ;;  %v15975_v2 = vld [vmem:[#allocation11] sm:$0xf] }
 0xc81   :  { %v9814_v51 = vsel %vm7595_vm4, %v9813_v59, %v9809_v61  ;;  %v16015_v59 = vld [vmem:[#allocation11 + $0x50] sm:$0xf]  ;;  %v17590_v61 = vld [vmem:[#allocation11 + $0x54] sm:$0xf0] }
 0xc82   :  { %v19036_v13 = vpack.c.b16 %v9814_v51, %v9814_v51  ;;  %v15722_v51 = vor.u32 %v17518_v54, %v15721_v3  ;;  %v16016_v50 = vor.u32 %v17590_v61, %v16015_v59  ;;  %v16080_v3 = vor.u32 %v17606_v35, %v16079_v47  ;;  %v16071_v54 = vld [vmem:[#allocation11 + $0xc0] sm:$0xf]  ;;  %v17604_v61 = vld [vmem:[#allocation11 + $0xc4] sm:$0xf0] }
 0xc83   :  { %10288 = vmatpush.bf16.msra.mxu1 %v15842_v53  ;;  %10305 = vmatpush.bf16.msrb.mxu3 %v15938_v30  ;;  %v15774_v53 = vor.u32 %v17527_v5, %v15771_v44  ;;  %v16160_v30 = vor.u32 %v17626_v43, %v16159_v31  ;;  %v17618_v5 = vld [vmem:[#allocation11 + $0x134] sm:$0xf0]  ;;  %v17640_v44 = vld [vmem:[#allocation11 + $0x1e4] sm:$0xf0]  ;;  %v15983_v43 = vld [vmem:[#allocation11 + $0x10] sm:$0xf]  ;;  %v16072_v6 = vor.u32 %v17604_v61, %v16071_v54 }
 0xc84   :  { %v9670_v63 = vpop.f32.mrf.mxu2  ;;  %10191 = vmatmul.bf16.vlgmr.msra.gmra.mxu2 %v19036_v13  ;;  %10217 = vmatmul.bf16.vlgmr.msrb.gmra.mxu0 %v19036_v13  ;;  %v17656_v35 = vld [vmem:[#allocation11 + $0x264] sm:$0xf0]  ;;  %v16351_v54 = vld [vmem:[#allocation11 + $0x2f0] sm:$0xf]  ;;  %v17674_v61 = vld [vmem:[#allocation11 + $0x2f4] sm:$0xf0] }
 0xc85   :  { %10313 = vmatpush.bf16.msrb.mxu0 %v15870_v12  ;;  %10330 = vmatpush.bf16.msra.mxu2 %v15966_v40  ;;  %v15697_v12 = vld [vmem:[#allocation8 + $0x6d0] sm:$0xf]  ;;  %v17512_v40 = vld [vmem:[#allocation8 + $0x6e4] sm:$0xf0]  ;;  %v17610_v63 = vld [vmem:[#allocation11 + $0xf4] sm:$0xf0] }
 0xc87   :  { %10289 = vmatpush.bf16.msra.mxu1 %v15818_v27  ;;  %10306 = vmatpush.bf16.msrb.mxu3 %v15914_v0  ;;  %v17515_v27 = vld [vmem:[#allocation8 + $0x704] sm:$0xf]  ;;  %v16095_v0 = vld [vmem:[#allocation11 + $0xf0] sm:$0xf] }
 0xc88   :  { %v15726_v58 = vor.u32 %v17515_v27, %v15723_v41  ;;  %v17636_v27 = vld [vmem:[#allocation11 + $0x1c4] sm:$0xf0] }
 0xc89   :  { %10314 = vmatpush.bf16.msrb.mxu0 %v15846_v45  ;;  %10331 = vmatpush.bf16.msra.mxu2 %v15942_v36  ;;  %v15698_v45 = vor.u32 %v17512_v40, %v15697_v12  ;;  %v16096_v36 = vor.u32 %v17610_v63, %v16095_v0  ;;  %v16063_v12 = vld [vmem:[#allocation11 + $0xb0] sm:$0xf]  ;;  %v17602_v40 = vld [vmem:[#allocation11 + $0xb4] sm:$0xf0] }
 0xc8a   :  { %v17634_v63 = vld [vmem:[#allocation11 + $0x1b4] sm:$0xf0] }
 0xc8b   :  { %10290 = vmatpush.bf16.msra.mxu1 %v15794_v14  ;;  %10307 = vmatpush.bf16.msrb.mxu3 %v15890_v32  ;;  %v17509_v14 = vld [vmem:[#allocation8 + $0x6d4] sm:$0xf]  ;;  %v16087_v32 = vld [vmem:[#allocation11 + $0xe0] sm:$0xf] }
 0xc8c   :  { %v16088_v1 = vor.u32 %v17608_v9, %v16087_v32  ;;  %v15702_v17 = vor.u32 %v17509_v14, %v15699_v48  ;;  %v15976_v14 = vor.u32 %v17580_v26, %v15975_v2  ;;  %v17612_v32 = vld [vmem:[#allocation11 + $0x104] sm:$0xf0]  ;;  %v16287_v9 = vld [vmem:[#allocation11 + $0x270] sm:$0xf]  ;;  %v16081_v26 = vld [vmem:[#allocation11 + $0xd8] sm:$0xf0] }
 0xc8d   :  { %10315 = vmatpush.bf16.msrb.mxu0 %v15822_v16  ;;  %10332 = vmatpush.bf16.msra.mxu2 %v15918_v24  ;;  %v17620_v16 = vld [vmem:[#allocation11 + $0x144] sm:$0xf0]  ;;  %v17642_v24 = vld [vmem:[#allocation11 + $0x1f4] sm:$0xf0] }
 0xc8e   :  { %10243 = vmatmul.bf16.vlgmr.msra.gmra.mxu3 %v19036_v13  ;;  %15969 = vmatmul.msk.bf16.vlgmr.msrb.gmra.mxu1 %vm6970_vm1, %v19029_v25  ;;  %v16224_v39 = vor.u32 %v17642_v24, %v16223_v46  ;;  %v16033_v46 = vld [vmem:[#allocation11 + $0x78] sm:$0xf0] }
 0xc8f   :  { %10291 = vmatpush.bf16.msra.mxu1 %v15770_v34  ;;  %10953 = vmatpush.bf16.msra.mxu3 %v16032_v22  ;;  %v17584_v34 = vld [vmem:[#allocation11 + $0x24] sm:$0xf0]  ;;  %v16136_v22 = vor.u32 %v17620_v16, %v16135_v19  ;;  %v17658_v19 = vld [vmem:[#allocation11 + $0x274] sm:$0xf0]  ;;  %v17593_v16 = vld [vmem:[#allocation11 + $0x74] sm:$0xf] }
 0xc90   :  { %v15992_v31 = vor.u32 %v17584_v34, %v15991_v38  ;;  %v16288_v24 = vor.u32 %v17658_v19, %v16287_v9  ;;  %v17598_v38 = vld [vmem:[#allocation11 + $0x94] sm:$0xf0]  ;;  %v16175_v34 = vld [vmem:[#allocation11 + $0x190] sm:$0xf]  ;;  %v17585_v9 = vld [vmem:[#allocation11 + $0x34] sm:$0xf] }
 0xc91   :  { %10316 = vmatpush.bf16.msrb.mxu0 %v15798_v10  ;;  %10333 = vmatpush.bf16.msra.mxu2 %v15894_v23  ;;  %v16127_v10 = vld [vmem:[#allocation11 + $0x130] sm:$0xf]  ;;  %v16215_v23 = vld [vmem:[#allocation11 + $0x1e0] sm:$0xf] }
 0xc92   :  { %v16216_v59 = vor.u32 %v17640_v44, %v16215_v23  ;;  %v16025_v23 = vld [vmem:[#allocation11 + $0x68] sm:$0xf0] }
 0xc93   :  { %10292 = vmatpush.bf16.msra.mxu1 %v15746_v56  ;;  %10954 = vmatpush.bf16.msra.mxu3 %v16024_v60  ;;  %v17582_v56 = vld [vmem:[#allocation11 + $0x14] sm:$0xf0]  ;;  %v16128_v60 = vor.u32 %v17618_v5, %v16127_v10  ;;  %v17591_v10 = vld [vmem:[#allocation11 + $0x64] sm:$0xf] }
 0xc94   :  { %10269 = vmatmul.bf16.vlgmr.msrb.gmra.mxu2 %v19036_v13  ;;  %15970 = vmatmul.msk.bf16.vlgmr.msra.gmra.mxu0 %vm6970_vm1, %v19029_v25  ;;  %v15984_v21 = vor.u32 %v17582_v56, %v15983_v43  ;;  %v16028_v44 = vor.u32 %v17591_v10, %v16025_v23  ;;  %v17596_v43 = vld [vmem:[#allocation11 + $0x84] sm:$0xf0]  ;;  %v16167_v56 = vld [vmem:[#allocation11 + $0x180] sm:$0xf]  ;;  %v16319_v10 = vld [vmem:[#allocation11 + $0x2b0] sm:$0xf] }
 0xc95   :  { %10317 = vmatpush.bf16.msrb.mxu0 %v15774_v53  ;;  %10979 = vmatpush.bf16.msrb.mxu2 %v16160_v30  ;;  %v16119_v53 = vld [vmem:[#allocation11 + $0x120] sm:$0xf]  ;;  %v16207_v30 = vld [vmem:[#allocation11 + $0x1d0] sm:$0xf] }
 0xc97   :  { %10293 = vmatpush.bf16.msra.mxu1 %v15722_v51  ;;  %10955 = vmatpush.bf16.msra.mxu3 %v16016_v50  ;;  %v16120_v51 = vor.u32 %v17616_v7, %v16119_v53  ;;  %v16208_v50 = vor.u32 %v17638_v62, %v16207_v30  ;;  %v17609_v53 = vld [vmem:[#allocation11 + $0xf4] sm:$0xf]  ;;  %v16352_v7 = vor.u32 %v17674_v61, %v16351_v54  ;;  %v16097_v30 = vld [vmem:[#allocation11 + $0xf8] sm:$0xf0]  ;;  %v16271_v62 = vld [vmem:[#allocation11 + $0x250] sm:$0xf] }
 0xc98   :  { %v15985_v54 = vld [vmem:[#allocation11 + $0x18] sm:$0xf0] }
 0xc99   :  { %10318 = vmatpush.bf16.msrb.mxu0 %v15750_v28  ;;  %10980 = vmatpush.bf16.msrb.mxu2 %v16152_v37  ;;  %v16199_v28 = vld [vmem:[#allocation11 + $0x1c0] sm:$0xf]  ;;  %v16064_v37 = vor.u32 %v17602_v40, %v16063_v12  ;;  %v17589_v12 = vld [vmem:[#allocation11 + $0x54] sm:$0xf] }
 0xc9a   :  { %v16200_v0 = vor.u32 %v17636_v27, %v16199_v28  ;;  %v17607_v28 = vld [vmem:[#allocation11 + $0xe4] sm:$0xf] }
 0xc9b   :  { %10294 = vmatpush.bf16.msra.mxu1 %v15698_v45  ;;  %10956 = vmatpush.bf16.msra.mxu3 %v16008_v49  ;;  %v16183_v45 = vld [vmem:[#allocation11 + $0x1a0] sm:$0xf]  ;;  %v16056_v49 = vor.u32 %v17600_v52, %v16055_v55  ;;  %v16009_v55 = vld [vmem:[#allocation11 + $0x48] sm:$0xf0] }
 0xc9d   :  { %10319 = vmatpush.bf16.msrb.mxu0 %v15726_v58  ;;  %10981 = vmatpush.bf16.msrb.mxu2 %v16144_v4  ;;  %v16103_v4 = vld [vmem:[#allocation11 + $0x100] sm:$0xf] }
 0xc9e   :  { %10295 = vmatmul.bf16.vlgmr.msra.gmra.mxu1 %v19036_v13  ;;  %15971 = vmatmul.msk.bf16.vlgmr.msrb.gmra.mxu3 %vm6970_vm1, %v19029_v25  ;;  %v16104_v48 = vor.u32 %v17612_v32, %v16103_v4 }
 0xc9f   :  { %10966 = vmatpush.bf16.msrb.mxu1 %v16096_v36  ;;  %10957 = vmatpush.bf16.msra.mxu3 %v16000_v57  ;;  %v17632_v36 = vld [vmem:[#allocation11 + $0x1a4] sm:$0xf0]  ;;  %v16036_v57 = vor.u32 %v17593_v16, %v16033_v46  ;;  %v16327_v16 = vld [vmem:[#allocation11 + $0x2c0] sm:$0xf] }
 0xca0   :  { %v16184_v58 = vor.u32 %v17632_v36, %v16183_v45  ;;  %v16335_v45 = vld [vmem:[#allocation11 + $0x2d0] sm:$0xf]  ;;  %v17605_v36 = vld [vmem:[#allocation11 + $0xd4] sm:$0xf]  ;;  %v17668_v46 = vld [vmem:[#allocation11 + $0x2c4] sm:$0xf0] }
 0xca1   :  { %10320 = vmatpush.bf16.msrb.mxu0 %v15702_v17  ;;  %10982 = vmatpush.bf16.msrb.mxu2 %v16136_v22  ;;  %v17630_v22 = vld [vmem:[#allocation11 + $0x194] sm:$0xf0]  ;;  %v16084_v4 = vor.u32 %v17605_v36, %v16081_v26  ;;  %v16041_v26 = vld [vmem:[#allocation11 + $0x88] sm:$0xf0] }
 0xca2   :  { %v16176_v47 = vor.u32 %v17630_v22, %v16175_v34  ;;  %v17648_v34 = vld [vmem:[#allocation11 + $0x224] sm:$0xf0] }
 0xca3   :  { %10967 = vmatpush.bf16.msrb.mxu1 %v16088_v1  ;;  %10958 = vmatpush.bf16.msra.mxu3 %v15992_v31  ;;  %v16047_v1 = vld [vmem:[#allocation11 + $0x90] sm:$0xf]  ;;  %v16039_v31 = vld [vmem:[#allocation11 + $0x80] sm:$0xf] }
 0xca4   :  { %10321 = vmatmul.bf16.vlgmr.msrb.gmra.mxu0 %v19036_v13  ;;  %15972 = vmatmul.msk.bf16.vlgmr.msra.gmra.mxu2 %vm6970_vm1, %v19029_v25  ;;  %v16112_v13 = vor.u32 %v17614_v29, %v16111_v15  ;;  %v16191_v25 = vld [vmem:[#allocation11 + $0x1b0] sm:$0xf]  ;;  %v16048_v17 = vor.u32 %v17598_v38, %v16047_v1  ;;  %v16343_v15 = vld [vmem:[#allocation11 + $0x2e0] sm:$0xf]  ;;  %v17672_v29 = vld [vmem:[#allocation11 + $0x2e4] sm:$0xf0] }
 0xca5   :  { %10992 = vmatpush.bf16.msra.mxu0 %v16224_v39  ;;  %10983 = vmatpush.bf16.msrb.mxu2 %v16128_v60  ;;  %v16192_v41 = vor.u32 %v17634_v63, %v16191_v25  ;;  %v16279_v39 = vld [vmem:[#allocation11 + $0x260] sm:$0xf]  ;;  %v17628_v60 = vld [vmem:[#allocation11 + $0x184] sm:$0xf0]  ;;  %v16344_v27 = vor.u32 %v17672_v29, %v16343_v15  ;;  %v16073_v1 = vld [vmem:[#allocation11 + $0xc8] sm:$0xf0] }
 0xca6   :  { %v16280_v5 = vor.u32 %v17656_v35, %v16279_v39  ;;  %v16247_v38 = vld [vmem:[#allocation11 + $0x220] sm:$0xf]  ;;  %v15993_v39 = vld [vmem:[#allocation11 + $0x28] sm:$0xf0] }
 0xca7   :  { %10968 = vmatpush.bf16.msrb.mxu1 %v16080_v3  ;;  %10959 = vmatpush.bf16.msra.mxu3 %v15984_v21  ;;  %v16040_v3 = vor.u32 %v17596_v43, %v16039_v31  ;;  %v17654_v21 = vld [vmem:[#allocation11 + $0x254] sm:$0xf0]  ;;  %v16248_v22 = vor.u32 %v17648_v34, %v16247_v38  ;;  %v16065_v31 = vld [vmem:[#allocation11 + $0xb8] sm:$0xf0]  ;;  %v16239_v43 = vld [vmem:[#allocation11 + $0x210] sm:$0xf] }
 0xca8   :  { %v15977_v15 = vld [vmem:[#allocation11 + $0x8] sm:$0xf0]  ;;  %v17639_v34 = vld [vmem:[#allocation11 + $0x1e4] sm:$0xf] }
 0xca9   :  { %10993 = vmatpush.bf16.msra.mxu0 %v16216_v59  ;;  %10984 = vmatpush.bf16.msrb.mxu2 %v16120_v51  ;;  %v16168_v59 = vor.u32 %v17628_v60, %v16167_v56  ;;  %v16272_v51 = vor.u32 %v17654_v21, %v16271_v62  ;;  %v17581_v60 = vld [vmem:[#allocation11 + $0x14] sm:$0xf]  ;;  %v16057_v21 = vld [vmem:[#allocation11 + $0xa8] sm:$0xf0] }
 0xcaa   :  { %v15988_v61 = vor.u32 %v17581_v60, %v15985_v54  ;;  %v16153_v60 = vld [vmem:[#allocation11 + $0x168] sm:$0xf0] }
 0xcab   :  { %10969 = vmatpush.bf16.msrb.mxu1 %v16072_v6  ;;  %10960 = vmatpush.bf16.msra.mxu3 %v15976_v14  ;;  %v16100_v6 = vor.u32 %v17609_v53, %v16097_v30  ;;  %v17650_v14 = vld [vmem:[#allocation11 + $0x234] sm:$0xf0]  ;;  %v16311_v53 = vld [vmem:[#allocation11 + $0x2a0] sm:$0xf]  ;;  %v17599_v30 = vld [vmem:[#allocation11 + $0xa4] sm:$0xf] }
 0xcad   :  { %10994 = vmatpush.bf16.msra.mxu0 %v16208_v50  ;;  %10985 = vmatpush.bf16.msrb.mxu2 %v16112_v13  ;;  %v16017_v50 = vld [vmem:[#allocation11 + $0x58] sm:$0xf0]  ;;  %v16263_v13 = vld [vmem:[#allocation11 + $0x240] sm:$0xf] }
 0xcae   :  { %v16020_v40 = vor.u32 %v17589_v12, %v16017_v50  ;;  %v16060_v12 = vor.u32 %v17599_v30, %v16057_v21 }
 0xcaf   :  { %10970 = vmatpush.bf16.msrb.mxu1 %v16064_v37  ;;  %11005 = vmatpush.bf16.msrb.mxu3 %v16288_v24  ;;  %v16089_v37 = vld [vmem:[#allocation11 + $0xe8] sm:$0xf0]  ;;  %v17603_v24 = vld [vmem:[#allocation11 + $0xc4] sm:$0xf] }
 0xcb0   :  { %v16092_v25 = vor.u32 %v17607_v28, %v16089_v37  ;;  %v17662_v37 = vld [vmem:[#allocation11 + $0x294] sm:$0xf0] }
 0xcb1   :  { %10995 = vmatpush.bf16.msra.mxu0 %v16200_v0  ;;  %10986 = vmatpush.bf16.msrb.mxu2 %v16104_v48  ;;  %v17652_v0 = vld [vmem:[#allocation11 + $0x244] sm:$0xf0]  ;;  %v16001_v48 = vld [vmem:[#allocation11 + $0x38] sm:$0xf0] }
 0xcb2   :  { %v16264_v63 = vor.u32 %v17652_v0, %v16263_v13  ;;  %v16004_v19 = vor.u32 %v17585_v9, %v16001_v48  ;;  %v17597_v0 = vld [vmem:[#allocation11 + $0x94] sm:$0xf] }
 0xcb3   :  { %10971 = vmatpush.bf16.msrb.mxu1 %v16056_v49  ;;  %11006 = vmatpush.bf16.msrb.mxu3 %v16280_v5  ;;  %v17670_v49 = vld [vmem:[#allocation11 + $0x2d4] sm:$0xf0]  ;;  %v17641_v48 = vld [vmem:[#allocation11 + $0x1f4] sm:$0xf] }
 0xcb4   :  { %v16336_v2 = vor.u32 %v17670_v49, %v16335_v45  ;;  %v17666_v5 = vld [vmem:[#allocation11 + $0x2b4] sm:$0xf0]  ;;  %v17595_v45 = vld [vmem:[#allocation11 + $0x84] sm:$0xf] }
 0xcb5   :  { %10996 = vmatpush.bf16.msra.mxu0 %v16192_v41  ;;  %11031 = vmatpush.bf16.msra.mxu2 %v16036_v57  ;;  %v17587_v41 = vld [vmem:[#allocation11 + $0x44] sm:$0xf]  ;;  %v16328_v57 = vor.u32 %v17668_v46, %v16327_v16  ;;  %v16320_v23 = vor.u32 %v17666_v5, %v16319_v10 }
 0xcb6   :  { %v16012_v52 = vor.u32 %v17587_v41, %v16009_v55  ;;  %v19052_v41 = vld [vmem:[#allocation10] sm:$0x3f]  ;;  %v16295_v55 = vld [vmem:[#allocation11 + $0x280] sm:$0xf] }
 0xcb7   :  { %10972 = vmatpush.bf16.msrb.mxu1 %v16048_v17  ;;  %11007 = vmatpush.bf16.msrb.mxu3 %v16272_v51  ;;  %v16076_v17 = vor.u32 %v17603_v24, %v16073_v1  ;;  %v17644_v51 = vld [vmem:[#allocation11 + $0x204] sm:$0xf0]  ;;  %v10347_v38 = vperm.slane %v19052_v41, 0  ;;  %v10349_v21 = vperm.slane %v19052_v41, 2 }
 0xcb9   :  { %10997 = vmatpush.bf16.msra.mxu0 %v16184_v58  ;;  %11032 = vmatpush.bf16.msra.mxu2 %v16028_v44  ;;  %v16255_v58 = vld [vmem:[#allocation11 + $0x230] sm:$0xf]  ;;  %v17601_v44 = vld [vmem:[#allocation11 + $0xb4] sm:$0xf] }
 0xcba   :  { %v16256_v32 = vor.u32 %v17650_v14, %v16255_v58  ;;  %v16068_v56 = vor.u32 %v17601_v44, %v16065_v31  ;;  %v10348_v14 = vperm.slane %v19052_v41, 1  ;;  %v17637_v44 = vld [vmem:[#allocation11 + $0x1d4] sm:$0xf]  ;;  %v16209_v31 = vld [vmem:[#allocation11 + $0x1d8] sm:$0xf0] }
 0xcbb   :  { %10973 = vmatpush.bf16.msrb.mxu1 %v16040_v3  ;;  %11008 = vmatpush.bf16.msrb.mxu3 %v16264_v63  ;;  %v17646_v3 = vld [vmem:[#allocation11 + $0x214] sm:$0xf0] }
 0xcbd   :  { %10998 = vmatpush.bf16.msra.mxu0 %v16176_v47  ;;  %11033 = vmatpush.bf16.msra.mxu2 %v16020_v40  ;;  %v17583_v47 = vld [vmem:[#allocation11 + $0x24] sm:$0xf] }
 0xcbe   :  { %v15996_v35 = vor.u32 %v17583_v47, %v15993_v39  ;;  %v17579_v40 = vld [vmem:[#allocation11 + $0x4] sm:$0xf] }
 0xcbf   :  { %11018 = vmatpush.bf16.msra.mxu1 %v16352_v7  ;;  %11009 = vmatpush.bf16.msrb.mxu3 %v16256_v32  ;;  %v17664_v7 = vld [vmem:[#allocation11 + $0x2a4] sm:$0xf0]  ;;  %v15980_v28 = vor.u32 %v17579_v40, %v15977_v15 }
 0xcc0   :  { %v16312_v62 = vor.u32 %v17664_v7, %v16311_v53 }
 0xcc1   :  { %10999 = vmatpush.bf16.msra.mxu0 %v16168_v59  ;;  %11034 = vmatpush.bf16.msra.mxu2 %v16012_v52  ;;  %v16240_v59 = vor.u32 %v17646_v3, %v16239_v43  ;;  %v17660_v52 = vld [vmem:[#allocation11 + $0x284] sm:$0xf0]  ;;  %v17623_v3 = vld [vmem:[#allocation11 + $0x164] sm:$0xf] }
 0xcc2   :  { %v16156_v30 = vor.u32 %v17623_v3, %v16153_v60  ;;  %v17651_v3 = vld [vmem:[#allocation11 + $0x244] sm:$0xf] }
 0xcc3   :  { %11019 = vmatpush.bf16.msra.mxu1 %v16344_v27  ;;  %11010 = vmatpush.bf16.msrb.mxu3 %v16248_v22  ;;  %v16303_v27 = vld [vmem:[#allocation11 + $0x290] sm:$0xf] }
 0xcc4   :  { %v16304_v13 = vor.u32 %v17662_v37, %v16303_v27  ;;  %v16193_v27 = vld [vmem:[#allocation11 + $0x1b8] sm:$0xf0] }
 0xcc5   :  { %11044 = vmatpush.bf16.msrb.mxu0 %v16100_v6  ;;  %11035 = vmatpush.bf16.msra.mxu2 %v16004_v19  ;;  %v16231_v6 = vld [vmem:[#allocation11 + $0x200] sm:$0xf]  ;;  %v16225_v19 = vld [vmem:[#allocation11 + $0x1f8] sm:$0xf0] }
 0xcc6   :  { %v16232_v50 = vor.u32 %v17644_v51, %v16231_v6  ;;  %v16228_v24 = vor.u32 %v17641_v48, %v16225_v19  ;;  %v17621_v6 = vld [vmem:[#allocation11 + $0x154] sm:$0xf]  ;;  %v16145_v51 = vld [vmem:[#allocation11 + $0x158] sm:$0xf0] }
 0xcc7   :  { %11020 = vmatpush.bf16.msra.mxu1 %v16336_v2  ;;  %11011 = vmatpush.bf16.msrb.mxu3 %v16240_v59  ;;  %v16296_v2 = vor.u32 %v17660_v52, %v16295_v55  ;;  %v16212_v59 = vor.u32 %v17637_v44, %v16209_v31  ;;  %v16148_v37 = vor.u32 %v17621_v6, %v16145_v51  ;;  %v10350_v55 = vperm.slane %v19052_v41, 3  ;;  %v16353_v19 = vld [vmem:[#allocation11 + $0x2f8] sm:$0xf0]  ;;  %v16121_v44 = vld [vmem:[#allocation11 + $0x128] sm:$0xf0] }
 0xcc8   :  { %v16337_v51 = vld [vmem:[#allocation11 + $0x2d8] sm:$0xf0] }
 0xcc9   :  { %11045 = vmatpush.bf16.msrb.mxu0 %v16092_v25  ;;  %11036 = vmatpush.bf16.msra.mxu2 %v15996_v35  ;;  %v16049_v25 = vld [vmem:[#allocation11 + $0x98] sm:$0xf0] }
 0xcca   :  { %v16052_v63 = vor.u32 %v17597_v0, %v16049_v25  ;;  %v16161_v35 = vld [vmem:[#allocation11 + $0x178] sm:$0xf0]  ;;  %v17619_v0 = vld [vmem:[#allocation11 + $0x144] sm:$0xf]  ;;  %v16137_v25 = vld [vmem:[#allocation11 + $0x148] sm:$0xf0] }
 0xccb   :  { %11021 = vmatpush.bf16.msra.mxu1 %v16328_v57  ;;  %11012 = vmatpush.bf16.msrb.mxu3 %v16232_v50  ;;  %v17657_v50 = vld [vmem:[#allocation11 + $0x274] sm:$0xf] }
 0xccd   :  { %11046 = vmatpush.bf16.msrb.mxu0 %v16084_v4  ;;  %11037 = vmatpush.bf16.msra.mxu2 %v15988_v61  ;;  %v16044_v4 = vor.u32 %v17595_v45, %v16041_v26  ;;  %v16201_v61 = vld [vmem:[#allocation11 + $0x1c8] sm:$0xf0]  ;;  %v17655_v45 = vld [vmem:[#allocation11 + $0x264] sm:$0xf] }
 0xcce   :  { %v16281_v26 = vld [vmem:[#allocation11 + $0x268] sm:$0xf0] }
 0xccf   :  { %11022 = vmatpush.bf16.msra.mxu1 %v16320_v23 }
 0xcd1   :  { %11047 = vmatpush.bf16.msrb.mxu0 %v16076_v17  ;;  %11038 = vmatpush.bf16.msra.mxu2 %v15980_v28  ;;  %v16217_v17 = vld [vmem:[#allocation11 + $0x1e8] sm:$0xf0]  ;;  %v17633_v28 = vld [vmem:[#allocation11 + $0x1b4] sm:$0xf] }
 0xcd2   :  { %v16220_v5 = vor.u32 %v17639_v34, %v16217_v17 }
 0xcd3   :  { %11023 = vmatpush.bf16.msra.mxu1 %v16312_v62 }
 0xcd5   :  { %11048 = vmatpush.bf16.msrb.mxu0 %v16068_v56 }
 0xcd7   :  { %11024 = vmatpush.bf16.msra.mxu1 %v16304_v13 }
 0xcd9   :  { %11049 = vmatpush.bf16.msrb.mxu0 %v16060_v12 }
 0xcdb   :  { %11025 = vmatpush.bf16.msra.mxu1 %v16296_v2 }
 0xcdd   :  { %11050 = vmatpush.bf16.msrb.mxu0 %v16052_v63 }
 0xce1   :  { %11051 = vmatpush.bf16.msrb.mxu0 %v16044_v4 }
 0xcfb   :  { %v10231_v29 = vpop.f32.mrf.mxu1 }
 0xd01   :  { %v10205_v49 = vpop.f32.mrf.mxu3  ;;  %v10218_v36 = vpop.f32.mrf.mxu0 }
 0xd02   :  { %v10232_v58 = vadd.f32 %v10231_v29, %v10218_v36  ;;  %v16289_v29 = vld [vmem:[#allocation11 + $0x278] sm:$0xf0] }
 0xd03   :  { %v10233_v32 = vpop.f32.mrf.mxu1  ;;  %v16292_v52 = vor.u32 %v17657_v50, %v16289_v29  ;;  %v16113_v50 = vld [vmem:[#allocation11 + $0x118] sm:$0xf0] }
 0xd04   :  { %v10340_v9 = vadd.f32 %v10232_v58, %v18984_v11  ;;  %v17625_v11 = vld [vmem:[#allocation11 + $0x174] sm:$0xf]  ;;  %v16185_v58 = vld [vmem:[#allocation11 + $0x1a8] sm:$0xf0] }
 0xd05   :  { %v16164_v43 = vor.u32 %v17625_v11, %v16161_v35  ;;  %v17673_v32 = vld [vmem:[#allocation11 + $0x2f4] sm:$0xf]  ;;  %v17671_v35 = vld [vmem:[#allocation11 + $0x2e4] sm:$0xf] }
 0xd06   :  { %v10360_v16 = vadd.f32 %v10348_v14, %v10340_v9  ;;  %v16140_v9 = vor.u32 %v17619_v0, %v16137_v25  ;;  %v16356_v11 = vor.u32 %v17673_v32, %v16353_v19  ;;  %v17667_v0 = vld [vmem:[#allocation11 + $0x2c4] sm:$0xf] }
 0xd07   :  { %v10192_v46 = vpop.f32.mrf.mxu2 }
 0xd08   :  { %v19056_v57 = vpack.c.bf16 %v10360_v16, %v10360_v16  ;;  %v10206_v1 = vadd.f32 %v10205_v49, %v10192_v46  ;;  %v16196_v49 = vor.u32 %v17633_v28, %v16193_v27  ;;  %v17617_v16 = vld [vmem:[#allocation11 + $0x134] sm:$0xf]  ;;  %v16129_v46 = vld [vmem:[#allocation11 + $0x138] sm:$0xf0] }
 0xd09   :  { %v10207_v22 = vpop.f32.mrf.mxu3  ;;  %v10220_v47 = vpop.f32.mrf.mxu0  ;;  %v17649_v27 = vld [vmem:[#allocation11 + $0x234] sm:$0xf] }
 0xd0a   :  { %v10339_v39 = vadd.f32 %v10206_v1, %v18981_v33  ;;  %10974 = vmatmul.bf16.vlgmr.msrb.gmra.mxu1 %v19056_v57  ;;  %v17635_v33 = vld [vmem:[#allocation11 + $0x1c4] sm:$0xf]  ;;  %v16284_v1 = vor.u32 %v17655_v45, %v16281_v26  ;;  %v16273_v22 = vld [vmem:[#allocation11 + $0x258] sm:$0xf0]  ;;  %v17629_v47 = vld [vmem:[#allocation11 + $0x194] sm:$0xf] }
 0xd0b   :  { %v10257_v10 = vpop.f32.mrf.mxu1  ;;  %11070 = vmatpush.bf16.msrb.mxu1 %v16228_v24  ;;  %v16204_v40 = vor.u32 %v17635_v33, %v16201_v61  ;;  %v16169_v33 = vld [vmem:[#allocation11 + $0x188] sm:$0xf0] }
 0xd0c   :  { %v10359_v23 = vadd.f32 %v10347_v38, %v10339_v39  ;;  %v17653_v38 = vld [vmem:[#allocation11 + $0x254] sm:$0xf]  ;;  %v16177_v39 = vld [vmem:[#allocation11 + $0x198] sm:$0xf0]  ;;  %v16105_v45 = vld [vmem:[#allocation11 + $0x108] sm:$0xf0] }
 0xd0d   :  { %v16180_v60 = vor.u32 %v17629_v47, %v16177_v39  ;;  %v16313_v47 = vld [vmem:[#allocation11 + $0x2a8] sm:$0xf0] }
 0xd0e   :  { %v19061_v56 = vpack.c.bf16 %v10359_v23, %v10359_v23  ;;  %v17615_v23 = vld [vmem:[#allocation11 + $0x124] sm:$0xf] }
 0xd0f   :  { %v10194_v54 = vpop.f32.mrf.mxu2  ;;  %11071 = vmatpush.bf16.msrb.mxu1 %v16220_v5  ;;  %v16345_v5 = vld [vmem:[#allocation11 + $0x2e8] sm:$0xf0] }
 0xd10   :  { %10961 = vmatmul.bf16.vlgmr.msra.gmra.mxu3 %v19061_v56  ;;  %v16265_v54 = vld [vmem:[#allocation11 + $0x248] sm:$0xf0] }
 0xd11   :  { %v10244_v53 = vpop.f32.mrf.mxu3  ;;  %v10283_v7 = vpop.f32.mrf.mxu0  ;;  %11057 = vmatpush.bf16.msra.mxu3 %v16164_v43  ;;  %v16276_v43 = vor.u32 %v17653_v38, %v16273_v22  ;;  %v17645_v38 = vld [vmem:[#allocation11 + $0x214] sm:$0xf]  ;;  %v17663_v22 = vld [vmem:[#allocation11 + $0x2a4] sm:$0xf] }
 0xd12   :  { %v10258_v62 = vadd.f32 %v10257_v10, %v10244_v53  ;;  %v16132_v10 = vor.u32 %v17617_v16, %v16129_v46  ;;  %v10351_v53 = vperm.slane %v19052_v41, 4  ;;  %v17665_v16 = vld [vmem:[#allocation11 + $0x2b4] sm:$0xf]  ;;  %v16321_v46 = vld [vmem:[#allocation11 + $0x2b8] sm:$0xf0] }
 0xd13   :  { %v10259_v12 = vpop.f32.mrf.mxu1  ;;  %11072 = vmatpush.bf16.msrb.mxu1 %v16212_v59  ;;  %v17627_v59 = vld [vmem:[#allocation11 + $0x184] sm:$0xf] }
 0xd14   :  { %v10341_v15 = vadd.f32 %v10258_v62, %v18987_v8  ;;  %v17631_v8 = vld [vmem:[#allocation11 + $0x1a4] sm:$0xf]  ;;  %v17669_v62 = vld [vmem:[#allocation11 + $0x2d4] sm:$0xf]  ;;  %v16172_v29 = vor.u32 %v17627_v59, %v16169_v33  ;;  %v17678_v33 = vld [vmem:[#allocation14 + $0x18] sm:$0xff] }
 0xd15   :  { %11058 = vmatpush.bf16.msra.mxu3 %v16156_v30  ;;  %v16188_v34 = vor.u32 %v17631_v8, %v16185_v58  ;;  %v16348_v30 = vor.u32 %v17671_v35, %v16345_v5  ;;  %v17613_v12 = vld [vmem:[#allocation11 + $0x114] sm:$0xf]  ;;  %v10352_v58 = vperm.slane %v19052_v41, 5  ;;  %v16241_v41 = vld [vmem:[#allocation11 + $0x218] sm:$0xf0]  ;;  %v16316_v35 = vor.u32 %v17663_v22, %v16313_v47  ;;  %v17679_v59 = vld [vmem:[#allocation14 + $0x20] sm:$0xff] }
 0xd16   :  { %v10361_v13 = vadd.f32 %v10349_v21, %v10341_v15  ;;  %v16124_v21 = vor.u32 %v17615_v23, %v16121_v44  ;;  %v16268_v15 = vor.u32 %v17651_v3, %v16265_v54  ;;  %v16116_v25 = vor.u32 %v17613_v12, %v16113_v50  ;;  %v16305_v5 = vld [vmem:[#allocation11 + $0x298] sm:$0xf0]  ;;  %v17680_v54 = vld [vmem:[#allocation14 + $0x28] sm:$0xff]  ;;  %v10467_v50 = vld [vmem:[#allocation13] sm:$0x3] }
 0xd17   :  { %v10270_v63 = vpop.f32.mrf.mxu2  ;;  %11073 = vmatpush.bf16.msrb.mxu1 %v16204_v40  ;;  %v17686_v12 = vld [vmem:[#allocation14 + $0x58] sm:$0xff] }
 0xd18   :  { %v19067_v36 = vpack.c.bf16 %v10361_v13, %v10361_v13  ;;  %v10284_v2 = vadd.f32 %v10283_v7, %v10270_v63  ;;  %v16340_v13 = vor.u32 %v17669_v62, %v16337_v51  ;;  %v17689_v62 = vld [vmem:[#allocation14 + $0x70] sm:$0xff]  ;;  %v17687_v51 = vld [vmem:[#allocation14 + $0x60] sm:$0xff] }
 0xd19   :  { %v10246_v14 = vpop.f32.mrf.mxu3  ;;  %v10285_v4 = vpop.f32.mrf.mxu0  ;;  %11059 = vmatpush.bf16.msra.mxu3 %v16148_v37  ;;  %v16257_v37 = vld [vmem:[#allocation11 + $0x238] sm:$0xf0] }
 0xd1a   :  { %v10342_v48 = vadd.f32 %v10284_v2, %v18990_v18  ;;  %10987 = vmatmul.bf16.vlgmr.msrb.gmra.mxu2 %v19067_v36  ;;  %v16260_v2 = vor.u32 %v17649_v27, %v16257_v37  ;;  %v16249_v14 = vld [vmem:[#allocation11 + $0x228] sm:$0xf0]  ;;  %v17685_v27 = vld [vmem:[#allocation14 + $0x50] sm:$0xff] }
 0xd1b   :  { %v10296_v24 = vpop.f32.mrf.mxu1  ;;  %11083 = vmatpush.bf16.msrb.mxu2 %v16292_v52  ;;  %11074 = vmatpush.bf16.msrb.mxu1 %v16196_v49  ;;  %v17611_v52 = vld [vmem:[#allocation11 + $0x104] sm:$0xf] }
 0xd1c   :  { %v10362_v17 = vadd.f32 %v10350_v55, %v10342_v48  ;;  %v16329_v55 = vld [vmem:[#allocation11 + $0x2c8] sm:$0xf0]  ;;  %v16108_v48 = vor.u32 %v17611_v52, %v16105_v45 }
 0xd1d   :  { %11060 = vmatpush.bf16.msra.mxu3 %v16140_v9  ;;  %v16332_v9 = vor.u32 %v17667_v0, %v16329_v55  ;;  %v17683_v55 = vld [vmem:[#allocation14 + $0x40] sm:$0xff] }
 0xd1e   :  { %v19071_v18 = vpack.c.bf16 %v10362_v17, %v10362_v17 }
 0xd1f   :  { %11084 = vmatpush.bf16.msrb.mxu2 %v16284_v1  ;;  %v10272_v31 = vpop.f32.mrf.mxu2  ;;  %11075 = vmatpush.bf16.msrb.mxu1 %v16188_v34  ;;  %v16324_v34 = vor.u32 %v17665_v16, %v16321_v46 }
 0xd20   :  { %11000 = vmatmul.bf16.vlgmr.msra.gmra.mxu0 %v19071_v18  ;;  %v17659_v31 = vld [vmem:[#allocation11 + $0x284] sm:$0xf] }
 0xd21   :  { %v10309_v61 = vpop.f32.mrf.mxu3  ;;  %v10322_v7 = vpop.f32.mrf.mxu0  ;;  %11096 = vmatpush.bf16.msra.mxu0 %v16356_v11  ;;  %11061 = vmatpush.bf16.msra.mxu3 %v16132_v10  ;;  %v16244_v11 = vor.u32 %v17645_v38, %v16241_v41  ;;  %v17661_v10 = vld [vmem:[#allocation11 + $0x294] sm:$0xf] }
 0xd22   :  { %v10310_v6 = vadd.f32 %v10309_v61, %v10296_v24  ;;  %v16308_v44 = vor.u32 %v17661_v10, %v16305_v5  ;;  %v17690_v61 = vld [vmem:[#allocation14 + $0x78] sm:$0xff] }
 0xd23   :  { %v10298_v40 = vpop.f32.mrf.mxu1  ;;  %11085 = vmatpush.bf16.msrb.mxu2 %v16276_v43  ;;  %11076 = vmatpush.bf16.msrb.mxu1 %v16180_v60  ;;  %v16297_v43 = vld [vmem:[#allocation11 + $0x288] sm:$0xf0]  ;;  %v17681_v60 = vld [vmem:[#allocation14 + $0x30] sm:$0xff] }
 0xd24   :  { %v10343_v28 = vadd.f32 %v10310_v6, %v18993_v20  ;;  %v17647_v20 = vld [vmem:[#allocation11 + $0x224] sm:$0xf]  ;;  %v16300_v3 = vor.u32 %v17659_v31, %v16297_v43  ;;  %v17688_v6 = vld [vmem:[#allocation14 + $0x68] sm:$0xff]  ;;  %v17710_v31 = vld [vmem:[#allocation16] ss:$0 sm:$0xff] }
 0xd25   :  { %11097 = vmatpush.bf16.msra.mxu0 %v16348_v30  ;;  %11062 = vmatpush.bf16.msra.mxu3 %v16124_v21  ;;  %v16252_v24 = vor.u32 %v17647_v20, %v16249_v14  ;;  %v17676_v30 = vld [vmem:[#allocation14 + $0x8] sm:$0xff]  ;;  %v17675_v21 = vld [vmem:[#allocation14] sm:$0xff] }
 0xd26   :  { %v10363_v63 = vadd.f32 %v10351_v53, %v10343_v28  ;;  %v10469_v28 = vperm.slane %v10467_v50, 0 }
 0xd27   :  { %11086 = vmatpush.bf16.msrb.mxu2 %v16268_v15  ;;  %v10335_v49 = vpop.f32.mrf.mxu2  ;;  %11077 = vmatpush.bf16.msrb.mxu1 %v16172_v29 }
 0xd28   :  { %v10369_v26 = vpack.c.bf16 %v10363_v63, %v10363_v63  ;;  %v10336_v8 = vadd.f32 %v10335_v49, %v10322_v7  ;;  %v17677_v7 = vld [vmem:[#allocation14 + $0x10] sm:$0xff] }
 0xd29   :  { %v10311_v4 = vpop.f32.mrf.mxu3  ;;  %v10324_v32 = vpop.f32.mrf.mxu0  ;;  %11098 = vmatpush.bf16.msra.mxu0 %v16340_v13  ;;  %11063 = vmatpush.bf16.msra.mxu3 %v16116_v25  ;;  %v17684_v13 = vld [vmem:[#allocation14 + $0x48] sm:$0xff] }
 0xd2a   :  { %v10344_v19 = vadd.f32 %v10336_v8, %v18996_v42  ;;  %11013 = vmatmul.bf16.vlgmr.msrb.gmra.mxu3 %v10369_v26  ;;  %11039 = vmatmul.bf16.vlgmr.msra.gmra.mxu2 %v19061_v56  ;;  %v17643_v42 = vld [vmem:[#allocation11 + $0x204] sm:$0xf]  ;;  %v16233_v56 = vld [vmem:[#allocation11 + $0x208] sm:$0xf0]  ;;  %v10470_v4 = vperm.slane %v10467_v50, 1 }
 0xd2b   :  { %11087 = vmatpush.bf16.msrb.mxu2 %v16260_v2  ;;  %v16236_v23 = vor.u32 %v17643_v42, %v16233_v56 }
 0xd2c   :  { %v10364_v1 = vadd.f32 %v10352_v58, %v10344_v19 }
 0xd2d   :  { %11099 = vmatpush.bf16.msra.mxu0 %v16332_v9  ;;  %11064 = vmatpush.bf16.msra.mxu3 %v16108_v48 }
 0xd2e   :  { %v10370_v17 = vpack.c.bf16 %v10364_v1, %v10364_v1 }
 0xd2f   :  { %11088 = vmatpush.bf16.msrb.mxu2 %v16252_v24  ;;  %v10337_v39 = vpop.f32.mrf.mxu2 }
 0xd30   :  { %11026 = vmatmul.bf16.vlgmr.msra.gmra.mxu1 %v10370_v17  ;;  %11052 = vmatmul.bf16.vlgmr.msrb.gmra.mxu0 %v19056_v57  ;;  %v17682_v57 = vld [vmem:[#allocation14 + $0x38] sm:$0xff] }
 0xd31   :  { %11100 = vmatpush.bf16.msra.mxu0 %v16324_v34  ;;  %11245 = vmatpush.bf16.msrb.mxu3 %v17682_v57 }
 0xd32   :  { %11258 = vmatpush.bf16.msra.mxu1 %v17690_v61 }
 0xd33   :  { %11089 = vmatpush.bf16.msrb.mxu2 %v16244_v11 }
 0xd35   :  { %11101 = vmatpush.bf16.msra.mxu0 %v16316_v35  ;;  %11246 = vmatpush.bf16.msrb.mxu3 %v17681_v60 }
 0xd36   :  { %11259 = vmatpush.bf16.msra.mxu1 %v17689_v62 }
 0xd37   :  { %11090 = vmatpush.bf16.msrb.mxu2 %v16236_v23 }
 0xd39   :  { %11102 = vmatpush.bf16.msra.mxu0 %v16308_v44  ;;  %11247 = vmatpush.bf16.msrb.mxu3 %v17680_v54 }
 0xd3a   :  { %11065 = vmatmul.bf16.vlgmr.msra.gmra.mxu3 %v19067_v36  ;;  %11091 = vmatmul.bf16.vlgmr.msrb.gmra.mxu2 %v10369_v26 }
 0xd3b   :  { %11260 = vmatpush.bf16.msra.mxu1 %v17688_v6 }
 0xd3d   :  { %11103 = vmatpush.bf16.msra.mxu0 %v16300_v3  ;;  %11248 = vmatpush.bf16.msrb.mxu3 %v17679_v59 }
 0xd3f   :  { %11261 = vmatpush.bf16.msra.mxu1 %v17687_v51 }
 0xd40   :  { %11078 = vmatmul.bf16.vlgmr.msrb.gmra.mxu1 %v19071_v18  ;;  %11104 = vmatmul.bf16.vlgmr.msra.gmra.mxu0 %v10370_v17 }
 0xd41   :  { %11249 = vmatpush.bf16.msrb.mxu3 %v17678_v33 }
 0xd43   :  { %11262 = vmatpush.bf16.msra.mxu1 %v17686_v12 }
 0xd45   :  { %11250 = vmatpush.bf16.msrb.mxu3 %v17677_v7 }
 0xd47   :  { %11263 = vmatpush.bf16.msra.mxu1 %v17685_v27 }
 0xd49   :  { %11251 = vmatpush.bf16.msrb.mxu3 %v17676_v30 }
 0xd4b   :  { %11264 = vmatpush.bf16.msra.mxu1 %v17684_v13 }
 0xd4d   :  { %11252 = vmatpush.bf16.msrb.mxu3 %v17675_v21 }
 0xd4f   :  { %11265 = vmatpush.bf16.msra.mxu1 %v17683_v55 }
 0xd87   :  { %v10975_v53 = vpop.f32.mrf.mxu1 }
 0xd8f   :  { %v10977_v36 = vpop.f32.mrf.mxu1 }
 0xd93   :  { %v10962_v18 = vpop.f32.mrf.mxu3 }
 0xd94   :  { %v10963_v37 = vadd.f32 %v10962_v18, %v10469_v28 }
 0xd96   :  { %v10976_v63 = vadd.f32 %v10975_v53, %v10963_v37 }
 0xd9b   :  { %v10964_v40 = vpop.f32.mrf.mxu3 }
 0xd9d   :  { %v10988_v15 = vpop.f32.mrf.mxu2  ;;  %v11001_v29 = vpop.f32.mrf.mxu0 }
 0xd9e   :  { %v10989_v52 = vadd.f32 %v10988_v15, %v10976_v63 }
 0xda0   :  { %v11002_v45 = vadd.f32 %v11001_v29, %v10989_v52 }
 0xda5   :  { %v10990_v0 = vpop.f32.mrf.mxu2  ;;  %v11003_v25 = vpop.f32.mrf.mxu0 }
 0xdad   :  { %v11014_v49 = vpop.f32.mrf.mxu3  ;;  %v11040_v2 = vpop.f32.mrf.mxu2 }
 0xdae   :  { %v11015_v26 = vadd.f32 %v11014_v49, %v11002_v45  ;;  %v11027_v8 = vpop.f32.mrf.mxu1  ;;  %v11053_v58 = vpop.f32.mrf.mxu0  ;;  %v11041_v46 = vadd.f32 %v11040_v2, %v10470_v4 }
 0xdb0   :  { %v11028_v20 = vadd.f32 %v11027_v8, %v11015_v26  ;;  %v11054_v24 = vadd.f32 %v11053_v58, %v11041_v46 }
 0xdb2   :  { %v11109_v14 = vmax.f32 %v11028_v20, 0.0 }
 0xdb4   :  { %v11111_v32 = vpack.c.bf16 %v11109_v14, %v11109_v14 }
 0xdb5   :  { %v11016_v9 = vpop.f32.mrf.mxu3  ;;  %v11042_v48 = vpop.f32.mrf.mxu2 }
 0xdb6   :  { %v11029_v19 = vpop.f32.mrf.mxu1  ;;  %v11055_v16 = vpop.f32.mrf.mxu0  ;;  %11253 = vmatmul.bf16.vlgmr.msrb.gmra.mxu3 %v11111_v32 }
 0xdbd   :  { %v11066_v1 = vpop.f32.mrf.mxu3  ;;  %v11092_v38 = vpop.f32.mrf.mxu2 }
 0xdbe   :  { %v11067_v41 = vadd.f32 %v11066_v1, %v11054_v24  ;;  %v11079_v34 = vpop.f32.mrf.mxu1  ;;  %v11105_v17 = vpop.f32.mrf.mxu0 }
 0xdc0   :  { %v11080_v22 = vadd.f32 %v11079_v34, %v11067_v41 }
 0xdc2   :  { %v11093_v47 = vadd.f32 %v11092_v38, %v11080_v22 }
 0xdc4   :  { %v11106_v39 = vadd.f32 %v11105_v17, %v11093_v47 }
 0xdc5   :  { %v11068_v11 = vpop.f32.mrf.mxu3  ;;  %v11094_v42 = vpop.f32.mrf.mxu2 }
 0xdc6   :  { %v11110_v56 = vmax.f32 %v11106_v39, 0.0  ;;  %v11081_v35 = vpop.f32.mrf.mxu1  ;;  %v11107_v10 = vpop.f32.mrf.mxu0 }
 0xdc8   :  { %v11112_v5 = vpack.c.bf16 %v11110_v56, %v11110_v56 }
 0xdca   :  { %11266 = vmatmul.bf16.vlgmr.msra.gmra.mxu1 %v11112_v5 }
 0xe39   :  { %v11254_v23 = vpop.f32.mrf.mxu3 }
 0xe3a   :  { %v11255_v43 = vadd.f32 %v17710_v31, %v11254_v23 }
 0xe41   :  { %v11256_v44 = vpop.f32.mrf.mxu3 }
 0xe47   :  { %v11267_v3 = vpop.f32.mrf.mxu1 }
 0xe48   :  { %v11268_v57 = vadd.f32 %v11267_v3, %v11255_v43 }
 0xe4a   :  { %11271 = vst [vmem:[#allocation17] sm:$0x3] %v11268_v57 }
 0xe4b   :  { %11282 = dma.vmem_to_hbm [thread:$0]  %s11278_s8, 32, %s11280_s12, [#allocation4]  }
 0xe4f   :  { %v11269_v60 = vpop.f32.mrf.mxu1 }
 0xe50   :  { %17998 = dma.done.wait [#allocation4], 32  }
 0xe51   :  { %17999 = vsyncadd [#allocation4], 4294967264 }
 0xe52   :  { %11287 = vsyncpa [#allocation3], 1 }
 0xe53   :  { %11288 = vsyncpa [#allocation6], 1 }
 0xe54   :  { %11289 = vsyncpa [#allocation9], 1 }
 0xe55   :  { %11290 = vsyncpa [#allocation12], 1 }
 0xe56   :  { %11291 = vsyncpa [#allocation15], 1 }
 0xe57   :  { %11292 = vsyncpa [#allocation4], 1 }

</bundles_post_ra>
